<compile_context>
chip_gen: v7x
topology: tpu7x:2x2x1
jax: 0.10.0
libtpu: 0.0.40
codegen_flags: <defaults>
</compile_context>

<pallas_src>
import jax
import jax.numpy as jnp
import numpy as np
from jax import lax
from jax.experimental import pallas as pl
from jax.experimental.pallas import tpu as pltpu


# ------------------------- Pallas kernels -------------------------

def _conv1_pool_kernel(x_ref, w_ref, b_ref, o_ref):
    """conv1 (5x5, pad 2) + bias + ReLU + 2x2 max-pool for one batch tile.

    x: (bt, 36, 32)  bf16 -- zero-padded images, lanes = padded width
    w: (5, 32, 336)  bf16 -- banded weights: w[kh][wl, j*12+co] = conv1_w[co,0,kh,wl-j]
    b: (1, 336)      f32  -- conv1 bias tiled over the 28 output columns
    o: (bt, 14, 324) bf16 -- pooled rows; valid channels live at lanes 24*pw + c
    """
    bt = x_ref.shape[0]
    # 5 accumulated banded matmuls (one per kh); the kw/cin sum is inside the weights.
    acc = jnp.dot(x_ref[:, 0:32, :].reshape(bt * 32, 32), w_ref[0],
                  preferred_element_type=jnp.float32)
    for kh in range(1, 5):
        lhs = x_ref[:, kh:kh + 32, :].reshape(bt * 32, 32)
        acc = acc + jnp.dot(lhs, w_ref[kh], preferred_element_type=jnp.float32)
    z = jnp.maximum(acc + b_ref[...], 0.0).reshape(bt, 32, 336)
    # 2x2 max-pool: pair-max over rows, then a 12-lane-shifted max over lanes.
    for pi in range(14):
        row = jnp.maximum(z[:, 2 * pi, :], z[:, 2 * pi + 1, :])
        row = jnp.maximum(row[:, 0:324], row[:, 12:336])
        o_ref[:, pi, :] = row.astype(o_ref.dtype)


def _conv2_classifier_kernel(h_ref, w2_ref, b2_ref, w1_ref, b1_ref, wf_ref, bf_ref,
                             o_ref):
    """conv2 (5x5, pad 2) + ReLU + 2x2 pool + fc1 + ReLU + fc2 + log_softmax (fused).

    h:  (bt, 20, 216) bf16 -- zero-padded conv1 output, lanes = (w, cin) packed
    w2: (5, 216, 168) bf16 -- banded conv2 weights
    b2: (1, 168) f32       -- conv2 bias tiled over the 14 output columns
    w1: (7, 156, 10) bf16  -- fc1 weights placed at the pooled lanes 24*pw + c
    b1: (1, 10) f32, wf: (10, classes) f32, bf: (1, classes) f32
    o:  (bt, classes) f32  -- log-probabilities
    """
    bt = h_ref.shape[0]
    acc = jnp.dot(h_ref[:, 0:16, :].reshape(bt * 16, 216), w2_ref[0],
                  preferred_element_type=jnp.float32)
    for kh in range(1, 5):
        lhs = h_ref[:, kh:kh + 16, :].reshape(bt * 16, 216)
        acc = acc + jnp.dot(lhs, w2_ref[kh], preferred_element_type=jnp.float32)
    z = jnp.maximum(acc + b2_ref[...], 0.0).reshape(bt, 16, 168)

    # 2x2 pool fused with the fc1 contraction: one pooled row -> one (bt,156)@(156,10)
    # matmul; garbage lanes (odd 12-lane groups) hit zero weight rows.
    z1 = jnp.zeros((bt, 10), jnp.float32)
    for pi in range(7):
        row = jnp.maximum(z[:, 2 * pi, :], z[:, 2 * pi + 1, :])
        row = jnp.maximum(row[:, 0:156], row[:, 12:168])
        z1 = z1 + jnp.dot(row.astype(jnp.bfloat16), w1_ref[pi],
                          preferred_element_type=jnp.float32)
    hidden = jnp.maximum(z1 + b1_ref[...], 0.0)
    logits = jnp.dot(hidden, wf_ref[...], preferred_element_type=jnp.float32) + bf_ref[...]
    m = jnp.max(logits, axis=-1, keepdims=True)
    lse = jnp.log(jnp.sum(jnp.exp(logits - m), axis=-1, keepdims=True)) + m
    o_ref[...] = logits - lse


def conv1_pool(xp, w1row, b1t, *, bt):
    b_pad = xp.shape[0]
    return pl.pallas_call(
        _conv1_pool_kernel,
        out_shape=jax.ShapeDtypeStruct((b_pad, 14, 324), jnp.bfloat16),
        grid=(b_pad // bt,),
        in_specs=[
            pl.BlockSpec((bt, 36, 32), lambda i: (i, 0, 0)),
            pl.BlockSpec((5, 32, 336), lambda i: (0, 0, 0)),
            pl.BlockSpec((1, 336), lambda i: (0, 0)),
        ],
        out_specs=pl.BlockSpec((bt, 14, 324), lambda i: (i, 0, 0)),
        compiler_params=pltpu.CompilerParams(dimension_semantics=("parallel",)),
    )(xp, w1row, b1t)


def conv2_classifier(h1p, w2row, b2t, w1p, b1f, w2f, b2f, *, bt):
    b_pad = h1p.shape[0]
    classes = w2f.shape[1]
    return pl.pallas_call(
        _conv2_classifier_kernel,
        out_shape=jax.ShapeDtypeStruct((b_pad, classes), jnp.float32),
        grid=(b_pad // bt,),
        in_specs=[
            pl.BlockSpec((bt, 20, 216), lambda i: (i, 0, 0)),
            pl.BlockSpec((5, 216, 168), lambda i: (0, 0, 0)),
            pl.BlockSpec((1, 168), lambda i: (0, 0)),
            pl.BlockSpec((7, 156, 10), lambda i: (0, 0, 0)),
            pl.BlockSpec((1, 10), lambda i: (0, 0)),
            pl.BlockSpec((10, classes), lambda i: (0, 0)),
            pl.BlockSpec((1, classes), lambda i: (0, 0)),
        ],
        out_specs=pl.BlockSpec((bt, classes), lambda i: (i, 0)),
        compiler_params=pltpu.CompilerParams(dimension_semantics=("parallel",)),
    )(h1p, w2row, b2t, w1p, b1f, w2f, b2f)


# ------------------------- host-side weight packing -------------------------

def _banded_conv_weight(w_oihw, n_out_cols, n_in_cols):
    """Fold the (kw, cin) sum of a 5x5 'same' conv into a block-Toeplitz matrix.

    Returns (5, n_in_cols*cin, n_out_cols*cout) with
    W[kh, wl*cin+ci, j*cout+co] = w[co, ci, kh, wl-j] for 0 <= wl-j <= 4, else 0.
    """
    cout, cin = w_oihw.shape[0], w_oihw.shape[1]
    wt = jnp.transpose(w_oihw, (2, 3, 1, 0))                  # (kh, kw, ci, co)
    wl = jnp.arange(n_in_cols)[:, None]
    jj = jnp.arange(n_out_cols)[None, :]
    kw = wl - jj                                               # (n_in, n_out)
    valid = (kw >= 0) & (kw <= 4)
    sel = wt[:, jnp.clip(kw, 0, 4)]                            # (5, n_in, n_out, ci, co)
    sel = jnp.where(valid[None, :, :, None, None], sel, 0.0)
    sel = jnp.transpose(sel, (0, 1, 3, 2, 4))                  # (5, n_in, ci, n_out, co)
    return sel.reshape(5, n_in_cols * cin, n_out_cols * cout)


def _fc1_lane_weight(fc1_w):
    """fc1 weights placed at the lanes where the pooled conv2 channels live.

    The pooled value for (ph, pw, c) sits at lane 24*pw + c of the ph-th pooled row;
    odd 12-lane groups hold pooling garbage and receive zero weight rows.
    """
    dense = jnp.transpose(fc1_w.reshape(10, 12, 7, 7), (2, 3, 1, 0))   # (ph, pw, c, h)
    w = jnp.zeros((7, 13, 12, 10), fc1_w.dtype).at[:, 0:13:2].set(dense)
    return w.reshape(7, 156, 10)


def cnn_forward(x_nchw, params):
    """x: (B, 1, 28, 28) f32 NCHW (as in PyTorch). Returns (B, classes) log-probs."""
    B = x_nchw.shape[0]
    classes = params["fc2_w"].shape[0]

    b8 = ((B + 7) // 8) * 8
    if b8 >= 64:
        bt = 64                                   # images per grid step (VMEM-safe everywhere)
        b_pad = ((B + bt - 1) // bt) * bt
    else:
        bt = b8
        b_pad = b8

    # banded / lane-packed weights (tiny, built once by XLA)
    w1row = _banded_conv_weight(params["conv1_w"], 28, 32).astype(jnp.bfloat16)
    b1t = jnp.tile(params["conv1_b"], 28).reshape(1, 336).astype(jnp.float32)
    w2row = _banded_conv_weight(params["conv2_w"], 14, 18).astype(jnp.bfloat16)
    b2t = jnp.tile(params["conv2_b"], 14).reshape(1, 168).astype(jnp.float32)
    w1p = _fc1_lane_weight(params["fc1_w"]).astype(jnp.bfloat16)
    b1f = params["fc1_b"].reshape(1, 10).astype(jnp.float32)
    w2f = params["fc2_w"].T.astype(jnp.float32)               # (10, classes)
    b2f = params["fc2_b"].reshape(1, classes).astype(jnp.float32)

    # stage 1: conv1 + relu + pool (images only zero-padded on the host; no im2col)
    x = x_nchw[:, 0, :, :].astype(jnp.bfloat16)
    x = jnp.pad(x, ((0, b_pad - B), (2, 6), (2, 2)))           # (b_pad, 36, 32)
    h1s = conv1_pool(x, w1row, b1t, bt=bt)                     # (b_pad, 14, 324)

    # host glue (4.7 KB/image): drop pooling-garbage lanes, zero-pad for conv2's window
    h1 = h1s.reshape(b_pad, 14, 27, 12)[:, :, 0::2, :]         # (b_pad, 14, 14, 12)
    h1p = jnp.pad(h1, ((0, 0), (2, 4), (2, 2), (0, 0))).reshape(b_pad, 20, 216)

    # stage 2: conv2 + relu + pool + fc1 + relu + fc2 + log_softmax, fully fused
    out = conv2_classifier(h1p, w2row, b2t, w1p, b1f, w2f, b2f, bt=bt)
    return out[:B]


# ------------------------- deterministic params & reference -------------------------

def init_params(key, classes=10):
    ks = jax.random.split(key, 8)

    def u(k, shape, fan_in):
        bound = 1.0 / np.sqrt(fan_in)
        return jax.random.uniform(k, shape, jnp.float32, -bound, bound)

    return {
        "conv1_w": u(ks[0], (12, 1, 5, 5), 1 * 25),
        "conv1_b": u(ks[1], (12,), 1 * 25),
        "conv2_w": u(ks[2], (12, 12, 5, 5), 12 * 25),
        "conv2_b": u(ks[3], (12,), 12 * 25),
        "fc1_w": u(ks[4], (10, 12 * 7 * 7), 12 * 7 * 7),
        "fc1_b": u(ks[5], (10,), 12 * 7 * 7),
        "fc2_w": u(ks[6], (classes, 10), 10),
        "fc2_b": u(ks[7], (classes,), 10),
    }


def cnn_reference(x, params):
    """Plain-JAX f32 reference mirroring the PyTorch forward."""
    def conv(xx, w, b):
        y = lax.conv_general_dilated(xx, w, (1, 1), ((2, 2), (2, 2)),
                                     dimension_numbers=("NCHW", "OIHW", "NCHW"))
        return y + b.reshape(1, -1, 1, 1)

    def pool(xx):
        B, C, H, W = xx.shape
        return jnp.max(xx.reshape(B, C, H // 2, 2, W // 2, 2), axis=(3, 5))

    h = pool(jnp.maximum(conv(x, params["conv1_w"], params["conv1_b"]), 0.0))
    h = pool(jnp.maximum(conv(h, params["conv2_w"], params["conv2_b"]), 0.0))
    h = h.reshape(x.shape[0], -1)
    h = jnp.maximum(h @ params["fc1_w"].T + params["fc1_b"], 0.0)
    z = h @ params["fc2_w"].T + params["fc2_b"]
    return jax.nn.log_softmax(z, axis=1)


if __name__ == "__main__":
    classes = 10
    key = jax.random.PRNGKey(0)
    kx, kp = jax.random.split(key)
    # MNIST-shaped input: fc1 expects 12*7*7, which forces 28x28 spatial.
    x = jax.random.normal(kx, (2, 1, 28, 28), dtype=jnp.float32)
    params = init_params(kp, classes)

    out = jax.jit(cnn_forward)(x, params)
    out = jax.block_until_ready(out)
    assert out.shape == (2, classes)

    ref = np.asarray(cnn_reference(x, params))
    # bf16 conv/fc path vs f32 reference -> slightly looser tolerance than pure f32
    if not np.allclose(np.asarray(out), ref, atol=2e-2, rtol=2e-2):
        raise AssertionError("Pallas CNN output mismatch vs JAX reference")

    print("KERNEL_OK")
</pallas_src>

<mosaic_0001>
module attributes {stable_mosaic.version = 11 : i64} {
  func.func @_conv1_pool_kernel(%arg0: i32, %arg1: memref<8x36x32xbf16, #tpu.memory_space<vmem>>, %arg2: memref<5x32x336xbf16, #tpu.memory_space<vmem>>, %arg3: memref<1x336xf32, #tpu.memory_space<vmem>>, %arg4: memref<8x14x324xbf16, #tpu.memory_space<vmem>>) attributes {dimension_semantics = [#tpu.dimension_semantics<parallel>], iteration_bounds = array<i64: 1>, scalar_prefetch = 0 : i64, scratch_operands = 0 : i64, tpu.core_type = #tpu.core_type<tc>, window_params = [{transform_indices = @transform_0, window_bounds = array<i64: 8, 36, 32>}, {pipeline_mode = #tpu.pipeline_mode<synchronous>, transform_indices = @transform_1, window_bounds = array<i64: 5, 32, 336>}, {pipeline_mode = #tpu.pipeline_mode<synchronous>, transform_indices = @transform_2, window_bounds = array<i64: 1, 336>}, {transform_indices = @transform_3, window_bounds = array<i64: 8, 14, 324>}]} {
    %c0 = arith.constant 0 : index
    %c0_0 = arith.constant 0 : index
    %c0_1 = arith.constant 0 : index
    %0 = vector.load %arg1[%c0, %c0_0, %c0_1] : memref<8x36x32xbf16, #tpu.memory_space<vmem>>, vector<8x32x32xbf16>
    %1 = vector.shape_cast %0 : vector<8x32x32xbf16> to vector<256x32xbf16>
    %c0_2 = arith.constant 0 : index
    %c0_3 = arith.constant 0 : index
    %c0_4 = arith.constant 0 : index
    %2 = vector.load %arg2[%c0_2, %c0_3, %c0_4] : memref<5x32x336xbf16, #tpu.memory_space<vmem>>, vector<1x32x336xbf16>
    %3 = vector.shape_cast %2 : vector<1x32x336xbf16> to vector<32x336xbf16>
    %cst = arith.constant dense<0.000000e+00> : vector<256x336xf32>
    %4 = tpu.matmul %1, %3, %cst {dimension_numbers = #tpu.dot_dimension_numbers<[1], [0], [0], [1], [0, 0, 1, 1], [], []>} : vector<256x32xbf16>, vector<32x336xbf16>, vector<256x336xf32> -> vector<256x336xf32>
    %c0_5 = arith.constant 0 : index
    %c1 = arith.constant 1 : index
    %c0_6 = arith.constant 0 : index
    %5 = vector.load %arg1[%c0_5, %c1, %c0_6] : memref<8x36x32xbf16, #tpu.memory_space<vmem>>, vector<8x32x32xbf16>
    %6 = vector.shape_cast %5 : vector<8x32x32xbf16> to vector<256x32xbf16>
    %c1_7 = arith.constant 1 : index
    %c0_8 = arith.constant 0 : index
    %c0_9 = arith.constant 0 : index
    %7 = vector.load %arg2[%c1_7, %c0_8, %c0_9] : memref<5x32x336xbf16, #tpu.memory_space<vmem>>, vector<1x32x336xbf16>
    %8 = vector.shape_cast %7 : vector<1x32x336xbf16> to vector<32x336xbf16>
    %cst_10 = arith.constant dense<0.000000e+00> : vector<256x336xf32>
    %9 = tpu.matmul %6, %8, %cst_10 {dimension_numbers = #tpu.dot_dimension_numbers<[1], [0], [0], [1], [0, 0, 1, 1], [], []>} : vector<256x32xbf16>, vector<32x336xbf16>, vector<256x336xf32> -> vector<256x336xf32>
    %10 = arith.addf %4, %9 : vector<256x336xf32>
    %c0_11 = arith.constant 0 : index
    %c2 = arith.constant 2 : index
    %c0_12 = arith.constant 0 : index
    %11 = vector.load %arg1[%c0_11, %c2, %c0_12] : memref<8x36x32xbf16, #tpu.memory_space<vmem>>, vector<8x32x32xbf16>
    %12 = vector.shape_cast %11 : vector<8x32x32xbf16> to vector<256x32xbf16>
    %c2_13 = arith.constant 2 : index
    %c0_14 = arith.constant 0 : index
    %c0_15 = arith.constant 0 : index
    %13 = vector.load %arg2[%c2_13, %c0_14, %c0_15] : memref<5x32x336xbf16, #tpu.memory_space<vmem>>, vector<1x32x336xbf16>
    %14 = vector.shape_cast %13 : vector<1x32x336xbf16> to vector<32x336xbf16>
    %cst_16 = arith.constant dense<0.000000e+00> : vector<256x336xf32>
    %15 = tpu.matmul %12, %14, %cst_16 {dimension_numbers = #tpu.dot_dimension_numbers<[1], [0], [0], [1], [0, 0, 1, 1], [], []>} : vector<256x32xbf16>, vector<32x336xbf16>, vector<256x336xf32> -> vector<256x336xf32>
    %16 = arith.addf %10, %15 : vector<256x336xf32>
    %c0_17 = arith.constant 0 : index
    %c3 = arith.constant 3 : index
    %c0_18 = arith.constant 0 : index
    %17 = vector.load %arg1[%c0_17, %c3, %c0_18] : memref<8x36x32xbf16, #tpu.memory_space<vmem>>, vector<8x32x32xbf16>
    %18 = vector.shape_cast %17 : vector<8x32x32xbf16> to vector<256x32xbf16>
    %c3_19 = arith.constant 3 : index
    %c0_20 = arith.constant 0 : index
    %c0_21 = arith.constant 0 : index
    %19 = vector.load %arg2[%c3_19, %c0_20, %c0_21] : memref<5x32x336xbf16, #tpu.memory_space<vmem>>, vector<1x32x336xbf16>
    %20 = vector.shape_cast %19 : vector<1x32x336xbf16> to vector<32x336xbf16>
    %cst_22 = arith.constant dense<0.000000e+00> : vector<256x336xf32>
    %21 = tpu.matmul %18, %20, %cst_22 {dimension_numbers = #tpu.dot_dimension_numbers<[1], [0], [0], [1], [0, 0, 1, 1], [], []>} : vector<256x32xbf16>, vector<32x336xbf16>, vector<256x336xf32> -> vector<256x336xf32>
    %22 = arith.addf %16, %21 : vector<256x336xf32>
    %c0_23 = arith.constant 0 : index
    %c4 = arith.constant 4 : index
    %c0_24 = arith.constant 0 : index
    %23 = vector.load %arg1[%c0_23, %c4, %c0_24] : memref<8x36x32xbf16, #tpu.memory_space<vmem>>, vector<8x32x32xbf16>
    %24 = vector.shape_cast %23 : vector<8x32x32xbf16> to vector<256x32xbf16>
    %c4_25 = arith.constant 4 : index
    %c0_26 = arith.constant 0 : index
    %c0_27 = arith.constant 0 : index
    %25 = vector.load %arg2[%c4_25, %c0_26, %c0_27] : memref<5x32x336xbf16, #tpu.memory_space<vmem>>, vector<1x32x336xbf16>
    %26 = vector.shape_cast %25 : vector<1x32x336xbf16> to vector<32x336xbf16>
    %cst_28 = arith.constant dense<0.000000e+00> : vector<256x336xf32>
    %27 = tpu.matmul %24, %26, %cst_28 {dimension_numbers = #tpu.dot_dimension_numbers<[1], [0], [0], [1], [0, 0, 1, 1], [], []>} : vector<256x32xbf16>, vector<32x336xbf16>, vector<256x336xf32> -> vector<256x336xf32>
    %28 = arith.addf %22, %27 : vector<256x336xf32>
    %c0_29 = arith.constant 0 : index
    %c0_30 = arith.constant 0 : index
    %29 = vector.load %arg3[%c0_29, %c0_30] : memref<1x336xf32, #tpu.memory_space<vmem>>, vector<1x336xf32>
    %30 = vector.broadcast %29 : vector<1x336xf32> to vector<256x336xf32>
    %31 = arith.addf %28, %30 : vector<256x336xf32>
    %cst_31 = arith.constant 0.000000e+00 : f32
    %32 = vector.broadcast %cst_31 : f32 to vector<256x336xf32>
    %33 = arith.maximumf %31, %32 : vector<256x336xf32>
    %34 = vector.shape_cast %33 : vector<256x336xf32> to vector<8x32x336xf32>
    %35 = vector.extract_strided_slice %34 {offsets = [0, 0, 0], sizes = [8, 1, 336], strides = [1, 1, 1]} : vector<8x32x336xf32> to vector<8x1x336xf32>
    %36 = vector.shape_cast %35 : vector<8x1x336xf32> to vector<8x336xf32>
    %37 = vector.extract_strided_slice %34 {offsets = [0, 1, 0], sizes = [8, 1, 336], strides = [1, 1, 1]} : vector<8x32x336xf32> to vector<8x1x336xf32>
    %38 = vector.shape_cast %37 : vector<8x1x336xf32> to vector<8x336xf32>
    %39 = arith.maximumf %36, %38 : vector<8x336xf32>
    %40 = vector.extract_strided_slice %39 {offsets = [0, 0], sizes = [8, 324], strides = [1, 1]} : vector<8x336xf32> to vector<8x324xf32>
    %41 = vector.extract_strided_slice %39 {offsets = [0, 12], sizes = [8, 324], strides = [1, 1]} : vector<8x336xf32> to vector<8x324xf32>
    %42 = arith.maximumf %40, %41 : vector<8x324xf32>
    %43 = arith.truncf %42 : vector<8x324xf32> to vector<8x324xbf16>
    %c0_32 = arith.constant 0 : index
    %c0_33 = arith.constant 0 : index
    %c0_34 = arith.constant 0 : index
    %44 = vector.load %arg4[%c0_32, %c0_33, %c0_34] : memref<8x14x324xbf16, #tpu.memory_space<vmem>>, vector<8x1x324xbf16>
    %45 = vector.shape_cast %44 : vector<8x1x324xbf16> to vector<8x324xbf16>
    %46 = vector.shape_cast %43 : vector<8x324xbf16> to vector<8x1x324xbf16>
    tpu.vector_store %arg4[%c0_32, %c0_33, %c0_34], %46 {strides = array<i32>} : memref<8x14x324xbf16, #tpu.memory_space<vmem>>, vector<8x1x324xbf16>,
    %47 = vector.extract_strided_slice %34 {offsets = [0, 2, 0], sizes = [8, 1, 336], strides = [1, 1, 1]} : vector<8x32x336xf32> to vector<8x1x336xf32>
    %48 = vector.shape_cast %47 : vector<8x1x336xf32> to vector<8x336xf32>
    %49 = vector.extract_strided_slice %34 {offsets = [0, 3, 0], sizes = [8, 1, 336], strides = [1, 1, 1]} : vector<8x32x336xf32> to vector<8x1x336xf32>
    %50 = vector.shape_cast %49 : vector<8x1x336xf32> to vector<8x336xf32>
    %51 = arith.maximumf %48, %50 : vector<8x336xf32>
    %52 = vector.extract_strided_slice %51 {offsets = [0, 0], sizes = [8, 324], strides = [1, 1]} : vector<8x336xf32> to vector<8x324xf32>
    %53 = vector.extract_strided_slice %51 {offsets = [0, 12], sizes = [8, 324], strides = [1, 1]} : vector<8x336xf32> to vector<8x324xf32>
    %54 = arith.maximumf %52, %53 : vector<8x324xf32>
    %55 = arith.truncf %54 : vector<8x324xf32> to vector<8x324xbf16>
    %c0_35 = arith.constant 0 : index
    %c1_36 = arith.constant 1 : index
    %c0_37 = arith.constant 0 : index
    %56 = vector.load %arg4[%c0_35, %c1_36, %c0_37] : memref<8x14x324xbf16, #tpu.memory_space<vmem>>, vector<8x1x324xbf16>
    %57 = vector.shape_cast %56 : vector<8x1x324xbf16> to vector<8x324xbf16>
    %58 = vector.shape_cast %55 : vector<8x324xbf16> to vector<8x1x324xbf16>
    tpu.vector_store %arg4[%c0_35, %c1_36, %c0_37], %58 {strides = array<i32>} : memref<8x14x324xbf16, #tpu.memory_space<vmem>>, vector<8x1x324xbf16>,
    %59 = vector.extract_strided_slice %34 {offsets = [0, 4, 0], sizes = [8, 1, 336], strides = [1, 1, 1]} : vector<8x32x336xf32> to vector<8x1x336xf32>
    %60 = vector.shape_cast %59 : vector<8x1x336xf32> to vector<8x336xf32>
    %61 = vector.extract_strided_slice %34 {offsets = [0, 5, 0], sizes = [8, 1, 336], strides = [1, 1, 1]} : vector<8x32x336xf32> to vector<8x1x336xf32>
    %62 = vector.shape_cast %61 : vector<8x1x336xf32> to vector<8x336xf32>
    %63 = arith.maximumf %60, %62 : vector<8x336xf32>
    %64 = vector.extract_strided_slice %63 {offsets = [0, 0], sizes = [8, 324], strides = [1, 1]} : vector<8x336xf32> to vector<8x324xf32>
    %65 = vector.extract_strided_slice %63 {offsets = [0, 12], sizes = [8, 324], strides = [1, 1]} : vector<8x336xf32> to vector<8x324xf32>
    %66 = arith.maximumf %64, %65 : vector<8x324xf32>
    %67 = arith.truncf %66 : vector<8x324xf32> to vector<8x324xbf16>
    %c0_38 = arith.constant 0 : index
    %c2_39 = arith.constant 2 : index
    %c0_40 = arith.constant 0 : index
    %68 = vector.load %arg4[%c0_38, %c2_39, %c0_40] : memref<8x14x324xbf16, #tpu.memory_space<vmem>>, vector<8x1x324xbf16>
    %69 = vector.shape_cast %68 : vector<8x1x324xbf16> to vector<8x324xbf16>
    %70 = vector.shape_cast %67 : vector<8x324xbf16> to vector<8x1x324xbf16>
    tpu.vector_store %arg4[%c0_38, %c2_39, %c0_40], %70 {strides = array<i32>} : memref<8x14x324xbf16, #tpu.memory_space<vmem>>, vector<8x1x324xbf16>,
    %71 = vector.extract_strided_slice %34 {offsets = [0, 6, 0], sizes = [8, 1, 336], strides = [1, 1, 1]} : vector<8x32x336xf32> to vector<8x1x336xf32>
    %72 = vector.shape_cast %71 : vector<8x1x336xf32> to vector<8x336xf32>
    %73 = vector.extract_strided_slice %34 {offsets = [0, 7, 0], sizes = [8, 1, 336], strides = [1, 1, 1]} : vector<8x32x336xf32> to vector<8x1x336xf32>
    %74 = vector.shape_cast %73 : vector<8x1x336xf32> to vector<8x336xf32>
    %75 = arith.maximumf %72, %74 : vector<8x336xf32>
    %76 = vector.extract_strided_slice %75 {offsets = [0, 0], sizes = [8, 324], strides = [1, 1]} : vector<8x336xf32> to vector<8x324xf32>
    %77 = vector.extract_strided_slice %75 {offsets = [0, 12], sizes = [8, 324], strides = [1, 1]} : vector<8x336xf32> to vector<8x324xf32>
    %78 = arith.maximumf %76, %77 : vector<8x324xf32>
    %79 = arith.truncf %78 : vector<8x324xf32> to vector<8x324xbf16>
    %c0_41 = arith.constant 0 : index
    %c3_42 = arith.constant 3 : index
    %c0_43 = arith.constant 0 : index
    %80 = vector.load %arg4[%c0_41, %c3_42, %c0_43] : memref<8x14x324xbf16, #tpu.memory_space<vmem>>, vector<8x1x324xbf16>
    %81 = vector.shape_cast %80 : vector<8x1x324xbf16> to vector<8x324xbf16>
    %82 = vector.shape_cast %79 : vector<8x324xbf16> to vector<8x1x324xbf16>
    tpu.vector_store %arg4[%c0_41, %c3_42, %c0_43], %82 {strides = array<i32>} : memref<8x14x324xbf16, #tpu.memory_space<vmem>>, vector<8x1x324xbf16>,
    %83 = vector.extract_strided_slice %34 {offsets = [0, 8, 0], sizes = [8, 1, 336], strides = [1, 1, 1]} : vector<8x32x336xf32> to vector<8x1x336xf32>
    %84 = vector.shape_cast %83 : vector<8x1x336xf32> to vector<8x336xf32>
    %85 = vector.extract_strided_slice %34 {offsets = [0, 9, 0], sizes = [8, 1, 336], strides = [1, 1, 1]} : vector<8x32x336xf32> to vector<8x1x336xf32>
    %86 = vector.shape_cast %85 : vector<8x1x336xf32> to vector<8x336xf32>
    %87 = arith.maximumf %84, %86 : vector<8x336xf32>
    %88 = vector.extract_strided_slice %87 {offsets = [0, 0], sizes = [8, 324], strides = [1, 1]} : vector<8x336xf32> to vector<8x324xf32>
    %89 = vector.extract_strided_slice %87 {offsets = [0, 12], sizes = [8, 324], strides = [1, 1]} : vector<8x336xf32> to vector<8x324xf32>
    %90 = arith.maximumf %88, %89 : vector<8x324xf32>
    %91 = arith.truncf %90 : vector<8x324xf32> to vector<8x324xbf16>
    %c0_44 = arith.constant 0 : index
    %c4_45 = arith.constant 4 : index
    %c0_46 = arith.constant 0 : index
    %92 = vector.load %arg4[%c0_44, %c4_45, %c0_46] : memref<8x14x324xbf16, #tpu.memory_space<vmem>>, vector<8x1x324xbf16>
    %93 = vector.shape_cast %92 : vector<8x1x324xbf16> to vector<8x324xbf16>
    %94 = vector.shape_cast %91 : vector<8x324xbf16> to vector<8x1x324xbf16>
    tpu.vector_store %arg4[%c0_44, %c4_45, %c0_46], %94 {strides = array<i32>} : memref<8x14x324xbf16, #tpu.memory_space<vmem>>, vector<8x1x324xbf16>,
    %95 = vector.extract_strided_slice %34 {offsets = [0, 10, 0], sizes = [8, 1, 336], strides = [1, 1, 1]} : vector<8x32x336xf32> to vector<8x1x336xf32>
    %96 = vector.shape_cast %95 : vector<8x1x336xf32> to vector<8x336xf32>
    %97 = vector.extract_strided_slice %34 {offsets = [0, 11, 0], sizes = [8, 1, 336], strides = [1, 1, 1]} : vector<8x32x336xf32> to vector<8x1x336xf32>
    %98 = vector.shape_cast %97 : vector<8x1x336xf32> to vector<8x336xf32>
    %99 = arith.maximumf %96, %98 : vector<8x336xf32>
    %100 = vector.extract_strided_slice %99 {offsets = [0, 0], sizes = [8, 324], strides = [1, 1]} : vector<8x336xf32> to vector<8x324xf32>
    %101 = vector.extract_strided_slice %99 {offsets = [0, 12], sizes = [8, 324], strides = [1, 1]} : vector<8x336xf32> to vector<8x324xf32>
    %102 = arith.maximumf %100, %101 : vector<8x324xf32>
    %103 = arith.truncf %102 : vector<8x324xf32> to vector<8x324xbf16>
    %c0_47 = arith.constant 0 : index
    %c5 = arith.constant 5 : index
    %c0_48 = arith.constant 0 : index
    %104 = vector.load %arg4[%c0_47, %c5, %c0_48] : memref<8x14x324xbf16, #tpu.memory_space<vmem>>, vector<8x1x324xbf16>
    %105 = vector.shape_cast %104 : vector<8x1x324xbf16> to vector<8x324xbf16>
    %106 = vector.shape_cast %103 : vector<8x324xbf16> to vector<8x1x324xbf16>
    tpu.vector_store %arg4[%c0_47, %c5, %c0_48], %106 {strides = array<i32>} : memref<8x14x324xbf16, #tpu.memory_space<vmem>>, vector<8x1x324xbf16>,
    %107 = vector.extract_strided_slice %34 {offsets = [0, 12, 0], sizes = [8, 1, 336], strides = [1, 1, 1]} : vector<8x32x336xf32> to vector<8x1x336xf32>
    %108 = vector.shape_cast %107 : vector<8x1x336xf32> to vector<8x336xf32>
    %109 = vector.extract_strided_slice %34 {offsets = [0, 13, 0], sizes = [8, 1, 336], strides = [1, 1, 1]} : vector<8x32x336xf32> to vector<8x1x336xf32>
    %110 = vector.shape_cast %109 : vector<8x1x336xf32> to vector<8x336xf32>
    %111 = arith.maximumf %108, %110 : vector<8x336xf32>
    %112 = vector.extract_strided_slice %111 {offsets = [0, 0], sizes = [8, 324], strides = [1, 1]} : vector<8x336xf32> to vector<8x324xf32>
    %113 = vector.extract_strided_slice %111 {offsets = [0, 12], sizes = [8, 324], strides = [1, 1]} : vector<8x336xf32> to vector<8x324xf32>
    %114 = arith.maximumf %112, %113 : vector<8x324xf32>
    %115 = arith.truncf %114 : vector<8x324xf32> to vector<8x324xbf16>
    %c0_49 = arith.constant 0 : index
    %c6 = arith.constant 6 : index
    %c0_50 = arith.constant 0 : index
    %116 = vector.load %arg4[%c0_49, %c6, %c0_50] : memref<8x14x324xbf16, #tpu.memory_space<vmem>>, vector<8x1x324xbf16>
    %117 = vector.shape_cast %116 : vector<8x1x324xbf16> to vector<8x324xbf16>
    %118 = vector.shape_cast %115 : vector<8x324xbf16> to vector<8x1x324xbf16>
    tpu.vector_store %arg4[%c0_49, %c6, %c0_50], %118 {strides = array<i32>} : memref<8x14x324xbf16, #tpu.memory_space<vmem>>, vector<8x1x324xbf16>,
    %119 = vector.extract_strided_slice %34 {offsets = [0, 14, 0], sizes = [8, 1, 336], strides = [1, 1, 1]} : vector<8x32x336xf32> to vector<8x1x336xf32>
    %120 = vector.shape_cast %119 : vector<8x1x336xf32> to vector<8x336xf32>
    %121 = vector.extract_strided_slice %34 {offsets = [0, 15, 0], sizes = [8, 1, 336], strides = [1, 1, 1]} : vector<8x32x336xf32> to vector<8x1x336xf32>
    %122 = vector.shape_cast %121 : vector<8x1x336xf32> to vector<8x336xf32>
    %123 = arith.maximumf %120, %122 : vector<8x336xf32>
    %124 = vector.extract_strided_slice %123 {offsets = [0, 0], sizes = [8, 324], strides = [1, 1]} : vector<8x336xf32> to vector<8x324xf32>
    %125 = vector.extract_strided_slice %123 {offsets = [0, 12], sizes = [8, 324], strides = [1, 1]} : vector<8x336xf32> to vector<8x324xf32>
    %126 = arith.maximumf %124, %125 : vector<8x324xf32>
    %127 = arith.truncf %126 : vector<8x324xf32> to vector<8x324xbf16>
    %c0_51 = arith.constant 0 : index
    %c7 = arith.constant 7 : index
    %c0_52 = arith.constant 0 : index
    %128 = vector.load %arg4[%c0_51, %c7, %c0_52] : memref<8x14x324xbf16, #tpu.memory_space<vmem>>, vector<8x1x324xbf16>
    %129 = vector.shape_cast %128 : vector<8x1x324xbf16> to vector<8x324xbf16>
    %130 = vector.shape_cast %127 : vector<8x324xbf16> to vector<8x1x324xbf16>
    tpu.vector_store %arg4[%c0_51, %c7, %c0_52], %130 {strides = array<i32>} : memref<8x14x324xbf16, #tpu.memory_space<vmem>>, vector<8x1x324xbf16>,
    %131 = vector.extract_strided_slice %34 {offsets = [0, 16, 0], sizes = [8, 1, 336], strides = [1, 1, 1]} : vector<8x32x336xf32> to vector<8x1x336xf32>
    %132 = vector.shape_cast %131 : vector<8x1x336xf32> to vector<8x336xf32>
    %133 = vector.extract_strided_slice %34 {offsets = [0, 17, 0], sizes = [8, 1, 336], strides = [1, 1, 1]} : vector<8x32x336xf32> to vector<8x1x336xf32>
    %134 = vector.shape_cast %133 : vector<8x1x336xf32> to vector<8x336xf32>
    %135 = arith.maximumf %132, %134 : vector<8x336xf32>
    %136 = vector.extract_strided_slice %135 {offsets = [0, 0], sizes = [8, 324], strides = [1, 1]} : vector<8x336xf32> to vector<8x324xf32>
    %137 = vector.extract_strided_slice %135 {offsets = [0, 12], sizes = [8, 324], strides = [1, 1]} : vector<8x336xf32> to vector<8x324xf32>
    %138 = arith.maximumf %136, %137 : vector<8x324xf32>
    %139 = arith.truncf %138 : vector<8x324xf32> to vector<8x324xbf16>
    %c0_53 = arith.constant 0 : index
    %c8 = arith.constant 8 : index
    %c0_54 = arith.constant 0 : index
    %140 = vector.load %arg4[%c0_53, %c8, %c0_54] : memref<8x14x324xbf16, #tpu.memory_space<vmem>>, vector<8x1x324xbf16>
    %141 = vector.shape_cast %140 : vector<8x1x324xbf16> to vector<8x324xbf16>
    %142 = vector.shape_cast %139 : vector<8x324xbf16> to vector<8x1x324xbf16>
    tpu.vector_store %arg4[%c0_53, %c8, %c0_54], %142 {strides = array<i32>} : memref<8x14x324xbf16, #tpu.memory_space<vmem>>, vector<8x1x324xbf16>,
    %143 = vector.extract_strided_slice %34 {offsets = [0, 18, 0], sizes = [8, 1, 336], strides = [1, 1, 1]} : vector<8x32x336xf32> to vector<8x1x336xf32>
    %144 = vector.shape_cast %143 : vector<8x1x336xf32> to vector<8x336xf32>
    %145 = vector.extract_strided_slice %34 {offsets = [0, 19, 0], sizes = [8, 1, 336], strides = [1, 1, 1]} : vector<8x32x336xf32> to vector<8x1x336xf32>
    %146 = vector.shape_cast %145 : vector<8x1x336xf32> to vector<8x336xf32>
    %147 = arith.maximumf %144, %146 : vector<8x336xf32>
    %148 = vector.extract_strided_slice %147 {offsets = [0, 0], sizes = [8, 324], strides = [1, 1]} : vector<8x336xf32> to vector<8x324xf32>
    %149 = vector.extract_strided_slice %147 {offsets = [0, 12], sizes = [8, 324], strides = [1, 1]} : vector<8x336xf32> to vector<8x324xf32>
    %150 = arith.maximumf %148, %149 : vector<8x324xf32>
    %151 = arith.truncf %150 : vector<8x324xf32> to vector<8x324xbf16>
    %c0_55 = arith.constant 0 : index
    %c9 = arith.constant 9 : index
    %c0_56 = arith.constant 0 : index
    %152 = vector.load %arg4[%c0_55, %c9, %c0_56] : memref<8x14x324xbf16, #tpu.memory_space<vmem>>, vector<8x1x324xbf16>
    %153 = vector.shape_cast %152 : vector<8x1x324xbf16> to vector<8x324xbf16>
    %154 = vector.shape_cast %151 : vector<8x324xbf16> to vector<8x1x324xbf16>
    tpu.vector_store %arg4[%c0_55, %c9, %c0_56], %154 {strides = array<i32>} : memref<8x14x324xbf16, #tpu.memory_space<vmem>>, vector<8x1x324xbf16>,
    %155 = vector.extract_strided_slice %34 {offsets = [0, 20, 0], sizes = [8, 1, 336], strides = [1, 1, 1]} : vector<8x32x336xf32> to vector<8x1x336xf32>
    %156 = vector.shape_cast %155 : vector<8x1x336xf32> to vector<8x336xf32>
    %157 = vector.extract_strided_slice %34 {offsets = [0, 21, 0], sizes = [8, 1, 336], strides = [1, 1, 1]} : vector<8x32x336xf32> to vector<8x1x336xf32>
    %158 = vector.shape_cast %157 : vector<8x1x336xf32> to vector<8x336xf32>
    %159 = arith.maximumf %156, %158 : vector<8x336xf32>
    %160 = vector.extract_strided_slice %159 {offsets = [0, 0], sizes = [8, 324], strides = [1, 1]} : vector<8x336xf32> to vector<8x324xf32>
    %161 = vector.extract_strided_slice %159 {offsets = [0, 12], sizes = [8, 324], strides = [1, 1]} : vector<8x336xf32> to vector<8x324xf32>
    %162 = arith.maximumf %160, %161 : vector<8x324xf32>
    %163 = arith.truncf %162 : vector<8x324xf32> to vector<8x324xbf16>
    %c0_57 = arith.constant 0 : index
    %c10 = arith.constant 10 : index
    %c0_58 = arith.constant 0 : index
    %164 = vector.load %arg4[%c0_57, %c10, %c0_58] : memref<8x14x324xbf16, #tpu.memory_space<vmem>>, vector<8x1x324xbf16>
    %165 = vector.shape_cast %164 : vector<8x1x324xbf16> to vector<8x324xbf16>
    %166 = vector.shape_cast %163 : vector<8x324xbf16> to vector<8x1x324xbf16>
    tpu.vector_store %arg4[%c0_57, %c10, %c0_58], %166 {strides = array<i32>} : memref<8x14x324xbf16, #tpu.memory_space<vmem>>, vector<8x1x324xbf16>,
    %167 = vector.extract_strided_slice %34 {offsets = [0, 22, 0], sizes = [8, 1, 336], strides = [1, 1, 1]} : vector<8x32x336xf32> to vector<8x1x336xf32>
    %168 = vector.shape_cast %167 : vector<8x1x336xf32> to vector<8x336xf32>
    %169 = vector.extract_strided_slice %34 {offsets = [0, 23, 0], sizes = [8, 1, 336], strides = [1, 1, 1]} : vector<8x32x336xf32> to vector<8x1x336xf32>
    %170 = vector.shape_cast %169 : vector<8x1x336xf32> to vector<8x336xf32>
    %171 = arith.maximumf %168, %170 : vector<8x336xf32>
    %172 = vector.extract_strided_slice %171 {offsets = [0, 0], sizes = [8, 324], strides = [1, 1]} : vector<8x336xf32> to vector<8x324xf32>
    %173 = vector.extract_strided_slice %171 {offsets = [0, 12], sizes = [8, 324], strides = [1, 1]} : vector<8x336xf32> to vector<8x324xf32>
    %174 = arith.maximumf %172, %173 : vector<8x324xf32>
    %175 = arith.truncf %174 : vector<8x324xf32> to vector<8x324xbf16>
    %c0_59 = arith.constant 0 : index
    %c11 = arith.constant 11 : index
    %c0_60 = arith.constant 0 : index
    %176 = vector.load %arg4[%c0_59, %c11, %c0_60] : memref<8x14x324xbf16, #tpu.memory_space<vmem>>, vector<8x1x324xbf16>
    %177 = vector.shape_cast %176 : vector<8x1x324xbf16> to vector<8x324xbf16>
    %178 = vector.shape_cast %175 : vector<8x324xbf16> to vector<8x1x324xbf16>
    tpu.vector_store %arg4[%c0_59, %c11, %c0_60], %178 {strides = array<i32>} : memref<8x14x324xbf16, #tpu.memory_space<vmem>>, vector<8x1x324xbf16>,
    %179 = vector.extract_strided_slice %34 {offsets = [0, 24, 0], sizes = [8, 1, 336], strides = [1, 1, 1]} : vector<8x32x336xf32> to vector<8x1x336xf32>
    %180 = vector.shape_cast %179 : vector<8x1x336xf32> to vector<8x336xf32>
    %181 = vector.extract_strided_slice %34 {offsets = [0, 25, 0], sizes = [8, 1, 336], strides = [1, 1, 1]} : vector<8x32x336xf32> to vector<8x1x336xf32>
    %182 = vector.shape_cast %181 : vector<8x1x336xf32> to vector<8x336xf32>
    %183 = arith.maximumf %180, %182 : vector<8x336xf32>
    %184 = vector.extract_strided_slice %183 {offsets = [0, 0], sizes = [8, 324], strides = [1, 1]} : vector<8x336xf32> to vector<8x324xf32>
    %185 = vector.extract_strided_slice %183 {offsets = [0, 12], sizes = [8, 324], strides = [1, 1]} : vector<8x336xf32> to vector<8x324xf32>
    %186 = arith.maximumf %184, %185 : vector<8x324xf32>
    %187 = arith.truncf %186 : vector<8x324xf32> to vector<8x324xbf16>
    %c0_61 = arith.constant 0 : index
    %c12 = arith.constant 12 : index
    %c0_62 = arith.constant 0 : index
    %188 = vector.load %arg4[%c0_61, %c12, %c0_62] : memref<8x14x324xbf16, #tpu.memory_space<vmem>>, vector<8x1x324xbf16>
    %189 = vector.shape_cast %188 : vector<8x1x324xbf16> to vector<8x324xbf16>
    %190 = vector.shape_cast %187 : vector<8x324xbf16> to vector<8x1x324xbf16>
    tpu.vector_store %arg4[%c0_61, %c12, %c0_62], %190 {strides = array<i32>} : memref<8x14x324xbf16, #tpu.memory_space<vmem>>, vector<8x1x324xbf16>,
    %191 = vector.extract_strided_slice %34 {offsets = [0, 26, 0], sizes = [8, 1, 336], strides = [1, 1, 1]} : vector<8x32x336xf32> to vector<8x1x336xf32>
    %192 = vector.shape_cast %191 : vector<8x1x336xf32> to vector<8x336xf32>
    %193 = vector.extract_strided_slice %34 {offsets = [0, 27, 0], sizes = [8, 1, 336], strides = [1, 1, 1]} : vector<8x32x336xf32> to vector<8x1x336xf32>
    %194 = vector.shape_cast %193 : vector<8x1x336xf32> to vector<8x336xf32>
    %195 = arith.maximumf %192, %194 : vector<8x336xf32>
    %196 = vector.extract_strided_slice %195 {offsets = [0, 0], sizes = [8, 324], strides = [1, 1]} : vector<8x336xf32> to vector<8x324xf32>
    %197 = vector.extract_strided_slice %195 {offsets = [0, 12], sizes = [8, 324], strides = [1, 1]} : vector<8x336xf32> to vector<8x324xf32>
    %198 = arith.maximumf %196, %197 : vector<8x324xf32>
    %199 = arith.truncf %198 : vector<8x324xf32> to vector<8x324xbf16>
    %c0_63 = arith.constant 0 : index
    %c13 = arith.constant 13 : index
    %c0_64 = arith.constant 0 : index
    %200 = vector.load %arg4[%c0_63, %c13, %c0_64] : memref<8x14x324xbf16, #tpu.memory_space<vmem>>, vector<8x1x324xbf16>
    %201 = vector.shape_cast %200 : vector<8x1x324xbf16> to vector<8x324xbf16>
    %202 = vector.shape_cast %199 : vector<8x324xbf16> to vector<8x1x324xbf16>
    tpu.vector_store %arg4[%c0_63, %c13, %c0_64], %202 {strides = array<i32>} : memref<8x14x324xbf16, #tpu.memory_space<vmem>>, vector<8x1x324xbf16>,
    return
  }
  func.func @transform_0(%arg0: i32) -> (i32, i32, i32) {
    %c0_i32 = arith.constant 0 : i32
    %c0_i32_0 = arith.constant 0 : i32
    %c0_i32_1 = arith.constant 0 : i32
    return %arg0, %c0_i32, %c0_i32_0 : i32, i32, i32
  }
  func.func @transform_1(%arg0: i32) -> (i32, i32, i32) {
    %c0_i32 = arith.constant 0 : i32
    %c0_i32_0 = arith.constant 0 : i32
    %c0_i32_1 = arith.constant 0 : i32
    %c0_i32_2 = arith.constant 0 : i32
    return %c0_i32, %c0_i32_0, %c0_i32_1 : i32, i32, i32
  }
  func.func @transform_2(%arg0: i32) -> (i32, i32) {
    %c0_i32 = arith.constant 0 : i32
    %c0_i32_0 = arith.constant 0 : i32
    %c0_i32_1 = arith.constant 0 : i32
    return %c0_i32, %c0_i32_0 : i32, i32
  }
  func.func @transform_3(%arg0: i32) -> (i32, i32, i32) {
    %c0_i32 = arith.constant 0 : i32
    %c0_i32_0 = arith.constant 0 : i32
    %c0_i32_1 = arith.constant 0 : i32
    return %arg0, %c0_i32, %c0_i32_0 : i32, i32, i32
  }
}

module attributes {stable_mosaic.version = 11 : i64} {
  func.func @_conv2_classifier_kernel(%arg0: i32, %arg1: memref<8x20x216xbf16, #tpu.memory_space<vmem>>, %arg2: memref<5x216x168xbf16, #tpu.memory_space<vmem>>, %arg3: memref<1x168xf32, #tpu.memory_space<vmem>>, %arg4: memref<7x156x10xbf16, #tpu.memory_space<vmem>>, %arg5: memref<1x10xf32, #tpu.memory_space<vmem>>, %arg6: memref<10x10xf32, #tpu.memory_space<vmem>>, %arg7: memref<1x10xf32, #tpu.memory_space<vmem>>, %arg8: memref<8x10xf32, #tpu.memory_space<vmem>>) attributes {dimension_semantics = [#tpu.dimension_semantics<parallel>], iteration_bounds = array<i64: 1>, scalar_prefetch = 0 : i64, scratch_operands = 0 : i64, tpu.core_type = #tpu.core_type<tc>, window_params = [{transform_indices = @transform_0, window_bounds = array<i64: 8, 20, 216>}, {pipeline_mode = #tpu.pipeline_mode<synchronous>, transform_indices = @transform_1, window_bounds = array<i64: 5, 216, 168>}, {pipeline_mode = #tpu.pipeline_mode<synchronous>, transform_indices = @transform_2, window_bounds = array<i64: 1, 168>}, {pipeline_mode = #tpu.pipeline_mode<synchronous>, transform_indices = @transform_3, window_bounds = array<i64: 7, 156, 10>}, {pipeline_mode = #tpu.pipeline_mode<synchronous>, transform_indices = @transform_4, window_bounds = array<i64: 1, 10>}, {pipeline_mode = #tpu.pipeline_mode<synchronous>, transform_indices = @transform_5, window_bounds = array<i64: 10, 10>}, {pipeline_mode = #tpu.pipeline_mode<synchronous>, transform_indices = @transform_6, window_bounds = array<i64: 1, 10>}, {transform_indices = @transform_7, window_bounds = array<i64: 8, 10>}]} {
    %c0 = arith.constant 0 : index
    %c0_0 = arith.constant 0 : index
    %c0_1 = arith.constant 0 : index
    %0 = vector.load %arg1[%c0, %c0_0, %c0_1] : memref<8x20x216xbf16, #tpu.memory_space<vmem>>, vector<8x16x216xbf16>
    %1 = vector.shape_cast %0 : vector<8x16x216xbf16> to vector<128x216xbf16>
    %c0_2 = arith.constant 0 : index
    %c0_3 = arith.constant 0 : index
    %c0_4 = arith.constant 0 : index
    %2 = vector.load %arg2[%c0_2, %c0_3, %c0_4] : memref<5x216x168xbf16, #tpu.memory_space<vmem>>, vector<1x216x168xbf16>
    %3 = vector.shape_cast %2 : vector<1x216x168xbf16> to vector<216x168xbf16>
    %cst = arith.constant dense<0.000000e+00> : vector<128x168xf32>
    %4 = tpu.matmul %1, %3, %cst {dimension_numbers = #tpu.dot_dimension_numbers<[1], [0], [0], [1], [0, 0, 1, 1], [], []>} : vector<128x216xbf16>, vector<216x168xbf16>, vector<128x168xf32> -> vector<128x168xf32>
    %c0_5 = arith.constant 0 : index
    %c1 = arith.constant 1 : index
    %c0_6 = arith.constant 0 : index
    %5 = vector.load %arg1[%c0_5, %c1, %c0_6] : memref<8x20x216xbf16, #tpu.memory_space<vmem>>, vector<8x16x216xbf16>
    %6 = vector.shape_cast %5 : vector<8x16x216xbf16> to vector<128x216xbf16>
    %c1_7 = arith.constant 1 : index
    %c0_8 = arith.constant 0 : index
    %c0_9 = arith.constant 0 : index
    %7 = vector.load %arg2[%c1_7, %c0_8, %c0_9] : memref<5x216x168xbf16, #tpu.memory_space<vmem>>, vector<1x216x168xbf16>
    %8 = vector.shape_cast %7 : vector<1x216x168xbf16> to vector<216x168xbf16>
    %cst_10 = arith.constant dense<0.000000e+00> : vector<128x168xf32>
    %9 = tpu.matmul %6, %8, %cst_10 {dimension_numbers = #tpu.dot_dimension_numbers<[1], [0], [0], [1], [0, 0, 1, 1], [], []>} : vector<128x216xbf16>, vector<216x168xbf16>, vector<128x168xf32> -> vector<128x168xf32>
    %10 = arith.addf %4, %9 : vector<128x168xf32>
    %c0_11 = arith.constant 0 : index
    %c2 = arith.constant 2 : index
    %c0_12 = arith.constant 0 : index
    %11 = vector.load %arg1[%c0_11, %c2, %c0_12] : memref<8x20x216xbf16, #tpu.memory_space<vmem>>, vector<8x16x216xbf16>
    %12 = vector.shape_cast %11 : vector<8x16x216xbf16> to vector<128x216xbf16>
    %c2_13 = arith.constant 2 : index
    %c0_14 = arith.constant 0 : index
    %c0_15 = arith.constant 0 : index
    %13 = vector.load %arg2[%c2_13, %c0_14, %c0_15] : memref<5x216x168xbf16, #tpu.memory_space<vmem>>, vector<1x216x168xbf16>
    %14 = vector.shape_cast %13 : vector<1x216x168xbf16> to vector<216x168xbf16>
    %cst_16 = arith.constant dense<0.000000e+00> : vector<128x168xf32>
    %15 = tpu.matmul %12, %14, %cst_16 {dimension_numbers = #tpu.dot_dimension_numbers<[1], [0], [0], [1], [0, 0, 1, 1], [], []>} : vector<128x216xbf16>, vector<216x168xbf16>, vector<128x168xf32> -> vector<128x168xf32>
    %16 = arith.addf %10, %15 : vector<128x168xf32>
    %c0_17 = arith.constant 0 : index
    %c3 = arith.constant 3 : index
    %c0_18 = arith.constant 0 : index
    %17 = vector.load %arg1[%c0_17, %c3, %c0_18] : memref<8x20x216xbf16, #tpu.memory_space<vmem>>, vector<8x16x216xbf16>
    %18 = vector.shape_cast %17 : vector<8x16x216xbf16> to vector<128x216xbf16>
    %c3_19 = arith.constant 3 : index
    %c0_20 = arith.constant 0 : index
    %c0_21 = arith.constant 0 : index
    %19 = vector.load %arg2[%c3_19, %c0_20, %c0_21] : memref<5x216x168xbf16, #tpu.memory_space<vmem>>, vector<1x216x168xbf16>
    %20 = vector.shape_cast %19 : vector<1x216x168xbf16> to vector<216x168xbf16>
    %cst_22 = arith.constant dense<0.000000e+00> : vector<128x168xf32>
    %21 = tpu.matmul %18, %20, %cst_22 {dimension_numbers = #tpu.dot_dimension_numbers<[1], [0], [0], [1], [0, 0, 1, 1], [], []>} : vector<128x216xbf16>, vector<216x168xbf16>, vector<128x168xf32> -> vector<128x168xf32>
    %22 = arith.addf %16, %21 : vector<128x168xf32>
    %c0_23 = arith.constant 0 : index
    %c4 = arith.constant 4 : index
    %c0_24 = arith.constant 0 : index
    %23 = vector.load %arg1[%c0_23, %c4, %c0_24] : memref<8x20x216xbf16, #tpu.memory_space<vmem>>, vector<8x16x216xbf16>
    %24 = vector.shape_cast %23 : vector<8x16x216xbf16> to vector<128x216xbf16>
    %c4_25 = arith.constant 4 : index
    %c0_26 = arith.constant 0 : index
    %c0_27 = arith.constant 0 : index
    %25 = vector.load %arg2[%c4_25, %c0_26, %c0_27] : memref<5x216x168xbf16, #tpu.memory_space<vmem>>, vector<1x216x168xbf16>
    %26 = vector.shape_cast %25 : vector<1x216x168xbf16> to vector<216x168xbf16>
    %cst_28 = arith.constant dense<0.000000e+00> : vector<128x168xf32>
    %27 = tpu.matmul %24, %26, %cst_28 {dimension_numbers = #tpu.dot_dimension_numbers<[1], [0], [0], [1], [0, 0, 1, 1], [], []>} : vector<128x216xbf16>, vector<216x168xbf16>, vector<128x168xf32> -> vector<128x168xf32>
    %28 = arith.addf %22, %27 : vector<128x168xf32>
    %c0_29 = arith.constant 0 : index
    %c0_30 = arith.constant 0 : index
    %29 = vector.load %arg3[%c0_29, %c0_30] : memref<1x168xf32, #tpu.memory_space<vmem>>, vector<1x168xf32>
    %30 = vector.broadcast %29 : vector<1x168xf32> to vector<128x168xf32>
    %31 = arith.addf %28, %30 : vector<128x168xf32>
    %cst_31 = arith.constant 0.000000e+00 : f32
    %32 = vector.broadcast %cst_31 : f32 to vector<128x168xf32>
    %33 = arith.maximumf %31, %32 : vector<128x168xf32>
    %34 = vector.shape_cast %33 : vector<128x168xf32> to vector<8x16x168xf32>
    %cst_32 = arith.constant 0.000000e+00 : f32
    %35 = vector.broadcast %cst_32 : f32 to vector<8x10xf32>
    %36 = vector.extract_strided_slice %34 {offsets = [0, 0, 0], sizes = [8, 1, 168], strides = [1, 1, 1]} : vector<8x16x168xf32> to vector<8x1x168xf32>
    %37 = vector.shape_cast %36 : vector<8x1x168xf32> to vector<8x168xf32>
    %38 = vector.extract_strided_slice %34 {offsets = [0, 1, 0], sizes = [8, 1, 168], strides = [1, 1, 1]} : vector<8x16x168xf32> to vector<8x1x168xf32>
    %39 = vector.shape_cast %38 : vector<8x1x168xf32> to vector<8x168xf32>
    %40 = arith.maximumf %37, %39 : vector<8x168xf32>
    %41 = vector.extract_strided_slice %40 {offsets = [0, 0], sizes = [8, 156], strides = [1, 1]} : vector<8x168xf32> to vector<8x156xf32>
    %42 = vector.extract_strided_slice %40 {offsets = [0, 12], sizes = [8, 156], strides = [1, 1]} : vector<8x168xf32> to vector<8x156xf32>
    %43 = arith.maximumf %41, %42 : vector<8x156xf32>
    %44 = arith.truncf %43 : vector<8x156xf32> to vector<8x156xbf16>
    %c0_33 = arith.constant 0 : index
    %c0_34 = arith.constant 0 : index
    %c0_35 = arith.constant 0 : index
    %45 = vector.load %arg4[%c0_33, %c0_34, %c0_35] : memref<7x156x10xbf16, #tpu.memory_space<vmem>>, vector<1x156x10xbf16>
    %46 = vector.shape_cast %45 : vector<1x156x10xbf16> to vector<156x10xbf16>
    %cst_36 = arith.constant dense<0.000000e+00> : vector<8x10xf32>
    %47 = tpu.matmul %44, %46, %cst_36 {dimension_numbers = #tpu.dot_dimension_numbers<[1], [0], [0], [1], [0, 0, 1, 1], [], []>} : vector<8x156xbf16>, vector<156x10xbf16>, vector<8x10xf32> -> vector<8x10xf32>
    %48 = arith.addf %35, %47 : vector<8x10xf32>
    %49 = vector.extract_strided_slice %34 {offsets = [0, 2, 0], sizes = [8, 1, 168], strides = [1, 1, 1]} : vector<8x16x168xf32> to vector<8x1x168xf32>
    %50 = vector.shape_cast %49 : vector<8x1x168xf32> to vector<8x168xf32>
    %51 = vector.extract_strided_slice %34 {offsets = [0, 3, 0], sizes = [8, 1, 168], strides = [1, 1, 1]} : vector<8x16x168xf32> to vector<8x1x168xf32>
    %52 = vector.shape_cast %51 : vector<8x1x168xf32> to vector<8x168xf32>
    %53 = arith.maximumf %50, %52 : vector<8x168xf32>
    %54 = vector.extract_strided_slice %53 {offsets = [0, 0], sizes = [8, 156], strides = [1, 1]} : vector<8x168xf32> to vector<8x156xf32>
    %55 = vector.extract_strided_slice %53 {offsets = [0, 12], sizes = [8, 156], strides = [1, 1]} : vector<8x168xf32> to vector<8x156xf32>
    %56 = arith.maximumf %54, %55 : vector<8x156xf32>
    %57 = arith.truncf %56 : vector<8x156xf32> to vector<8x156xbf16>
    %c1_37 = arith.constant 1 : index
    %c0_38 = arith.constant 0 : index
    %c0_39 = arith.constant 0 : index
    %58 = vector.load %arg4[%c1_37, %c0_38, %c0_39] : memref<7x156x10xbf16, #tpu.memory_space<vmem>>, vector<1x156x10xbf16>
    %59 = vector.shape_cast %58 : vector<1x156x10xbf16> to vector<156x10xbf16>
    %cst_40 = arith.constant dense<0.000000e+00> : vector<8x10xf32>
    %60 = tpu.matmul %57, %59, %cst_40 {dimension_numbers = #tpu.dot_dimension_numbers<[1], [0], [0], [1], [0, 0, 1, 1], [], []>} : vector<8x156xbf16>, vector<156x10xbf16>, vector<8x10xf32> -> vector<8x10xf32>
    %61 = arith.addf %48, %60 : vector<8x10xf32>
    %62 = vector.extract_strided_slice %34 {offsets = [0, 4, 0], sizes = [8, 1, 168], strides = [1, 1, 1]} : vector<8x16x168xf32> to vector<8x1x168xf32>
    %63 = vector.shape_cast %62 : vector<8x1x168xf32> to vector<8x168xf32>
    %64 = vector.extract_strided_slice %34 {offsets = [0, 5, 0], sizes = [8, 1, 168], strides = [1, 1, 1]} : vector<8x16x168xf32> to vector<8x1x168xf32>
    %65 = vector.shape_cast %64 : vector<8x1x168xf32> to vector<8x168xf32>
    %66 = arith.maximumf %63, %65 : vector<8x168xf32>
    %67 = vector.extract_strided_slice %66 {offsets = [0, 0], sizes = [8, 156], strides = [1, 1]} : vector<8x168xf32> to vector<8x156xf32>
    %68 = vector.extract_strided_slice %66 {offsets = [0, 12], sizes = [8, 156], strides = [1, 1]} : vector<8x168xf32> to vector<8x156xf32>
    %69 = arith.maximumf %67, %68 : vector<8x156xf32>
    %70 = arith.truncf %69 : vector<8x156xf32> to vector<8x156xbf16>
    %c2_41 = arith.constant 2 : index
    %c0_42 = arith.constant 0 : index
    %c0_43 = arith.constant 0 : index
    %71 = vector.load %arg4[%c2_41, %c0_42, %c0_43] : memref<7x156x10xbf16, #tpu.memory_space<vmem>>, vector<1x156x10xbf16>
    %72 = vector.shape_cast %71 : vector<1x156x10xbf16> to vector<156x10xbf16>
    %cst_44 = arith.constant dense<0.000000e+00> : vector<8x10xf32>
    %73 = tpu.matmul %70, %72, %cst_44 {dimension_numbers = #tpu.dot_dimension_numbers<[1], [0], [0], [1], [0, 0, 1, 1], [], []>} : vector<8x156xbf16>, vector<156x10xbf16>, vector<8x10xf32> -> vector<8x10xf32>
    %74 = arith.addf %61, %73 : vector<8x10xf32>
    %75 = vector.extract_strided_slice %34 {offsets = [0, 6, 0], sizes = [8, 1, 168], strides = [1, 1, 1]} : vector<8x16x168xf32> to vector<8x1x168xf32>
    %76 = vector.shape_cast %75 : vector<8x1x168xf32> to vector<8x168xf32>
    %77 = vector.extract_strided_slice %34 {offsets = [0, 7, 0], sizes = [8, 1, 168], strides = [1, 1, 1]} : vector<8x16x168xf32> to vector<8x1x168xf32>
    %78 = vector.shape_cast %77 : vector<8x1x168xf32> to vector<8x168xf32>
    %79 = arith.maximumf %76, %78 : vector<8x168xf32>
    %80 = vector.extract_strided_slice %79 {offsets = [0, 0], sizes = [8, 156], strides = [1, 1]} : vector<8x168xf32> to vector<8x156xf32>
    %81 = vector.extract_strided_slice %79 {offsets = [0, 12], sizes = [8, 156], strides = [1, 1]} : vector<8x168xf32> to vector<8x156xf32>
    %82 = arith.maximumf %80, %81 : vector<8x156xf32>
    %83 = arith.truncf %82 : vector<8x156xf32> to vector<8x156xbf16>
    %c3_45 = arith.constant 3 : index
    %c0_46 = arith.constant 0 : index
    %c0_47 = arith.constant 0 : index
    %84 = vector.load %arg4[%c3_45, %c0_46, %c0_47] : memref<7x156x10xbf16, #tpu.memory_space<vmem>>, vector<1x156x10xbf16>
    %85 = vector.shape_cast %84 : vector<1x156x10xbf16> to vector<156x10xbf16>
    %cst_48 = arith.constant dense<0.000000e+00> : vector<8x10xf32>
    %86 = tpu.matmul %83, %85, %cst_48 {dimension_numbers = #tpu.dot_dimension_numbers<[1], [0], [0], [1], [0, 0, 1, 1], [], []>} : vector<8x156xbf16>, vector<156x10xbf16>, vector<8x10xf32> -> vector<8x10xf32>
    %87 = arith.addf %74, %86 : vector<8x10xf32>
    %88 = vector.extract_strided_slice %34 {offsets = [0, 8, 0], sizes = [8, 1, 168], strides = [1, 1, 1]} : vector<8x16x168xf32> to vector<8x1x168xf32>
    %89 = vector.shape_cast %88 : vector<8x1x168xf32> to vector<8x168xf32>
    %90 = vector.extract_strided_slice %34 {offsets = [0, 9, 0], sizes = [8, 1, 168], strides = [1, 1, 1]} : vector<8x16x168xf32> to vector<8x1x168xf32>
    %91 = vector.shape_cast %90 : vector<8x1x168xf32> to vector<8x168xf32>
    %92 = arith.maximumf %89, %91 : vector<8x168xf32>
    %93 = vector.extract_strided_slice %92 {offsets = [0, 0], sizes = [8, 156], strides = [1, 1]} : vector<8x168xf32> to vector<8x156xf32>
    %94 = vector.extract_strided_slice %92 {offsets = [0, 12], sizes = [8, 156], strides = [1, 1]} : vector<8x168xf32> to vector<8x156xf32>
    %95 = arith.maximumf %93, %94 : vector<8x156xf32>
    %96 = arith.truncf %95 : vector<8x156xf32> to vector<8x156xbf16>
    %c4_49 = arith.constant 4 : index
    %c0_50 = arith.constant 0 : index
    %c0_51 = arith.constant 0 : index
    %97 = vector.load %arg4[%c4_49, %c0_50, %c0_51] : memref<7x156x10xbf16, #tpu.memory_space<vmem>>, vector<1x156x10xbf16>
    %98 = vector.shape_cast %97 : vector<1x156x10xbf16> to vector<156x10xbf16>
    %cst_52 = arith.constant dense<0.000000e+00> : vector<8x10xf32>
    %99 = tpu.matmul %96, %98, %cst_52 {dimension_numbers = #tpu.dot_dimension_numbers<[1], [0], [0], [1], [0, 0, 1, 1], [], []>} : vector<8x156xbf16>, vector<156x10xbf16>, vector<8x10xf32> -> vector<8x10xf32>
    %100 = arith.addf %87, %99 : vector<8x10xf32>
    %101 = vector.extract_strided_slice %34 {offsets = [0, 10, 0], sizes = [8, 1, 168], strides = [1, 1, 1]} : vector<8x16x168xf32> to vector<8x1x168xf32>
    %102 = vector.shape_cast %101 : vector<8x1x168xf32> to vector<8x168xf32>
    %103 = vector.extract_strided_slice %34 {offsets = [0, 11, 0], sizes = [8, 1, 168], strides = [1, 1, 1]} : vector<8x16x168xf32> to vector<8x1x168xf32>
    %104 = vector.shape_cast %103 : vector<8x1x168xf32> to vector<8x168xf32>
    %105 = arith.maximumf %102, %104 : vector<8x168xf32>
    %106 = vector.extract_strided_slice %105 {offsets = [0, 0], sizes = [8, 156], strides = [1, 1]} : vector<8x168xf32> to vector<8x156xf32>
    %107 = vector.extract_strided_slice %105 {offsets = [0, 12], sizes = [8, 156], strides = [1, 1]} : vector<8x168xf32> to vector<8x156xf32>
    %108 = arith.maximumf %106, %107 : vector<8x156xf32>
    %109 = arith.truncf %108 : vector<8x156xf32> to vector<8x156xbf16>
    %c5 = arith.constant 5 : index
    %c0_53 = arith.constant 0 : index
    %c0_54 = arith.constant 0 : index
    %110 = vector.load %arg4[%c5, %c0_53, %c0_54] : memref<7x156x10xbf16, #tpu.memory_space<vmem>>, vector<1x156x10xbf16>
    %111 = vector.shape_cast %110 : vector<1x156x10xbf16> to vector<156x10xbf16>
    %cst_55 = arith.constant dense<0.000000e+00> : vector<8x10xf32>
    %112 = tpu.matmul %109, %111, %cst_55 {dimension_numbers = #tpu.dot_dimension_numbers<[1], [0], [0], [1], [0, 0, 1, 1], [], []>} : vector<8x156xbf16>, vector<156x10xbf16>, vector<8x10xf32> -> vector<8x10xf32>
    %113 = arith.addf %100, %112 : vector<8x10xf32>
    %114 = vector.extract_strided_slice %34 {offsets = [0, 12, 0], sizes = [8, 1, 168], strides = [1, 1, 1]} : vector<8x16x168xf32> to vector<8x1x168xf32>
    %115 = vector.shape_cast %114 : vector<8x1x168xf32> to vector<8x168xf32>
    %116 = vector.extract_strided_slice %34 {offsets = [0, 13, 0], sizes = [8, 1, 168], strides = [1, 1, 1]} : vector<8x16x168xf32> to vector<8x1x168xf32>
    %117 = vector.shape_cast %116 : vector<8x1x168xf32> to vector<8x168xf32>
    %118 = arith.maximumf %115, %117 : vector<8x168xf32>
    %119 = vector.extract_strided_slice %118 {offsets = [0, 0], sizes = [8, 156], strides = [1, 1]} : vector<8x168xf32> to vector<8x156xf32>
    %120 = vector.extract_strided_slice %118 {offsets = [0, 12], sizes = [8, 156], strides = [1, 1]} : vector<8x168xf32> to vector<8x156xf32>
    %121 = arith.maximumf %119, %120 : vector<8x156xf32>
    %122 = arith.truncf %121 : vector<8x156xf32> to vector<8x156xbf16>
    %c6 = arith.constant 6 : index
    %c0_56 = arith.constant 0 : index
    %c0_57 = arith.constant 0 : index
    %123 = vector.load %arg4[%c6, %c0_56, %c0_57] : memref<7x156x10xbf16, #tpu.memory_space<vmem>>, vector<1x156x10xbf16>
    %124 = vector.shape_cast %123 : vector<1x156x10xbf16> to vector<156x10xbf16>
    %cst_58 = arith.constant dense<0.000000e+00> : vector<8x10xf32>
    %125 = tpu.matmul %122, %124, %cst_58 {dimension_numbers = #tpu.dot_dimension_numbers<[1], [0], [0], [1], [0, 0, 1, 1], [], []>} : vector<8x156xbf16>, vector<156x10xbf16>, vector<8x10xf32> -> vector<8x10xf32>
    %126 = arith.addf %113, %125 : vector<8x10xf32>
    %c0_59 = arith.constant 0 : index
    %c0_60 = arith.constant 0 : index
    %127 = vector.load %arg5[%c0_59, %c0_60] : memref<1x10xf32, #tpu.memory_space<vmem>>, vector<1x10xf32>
    %128 = vector.broadcast %127 : vector<1x10xf32> to vector<8x10xf32>
    %129 = arith.addf %126, %128 : vector<8x10xf32>
    %cst_61 = arith.constant 0.000000e+00 : f32
    %130 = vector.broadcast %cst_61 : f32 to vector<8x10xf32>
    %131 = arith.maximumf %129, %130 : vector<8x10xf32>
    %c0_62 = arith.constant 0 : index
    %c0_63 = arith.constant 0 : index
    %132 = vector.load %arg6[%c0_62, %c0_63] : memref<10x10xf32, #tpu.memory_space<vmem>>, vector<10x10xf32>
    %cst_64 = arith.constant dense<0.000000e+00> : vector<8x10xf32>
    %133 = tpu.matmul %131, %132, %cst_64 {dimension_numbers = #tpu.dot_dimension_numbers<[1], [0], [0], [1], [0, 0, 1, 1], [], []>} : vector<8x10xf32>, vector<10x10xf32>, vector<8x10xf32> -> vector<8x10xf32>
    %c0_65 = arith.constant 0 : index
    %c0_66 = arith.constant 0 : index
    %134 = vector.load %arg7[%c0_65, %c0_66] : memref<1x10xf32, #tpu.memory_space<vmem>>, vector<1x10xf32>
    %135 = vector.broadcast %134 : vector<1x10xf32> to vector<8x10xf32>
    %136 = arith.addf %133, %135 : vector<8x10xf32>
    %cst_67 = arith.constant dense<0xFF800000> : vector<8xf32>
    %137 = vector.multi_reduction <maximumf>, %136, %cst_67 [1] : vector<8x10xf32> to vector<8xf32>
    %138 = vector.shape_cast %137 : vector<8xf32> to vector<8x1xf32>
    %139 = vector.broadcast %138 : vector<8x1xf32> to vector<8x10xf32>
    %140 = arith.subf %136, %139 : vector<8x10xf32>
    %141 = math.exp %140 : vector<8x10xf32>
    %cst_68 = arith.constant dense<0.000000e+00> : vector<8xf32>
    %142 = vector.multi_reduction <add>, %141, %cst_68 [1] : vector<8x10xf32> to vector<8xf32>
    %143 = vector.shape_cast %142 : vector<8xf32> to vector<8x1xf32>
    %144 = math.log %143 : vector<8x1xf32>
    %145 = arith.addf %144, %138 : vector<8x1xf32>
    %146 = vector.broadcast %145 : vector<8x1xf32> to vector<8x10xf32>
    %147 = arith.subf %136, %146 : vector<8x10xf32>
    %c0_69 = arith.constant 0 : index
    %c0_70 = arith.constant 0 : index
    %148 = vector.load %arg8[%c0_69, %c0_70] : memref<8x10xf32, #tpu.memory_space<vmem>>, vector<8x10xf32>
    tpu.vector_store %arg8[%c0_69, %c0_70], %147 {strides = array<i32>} : memref<8x10xf32, #tpu.memory_space<vmem>>, vector<8x10xf32>,
    return
  }
  func.func @transform_0(%arg0: i32) -> (i32, i32, i32) {
    %c0_i32 = arith.constant 0 : i32
    %c0_i32_0 = arith.constant 0 : i32
    %c0_i32_1 = arith.constant 0 : i32
    return %arg0, %c0_i32, %c0_i32_0 : i32, i32, i32
  }
  func.func @transform_1(%arg0: i32) -> (i32, i32, i32) {
    %c0_i32 = arith.constant 0 : i32
    %c0_i32_0 = arith.constant 0 : i32
    %c0_i32_1 = arith.constant 0 : i32
    %c0_i32_2 = arith.constant 0 : i32
    return %c0_i32, %c0_i32_0, %c0_i32_1 : i32, i32, i32
  }
  func.func @transform_2(%arg0: i32) -> (i32, i32) {
    %c0_i32 = arith.constant 0 : i32
    %c0_i32_0 = arith.constant 0 : i32
    %c0_i32_1 = arith.constant 0 : i32
    return %c0_i32, %c0_i32_0 : i32, i32
  }
  func.func @transform_3(%arg0: i32) -> (i32, i32, i32) {
    %c0_i32 = arith.constant 0 : i32
    %c0_i32_0 = arith.constant 0 : i32
    %c0_i32_1 = arith.constant 0 : i32
    %c0_i32_2 = arith.constant 0 : i32
    return %c0_i32, %c0_i32_0, %c0_i32_1 : i32, i32, i32
  }
  func.func @transform_4(%arg0: i32) -> (i32, i32) {
    %c0_i32 = arith.constant 0 : i32
    %c0_i32_0 = arith.constant 0 : i32
    %c0_i32_1 = arith.constant 0 : i32
    return %c0_i32, %c0_i32_0 : i32, i32
  }
  func.func @transform_5(%arg0: i32) -> (i32, i32) {
    %c0_i32 = arith.constant 0 : i32
    %c0_i32_0 = arith.constant 0 : i32
    %c0_i32_1 = arith.constant 0 : i32
    return %c0_i32, %c0_i32_0 : i32, i32
  }
  func.func @transform_6(%arg0: i32) -> (i32, i32) {
    %c0_i32 = arith.constant 0 : i32
    %c0_i32_0 = arith.constant 0 : i32
    %c0_i32_1 = arith.constant 0 : i32
    return %c0_i32, %c0_i32_0 : i32, i32
  }
  func.func @transform_7(%arg0: i32) -> (i32, i32) {
    %c0_i32 = arith.constant 0 : i32
    %c0_i32_0 = arith.constant 0 : i32
    return %arg0, %c0_i32 : i32, i32
  }
}

</mosaic_0001>

<bundles_post_ra>
// kernel: tile.13
= control target key start
LH: loop header
LB: loop body
LE: loop exit
PB: predicated region body
PF: predicated region fallthrough
CT: control target
= control target key end

     0   :  { %s40_s0 = inlined_call_operand.vmem [shape: f32[12], index: 0, kind: input, shape index: {}]   ;;  %s41_s1 = inlined_call_operand.vmem [shape: f32[28,12], index: 1, kind: output, shape index: {}]  }
   0x1   :  { %v4_v0 = vld [vmem:[%s40_s0] ss:$0 sm:$0xff] }
   0x2   :  { %5 = vst [vmem:[%s41_s1] sm:$0xff] %v4_v0  ;;  %12 = vst [vmem:[%s41_s1 + $0x8] sm:$0xff] %v4_v0 }
   0x3   :  { %13 = vst [vmem:[%s41_s1 + $0x10] sm:$0xff] %v4_v0  ;;  %14 = vst [vmem:[%s41_s1 + $0x18] sm:$0xff] %v4_v0 }

// kernel: tile.14
= control target key start
LH: loop header
LB: loop body
LE: loop exit
PB: predicated region body
PF: predicated region fallthrough
CT: control target
= control target key end

     0   :  { %vm9_vm0 = vcmask 31744   ;;  %vm13_vm1 = vcmask 64512   ;;  %s274_s14 = smov 124   ;;  %s275_s15 = smov 112   ;;  %vm3_vm2 = vcmask 97280   ;;  %vm16_vm3 = vcmask 1048544   ;;  %s414_s0 = inlined_call_operand.vmem [shape: f32[28,12], index: 0, kind: input, shape index: {}]   ;;  %s415_s1 = inlined_call_operand.vmem [shape: f32[1,336], index: 1, kind: output, shape index: {}]  }
   0x1   :  { %v216_v0 = vld [vmem:[%s414_s0 + $0x15] sm:$0x1]   ;;  %v220_v3 = vld [vmem:[%s414_s0 + $0x14] sm:$0x1]   ;;  %v218_v4 = vld [vmem:[%s414_s0 + $0xa] sm:$0x1]  }
   0x2   :  { %v217_v1 = vld [vmem:[%s414_s0 + $0x15] sm:$0x1]   ;;  %34 = vrot.lane.b32.xlu1 %v220_v3, %s275_s15  ;;  %v219_v5 = vld [vmem:[%s414_s0 + $0xa] sm:$0x1]   ;;  %v221_v7 = vld [vmem:[%s414_s0 + $0x9] sm:$0x1]  }
   0x3   :  { %v10_v2 = vsel %vm9_vm0, %v217_v1, %v216_v0  ;;  %v24_v6 = vsel %vm13_vm1, %v219_v5, %v218_v4  ;;  %s276_s20 = smov 120   ;;  %s277_s21 = smov 108   ;;  %v222_v8 = vld [vmem:[%s414_s0 + $0x13] sm:$0x1]   ;;  %v223_v9 = vld [vmem:[%s414_s0 + $0x8] sm:$0x1]  }
   0x4   :  { %11 = vrot.lane.b32.xlu0 %v10_v2, %s274_s14  ;;  %s278_s26 = smov 100   ;;  %s279_s27 = smov 96   ;;  %v224_v10 = vld [vmem:[%s414_s0 + $0x12] sm:$0x1]   ;;  %v225_v11 = vld [vmem:[%s414_s0 + $0x7] sm:$0x1]  }
   0x5   :  { %s280_s3 = smov 88   ;;  %s281_s4 = smov 84   ;;  %v226_v12 = vld [vmem:[%s414_s0 + $0x11] sm:$0x1]   ;;  %v227_v13 = vld [vmem:[%s414_s0 + $0x6] sm:$0x1]  }
   0x6   :  { %41 = vrot.lane.b32.xlu1 %v221_v7, %s277_s21  ;;  %v2_v14 = vld [vmem:[%s414_s0] sm:$0x1]   ;;  %s282_s11 = smov 76   ;;  %s283_s12 = smov 72   ;;  %v228_v15 = vld [vmem:[%s414_s0 + $0x1b] sm:$0x1]  }
   0x7   :  { %4 = vst.msk [vmem:[#allocation0] sm:$0x1] %vm3_vm2, %v2_v14   ;;  %v229_v16 = vld [vmem:[%s414_s0 + $0x10] sm:$0x1]   ;;  %s284_s17 = smov 68   ;;  %s285_s18 = smov 64  }
   0x8   :  { %25 = vrot.lane.b32.xlu0 %v24_v6, %s276_s20  ;;  %v230_v17 = vld [vmem:[%s414_s0 + $0x5] sm:$0x1]   ;;  %v231_v18 = vld [vmem:[%s414_s0 + $0x1a] sm:$0x1]   ;;  %s286_s23 = smov 60   ;;  %s287_s24 = smov 56  }
   0x9   :  { %v232_v19 = vld [vmem:[%s414_s0 + $0xf] sm:$0x1]   ;;  %v233_v20 = vld [vmem:[%s414_s0 + $0x4] sm:$0x1]   ;;  %s288_s29 = smov 52   ;;  %s289_s30 = smov 48  }
   0xa   :  { %54 = vrot.lane.b32.xlu1 %v223_v9, %s279_s27  ;;  %v234_v21 = vld [vmem:[%s414_s0 + $0x19] sm:$0x1]   ;;  %v235_v22 = vld [vmem:[%s414_s0 + $0xe] sm:$0x1]   ;;  %s290_s6 = smov 44   ;;  %s291_s7 = smov 40  }
   0xb   :  { %v236_v23 = vld [vmem:[%s414_s0 + $0x3] sm:$0x1]   ;;  %v237_v24 = vld [vmem:[%s414_s0 + $0x18] sm:$0x1]   ;;  %s293_s13 = smov 32   ;;  %s295_s19 = smov 24  }
   0xc   :  { %47 = vrot.lane.b32.xlu0 %v222_v8, %s278_s26  ;;  %v238_v25 = vld [vmem:[%s414_s0 + $0xd] sm:$0x1]   ;;  %v239_v26 = vld [vmem:[%s414_s0 + $0x2] sm:$0x1]   ;;  %v240_v27 = vld [vmem:[%s414_s0 + $0x17] sm:$0x1]  }
   0xd   :  { %v241_v28 = vld [vmem:[%s414_s0 + $0xc] sm:$0x1]   ;;  %s297_s25 = smov 16   ;;  %v242_v29 = vld [vmem:[%s414_s0 + $0x1] sm:$0x1]   ;;  %s299_s2 = smov 8  }
   0xe   :  { %67 = vrot.lane.b32.xlu1 %v225_v11, %s281_s4  ;;  %v243_v30 = vld [vmem:[%s414_s0 + $0x16] sm:$0x1]   ;;  %v244_v31 = vld [vmem:[%s414_s0 + $0xb] sm:$0x1]   ;;  %s300_s0 = smov 4   ;;  %vm30_vm4 = vcmask 1048512  }
   0xf   :  { %vm36_vm5 = vcmask 1015680   ;;  %vm43_vm6 = vcmask 982880   ;;  %vm49_vm7 = vcmask 917280   ;;  %vm56_vm8 = vcmask 884480  }
  0x10   :  { %60 = vrot.lane.b32.xlu0 %v224_v10, %s280_s3  ;;  %vm62_vm9 = vcmask 818880   ;;  %vm69_vm10 = vcmask 786080   ;;  %vm75_vm11 = vcmask 720480   ;;  %vm82_vm12 = vcmask 687680  }
  0x11   :  { %vm88_vm13 = vcmask 654880   ;;  %vm95_vm14 = vcmask 622080   ;;  %vm102_vm15 = vcmask 589280   ;;  %vm122_vm2 = vcmask 490880  }
  0x12   :  { %80 = vrot.lane.b32.xlu1 %v227_v13, %s283_s12  ;;  %s292_s12 = smov 36  }
  0x14   :  { %73 = vrot.lane.b32.xlu0 %v226_v12, %s282_s11 }
  0x16   :  { %93 = vrot.lane.b32.xlu1 %v229_v16, %s285_s18  ;;  %s294_s18 = smov 28  }
  0x18   :  { %86 = vrot.lane.b32.xlu0 %v228_v15, %s284_s17 }
  0x1a   :  { %106 = vrot.lane.b32.xlu1 %v231_v18, %s287_s24  ;;  %s296_s24 = smov 20  }
  0x1c   :  { %100 = vrot.lane.b32.xlu0 %v230_v17, %s286_s23 }
  0x1e   :  { %120 = vrot.lane.b32.xlu1 %v233_v20, %s289_s30  ;;  %s298_s30 = smov 12  }
  0x20   :  { %113 = vrot.lane.b32.xlu0 %v232_v19, %s288_s29 }
  0x22   :  { %133 = vrot.lane.b32.xlu1 %v235_v22, %s291_s7 }
  0x24   :  { %126 = vrot.lane.b32.xlu0 %v234_v21, %s290_s6 }
  0x26   :  { %146 = vrot.lane.b32.xlu1 %v237_v24, %s293_s13 }
  0x28   :  { %140 = vrot.lane.b32.xlu0 %v236_v23, %s292_s12 }
  0x2a   :  { %160 = vrot.lane.b32.xlu1 %v239_v26, %s295_s19 }
  0x2c   :  { %153 = vrot.lane.b32.xlu0 %v238_v25, %s294_s18 }
  0x2e   :  { %173 = vrot.lane.b32.xlu1 %v241_v28, %s297_s25 }
  0x30   :  { %166 = vrot.lane.b32.xlu0 %v240_v27, %s296_s24 }
  0x32   :  { %186 = vrot.lane.b32.xlu1 %v243_v30, %s299_s2 }
  0x34   :  { %180 = vrot.lane.b32.xlu0 %v242_v29, %s298_s30 }
  0x38   :  { %193 = vrot.lane.b32.xlu0 %v244_v31, %s300_s0 }
  0x74   :  { %v35_v33 = vpop.permute.xlu1 %34  }
  0x76   :  { %v12_v32 = vpop.permute.xlu0 %11  }
  0x77   :  { %15 = vst.msk [vmem:[#allocation0 + $0x10] sm:$0x1] %vm13_vm1, %v12_v32   ;;  %vm115_vm1 = vcmask 523680  }
  0x78   :  { %18 = vst.msk [vmem:[#allocation0 + $0x8] sm:$0x1] %vm16_vm3, %v12_v32   ;;  %v42_v35 = vpop.permute.xlu1 %41   ;;  %vm128_vm3 = vcmask 458080  }
  0x7a   :  { %v26_v34 = vpop.permute.xlu0 %25  }
  0x7b   :  { %29 = vst.msk [vmem:[#allocation0 + $0x8] sm:$0x1] %vm9_vm0, %v26_v34   ;;  %vm108_vm0 = vcmask 556480  }
  0x7c   :  { %31 = vst.msk [vmem:[#allocation0] sm:$0x1] %vm30_vm4, %v26_v34   ;;  %v55_v37 = vpop.permute.xlu1 %54   ;;  %vm135_vm4 = vcmask 425280  }
  0x7d   :  { %38 = vst.msk [vmem:[#allocation0 + $0x8] sm:$0x1] %vm36_vm5, %v35_v33   ;;  %vm142_vm5 = vcmask 392480  }
  0x7e   :  { %44 = vst.msk [vmem:[#allocation0] sm:$0x1] %vm43_vm6, %v42_v35   ;;  %v48_v36 = vpop.permute.xlu0 %47   ;;  %vm148_vm6 = vcmask 359680  }
  0x7f   :  { %51 = vst.msk [vmem:[#allocation0 + $0x8] sm:$0x1] %vm49_vm7, %v48_v36   ;;  %vm155_vm7 = vcmask 326880  }
  0x80   :  { %57 = vst.msk [vmem:[#allocation0] sm:$0x1] %vm56_vm8, %v55_v37   ;;  %v68_v39 = vpop.permute.xlu1 %67   ;;  %vm162_vm8 = vcmask 294080  }
  0x81   :  { %70 = vst.msk [vmem:[#allocation0] sm:$0x1] %vm69_vm10, %v68_v39   ;;  %vm175_vm10 = vcmask 228480  }
  0x82   :  { %v61_v38 = vpop.permute.xlu0 %60  }
  0x83   :  { %64 = vst.msk [vmem:[#allocation0 + $0x8] sm:$0x1] %vm62_vm9, %v61_v38   ;;  %vm168_vm9 = vcmask 261280  }
  0x84   :  { %v81_v41 = vpop.permute.xlu1 %80  }
  0x85   :  { %83 = vst.msk [vmem:[#allocation0] sm:$0x1] %vm82_vm12, %v81_v41   ;;  %vm188_vm12 = vcmask 162880  }
  0x86   :  { %v74_v40 = vpop.permute.xlu0 %73  }
  0x87   :  { %77 = vst.msk [vmem:[#allocation0 + $0x8] sm:$0x1] %vm75_vm11, %v74_v40   ;;  %vm182_vm11 = vcmask 195680  }
  0x88   :  { %v94_v43 = vpop.permute.xlu1 %93  }
  0x89   :  { %97 = vst.msk [vmem:[#allocation0 + $0x8] sm:$0x1] %vm95_vm14, %v94_v43  }
  0x8a   :  { %v87_v42 = vpop.permute.xlu0 %86  }
  0x8b   :  { %90 = vst.msk [vmem:[#allocation0 + $0x10] sm:$0x1] %vm88_vm13, %v87_v42   ;;  %vm195_vm13 = vcmask 130080  }
  0x8c   :  { %v107_v45 = vpop.permute.xlu1 %106  }
  0x8d   :  { %110 = vst.msk [vmem:[#allocation0 + $0x10] sm:$0x1] %vm108_vm0, %v107_v45  }
  0x8e   :  { %v101_v44 = vpop.permute.xlu0 %100  }
  0x8f   :  { %103 = vst.msk [vmem:[#allocation0] sm:$0x1] %vm102_vm15, %v101_v44  }
  0x90   :  { %v121_v47 = vpop.permute.xlu1 %120  }
  0x91   :  { %123 = vst.msk [vmem:[#allocation0] sm:$0x1] %vm122_vm2, %v121_v47  }
  0x92   :  { %v114_v46 = vpop.permute.xlu0 %113  }
  0x93   :  { %117 = vst.msk [vmem:[#allocation0 + $0x8] sm:$0x1] %vm115_vm1, %v114_v46  }
  0x94   :  { %v134_v49 = vpop.permute.xlu1 %133  }
  0x95   :  { %137 = vst.msk [vmem:[#allocation0 + $0x8] sm:$0x1] %vm135_vm4, %v134_v49  }
  0x96   :  { %v127_v48 = vpop.permute.xlu0 %126  }
  0x97   :  { %130 = vst.msk [vmem:[#allocation0 + $0x10] sm:$0x1] %vm128_vm3, %v127_v48  }
  0x98   :  { %v147_v51 = vpop.permute.xlu1 %146  }
  0x99   :  { %150 = vst.msk [vmem:[#allocation0 + $0x10] sm:$0x1] %vm148_vm6, %v147_v51  }
  0x9a   :  { %v141_v50 = vpop.permute.xlu0 %140  }
  0x9b   :  { %143 = vst.msk [vmem:[#allocation0] sm:$0x1] %vm142_vm5, %v141_v50  }
  0x9c   :  { %v161_v53 = vpop.permute.xlu1 %160  }
  0x9d   :  { %163 = vst.msk [vmem:[#allocation0] sm:$0x1] %vm162_vm8, %v161_v53  }
  0x9e   :  { %v154_v52 = vpop.permute.xlu0 %153  }
  0x9f   :  { %157 = vst.msk [vmem:[#allocation0 + $0x8] sm:$0x1] %vm155_vm7, %v154_v52  }
  0xa0   :  { %v174_v55 = vpop.permute.xlu1 %173  }
  0xa1   :  { %177 = vst.msk [vmem:[#allocation0 + $0x8] sm:$0x1] %vm175_vm10, %v174_v55  }
  0xa2   :  { %v167_v54 = vpop.permute.xlu0 %166  }
  0xa3   :  { %170 = vst.msk [vmem:[#allocation0 + $0x10] sm:$0x1] %vm168_vm9, %v167_v54  }
  0xa4   :  { %v187_v57 = vpop.permute.xlu1 %186  }
  0xa5   :  { %190 = vst.msk [vmem:[#allocation0 + $0x10] sm:$0x1] %vm188_vm12, %v187_v57  }
  0xa6   :  { %v181_v56 = vpop.permute.xlu0 %180  }
  0xa7   :  { %183 = vst.msk [vmem:[#allocation0] sm:$0x1] %vm182_vm11, %v181_v56  }
  0xaa   :  { %v194_v58 = vpop.permute.xlu0 %193  }
  0xab   :  { %197 = vst.msk [vmem:[#allocation0 + $0x8] sm:$0x1] %vm195_vm13, %v194_v58  }
  0xac   :  { %v210_v60 = vld [vmem:[#allocation0 + $0x10] sm:$0x1] }
  0xad   :  { %246 = vst [vmem:[%s415_s1 + $0x2] sm:$0x1] %v210_v60 }
  0xae   :  { %v201_v59 = vld [vmem:[#allocation0] sm:$0x1] }
  0xaf   :  { %203 = vst [vmem:[%s415_s1] sm:$0x1] %v201_v59 }
  0xb2   :  { %v205_v61 = vld [vmem:[#allocation0 + $0x8] sm:$0x1] }
  0xb3   :  { %245 = vst [vmem:[%s415_s1 + $0x1] sm:$0x1] %v205_v61 }

// kernel: cnn_forward.2
= control target key start
LH: loop header
LB: loop body
LE: loop exit
PB: predicated region body
PF: predicated region fallthrough
CT: control target
= control target key end

     0   :  { %v13636_v1 = vmov 0   ;;  %vm13761_vm0 = vsmask.f32 3328  ;;  %vm64_vm1 = vsmask.f32 7440  ;;  %vm507_vm2 = vcmask 261120   ;;  %s13605_s1 = inlined_call_operand.vmem [shape: bf16[5,32,336], index: 1, kind: input, shape index: {}]   ;;  %s13606_s0 = inlined_call_operand.vmem [shape: bf16[8,36,32], index: 0, kind: input, shape index: {}]   ;;  %s13607_s2 = inlined_call_operand.vmem [shape: f32[1,336], index: 2, kind: input, shape index: {}]   ;;  %s13608_s3 = inlined_call_operand.vmem [shape: bf16[8,14,324], index: 3, kind: output, shape index: {}]  }
   0x1   :  { %v8076_v0 = vld [vmem:[%s13605_s1 + $0x34] ss:$12 sps:$4 sm:$0xff]   ;;  %1102 = vmatprep.mubr.bf16.mxu0 %v13636_v1  ;;  %588 = vmatprep.mubr.bf16.mxu1 %v13636_v1  ;;  %v8189_v2 = vld [vmem:[%s13605_s1 + $0x4] ss:$12 sps:$4 sm:$0xff]   ;;  %v8082_v5 = vld [vmem:[%s13605_s1 + $0x4c] ss:$12 sps:$4 sm:$0xff]  }
   0x2   :  { %556 = vmatprep.subr.bf16.mxu1 %v8076_v0  ;;  %v8080_v3 = vld [vmem:[%s13605_s1 + $0x30] ss:$12 sps:$4 sm:$0xff]   ;;  %v8081_v4 = vld [vmem:[%s13605_s1] ss:$12 sps:$4 sm:$0xff]   ;;  %1070 = vmatprep.subr.bf16.mxu0 %v8189_v2  ;;  %v8086_v7 = vld [vmem:[%s13605_s1 + $0x48] ss:$12 sps:$4 sm:$0xff]  }
   0x3   :  { %557 = vmatpush1.bf16.msra.mxu1 %v8080_v3  ;;  %1071 = vmatpush1.bf16.msra.mxu0 %v8081_v4  ;;  %v8084_v6 = vld [vmem:[%s13605_s1 + $0x1c] ss:$12 sps:$4 sm:$0xff]   ;;  %v8087_v8 = vld [vmem:[%s13605_s1 + $0x18] ss:$12 sps:$4 sm:$0xff]   ;;  %v15_v10 = vld [vmem:[%s13606_s0] sm:$0xf] }
   0x4   :  { %558 = vmatprep.subr.bf16.mxu1 %v8082_v5  ;;  %1072 = vmatprep.subr.bf16.mxu0 %v8084_v6  ;;  %v8213_v9 = vld [vmem:[%s13605_s1 + $0x38] ss:$12 sps:$4 sm:$0xff]   ;;  %v67_v12 = vshrl.u32 %v15_v10, 16  ;;  %v70_v13 = vshll.u32 %v15_v10, 16  ;;  %v8229_v15 = vld [vmem:[%s13606_s0 + $0x8] sm:$0xf]  ;;  %vm8255_vm3 = vmor %vm13761_vm0, %vm64_vm1 }
   0x5   :  { %v8221_v11 = vld [vmem:[%s13606_s0 + $0x4] sm:$0xf]  ;;  %v86_v18 = vshll.u32 %v8229_v15, 16  ;;  %v8237_v19 = vld [vmem:[%s13606_s0 + $0xc] sm:$0xf]  ;;  %v90_v34 = vshrl.u32 %v8229_v15, 16 }
   0x6   :  { %v8224_v14 = vcombine.low %v15_v10, %v8221_v11  ;;  %v76_v16 = vshll.u32 %v8221_v11, 16  ;;  %v80_v17 = vshrl.u32 %v8221_v11, 16  ;;  %13841 = vst [vmem:[#allocation3_spill] sm:$0xff] %v8237_v19  ;;  %v69_v20 = vrot.slane %v67_v12, 4  ;;  %v8243_v22 = vld [vmem:[%s13606_s0 + $0x10] sm:$0x1] }
   0x7   :  { %559 = vmatpush1.bf16.msra.mxu1 %v8086_v7  ;;  %1073 = vmatpush1.bf16.msra.mxu0 %v8087_v8  ;;  %v72_v21 = vrot.slane %v70_v13, 5  ;;  %v88_v25 = vrot.slane %v86_v18, 5  ;;  %v8091_v26 = vld [vmem:[%s13605_s1 + $0x60] ss:$12 sps:$4 sm:$0xff]   ;;  %v2168_v30 = vrot.slane %v86_v18, 6  ;;  %v13633_v35 = vshll.u32 %v8237_v19, 16 }
   0x8   :  { %13840 = vst [vmem:[#allocation2_spill] sm:$0xff] %v8224_v14  ;;  %7266 = vmatprep.subr.bf16.mxu1 %v8213_v9  ;;  %v78_v23 = vrot.slane %v76_v16, 5  ;;  %v82_v24 = vrot.slane %v80_v17, 4  ;;  %v2162_v28 = vrot.slane %v80_v17, 5  ;;  %v2163_v29 = vrot.slane %v76_v16, 6 }
   0x9   :  { %v73_v27 = vor.u32 %v72_v21, %v69_v20  ;;  %v8093_v31 = vld [vmem:[%s13605_s1 + $0x64] ss:$12 sps:$4 sm:$0xff]   ;;  %v13634_v36 = vshrl.u32 %v8237_v19, 16  ;;  %v19_v37 = vld [vmem:[%s13606_s0 + $0x14] sm:$0xf]  ;;  %v106_v40 = vshll.u32 %v8243_v22, 16  ;;  %v8277_v47 = vcombine.low %v8229_v15, %v8237_v19 }
   0xa   :  { %6718 = vmatmul.mubr.msk.bf16.vlgmr.msra.gmra.mrb[0].mxu0 %vm507_vm2, %v8224_v14  ;;  %v83_v33 = vor.u32 %v82_v24, %v78_v23  ;;  %v8266_v39 = vor.u32 %v2163_v29, %v2162_v28  ;;  %1692 = vmatprep.subr.bf16.mxu0 %v8093_v31  ;;  %v111_v41 = vshrl.u32 %v19_v37, 16  ;;  %v92_v43 = vrot.slane %v90_v34, 4  ;;  %v8282_v49 = vld [vmem:[%s13606_s0 + $0x18] sm:$0xf]  ;;  %v8289_v54 = vld [vmem:[%s13606_s0 + $0x1c] sm:$0xf] }
   0xb   :  { %1112 = vmatprep.mubr.bf16.mxu0 %v13636_v1  ;;  %v74_v38 = vrot.slane %v73_v27, 4  ;;  %v98_v44 = vrot.slane %v13633_v35, 5  ;;  %v102_v45 = vrot.slane %v13634_v36, 4  ;;  %1693 = vmatpush1.bf16.msra.mxu0 %v8091_v26  ;;  %13844 = vst [vmem:[#allocation4_spill] sm:$0xff] %v8277_v47  ;;  %v2167_v48 = vrot.slane %v90_v34, 5  ;;  %13845 = vst [vmem:[#allocation5_spill] sm:$0xff] %v8282_v49 }
   0xc   :  { %v84_v42 = vrot.slane %v83_v33, 4  ;;  %v93_v51 = vor.u32 %v92_v43, %v88_v25  ;;  %v108_v53 = vrot.slane %v106_v40, 5  ;;  %13846 = vst [vmem:[#allocation6_spill] sm:$0xff] %v8289_v54  ;;  %v113_v57 = vrot.slane %v111_v41, 4  ;;  %v8305_v3 = vld [vmem:[%s13606_s0 + $0x20] sm:$0xf] }
   0xd   :  { %v79_v46 = vsel %vm8255_vm3, %v74_v38, %v78_v23  ;;  %v103_v52 = vor.u32 %v102_v45, %v98_v44  ;;  %v8293_v56 = vor.u32 %v2168_v30, %v2167_v48  ;;  %v114_v58 = vshll.u32 %v19_v37, 16  ;;  %v23_v17 = vld [vmem:[%s13606_s0 + $0x28] sm:$0xf]  ;;  %v8339_v24 = vld [vmem:[%s13606_s0 + $0x2c] sm:$0xf] }
   0xe   :  { %v89_v50 = vsel %vm8255_vm3, %v84_v42, %v88_v25  ;;  %v94_v59 = vrot.slane %v93_v51, 4  ;;  %v13631_v61 = vshll.u32 %v8282_v49, 16  ;;  %v13632_v62 = vshrl.u32 %v8282_v49, 16  ;;  %v8102_v29 = vld [vmem:[%s13605_s1 + $0x7c] ss:$12 sps:$4 sm:$0xff]  }
   0xf   :  { %v8291_v55 = vcombine.low %v79_v46, %v89_v50  ;;  %v104_v60 = vrot.slane %v103_v52, 4  ;;  %v116_v63 = vrot.slane %v114_v58, 5  ;;  %v13629_v0 = vshll.u32 %v8289_v54, 16  ;;  %v8100_v30 = vld [vmem:[%s13605_s1 + $0x78] ss:$12 sps:$4 sm:$0xff]   ;;  %1694 = vmatprep.subr.bf16.mxu0 %v8102_v29 }
  0x10   :  { %v13630_v4 = vshrl.u32 %v8289_v54, 16  ;;  %v99_v5 = vsel %vm8255_vm3, %v94_v59, %v98_v44  ;;  %v122_v7 = vrot.slane %v13631_v61, 5  ;;  %v126_v8 = vrot.slane %v13632_v62, 4  ;;  %v8103_v33 = vld [vmem:[%s13605_s1 + $0x50] ss:$12 sps:$4 sm:$0xff]   ;;  %1695 = vmatpush1.bf16.msra.mxu0 %v8100_v30 }
  0x11   :  { %6664 = vmatmul.mubr.msk.bf16.vlgmr.msra.gmra.mrb[0].mxu1 %vm507_vm2, %v8291_v55  ;;  %v109_v6 = vsel %vm8255_vm3, %v104_v60, %v108_v53  ;;  %v117_v10 = vor.u32 %v116_v63, %v113_v57  ;;  %v13624_v13 = vshll.u32 %v8305_v3, 16  ;;  %v13625_v16 = vshrl.u32 %v8305_v3, 16  ;;  %v8379_v57 = vld [vmem:[%s13606_s0 + $0x30] sm:$0xf]  ;;  %v8388_v60 = vld [vmem:[%s13606_s0 + $0x34] sm:$0xf] }
  0x12   :  { %6719 = vmatmul.mubr.msk.bf16.gmra.mrb[4].mxu0 %vm507_vm2, %v8277_v47  ;;  %7267 = vmatpush3.bf16.msra.mxu1 %v8213_v9  ;;  %v8322_v9 = vld [vmem:[%s13606_s0 + $0x24] sm:$0x1]  ;;  %v127_v12 = vor.u32 %v126_v8, %v122_v7  ;;  %v8329_v18 = vcombine.low %v99_v5, %v109_v6  ;;  %v8332_v20 = vcombine.low %v19_v37, %v8282_v49  ;;  %v136_v23 = vrot.slane %v13630_v4, 4  ;;  %v8110_v29 = vld [vmem:[%s13605_s1 + $0x94] ss:$12 sps:$4 sm:$0xff]  }
  0x13   :  { %598 = vmatprep.mubr.bf16.mxu1 %v13636_v1  ;;  %1122 = vmatprep.mubr.bf16.mxu0 %v13636_v1  ;;  %v118_v21 = vrot.slane %v117_v10, 4  ;;  %v132_v26 = vrot.slane %v13629_v0, 5  ;;  %v142_v27 = vrot.slane %v13624_v13, 5  ;;  %v146_v28 = vrot.slane %v13625_v16, 4  ;;  %v8588_v13 = vld [vmem:[%s13606_s0 + $0x70] sm:$0xf] }
  0x14   :  { %13847 = vst [vmem:[#allocation7_spill] sm:$0xff] %v8332_v20  ;;  %v128_v25 = vrot.slane %v127_v12, 4  ;;  %v150_v31 = vshll.u32 %v8322_v9, 16  ;;  %v155_v38 = vshrl.u32 %v23_v17, 16  ;;  %v158_v40 = vshll.u32 %v23_v17, 16  ;;  %7268 = vmatprep.subr.bf16.mxu1 %v8103_v33  ;;  %2554 = vmatprep.subr.bf16.mxu0 %v8110_v29  ;;  %13856 = vst [vmem:[#allocation16_spill] sm:$0xff] %v8588_v13 }
  0x15   :  { %v123_v34 = vsel %vm8255_vm3, %v118_v21, %v122_v7  ;;  %v137_v37 = vor.u32 %v136_v23, %v132_v26  ;;  %v147_v42 = vor.u32 %v146_v28, %v142_v27  ;;  %v13621_v43 = vshll.u32 %v8339_v24, 16  ;;  %v8407_v21 = vld [vmem:[%s13606_s0 + $0x38] sm:$0x1]  ;;  %v27_v28 = vld [vmem:[%s13606_s0 + $0x3c] sm:$0xf] }
  0x16   :  { %v133_v41 = vsel %vm8255_vm3, %v128_v25, %v132_v26  ;;  %v13622_v44 = vshrl.u32 %v8339_v24, 16  ;;  %v8371_v45 = vcombine.low %v8289_v54, %v8305_v3  ;;  %7269 = vmatpush3.bf16.msra.mxu1 %v8103_v33  ;;  %v157_v50 = vrot.slane %v155_v38, 4 }
  0x17   :  { %v8373_v46 = vcombine.low %v123_v34, %v133_v41  ;;  %v138_v48 = vrot.slane %v137_v37, 4  ;;  %v160_v51 = vrot.slane %v158_v40, 5  ;;  %7446 = vmatprep.subr.bf16.mxu1 %v8189_v2  ;;  %v148_v52 = vrot.slane %v147_v42, 4  ;;  %v8431_v34 = vld [vmem:[%s13606_s0 + $0x40] sm:$0xf] }
  0x18   :  { %13848 = vst [vmem:[#allocation8_spill] sm:$0xff] %v8371_v45  ;;  %v152_v53 = vrot.slane %v150_v31, 5  ;;  %v166_v58 = vrot.slane %v13621_v43, 5  ;;  %v170_v59 = vrot.slane %v13622_v44, 4  ;;  %v13617_v5 = vshll.u32 %v8379_v57, 16 }
  0x19   :  { %6665 = vmatmul.mubr.msk.bf16.gmra.mrb[4].mxu1 %vm507_vm2, %v8329_v18  ;;  %v143_v2 = vsel %vm8255_vm3, %v138_v48, %v142_v27  ;;  %v161_v63 = vor.u32 %v160_v51, %v157_v50  ;;  %v13618_v6 = vshrl.u32 %v8379_v57, 16  ;;  %v13612_v10 = vshll.u32 %v8388_v60, 16 }
  0x1a   :  { %6720 = vmatmul.mubr.msk.bf16.gmra.mrb[8].mxu0 %vm507_vm2, %v8332_v20  ;;  %608 = vmatprep.mubr.bf16.mxu1 %v13636_v1  ;;  %v153_v7 = vsel %vm8255_vm3, %v148_v52, %v152_v53  ;;  %v171_v8 = vor.u32 %v170_v59, %v166_v58  ;;  %v13616_v12 = vshrl.u32 %v8388_v60, 16  ;;  %v8412_v25 = vcombine.low %v23_v17, %v8339_v24 }
  0x1b   :  { %1132 = vmatprep.mubr.bf16.mxu0 %v13636_v1  ;;  %v8409_v23 = vcombine.low %v143_v2, %v153_v7  ;;  %v162_v26 = vrot.slane %v161_v63, 4  ;;  %v176_v27 = vrot.slane %v13617_v5, 5  ;;  %v180_v31 = vrot.slane %v13618_v6, 4  ;;  %v8453_v2 = vld [vmem:[%s13606_s0 + $0x44] sm:$0xf] }
  0x1c   :  { %13849 = vst [vmem:[#allocation9_spill] sm:$0xff] %v8412_v25  ;;  %v172_v30 = vrot.slane %v171_v8, 4  ;;  %v186_v17 = vrot.slane %v13612_v10, 5  ;;  %v190_v33 = vrot.slane %v13616_v12, 4  ;;  %v194_v37 = vshll.u32 %v8407_v21, 16 }
  0x1d   :  { %v199_v38 = vshrl.u32 %v27_v28, 16  ;;  %v167_v40 = vsel %vm8255_vm3, %v162_v26, %v166_v58  ;;  %v202_v41 = vshll.u32 %v27_v28, 16  ;;  %v13609_v42 = vshll.u32 %v8431_v34, 16 }
  0x1e   :  { %v13611_v48 = vshrl.u32 %v8431_v34, 16  ;;  %v177_v50 = vsel %vm8255_vm3, %v172_v30, %v176_v27  ;;  %v181_v51 = vor.u32 %v180_v31, %v176_v27  ;;  %v191_v52 = vor.u32 %v190_v33, %v186_v17  ;;  %v8464_v30 = vld [vmem:[%s13606_s0 + $0x48] sm:$0xf] }
  0x1f   :  { %v8448_v53 = vcombine.low %v8379_v57, %v8388_v60  ;;  %v196_v59 = vrot.slane %v194_v37, 5  ;;  %v201_v58 = vrot.slane %v199_v38, 4  ;;  %v8455_v63 = vcombine.low %v167_v40, %v177_v50 }
  0x20   :  { %v204_v7 = vrot.slane %v202_v41, 5  ;;  %v210_v8 = vrot.slane %v13609_v42, 5  ;;  %v214_v26 = vrot.slane %v13611_v48, 4  ;;  %v182_v27 = vrot.slane %v181_v51, 4 }
  0x21   :  { %6666 = vmatmul.mubr.msk.bf16.gmra.mrb[8].mxu1 %vm507_vm2, %v8373_v46  ;;  %13850 = vst [vmem:[#allocation10_spill] sm:$0xff] %v8448_v53  ;;  %v192_v29 = vrot.slane %v191_v52, 4  ;;  %v13610_v31 = vshll.u32 %v8453_v2, 16  ;;  %v13615_v38 = vshrl.u32 %v8453_v2, 16  ;;  %v13613_v50 = vshll.u32 %v8464_v30, 16 }
  0x22   :  { %6721 = vmatmul.mubr.msk.bf16.gmra.mrb[12].mxu0 %vm507_vm2, %v8371_v45  ;;  %618 = vmatprep.mubr.bf16.mxu1 %v13636_v1  ;;  %v205_v33 = vor.u32 %v204_v7, %v201_v58  ;;  %v215_v37 = vor.u32 %v214_v26, %v210_v8  ;;  %v187_v40 = vsel %vm8255_vm3, %v182_v27, %v186_v17  ;;  %v13614_v51 = vshrl.u32 %v8464_v30, 16  ;;  %v31_v52 = vld [vmem:[%s13606_s0 + $0x50] sm:$0xf]  ;;  %v8491_v17 = vld [vmem:[%s13606_s0 + $0x4c] sm:$0x1] }
  0x23   :  { %1142 = vmatprep.mubr.bf16.mxu0 %v13636_v1  ;;  %v197_v41 = vsel %vm8255_vm3, %v192_v29, %v196_v59  ;;  %v8484_v58 = vcombine.low %v27_v28, %v8431_v34  ;;  %v220_v7 = vrot.slane %v13610_v31, 5  ;;  %v224_v29 = vrot.slane %v13615_v38, 4  ;;  %v8504_v31 = vld [vmem:[%s13606_s0 + $0x54] sm:$0xf] }
  0x24   :  { %v8493_v59 = vcombine.low %v187_v40, %v197_v41  ;;  %v206_v26 = vrot.slane %v205_v33, 4  ;;  %v216_v27 = vrot.slane %v215_v37, 4  ;;  %v230_v42 = vrot.slane %v13613_v50, 5 }
  0x25   :  { %13851 = vst [vmem:[#allocation11_spill] sm:$0xff] %v8484_v58  ;;  %v234_v28 = vrot.slane %v13614_v51, 4  ;;  %v243_v48 = vshrl.u32 %v31_v52, 16  ;;  %v246_v10 = vshll.u32 %v31_v52, 16  ;;  %v238_v40 = vshll.u32 %v8491_v17, 16 }
  0x26   :  { %v211_v33 = vsel %vm8255_vm3, %v206_v26, %v210_v8  ;;  %v221_v37 = vsel %vm8255_vm3, %v216_v27, %v220_v7  ;;  %v225_v41 = vor.u32 %v224_v29, %v220_v7  ;;  %v13619_v51 = vshll.u32 %v8504_v31, 16  ;;  %v8528_v27 = vld [vmem:[%s13606_s0 + $0x58] sm:$0xf] }
  0x27   :  { %v235_v50 = vor.u32 %v234_v28, %v230_v42  ;;  %v13620_v38 = vshrl.u32 %v8504_v31, 16  ;;  %v245_v12 = vrot.slane %v243_v48, 4  ;;  %v248_v5 = vrot.slane %v246_v10, 5  ;;  %v8537_v48 = vld [vmem:[%s13606_s0 + $0x5c] sm:$0xf] }
  0x28   :  { %v8519_v6 = vcombine.low %v211_v33, %v221_v37  ;;  %v8523_v8 = vcombine.low %v8453_v2, %v8464_v30  ;;  %v240_v26 = vrot.slane %v238_v40, 5  ;;  %v226_v7 = vrot.slane %v225_v41, 4  ;;  %13853 = vst [vmem:[#allocation13_spill] sm:$0xff] %v8537_v48 }
  0x29   :  { %6667 = vmatmul.mubr.msk.bf16.gmra.mrb[12].mxu1 %vm507_vm2, %v8409_v23  ;;  %v236_v29 = vrot.slane %v235_v50, 4  ;;  %v254_v28 = vrot.slane %v13619_v51, 5  ;;  %v258_v10 = vrot.slane %v13620_v38, 4  ;;  %v249_v33 = vor.u32 %v248_v5, %v245_v12  ;;  %v8556_v38 = vld [vmem:[%s13606_s0 + $0x64] sm:$0xf] }
  0x2a   :  { %6722 = vmatmul.mubr.msk.bf16.gmra.mrb[16].mxu0 %vm507_vm2, %v8412_v25  ;;  %628 = vmatprep.mubr.bf16.mxu1 %v13636_v1  ;;  %13852 = vst [vmem:[#allocation12_spill] sm:$0xff] %v8523_v8  ;;  %v13623_v50 = vshll.u32 %v8528_v27, 16  ;;  %v13626_v37 = vshrl.u32 %v8528_v27, 16  ;;  %v13627_v40 = vshll.u32 %v8537_v48, 16  ;;  %v231_v41 = vsel %vm8255_vm3, %v226_v7, %v230_v42  ;;  %v8564_v42 = vld [vmem:[%s13606_s0 + $0x68] sm:$0xf] }
  0x2b   :  { %1152 = vmatprep.mubr.bf16.mxu0 %v13636_v1  ;;  %v241_v5 = vsel %vm8255_vm3, %v236_v29, %v240_v26  ;;  %v259_v12 = vor.u32 %v258_v10, %v254_v28  ;;  %v13628_v51 = vshrl.u32 %v8537_v48, 16  ;;  %v8559_v43 = vcombine.low %v31_v52, %v8504_v31  ;;  %13855 = vst [vmem:[#allocation15_spill] sm:$0xff] %v8564_v42  ;;  %v8573_v29 = vld [vmem:[%s13606_s0 + $0x60] sm:$0x1] }
  0x2c   :  { %v250_v44 = vrot.slane %v249_v33, 4  ;;  %v8566_v26 = vcombine.low %v231_v41, %v241_v5  ;;  %v264_v7 = vrot.slane %v13623_v50, 5  ;;  %v268_v52 = vrot.slane %v13626_v37, 4 }
  0x2d   :  { %13854 = vst [vmem:[#allocation14_spill] sm:$0xff] %v8559_v43  ;;  %v8579_v10 = vrot.slane %v13627_v40, 5  ;;  %v260_v33 = vrot.slane %v259_v12, 4  ;;  %v278_v41 = vrot.slane %v13628_v51, 4  ;;  %v287_v5 = vshrl.u32 %v8556_v38, 16 }
  0x2e   :  { %v290_v50 = vshll.u32 %v8556_v38, 16  ;;  %v13635_v16 = vshll.u32 %v8564_v42, 16  ;;  %v13639_v37 = vshrl.u32 %v8564_v42, 16  ;;  %v255_v40 = vsel %vm8255_vm3, %v250_v44, %v254_v28  ;;  %v8598_v51 = vld [vmem:[%s13606_s0 + $0x6c] sm:$0xf] }
  0x2f   :  { %v282_v12 = vshll.u32 %v8573_v29, 16  ;;  %v269_v0 = vor.u32 %v268_v52, %v264_v7  ;;  %v265_v28 = vsel %vm8255_vm3, %v260_v33, %v264_v7  ;;  %v279_v62 = vor.u32 %v278_v41, %v8579_v10 }
  0x30   :  { %v289_v35 = vrot.slane %v287_v5, 4  ;;  %v292_v36 = vrot.slane %v290_v50, 5  ;;  %v8614_v52 = vrot.slane %v13635_v16, 5  ;;  %v302_v61 = vrot.slane %v13639_v37, 4 }
  0x31   :  { %6668 = vmatmul.mubr.msk.bf16.gmra.mrb[16].mxu1 %vm507_vm2, %v8455_v63  ;;  %v8621_v4 = vcombine.low %v8528_v27, %v8537_v48  ;;  %v8623_v7 = vcombine.low %v255_v40, %v265_v28  ;;  %v13858_v33 = vshrl.u32 %v8598_v51, 16  ;;  %v13859_v50 = vshll.u32 %v8588_v13, 16 }
  0x32   :  { %6723 = vmatmul.mubr.msk.bf16.gmra.mrb[20].mxu0 %vm507_vm2, %v8448_v53  ;;  %638 = vmatprep.mubr.bf16.mxu1 %v13636_v1  ;;  %v13860_v16 = vshrl.u32 %v8588_v13, 16  ;;  %v280_v37 = vrot.slane %v279_v62, 4  ;;  %v293_v44 = vor.u32 %v292_v36, %v289_v35  ;;  %v1453_v40 = vrot.slane %v8221_v11, 5  ;;  %v9183_v53 = vld [vmem:[%s13606_s0 + $0x10] sm:$0x3] }
  0x33   :  { %1162 = vmatprep.mubr.bf16.mxu0 %v13636_v1  ;;  %13857 = vst [vmem:[#allocation17_spill] sm:$0xff] %v8621_v4  ;;  %v312_v41 = vrot.slane %v13858_v33, 4  ;;  %v8629_v5 = vrot.slane %v13859_v50, 5  ;;  %v303_v28 = vor.u32 %v302_v61, %v8614_v52  ;;  %v13861_v33 = vshll.u32 %v8598_v51, 16  ;;  %v8656_v61 = vld [vmem:[%s13606_s0 + $0x78] sm:$0xf] }
  0x34   :  { %vm1448_vm4 = vcmask 1042432   ;;  %vm1449_vm5 = vcmask 1046532   ;;  %13862 = vst [vmem:[#allocation18_spill] sm:$0xff] %v8656_v61  ;;  %v13863_v62 = vmov 0   ;;  %vm13762_vm7 = vsmask.f32 2304 }
  0x35   :  { %v308_v50 = vrot.slane %v13861_v33, 5  ;;  %v1455_v33 = vrot.slane %v1453_v40, 4  ;;  %vm8668_vm6 = vmor %vm1448_vm4, %vm1449_vm5  ;;  %vm2151_vm8 = vsmask.f32 6416  ;;  %vm3028_vm10 = vcmask 1041408  }
  0x36   :  { %vm8882_vm9 = vmor %vm13762_vm7, %vm2151_vm8  ;;  %vm3029_vm11 = vcmask 1045508   ;;  %vm13814_vm13 = vcmask 949248   ;;  %vm4269_vm14 = vsmask.f32 256  ;;  %vm4268_vm15 = vcmask 1040384  }
  0x37   :  { %v313_v35 = vor.u32 %v312_v41, %v308_v50  ;;  %v294_v41 = vrot.slane %v293_v44, 4  ;;  %v334_v44 = vshll.u32 %v8656_v61, 16  ;;  %vm9682_vm12 = vmor %vm3028_vm10, %vm3029_vm11  ;;  %vm4271_vm1 = vcmask 1044484  }
  0x38   :  { %vm13770_vm4 = vcmask 548864   ;;  %vm4423_vm5 = vsmask.f32 7954  ;;  %vm4524_vm8 = vsmask.f32 1280  ;;  %vm4526_vm11 = vcmask 1045509  }
  0x39   :  { %6669 = vmatmul.mubr.msk.bf16.gmra.mrb[20].mxu1 %vm507_vm2, %v8493_v59  ;;  %v314_v25 = vrot.slane %v313_v35, 4  ;;  %v299_v14 = vsel %vm8255_vm3, %v294_v41, %v8614_v52  ;;  %v8698_v35 = vld [vmem:[%s13606_s0 + $0x80] sm:$0xf]  ;;  %v1514_v41 = vrot.slane %v8573_v29, 5  ;;  %vm4533_vm0 = vcmask 549889  }
  0x3a   :  { %6724 = vmatmul.mubr.msk.bf16.gmra.mrb[24].mxu0 %vm507_vm2, %v8484_v58  ;;  %648 = vmatprep.mubr.bf16.mxu1 %v13636_v1  ;;  %v8636_v58 = vld [vmem:[%s13606_s0 + $0x74] sm:$0x1]  ;;  %13867 = vst [vmem:[#allocation20_spill] sm:$0xff] %v8698_v35 }
  0x3b   :  { %1172 = vmatprep.mubr.bf16.mxu0 %v13636_v1  ;;  %v326_v36 = vshll.u32 %v8636_v58, 16 }
  0x3d   :  { %v328_v20 = vrot.slane %v326_v36, 5  ;;  %v13651_v36 = vrot.slane %v8528_v27, 5 }
  0x41   :  { %6670 = vmatmul.mubr.msk.bf16.gmra.mrb[24].mxu1 %vm507_vm2, %v8519_v6 }
  0x42   :  { %6725 = vmatmul.mubr.msk.bf16.gmra.mrb[28].mxu0 %vm507_vm2, %v8523_v8  ;;  %658 = vmatprep.mubr.bf16.mxu1 %v13636_v1  ;;  %v284_v8 = vrot.slane %v282_v12, 5 }
  0x43   :  { %1182 = vmatprep.mubr.bf16.mxu0 %v13636_v1 }
  0x44   :  { %v285_v12 = vsel %vm8255_vm3, %v280_v37, %v284_v8  ;;  %v8679_v8 = vcombine.low %v8556_v38, %v8564_v42  ;;  %v1456_v37 = vrot.slane %v8229_v15, 5 }
  0x46   :  { %13866 = vst [vmem:[#allocation19_spill] sm:$0xff] %v8679_v8  ;;  %v1457_v52 = vsel %vm8668_vm6, %v1455_v33, %v1456_v37  ;;  %v1458_v47 = vrot.slane %v1456_v37, 4  ;;  %v1459_v37 = vrot.slane %v8237_v19, 5 }
  0x49   :  { %6671 = vmatmul.mubr.msk.bf16.gmra.mrb[28].mxu1 %vm507_vm2, %v8566_v26 }
  0x4a   :  { %6726 = vmatmul.mubr.msk.bf16.gmra.mrb[32].mxu0 %vm507_vm2, %v8559_v43  ;;  %668 = vmatprep.mubr.bf16.mxu1 %v13636_v1  ;;  %v270_v43 = vrot.slane %v269_v0, 4 }
  0x4b   :  { %1192 = vmatprep.mubr.bf16.mxu0 %v13636_v1  ;;  %v322_v1 = vrot.slane %v13860_v16, 4  ;;  %v8645_v16 = vld [vmem:[%s13606_s0] sm:$0xe] }
  0x4c   :  { %v275_v0 = vsel %vm8255_vm3, %v270_v43, %v8579_v10  ;;  %v8675_v43 = vld [vmem:[%s13606_s0 + $0x7c] sm:$0xf]  ;;  %v331_v10 = vshrl.u32 %v8656_v61, 16  ;;  %v2157_v19 = vshll.u32 %v8645_v16, 16 }
  0x4d   :  { %v323_v11 = vor.u32 %v322_v1, %v8629_v5  ;;  %v6750_v1 = vrot.slane %v8645_v16, 9  ;;  %v13652_v15 = vshll.u32 %v8675_v43, 16 }
  0x4f   :  { %v324_v45 = vrot.slane %v323_v11, 4  ;;  %v1454_v38 = vsel %vm8668_vm6, %v6750_v1, %v1453_v40  ;;  %v13655_v11 = vshrl.u32 %v8675_v43, 16  ;;  %v333_v40 = vrot.slane %v331_v10, 4 }
  0x50   :  { %v1510_v1 = vrot.slane %v13651_v36, 4  ;;  %v8723_v10 = vcombine.low %v8598_v51, %v8588_v13  ;;  %v8739_v36 = vcombine.low %v1454_v38, %v1457_v52  ;;  %v8789_v52 = vld [vmem:[%s13606_s0 + $0x94] sm:$0xf] }
  0x51   :  { %6672 = vmatmul.mubr.msk.bf16.gmra.mrb[32].mxu1 %vm507_vm2, %v8623_v7 }
  0x52   :  { %6727 = vmatmul.mubr.msk.bf16.gmra.mrb[36].mxu0 %vm507_vm2, %v8621_v4  ;;  %678 = vmatprep.mubr.bf16.mxu1 %v13863_v62  ;;  %v304_v4 = vrot.slane %v303_v28, 4  ;;  %v8684_v28 = vcombine.low %v275_v0, %v285_v12  ;;  %v1511_v0 = vrot.slane %v8537_v48, 5  ;;  %v336_v12 = vrot.slane %v334_v44, 5  ;;  %13868 = vst [vmem:[#allocation21_spill] sm:$0xff] %v8723_v10  ;;  %13869 = vst [vmem:[#allocation22_spill] sm:$0xff] %v8739_v36 }
  0x53   :  { %1202 = vmatprep.mubr.bf16.mxu0 %v13863_v62 }
  0x54   :  { %v309_v42 = vsel %vm8255_vm3, %v304_v4, %v308_v50  ;;  %v319_v4 = vsel %vm8255_vm3, %v314_v25, %v8629_v5  ;;  %v329_v50 = vsel %vm8255_vm3, %v324_v45, %v328_v20  ;;  %v1513_v33 = vrot.slane %v1511_v0, 4 }
  0x55   :  { %v8718_v29 = vcombine.low %v299_v14, %v309_v42  ;;  %v8727_v25 = vrot.slane %v13652_v15, 5  ;;  %v13656_v20 = vshll.u32 %v8698_v35, 16  ;;  %v346_v45 = vrot.slane %v13655_v11, 4  ;;  %v8746_v11 = vld [vmem:[%s13606_s0 + $0x84] sm:$0xf] }
  0x56   :  { %v1512_v5 = vsel %vm8668_vm6, %v1510_v1, %v1511_v0  ;;  %v1515_v14 = vsel %vm8668_vm6, %v1513_v33, %v1514_v41  ;;  %v13657_v42 = vrot.slane %v8598_v51, 5  ;;  %v8737_v44 = vcombine.low %v319_v4, %v329_v50  ;;  %13870 = vst [vmem:[#allocation23_spill] sm:$0xff] %v8746_v11  ;;  %v8763_v4 = vld [vmem:[%s13606_s0 + $0x88] sm:$0x1] }
  0x57   :  { %v8741_v15 = vcombine.low %v1512_v5, %v1515_v14  ;;  %v337_v48 = vor.u32 %v336_v12, %v333_v40  ;;  %v1524_v41 = vrot.slane %v8588_v13, 5  ;;  %v1527_v1 = vrot.slane %v8636_v58, 5 }
  0x58   :  { %v1523_v0 = vrot.slane %v13657_v42, 4  ;;  %v8754_v38 = vrot.slane %v13656_v20, 5  ;;  %v13658_v40 = vrot.slane %v8698_v35, 5  ;;  %v347_v12 = vor.u32 %v346_v45, %v8727_v25 }
  0x59   :  { %6673 = vmatmul.mubr.msk.bf16.gmra.mrb[36].mxu1 %vm507_vm2, %v8684_v28  ;;  %v1526_v50 = vrot.slane %v1524_v41, 4  ;;  %v1537_v33 = vrot.slane %v8746_v11, 5  ;;  %v1540_v45 = vrot.slane %v8763_v4, 5  ;;  %v8777_v42 = vrot.slane %v337_v48, 4 }
  0x5a   :  { %6728 = vmatmul.mubr.msk.bf16.gmra.mrb[40].mxu0 %vm507_vm2, %v8679_v8  ;;  %688 = vmatprep.mubr.bf16.mxu1 %v13863_v62  ;;  %v1525_v58 = vsel %vm8668_vm6, %v1523_v0, %v1524_v41  ;;  %v1536_v20 = vrot.slane %v13658_v40, 4  ;;  %v1462_v0 = vrot.slane %v8243_v22, 5  ;;  %v1460_v40 = vsel %vm8668_vm6, %v1458_v47, %v1459_v37 }
  0x5b   :  { %1212 = vmatprep.mubr.bf16.mxu0 %v13863_v62  ;;  %v1528_v41 = vsel %vm8668_vm6, %v1526_v50, %v1527_v1  ;;  %v1539_v5 = vrot.slane %v1537_v33, 4  ;;  %v1461_v14 = vrot.slane %v1459_v37, 4  ;;  %v348_v1 = vrot.slane %v347_v12, 4 }
  0x5c   :  { %v8791_v48 = vcombine.low %v1525_v58, %v1528_v41  ;;  %v1538_v22 = vsel %vm8668_vm6, %v1536_v20, %v1537_v33  ;;  %v13872_v50 = vshrl.u32 %v8698_v35, 16  ;;  %v13667_v37 = vrot.slane %v8789_v52, 5  ;;  %v8814_v33 = vld [vmem:[%s13606_s0 + $0x9c] sm:$0x1] }
  0x5d   :  { %v1541_v47 = vsel %vm8668_vm6, %v1539_v5, %v1540_v45  ;;  %v13873_v58 = vshll.u32 %v8746_v11, 16  ;;  %v13874_v20 = vshrl.u32 %v8746_v11, 16  ;;  %v8822_v5 = vld [vmem:[%s13606_s0 + $0x8c] sm:$0xf]  ;;  %v370_v11 = vshll.u32 %v8763_v4, 16 }
  0x5e   :  { %13871 = vst [vmem:[#allocation24_spill] sm:$0xff] %v8791_v48  ;;  %v356_v13 = vrot.slane %v13872_v50, 4  ;;  %v8816_v50 = vcombine.low %v1538_v22, %v1541_v47  ;;  %13876 = vst [vmem:[#allocation26_spill] sm:$0xff] %v8822_v5  ;;  %v1549_v45 = vrot.slane %v13667_v37, 4  ;;  %v343_v22 = vsel %vm8255_vm3, %v8777_v42, %v8727_v25  ;;  %v8839_v37 = vld [vmem:[%s13606_s0 + $0x90] sm:$0xf] }
  0x5f   :  { %v8807_v41 = vrot.slane %v13873_v58, 5  ;;  %v366_v12 = vrot.slane %v13874_v20, 4  ;;  %v1553_v58 = vrot.slane %v8814_v33, 5  ;;  %v2154_v20 = vshrl.u32 %v8645_v16, 16  ;;  %v8108_v25 = vld [vmem:[%s13605_s1 + $0x90] ss:$12 sps:$4 sm:$0xff]  }
  0x60   :  { %13875 = vst [vmem:[#allocation25_spill] sm:$0xff] %v8816_v50  ;;  %v1463_v47 = vsel %vm8668_vm6, %v1461_v14, %v1462_v0  ;;  %v353_v16 = vsel %vm8255_vm3, %v348_v1, %v8754_v38  ;;  %v357_v61 = vor.u32 %v356_v13, %v8754_v38  ;;  %v8851_v42 = vld [vmem:[%s13606_s0 + $0x14] sm:$0xe]  ;;  %v1466_v0 = vrot.slane %v8282_v49, 5  ;;  %v8113_v13 = vld [vmem:[%s13605_s1 + $0xac] ss:$12 sps:$4 sm:$0xff]  }
  0x61   :  { %6674 = vmatmul.mubr.msk.bf16.gmra.mrb[40].mxu1 %vm507_vm2, %v8718_v29  ;;  %13877 = vst [vmem:[#allocation27_spill] sm:$0xff] %v8851_v42  ;;  %v2156_v14 = vrot.slane %v2154_v20, 5  ;;  %v375_v35 = vshrl.u32 %v8822_v5, 16  ;;  %v2159_v1 = vrot.slane %v2157_v19, 6  ;;  %v13883_v48 = vshrl.u32 %v8839_v37, 16 }
  0x62   :  { %6729 = vmatmul.mubr.msk.bf16.gmra.mrb[44].mxu0 %vm507_vm2, %v8723_v10  ;;  %698 = vmatprep.mubr.bf16.mxu1 %v13863_v62  ;;  %v8800_v10 = vld [vmem:[%s13606_s0 + $0x98] sm:$0xf]  ;;  %v358_v19 = vrot.slane %v357_v61, 4  ;;  %v1468_v20 = vrot.slane %v1466_v0, 4 }
  0x63   :  { %1724 = vmatprep.mubr.bf16.mxu0 %v13863_v62  ;;  %v1550_v8 = vrot.slane %v8800_v10, 5  ;;  %v390_v61 = vrot.slane %v13883_v48, 4 }
  0x65   :  { %v1552_v50 = vrot.slane %v1550_v8, 4  ;;  %v1551_v4 = vsel %vm8668_vm6, %v1549_v45, %v1550_v8  ;;  %v367_v8 = vor.u32 %v366_v12, %v8807_v41  ;;  %v378_v45 = vshll.u32 %v8822_v5, 16 }
  0x66   :  { %v6751_v12 = vrot.slane %v8851_v42, 9  ;;  %v1469_v5 = vrot.slane %v8289_v54, 5  ;;  %v13882_v42 = vshll.u32 %v8839_v37, 16 }
  0x67   :  { %v1554_v38 = vsel %vm8668_vm6, %v1552_v50, %v1553_v58  ;;  %v2160_v50 = vor.u32 %v2159_v1, %v2156_v14  ;;  %v8874_v58 = vcombine.low %v1460_v40, %v1463_v47  ;;  %v368_v14 = vrot.slane %v367_v8, 4 }
  0x68   :  { %v8869_v49 = vcombine.low %v1551_v4, %v1554_v38  ;;  %v8111_v4 = vld [vmem:[%s13605_s1 + $0xa8] ss:$12 sps:$4 sm:$0xff]   ;;  %v377_v1 = vrot.slane %v375_v35, 4  ;;  %v380_v54 = vrot.slane %v378_v45, 5  ;;  %v1467_v35 = vsel %vm8668_vm6, %v6751_v12, %v1466_v0 }
  0x69   :  { %6675 = vmatmul.mubr.msk.bf16.gmra.mrb[44].mxu1 %vm507_vm2, %v8737_v44  ;;  %v2161_v40 = vrot.slane %v2160_v50, 4  ;;  %v13685_v8 = vshrl.u32 %v8789_v52, 16  ;;  %v13682_v45 = vshll.u32 %v8800_v10, 16 }
  0x6a   :  { %6788 = vmatmul.mubr.msk.bf16.vlgmr.msra.gmra.mrb[0].mxu0 %vm507_vm2, %v8739_v36  ;;  %13878 = vst [vmem:[#allocation28_spill] sm:$0xff] %v8869_v49  ;;  %708 = vmatprep.mubr.bf16.mxu1 %v13863_v62  ;;  %v372_v36 = vrot.slane %v370_v11, 5  ;;  %v13881_v11 = vrot.slane %v8266_v39, 4  ;;  %v386_v49 = vrot.slane %v13882_v42, 5  ;;  %v381_v48 = vor.u32 %v380_v54, %v377_v1 }
  0x6b   :  { %1734 = vmatprep.mubr.bf16.mxu0 %v13863_v62  ;;  %2555 = vmatpush1.bf16.msra.mxu0 %v8108_v25  ;;  %v8891_v25 = vcombine.low %v343_v22, %v353_v16  ;;  %v363_v22 = vsel %vm8255_vm3, %v358_v19, %v8807_v41  ;;  %v1470_v16 = vsel %vm8668_vm6, %v1468_v20, %v1469_v5  ;;  %v13684_v42 = vshll.u32 %v8789_v52, 16 }
  0x6c   :  { %2556 = vmatprep.subr.bf16.mxu0 %v8113_v13  ;;  %v2170_v47 = vsel %vm8882_vm9, %v13881_v11, %v8293_v56  ;;  %v2165_v13 = vsel %vm8882_vm9, %v2161_v40, %v8266_v39  ;;  %v373_v39 = vsel %vm8255_vm3, %v368_v14, %v372_v36  ;;  %v1472_v41 = vrot.slane %v8305_v3, 5 }
  0x6d   :  { %v8900_v50 = vcombine.low %v2165_v13, %v2170_v47  ;;  %v391_v0 = vor.u32 %v390_v61, %v386_v49  ;;  %v13683_v20 = vshrl.u32 %v8800_v10, 16  ;;  %v8922_v19 = vcombine.low %v363_v22, %v373_v39 }
  0x6e   :  { %v8924_v12 = vcombine.low %v1467_v35, %v1470_v16  ;;  %v1471_v54 = vrot.slane %v1469_v5, 4  ;;  %v382_v36 = vrot.slane %v381_v48, 4  ;;  %v1474_v40 = vrot.slane %v1472_v41, 4  ;;  %v8123_v35 = vld [vmem:[%s13605_s1 + $0xc4] ss:$12 sps:$4 sm:$0xff]  }
  0x6f   :  { %2557 = vmatpush1.bf16.msra.mxu0 %v8111_v4  ;;  %13884 = vst [vmem:[#allocation29_spill] sm:$0xff] %v8900_v50  ;;  %v396_v4 = vrot.slane %v13684_v42, 5  ;;  %v1475_v11 = vrot.slane %v8322_v9, 5  ;;  %v392_v47 = vrot.slane %v391_v0, 4  ;;  %v400_v14 = vrot.slane %v13685_v8, 4  ;;  %v13905_v42 = vld [vmem:[#allocation5_spill] sm:$0xff] }
  0x70   :  { %v406_v1 = vrot.slane %v13682_v45, 5  ;;  %v410_v61 = vrot.slane %v13683_v20, 4  ;;  %v387_v5 = vsel %vm8255_vm3, %v382_v36, %v386_v49  ;;  %v1473_v9 = vsel %vm8668_vm6, %v1471_v54, %v1472_v41  ;;  %v8956_v48 = vld [vmem:[%s13606_s0 + $0x28] sm:$0xe]  ;;  %3272 = vmatprep.subr.bf16.mxu0 %v8123_v35 }
  0x71   :  { %6676 = vmatmul.mubr.msk.bf16.gmra.mrb[48].mxu1 %vm507_vm2, %v8891_v25  ;;  %v1476_v13 = vsel %vm8668_vm6, %v1474_v40, %v1475_v11  ;;  %v414_v22 = vshll.u32 %v8814_v33, 16  ;;  %v397_v16 = vsel %vm8255_vm3, %v392_v47, %v396_v4  ;;  %v401_v49 = vor.u32 %v400_v14, %v396_v4 }
  0x72   :  { %6789 = vmatmul.mubr.msk.bf16.gmra.mrb[4].mxu0 %vm507_vm2, %v8874_v58  ;;  %718 = vmatprep.mubr.bf16.mxu1 %v13863_v62  ;;  %v411_v39 = vor.u32 %v410_v61, %v406_v1  ;;  %v1479_v33 = vrot.slane %v8339_v24, 5  ;;  %v8959_v41 = vcombine.low %v387_v5, %v397_v16  ;;  %v8961_v0 = vcombine.low %v1473_v9, %v1476_v13 }
  0x73   :  { %1744 = vmatprep.mubr.bf16.mxu0 %v13863_v62  ;;  %v416_v54 = vrot.slane %v414_v22, 5  ;;  %v6752_v36 = vrot.slane %v8956_v48, 9  ;;  %v402_v40 = vrot.slane %v401_v49, 4  ;;  %v1482_v4 = vrot.slane %v8379_v57, 5 }
  0x74   :  { %v412_v11 = vrot.slane %v411_v39, 4  ;;  %v1481_v47 = vrot.slane %v1479_v33, 4  ;;  %v1485_v13 = vrot.slane %v8388_v60, 5  ;;  %v1488_v39 = vrot.slane %v8407_v21, 5  ;;  %v9000_v21 = vld [vmem:[%s13606_s0 + $0x3c] sm:$0xe] }
  0x75   :  { %v1480_v14 = vsel %vm8668_vm6, %v6752_v36, %v1479_v33  ;;  %v407_v61 = vsel %vm8255_vm3, %v402_v40, %v406_v1  ;;  %v1484_v16 = vrot.slane %v1482_v4, 4  ;;  %v1492_v33 = vrot.slane %v8431_v34, 5 }
  0x76   :  { %v417_v5 = vsel %vm8255_vm3, %v412_v11, %v416_v54  ;;  %v1483_v9 = vsel %vm8668_vm6, %v1481_v47, %v1482_v4  ;;  %v1487_v49 = vrot.slane %v1485_v13, 4  ;;  %v6753_v36 = vrot.slane %v9000_v21, 9  ;;  %v8132_v11 = vld [vmem:[%s13605_s1] ss:$12 sps:$4 sm:$0xff]  }
  0x77   :  { %v8980_v22 = vcombine.low %v407_v61, %v417_v5  ;;  %v8982_v35 = vcombine.low %v1480_v14, %v1483_v9  ;;  %v1486_v32 = vsel %vm8668_vm6, %v1484_v16, %v1485_v13  ;;  %v1495_v40 = vrot.slane %v8453_v2, 5  ;;  %v9027_v61 = vld [vmem:[%s13605_s1 + $0x8] ss:$12 sps:$4 sm:$0xff]   ;;  %v8134_v16 = vld [vmem:[%s13605_s1 + $0x18] ss:$12 sps:$4 sm:$0xff]  }
  0x78   :  { %v1489_v1 = vsel %vm8668_vm6, %v1487_v49, %v1488_v39  ;;  %v1493_v47 = vsel %vm8668_vm6, %v6753_v36, %v1492_v33  ;;  %v1498_v14 = vrot.slane %v8464_v30, 5  ;;  %v1501_v13 = vrot.slane %v8491_v17, 5 }
  0x79   :  { %6677 = vmatmul.mubr.msk.bf16.gmra.mrb[52].mxu1 %vm507_vm2, %v8922_v19  ;;  %v9002_v54 = vcombine.low %v1486_v32, %v1489_v1  ;;  %v1497_v5 = vrot.slane %v1495_v40, 4  ;;  %v1505_v39 = vrot.slane %v8504_v31, 5  ;;  %v13885_v36 = vrot.slane %v8528_v27, 5 }
  0x7a   :  { %6790 = vmatmul.mubr.msk.bf16.gmra.mrb[8].mxu0 %vm507_vm2, %v8924_v12  ;;  %728 = vmatprep.mubr.bf16.mxu1 %v13863_v62  ;;  %v1500_v9 = vrot.slane %v1498_v14, 4  ;;  %v13906_v8 = vshrl.u32 %v13905_v42, 16  ;;  %vm4421_vm3 = vsmask.f32 7938 }
  0x7b   :  { %1754 = vmatprep.mubr.bf16.mxu0 %v13863_v62  ;;  %v1499_v17 = vsel %vm8668_vm6, %v1497_v5, %v1498_v14  ;;  %vm10938_vm7 = vmand %vm4268_vm15, %vm4421_vm3 }
  0x7c   :  { %v1502_v49 = vsel %vm8668_vm6, %v1500_v9, %v1501_v13  ;;  %v13889_v13 = vld [vmem:[#allocation20_spill] sm:$0xff] }
  0x7d   :  { %v9053_v32 = vcombine.low %v1499_v17, %v1502_v49 }
  0x81   :  { %6678 = vmatmul.mubr.msk.bf16.gmra.mrb[56].mxu1 %vm507_vm2, %v8959_v41 }
  0x82   :  { %6791 = vmatmul.mubr.msk.bf16.gmra.mrb[12].mxu0 %vm507_vm2, %v8961_v0  ;;  %738 = vmatprep.mubr.bf16.mxu1 %v13863_v62 }
  0x83   :  { %1764 = vmatprep.mubr.bf16.mxu0 %v13863_v62 }
  0x89   :  { %6679 = vmatmul.mubr.msk.bf16.gmra.mrb[60].mxu1 %vm507_vm2, %v8980_v22 }
  0x8a   :  { %6792 = vmatmul.mubr.msk.bf16.gmra.mrb[16].mxu0 %vm507_vm2, %v8982_v35  ;;  %7270 = vmatprep.mubr.msk.bf16.mxu1 %vm507_vm2, %v8291_v55  ;;  %v1494_v55 = vrot.slane %v1492_v33, 4 }
  0x8b   :  { %1774 = vmatprep.mubr.bf16.mxu0 %v13863_v62 }
  0x8c   :  { %v1496_v4 = vsel %vm8668_vm6, %v1494_v55, %v1495_v40 }
  0x91   :  { %7271 = vmatmul.mubr.msk.bf16.vlgmr.msra.gmra.mrb[64].mxu1 %vm507_vm2, %v8329_v18  ;;  %v8133_v18 = vld [vmem:[%s13605_s1 + $0x1c] ss:$12 sps:$4 sm:$0xff]  }
  0x92   :  { %6793 = vmatmul.mubr.msk.bf16.gmra.mrb[20].mxu0 %vm507_vm2, %v9002_v54  ;;  %7448 = vmatpush1.bf16.msra.mxu1 %v8132_v11  ;;  %v9082_v11 = vld [vmem:[%s13606_s0 + $0x64] sm:$0xe] }
  0x93   :  { %7274 = vmatprep.mubr.msk.bf16.mxu1 %vm507_vm2, %v8373_v46  ;;  %1784 = vmatprep.mubr.bf16.mxu0 %v13863_v62  ;;  %v9029_v46 = vcombine.low %v1493_v47, %v1496_v4  ;;  %v6755_v47 = vrot.slane %v9082_v11, 9 }
  0x94   :  { %7447 = vmatprep.subr.bf16.mxu1 %v8133_v18 }
  0x96   :  { %7449 = vmatpush1.bf16.msra.mxu1 %v8134_v16  ;;  %v13890_v16 = vrot.slane %v13889_v13, 5 }
  0x97   :  { %7302 = vmatprep.subr.bf16.mxu1 %v9027_v61 }
  0x99   :  { %7275 = vmatmul.mubr.msk.bf16.gmra.mrb[68].mxu1 %vm507_vm2, %v8409_v23  ;;  %v9051_v23 = vld [vmem:[%s13606_s0 + $0x50] sm:$0xe] }
  0x9a   :  { %6794 = vmatmul.mubr.msk.bf16.gmra.mrb[24].mxu0 %vm507_vm2, %v9029_v46  ;;  %7278 = vmatprep.mubr.msk.bf16.mxu1 %vm507_vm2, %v8455_v63  ;;  %v6754_v1 = vrot.slane %v9051_v23, 9  ;;  %v1507_v63 = vrot.slane %v1505_v39, 4 }
  0x9b   :  { %1794 = vmatprep.mubr.bf16.mxu0 %v13863_v62 }
  0x9c   :  { %v1506_v33 = vsel %vm8668_vm6, %v6754_v1, %v1505_v39  ;;  %v1509_v55 = vsel %vm8668_vm6, %v1507_v63, %v13885_v36  ;;  %v13891_v39 = vld [vmem:[#allocation18_spill] sm:$0xff]  ;;  %v13892_v36 = vld [vmem:[#allocation25_spill] sm:$0xff] }
  0x9d   :  { %v9069_v40 = vcombine.low %v1506_v33, %v1509_v55  ;;  %v9143_v1 = vcombine.low %v13891_v39, %v8675_v43  ;;  %v8117_v33 = vld [vmem:[%s13605_s1 + $0x20] ss:$12 sps:$4 sm:$0xff]   ;;  %v2181_v39 = vshll.u32 %v9183_v53, 16 }
  0xa1   :  { %7279 = vmatmul.mubr.msk.bf16.gmra.mrb[72].mxu1 %vm507_vm2, %v8493_v59 }
  0xa2   :  { %6795 = vmatmul.mubr.msk.bf16.gmra.mrb[28].mxu0 %vm507_vm2, %v9053_v32  ;;  %7282 = vmatprep.mubr.msk.bf16.mxu1 %vm507_vm2, %v8519_v6  ;;  %v13886_v6 = vld [vmem:[#allocation15_spill] sm:$0xff] }
  0xa3   :  { %1804 = vmatprep.mubr.bf16.mxu0 %v13863_v62  ;;  %v1518_v59 = vrot.slane %v13886_v6, 5 }
  0xa5   :  { %v1520_v4 = vrot.slane %v1518_v59, 4 }
  0xa9   :  { %7283 = vmatmul.mubr.msk.bf16.gmra.mrb[76].mxu1 %vm507_vm2, %v8566_v26  ;;  %v1519_v26 = vsel %vm8668_vm6, %v6755_v47, %v1518_v59  ;;  %v13893_v59 = vrot.slane %v8789_v52, 5 }
  0xaa   :  { %6796 = vmatmul.mubr.msk.bf16.gmra.mrb[32].mxu0 %vm507_vm2, %v9069_v40  ;;  %7286 = vmatprep.mubr.msk.bf16.mxu1 %vm507_vm2, %v8623_v7  ;;  %v13887_v7 = vrot.slane %v8598_v51, 5 }
  0xab   :  { %1814 = vmatprep.mubr.bf16.mxu0 %v13863_v62 }
  0xac   :  { %v1522_v14 = vsel %vm8668_vm6, %v1520_v4, %v13887_v7  ;;  %v9165_v4 = vld [vmem:[%s13605_s1 + $0x68] ss:$12 sps:$4 sm:$0xff]  }
  0xad   :  { %v9098_v18 = vcombine.low %v1519_v26, %v1522_v14  ;;  %v13894_v26 = vld [vmem:[#allocation23_spill] sm:$0xff]  ;;  %v13897_v14 = vld [vmem:[#allocation26_spill] sm:$0xff] }
  0xb1   :  { %7287 = vmatmul.mubr.msk.bf16.gmra.mrb[80].mxu1 %vm507_vm2, %v8684_v28  ;;  %v1531_v28 = vrot.slane %v8675_v43, 5 }
  0xb2   :  { %6797 = vmatmul.mubr.msk.bf16.gmra.mrb[36].mxu0 %vm507_vm2, %v8741_v15  ;;  %7290 = vmatprep.mubr.msk.bf16.mxu1 %vm507_vm2, %v8718_v29  ;;  %v9111_v29 = vld [vmem:[%s13606_s0 + $0x78] sm:$0xe] }
  0xb3   :  { %1824 = vmatprep.mubr.bf16.mxu0 %v13863_v62  ;;  %v6756_v5 = vrot.slane %v9111_v29, 9  ;;  %v1533_v9 = vrot.slane %v1531_v28, 4 }
  0xb5   :  { %v1535_v17 = vsel %vm8668_vm6, %v1533_v9, %v13890_v16 }
  0xb9   :  { %7291 = vmatmul.mubr.msk.bf16.gmra.mrb[84].mxu1 %vm507_vm2, %v8737_v44  ;;  %v13888_v44 = vld [vmem:[#allocation24_spill] sm:$0xff] }
  0xba   :  { %6798 = vmatmul.mubr.msk.bf16.gmra.mrb[40].mxu0 %vm507_vm2, %v9098_v18  ;;  %7294 = vmatprep.mubr.msk.bf16.mxu1 %vm507_vm2, %v8891_v25  ;;  %v1532_v25 = vsel %vm8668_vm6, %v6756_v5, %v1531_v28  ;;  %13896 = vst [vmem:[#allocation24_spill] sm:$0xff] %v9183_v53  ;;  %v9187_v28 = vcombine.low %v13897_v14, %v8839_v37  ;;  %v13898_v5 = vld [vmem:[#allocation3_spill] sm:$0xff]  ;;  %v2183_v14 = vrot.slane %v2181_v39, 6 }
  0xbb   :  { %1834 = vmatprep.mubr.bf16.mxu0 %v13863_v62  ;;  %v9127_v49 = vcombine.low %v1532_v25, %v1535_v17  ;;  %v13899_v9 = vshrl.u32 %v13898_v5, 16  ;;  %v13900_v16 = vshll.u32 %v13898_v5, 16 }
  0xbd   :  { %v2172_v25 = vrot.slane %v13899_v9, 5  ;;  %v2173_v17 = vrot.slane %v13900_v16, 6  ;;  %v9207_v9 = vcombine.low %v8789_v52, %v8800_v10 }
  0xc1   :  { %7295 = vmatmul.mubr.msk.bf16.gmra.mrb[88].mxu1 %vm507_vm2, %v8922_v19  ;;  %v1544_v19 = vrot.slane %v8839_v37, 5 }
  0xc2   :  { %6799 = vmatmul.mubr.msk.bf16.gmra.mrb[44].mxu0 %vm507_vm2, %v13888_v44  ;;  %7298 = vmatprep.mubr.msk.bf16.mxu1 %vm507_vm2, %v8959_v41  ;;  %v9139_v41 = vld [vmem:[%s13606_s0 + $0x8c] sm:$0xe] }
  0xc3   :  { %1844 = vmatprep.mubr.bf16.mxu0 %v13863_v62  ;;  %v1546_v63 = vrot.slane %v1544_v19, 4 }
  0xc5   :  { %v1548_v47 = vsel %vm8668_vm6, %v1546_v63, %v13893_v59  ;;  %v13902_v63 = vld [vmem:[#allocation27_spill] sm:$0xff]  ;;  %v2174_v59 = vor.u32 %v2173_v17, %v2172_v25  ;;  %v2171_v25 = vrot.slane %v8293_v56, 4 }
  0xc7   :  { %v2176_v17 = vrot.slane %v2174_v59, 4 }
  0xc9   :  { %7299 = vmatmul.mubr.msk.bf16.gmra.mrb[92].mxu1 %vm507_vm2, %v8980_v22  ;;  %v6757_v22 = vrot.slane %v9139_v41, 9 }
  0xca   :  { %6800 = vmatmul.mubr.msk.bf16.gmra.mrb[48].mxu0 %vm507_vm2, %v9127_v49  ;;  %1222 = vmatprep.mubr.bf16.mxu1 %v13863_v62 }
  0xcb   :  { %1854 = vmatprep.mubr.bf16.mxu0 %v13863_v62  ;;  %v1545_v55 = vsel %vm8668_vm6, %v6757_v22, %v1544_v19  ;;  %v2178_v19 = vshrl.u32 %v9183_v53, 16  ;;  %v13901_v22 = vld [vmem:[#allocation28_spill] sm:$0xff]  ;;  %vm4523_vm6 = vcmask 1041409  }
  0xcc   :  { %v9171_v7 = vcombine.low %v1545_v55, %v1548_v47  ;;  %v2190_v55 = vshll.u32 %v13902_v63, 16 }
  0xcd   :  { %v2180_v47 = vrot.slane %v2178_v19, 5 }
  0xce   :  { %13895 = vst [vmem:[#allocation15_spill] sm:$0xff] %v9171_v7  ;;  %v2192_v20 = vrot.slane %v2190_v55, 6 }
  0xcf   :  { %v2184_v19 = vor.u32 %v2183_v14, %v2180_v47 }
  0xd1   :  { %6730 = vmatmul.mubr.msk.bf16.vlgmr.msra.gmra.mrb[48].mxu1 %vm507_vm2, %v9143_v1 }
  0xd2   :  { %6801 = vmatmul.mubr.msk.bf16.gmra.mrb[52].mxu0 %vm507_vm2, %v13892_v36  ;;  %7303 = vmatpush3.bf16.msra.mxu1 %v9027_v61  ;;  %v9169_v61 = vcombine.low %v13889_v13, %v13894_v26 }
  0xd3   :  { %1232 = vmatprep.mubr.bf16.mxu1 %v13863_v62  ;;  %1864 = vmatprep.mubr.bf16.mxu0 %v13863_v62 }
  0xd4   :  { %7304 = vmatprep.subr.bf16.mxu1 %v8117_v33 }
  0xd5   :  { %v14001_v38 = vld [vmem:[#allocation15_spill] sm:$0xff] }
  0xd6   :  { %7305 = vmatpush3.bf16.msra.mxu1 %v8117_v33  ;;  %v2187_v33 = vshrl.u32 %v13902_v63, 16  ;;  %v2195_v63 = vrot.slane %v13906_v8, 5  ;;  %v13910_v8 = vld [vmem:[#allocation6_spill] sm:$0xff] }
  0xd7   :  { %7338 = vmatprep.subr.bf16.mxu1 %v9165_v4  ;;  %v13912_v47 = vshll.u32 %v13910_v8, 16 }
  0xd8   :  { %v2189_v45 = vrot.slane %v2187_v33, 5  ;;  %v8128_v33 = vld [vmem:[%s13605_s1 + $0xdc] ss:$12 sps:$4 sm:$0xff]  }
  0xd9   :  { %6731 = vmatmul.mubr.msk.bf16.gmra.mrb[52].mxu1 %vm507_vm2, %v9169_v61  ;;  %v2201_v14 = vrot.slane %v13912_v47, 6 }
  0xda   :  { %6802 = vmatmul.mubr.msk.bf16.gmra.mrb[56].mxu0 %vm507_vm2, %v9171_v7  ;;  %1242 = vmatprep.mubr.bf16.mxu1 %v13863_v62 }
  0xdb   :  { %1874 = vmatprep.mubr.bf16.mxu0 %v13863_v62 }
  0xe1   :  { %6732 = vmatmul.mubr.msk.bf16.gmra.mrb[56].mxu1 %vm507_vm2, %v9187_v28 }
  0xe2   :  { %6803 = vmatmul.mubr.msk.bf16.gmra.mrb[60].mxu0 %vm507_vm2, %v13901_v22  ;;  %1252 = vmatprep.mubr.bf16.mxu1 %v13863_v62  ;;  %v13907_v22 = vshll.u32 %v13905_v42, 16  ;;  %v2193_v42 = vor.u32 %v2192_v20, %v2189_v45  ;;  %v9244_v45 = vld [vmem:[%s13606_s0 + $0x24] sm:$0x3] }
  0xe3   :  { %2586 = vmatprep.mubr.bf16.mxu0 %v13863_v62  ;;  %13914 = vst [vmem:[#allocation26_spill] sm:$0xff] %v9244_v45  ;;  %v8126_v20 = vld [vmem:[%s13605_s1 + $0xd8] ss:$12 sps:$4 sm:$0xff]  }
  0xe4   :  { %v9203_v5 = vpop.f32.mrb[0].mxu1  ;;  %v2196_v53 = vrot.slane %v13907_v22, 6  ;;  %v13911_v22 = vshrl.u32 %v13910_v8, 16 }
  0xe5   :  { %13903 = vst [vmem:[#allocation20_spill] sm:$0xff] %v9203_v5  ;;  %v9209_v16 = vpop.f32.mrb[1].mxu1  ;;  %v2185_v5 = vsel %vm8882_vm9, %v2176_v17, %v2184_v19  ;;  %v13919_v19 = vshrl.u32 %v8305_v3, 16 }
  0xe6   :  { %13904 = vst [vmem:[#allocation18_spill] sm:$0xff] %v9209_v16  ;;  %v9215_v7 = vpop.f32.mrb[2].mxu1  ;;  %v8121_v16 = vld [vmem:[%s13605_s1 + $0xc0] ss:$12 sps:$4 sm:$0xff]   ;;  %v2197_v56 = vor.u32 %v2196_v53, %v2195_v63  ;;  %v2200_v55 = vrot.slane %v13911_v22, 5  ;;  %v13920_v22 = vshll.u32 %v8305_v3, 16 }
  0xe7   :  { %13908 = vst [vmem:[#allocation25_spill] sm:$0xff] %v9215_v7  ;;  %v9218_v39 = vpop.f32.mrb[3].mxu1  ;;  %v2175_v7 = vsel %vm8882_vm9, %v2171_v25, %v2174_v59  ;;  %v2194_v59 = vrot.slane %v2193_v42, 4  ;;  %v2205_v8 = vrot.slane %v13919_v19, 5  ;;  %v13923_v19 = vld [vmem:[#allocation7_spill] sm:$0xff] }
  0xe8   :  { %13909 = vst [vmem:[#allocation23_spill] sm:$0xff] %v9218_v39  ;;  %v13913_v39 = vld [vmem:[#allocation2_spill] sm:$0xff]  ;;  %v2199_v25 = vrot.slane %v2197_v56, 4  ;;  %v2202_v17 = vor.u32 %v2201_v14, %v2200_v55  ;;  %v2206_v47 = vrot.slane %v13920_v22, 6  ;;  %v2220_v55 = vshrl.u32 %v8956_v48, 16 }
  0xe9   :  { %6733 = vmatmul.mubr.msk.bf16.gmra.mrb[60].mxu1 %vm507_vm2, %v9207_v9  ;;  %v2198_v3 = vsel %vm8882_vm9, %v2194_v59, %v2197_v56  ;;  %v2223_v14 = vshll.u32 %v8956_v48, 16  ;;  %v9285_v56 = vld [vmem:[%s13605_s1 + $0x98] ss:$12 sps:$4 sm:$0xff]  }
  0xea   :  { %6850 = vmatmul.mubr.msk.bf16.vlgmr.msra.gmra.mrb[0].mxu0 %vm507_vm2, %v8900_v50  ;;  %7306 = vmatprep.mubr.msk.bf16.mxu1 %vm507_vm2, %v13913_v39  ;;  %v9253_v39 = vcombine.low %v2175_v7, %v2185_v5  ;;  %v2211_v50 = vshrl.u32 %v9244_v45, 16  ;;  %v8124_v7 = vld [vmem:[%s13605_s1 + $0x80] ss:$12 sps:$4 sm:$0xff]   ;;  %v13922_v5 = vld [vmem:[#allocation4_spill] sm:$0xff]  ;;  %v2203_v42 = vsel %vm8882_vm9, %v2199_v25, %v2202_v17 }
  0xeb   :  { %2596 = vmatprep.mubr.bf16.mxu0 %v13863_v62  ;;  %3273 = vmatpush1.bf16.msra.mxu0 %v8121_v16  ;;  %v9289_v25 = vcombine.low %v2198_v3, %v2203_v42  ;;  %v13929_v3 = vld [vmem:[#allocation8_spill] sm:$0xff] }
  0xec   :  { %v9249_v53 = vpop.f32.mrb[4].mxu1  ;;  %3274 = vmatprep.subr.bf16.mxu0 %v8128_v33  ;;  %13917 = vst [vmem:[#allocation5_spill] sm:$0xff] %v9253_v39  ;;  %v2213_v22 = vrot.slane %v2211_v50, 5 }
  0xed   :  { %13915 = vst [vmem:[#allocation3_spill] sm:$0xff] %v9249_v53  ;;  %v9251_v63 = vpop.f32.mrb[5].mxu1  ;;  %v2214_v53 = vshll.u32 %v9244_v45, 16 }
  0xee   :  { %13916 = vst [vmem:[#allocation27_spill] sm:$0xff] %v9251_v63  ;;  %v9255_v16 = vpop.f32.mrb[6].mxu1 }
  0xef   :  { %13918 = vst [vmem:[#allocation6_spill] sm:$0xff] %v9255_v16  ;;  %v9263_v33 = vpop.f32.mrb[7].mxu1  ;;  %3275 = vmatpush1.bf16.msra.mxu0 %v8126_v20  ;;  %v2207_v20 = vor.u32 %v2206_v47, %v2205_v8  ;;  %v13925_v8 = vshrl.u32 %v8339_v24, 16  ;;  %v2204_v16 = vrot.slane %v2202_v17, 4  ;;  %v13931_v17 = vshll.u32 %v8379_v57, 16 }
  0xf0   :  { %13921 = vst [vmem:[#allocation2_spill] sm:$0xff] %v9263_v33  ;;  %v2225_v33 = vrot.slane %v2223_v14, 6 }
  0xf1   :  { %7307 = vmatmul.mubr.msk.bf16.vlgmr.msra.gmra.mrb[64].mxu1 %vm507_vm2, %v13922_v5  ;;  %v2216_v5 = vrot.slane %v2214_v53, 6  ;;  %v2228_v50 = vrot.slane %v13925_v8, 5  ;;  %v13926_v53 = vshll.u32 %v8339_v24, 16  ;;  %v2209_v63 = vrot.slane %v2207_v20, 4 }
  0xf2   :  { %6851 = vmatmul.mubr.msk.bf16.gmra.mrb[4].mxu0 %vm507_vm2, %v9253_v39  ;;  %7339 = vmatpush3.bf16.msra.mxu1 %v9165_v4  ;;  %v2222_v4 = vrot.slane %v2220_v55, 5  ;;  %v13930_v24 = vshrl.u32 %v8379_v57, 16  ;;  %v2234_v8 = vrot.slane %v13931_v17, 6 }
  0xf3   :  { %7310 = vmatprep.mubr.msk.bf16.mxu1 %vm507_vm2, %v13923_v19  ;;  %2606 = vmatprep.mubr.bf16.mxu0 %v13863_v62  ;;  %v2229_v47 = vrot.slane %v13926_v53, 6  ;;  %v2217_v45 = vor.u32 %v2216_v5, %v2213_v22  ;;  %v13932_v22 = vld [vmem:[#allocation9_spill] sm:$0xff] }
  0xf4   :  { %7340 = vmatprep.subr.bf16.mxu1 %v8124_v7  ;;  %v9287_v59 = vpop.f32.mrb[8].mxu1  ;;  %v2226_v42 = vor.u32 %v2225_v33, %v2222_v4  ;;  %v2233_v14 = vrot.slane %v13930_v24, 5  ;;  %v9320_v33 = vld [vmem:[%s13606_s0 + $0x38] sm:$0x3] }
  0xf5   :  { %v9291_v48 = vpop.f32.mrb[9].mxu1  ;;  %v2230_v55 = vor.u32 %v2229_v47, %v2228_v50  ;;  %v2218_v5 = vsel %vm8882_vm9, %v2209_v63, %v2217_v45  ;;  %v13937_v45 = vshll.u32 %v8388_v60, 16  ;;  %v2244_v17 = vshrl.u32 %v9320_v33, 16 }
  0xf6   :  { %13924 = vst [vmem:[#allocation4_spill] sm:$0xff] %v9291_v48  ;;  %v9297_v19 = vpop.f32.mrb[10].mxu1  ;;  %7341 = vmatpush3.bf16.msra.mxu1 %v8124_v7  ;;  %v2208_v7 = vsel %vm8882_vm9, %v2204_v16, %v2207_v20  ;;  %v2227_v53 = vrot.slane %v2226_v42, 4  ;;  %v13936_v16 = vshrl.u32 %v8388_v60, 16  ;;  %v2253_v60 = vshrl.u32 %v9000_v21, 16 }
  0xf7   :  { %13927 = vst [vmem:[#allocation7_spill] sm:$0xff] %v9297_v19  ;;  %v9299_v39 = vpop.f32.mrb[11].mxu1  ;;  %7374 = vmatprep.subr.bf16.mxu1 %v9285_v56  ;;  %v9326_v50 = vcombine.low %v2208_v7, %v2218_v5  ;;  %v2232_v47 = vrot.slane %v2230_v55, 4  ;;  %v2239_v63 = vrot.slane %v13937_v45, 6  ;;  %v13940_v7 = vld [vmem:[#allocation11_spill] sm:$0xff] }
  0xf8   :  { %13928 = vst [vmem:[#allocation30_spill] sm:$0xff] %v9299_v39  ;;  %v2238_v20 = vrot.slane %v13936_v16, 5  ;;  %v2231_v42 = vsel %vm8882_vm9, %v2227_v53, %v2230_v55  ;;  %v2255_v53 = vrot.slane %v2253_v60, 5 }
  0xf9   :  { %7311 = vmatmul.mubr.msk.bf16.gmra.mrb[68].mxu1 %vm507_vm2, %v13929_v3  ;;  %v2235_v3 = vor.u32 %v2234_v8, %v2233_v14  ;;  %v2256_v8 = vshll.u32 %v9000_v21, 16  ;;  %v13943_v21 = vshll.u32 %v8431_v34, 16 }
  0xfa   :  { %6852 = vmatmul.mubr.msk.bf16.gmra.mrb[8].mxu0 %vm507_vm2, %v9289_v25  ;;  %7314 = vmatprep.mubr.msk.bf16.mxu1 %vm507_vm2, %v13932_v22  ;;  %v2247_v22 = vshll.u32 %v9320_v33, 16  ;;  %v2240_v5 = vor.u32 %v2239_v63, %v2238_v20 }
  0xfb   :  { %2616 = vmatprep.mubr.bf16.mxu0 %v13863_v62  ;;  %v2236_v14 = vsel %vm8882_vm9, %v2232_v47, %v2235_v3  ;;  %v2258_v47 = vrot.slane %v2256_v8, 6  ;;  %v2262_v19 = vrot.slane %v13943_v21, 6  ;;  %v2237_v48 = vrot.slane %v2235_v3, 4  ;;  %v13949_v21 = vld [vmem:[#allocation14_spill] sm:$0xff] }
  0xfc   :  { %v9322_v4 = vpop.f32.mrb[12].mxu1  ;;  %v2249_v16 = vrot.slane %v2247_v22, 6  ;;  %v2242_v20 = vrot.slane %v2240_v5, 4  ;;  %v13946_v22 = vld [vmem:[#allocation12_spill] sm:$0xff] }
  0xfd   :  { %13933 = vst [vmem:[#allocation8_spill] sm:$0xff] %v9322_v4  ;;  %v9324_v57 = vpop.f32.mrb[13].mxu1  ;;  %v2241_v3 = vsel %vm8882_vm9, %v2237_v48, %v2240_v5  ;;  %v13953_v48 = vshrl.u32 %v8464_v30, 16 }
  0xfe   :  { %13934 = vst [vmem:[#allocation9_spill] sm:$0xff] %v9324_v57  ;;  %v9328_v24 = vpop.f32.mrb[14].mxu1  ;;  %v13939_v57 = vld [vmem:[#allocation10_spill] sm:$0xff] }
  0xff   :  { %13935 = vst [vmem:[#allocation31_spill] sm:$0xff] %v9328_v24  ;;  %v9336_v4 = vpop.f32.mrb[15].mxu1  ;;  %v13942_v24 = vshrl.u32 %v8431_v34, 16  ;;  %v13948_v34 = vshll.u32 %v8453_v2, 16  ;;  %v2271_v5 = vrot.slane %v13953_v48, 5 }
 0x100   :  { %13938 = vst [vmem:[#allocation32_spill] sm:$0xff] %v9336_v4  ;;  %v9353_v4 = vcombine.low %v2231_v42, %v2236_v14  ;;  %v2259_v42 = vor.u32 %v2258_v47, %v2255_v53 }
 0x101   :  { %7315 = vmatmul.mubr.msk.bf16.gmra.mrb[72].mxu1 %vm507_vm2, %v13939_v57  ;;  %v2246_v57 = vrot.slane %v2244_v17, 5  ;;  %v2261_v39 = vrot.slane %v13942_v24, 5  ;;  %v13947_v24 = vshrl.u32 %v8453_v2, 16  ;;  %v2267_v8 = vrot.slane %v13948_v34, 6 }
 0x102   :  { %6853 = vmatmul.mubr.msk.bf16.gmra.mrb[12].mxu0 %vm507_vm2, %v9326_v50  ;;  %7318 = vmatprep.mubr.msk.bf16.mxu1 %vm507_vm2, %v13940_v7  ;;  %v2260_v53 = vrot.slane %v2259_v42, 4 }
 0x103   :  { %2626 = vmatprep.mubr.bf16.mxu0 %v13863_v62  ;;  %v2250_v63 = vor.u32 %v2249_v16, %v2246_v57  ;;  %v2263_v14 = vor.u32 %v2262_v19, %v2261_v39  ;;  %v2266_v60 = vrot.slane %v13947_v24, 5  ;;  %v9383_v39 = vld [vmem:[%s13606_s0 + $0x4c] sm:$0x3] }
 0x104   :  { %v9351_v45 = vpop.f32.mrb[16].mxu1  ;;  %v2277_v34 = vshrl.u32 %v9383_v39, 16 }
 0x105   :  { %v9355_v55 = vpop.f32.mrb[17].mxu1  ;;  %v2251_v57 = vsel %vm8882_vm9, %v2242_v20, %v2250_v63  ;;  %v2265_v47 = vrot.slane %v2263_v14, 4  ;;  %v13954_v20 = vshll.u32 %v8464_v30, 16  ;;  %v2264_v42 = vsel %vm8882_vm9, %v2260_v53, %v2263_v14 }
 0x106   :  { %13941 = vst [vmem:[#allocation10_spill] sm:$0xff] %v9355_v55  ;;  %v9361_v7 = vpop.f32.mrb[18].mxu1  ;;  %v9389_v16 = vcombine.low %v2241_v3, %v2251_v57  ;;  %v2286_v30 = vshrl.u32 %v9051_v23, 16  ;;  %v13957_v3 = vld [vmem:[#allocation19_spill] sm:$0xff] }
 0x107   :  { %13944 = vst [vmem:[#allocation11_spill] sm:$0xff] %v9361_v7  ;;  %v9363_v17 = vpop.f32.mrb[19].mxu1  ;;  %v2272_v63 = vrot.slane %v13954_v20, 6 }
 0x108   :  { %13945 = vst [vmem:[#allocation33_spill] sm:$0xff] %v9363_v17  ;;  %v2288_v53 = vrot.slane %v2286_v30, 5 }
 0x109   :  { %7319 = vmatmul.mubr.msk.bf16.gmra.mrb[76].mxu1 %vm507_vm2, %v13946_v22  ;;  %v2268_v22 = vor.u32 %v2267_v8, %v2266_v60  ;;  %v2289_v8 = vshll.u32 %v9051_v23, 16  ;;  %v2273_v57 = vor.u32 %v2272_v63, %v2271_v5  ;;  %v13959_v23 = vshll.u32 %v8504_v31, 16 }
 0x10a   :  { %6854 = vmatmul.mubr.msk.bf16.gmra.mrb[16].mxu0 %vm507_vm2, %v9353_v4  ;;  %7322 = vmatprep.mubr.msk.bf16.mxu1 %vm507_vm2, %v13949_v21  ;;  %v2280_v21 = vshll.u32 %v9383_v39, 16 }
 0x10b   :  { %2636 = vmatprep.mubr.bf16.mxu0 %v13863_v62  ;;  %v2269_v60 = vsel %vm8882_vm9, %v2265_v47, %v2268_v22  ;;  %v2291_v47 = vrot.slane %v2289_v8, 6  ;;  %v2295_v7 = vrot.slane %v13959_v23, 6  ;;  %v2270_v55 = vrot.slane %v2268_v22, 4 }
 0x10c   :  { %v9385_v19 = vpop.f32.mrb[20].mxu1  ;;  %v2282_v48 = vrot.slane %v2280_v21, 6  ;;  %v2275_v5 = vrot.slane %v2273_v57, 4  ;;  %v13961_v21 = vld [vmem:[#allocation21_spill] sm:$0xff] }
 0x10d   :  { %13950 = vst [vmem:[#allocation12_spill] sm:$0xff] %v9385_v19  ;;  %v9387_v2 = vpop.f32.mrb[21].mxu1  ;;  %v2274_v22 = vsel %vm8882_vm9, %v2270_v55, %v2273_v57  ;;  %v13967_v55 = vld [vmem:[#allocation13_spill] sm:$0xff] }
 0x10e   :  { %13951 = vst [vmem:[#allocation14_spill] sm:$0xff] %v9387_v2  ;;  %v9391_v24 = vpop.f32.mrb[22].mxu1  ;;  %v13956_v2 = vld [vmem:[#allocation17_spill] sm:$0xff]  ;;  %v13968_v57 = vshrl.u32 %v13967_v55, 16 }
 0x10f   :  { %13952 = vst [vmem:[#allocation34_spill] sm:$0xff] %v9391_v24  ;;  %v9399_v19 = vpop.f32.mrb[23].mxu1  ;;  %v13958_v24 = vshrl.u32 %v8504_v31, 16  ;;  %v13963_v31 = vshll.u32 %v8528_v27, 16 }
 0x110   :  { %13955 = vst [vmem:[#allocation35_spill] sm:$0xff] %v9399_v19  ;;  %v9416_v19 = vcombine.low %v2264_v42, %v2269_v60  ;;  %v2292_v42 = vor.u32 %v2291_v47, %v2288_v53 }
 0x111   :  { %7323 = vmatmul.mubr.msk.bf16.gmra.mrb[80].mxu1 %vm507_vm2, %v13956_v2  ;;  %v2279_v2 = vrot.slane %v2277_v34, 5  ;;  %v2294_v17 = vrot.slane %v13958_v24, 5  ;;  %v13962_v24 = vshrl.u32 %v8528_v27, 16  ;;  %v2300_v8 = vrot.slane %v13963_v31, 6 }
 0x112   :  { %6855 = vmatmul.mubr.msk.bf16.gmra.mrb[20].mxu0 %vm507_vm2, %v9389_v16  ;;  %7326 = vmatprep.mubr.msk.bf16.mxu1 %vm507_vm2, %v13957_v3 }
 0x113   :  { %2646 = vmatprep.mubr.bf16.mxu0 %v13863_v62  ;;  %v2283_v63 = vor.u32 %v2282_v48, %v2279_v2  ;;  %v2296_v60 = vor.u32 %v2295_v7, %v2294_v17  ;;  %v2299_v30 = vrot.slane %v13962_v24, 5  ;;  %v9446_v7 = vld [vmem:[%s13606_s0 + $0x60] sm:$0x3] }
 0x114   :  { %v9414_v20 = vpop.f32.mrb[24].mxu1  ;;  %v2310_v24 = vshrl.u32 %v9446_v7, 16  ;;  %v2313_v31 = vshll.u32 %v9446_v7, 16 }
 0x115   :  { %v9418_v14 = vpop.f32.mrb[25].mxu1  ;;  %v2284_v2 = vsel %vm8882_vm9, %v2275_v5, %v2283_v63  ;;  %v2298_v53 = vrot.slane %v2296_v60, 4  ;;  %v2301_v47 = vor.u32 %v2300_v8, %v2299_v30  ;;  %v13969_v5 = vshll.u32 %v13967_v55, 16 }
 0x116   :  { %v9424_v3 = vpop.f32.mrb[26].mxu1  ;;  %v9452_v48 = vcombine.low %v2274_v22, %v2284_v2  ;;  %v2319_v8 = vshrl.u32 %v9082_v11, 16  ;;  %v2322_v22 = vshll.u32 %v9082_v11, 16  ;;  %v2315_v55 = vrot.slane %v2313_v31, 6 }
 0x117   :  { %v9426_v34 = vpop.f32.mrb[27].mxu1  ;;  %v2305_v63 = vrot.slane %v13969_v5, 6  ;;  %v2302_v30 = vsel %vm8882_vm9, %v2298_v53, %v2301_v47  ;;  %v13972_v11 = vshll.u32 %v13886_v6, 16 }
 0x118   :  { %13960 = vst [vmem:[#allocation17_spill] sm:$0xff] %v9426_v34  ;;  %v2324_v53 = vrot.slane %v2322_v22, 6  ;;  %v2303_v34 = vrot.slane %v2301_v47, 4  ;;  %v13976_v22 = vld [vmem:[#allocation22_spill] sm:$0xff] }
 0x119   :  { %7327 = vmatmul.mubr.msk.bf16.gmra.mrb[84].mxu1 %vm507_vm2, %v13961_v21  ;;  %v2304_v21 = vrot.slane %v13968_v57, 5 }
 0x11a   :  { %6856 = vmatmul.mubr.msk.bf16.gmra.mrb[24].mxu0 %vm507_vm2, %v9416_v19  ;;  %7330 = vmatprep.mubr.msk.bf16.mxu1 %vm507_vm2, %v9143_v1  ;;  %v2293_v1 = vrot.slane %v2292_v42, 4 }
 0x11b   :  { %2656 = vmatprep.mubr.bf16.mxu0 %v13863_v62  ;;  %v2306_v2 = vor.u32 %v2305_v63, %v2304_v21 }
 0x11c   :  { %v9448_v17 = vpop.f32.mrb[28].mxu1  ;;  %v2297_v42 = vsel %vm8882_vm9, %v2293_v1, %v2296_v60  ;;  %v2321_v1 = vrot.slane %v2319_v8, 5 }
 0x11d   :  { %13964 = vst [vmem:[#allocation19_spill] sm:$0xff] %v9448_v17  ;;  %v9450_v27 = vpop.f32.mrb[29].mxu1  ;;  %v9479_v5 = vcombine.low %v2297_v42, %v2302_v30  ;;  %v2308_v21 = vrot.slane %v2306_v2, 4  ;;  %v2307_v47 = vsel %vm8882_vm9, %v2303_v34, %v2306_v2  ;;  %v13980_v34 = vld [vmem:[#allocation16_spill] sm:$0xff] }
 0x11e   :  { %13965 = vst [vmem:[#allocation21_spill] sm:$0xff] %v9450_v27  ;;  %v9454_v23 = vpop.f32.mrb[30].mxu1  ;;  %v2328_v27 = vrot.slane %v13972_v11, 6  ;;  %v2325_v31 = vor.u32 %v2324_v53, %v2321_v1  ;;  %v13981_v2 = vshrl.u32 %v13980_v34, 16 }
 0x11f   :  { %13966 = vst [vmem:[#allocation36_spill] sm:$0xff] %v9454_v23  ;;  %v9462_v17 = vpop.f32.mrb[31].mxu1 }
 0x120   :  { %13970 = vst [vmem:[#allocation13_spill] sm:$0xff] %v9462_v17  ;;  %v13971_v17 = vshrl.u32 %v13886_v6, 16  ;;  %v13975_v6 = vshll.u32 %v8598_v51, 16 }
 0x121   :  { %7331 = vmatmul.mubr.msk.bf16.gmra.mrb[88].mxu1 %vm507_vm2, %v9169_v61  ;;  %v2312_v61 = vrot.slane %v2310_v24, 5 }
 0x122   :  { %6857 = vmatmul.mubr.msk.bf16.gmra.mrb[28].mxu0 %vm507_vm2, %v9452_v48  ;;  %7334 = vmatprep.mubr.msk.bf16.mxu1 %vm507_vm2, %v9187_v28  ;;  %v2327_v23 = vrot.slane %v13971_v17, 5  ;;  %v13974_v17 = vshrl.u32 %v8598_v51, 16  ;;  %v2333_v8 = vrot.slane %v13975_v6, 6 }
 0x123   :  { %2666 = vmatprep.mubr.bf16.mxu0 %v13863_v62  ;;  %v2316_v63 = vor.u32 %v2315_v55, %v2312_v61  ;;  %v2326_v55 = vrot.slane %v2325_v31, 4  ;;  %v8129_v31 = vld [vmem:[%s13605_s1 + $0xb0] ss:$12 sps:$4 sm:$0xff]  }
 0x124   :  { %v9477_v57 = vpop.f32.mrb[32].mxu1  ;;  %v2329_v42 = vor.u32 %v2328_v27, %v2327_v23  ;;  %v2332_v30 = vrot.slane %v13974_v17, 5  ;;  %v9509_v27 = vld [vmem:[%s13606_s0 + $0x74] sm:$0x3]  ;;  %v2337_v17 = vrot.slane %v13981_v2, 5 }
 0x125   :  { %v9481_v60 = vpop.f32.mrb[33].mxu1  ;;  %v2343_v6 = vshrl.u32 %v9509_v27, 16 }
 0x126   :  { %v9487_v28 = vpop.f32.mrb[34].mxu1  ;;  %v2331_v1 = vrot.slane %v2329_v42, 4  ;;  %v2334_v53 = vor.u32 %v2333_v8, %v2332_v30  ;;  %v2330_v30 = vsel %vm8882_vm9, %v2326_v55, %v2329_v42  ;;  %v9547_v42 = vld [vmem:[%s13605_s1 + $0xc8] ss:$12 sps:$4 sm:$0xff]  }
 0x127   :  { %v9489_v24 = vpop.f32.mrb[35].mxu1 }
 0x128   :  { %13973 = vst [vmem:[#allocation37_spill] sm:$0xff] %v9489_v24  ;;  %v2335_v8 = vsel %vm8882_vm9, %v2331_v1, %v2334_v53 }
 0x129   :  { %7335 = vmatmul.mubr.msk.bf16.gmra.mrb[92].mxu1 %vm507_vm2, %v9207_v9  ;;  %v2317_v9 = vsel %vm8882_vm9, %v2308_v21, %v2316_v63  ;;  %v13982_v21 = vshll.u32 %v13980_v34, 16  ;;  %v9551_v1 = vcombine.low %v2330_v30, %v2335_v8 }
 0x12a   :  { %6858 = vmatmul.mubr.msk.bf16.gmra.mrb[32].mxu0 %vm507_vm2, %v9479_v5  ;;  %7342 = vmatprep.mubr.msk.bf16.mxu1 %vm507_vm2, %v13976_v22  ;;  %v9515_v61 = vcombine.low %v2307_v47, %v2317_v9  ;;  %v2346_v22 = vshll.u32 %v9509_v27, 16  ;;  %v2352_v47 = vshrl.u32 %v9111_v29, 16  ;;  %v2355_v9 = vshll.u32 %v9111_v29, 16 }
 0x12b   :  { %2676 = vmatprep.mubr.bf16.mxu0 %v13863_v62  ;;  %v2338_v63 = vrot.slane %v13982_v21, 6 }
 0x12c   :  { %v9511_v23 = vpop.f32.mrb[36].mxu1  ;;  %v2348_v2 = vrot.slane %v2346_v22, 6  ;;  %v2357_v21 = vrot.slane %v2355_v9, 6 }
 0x12d   :  { %13977 = vst [vmem:[#allocation22_spill] sm:$0xff] %v9511_v23  ;;  %v9513_v51 = vpop.f32.mrb[37].mxu1  ;;  %v2339_v34 = vor.u32 %v2338_v63, %v2337_v17  ;;  %v13985_v63 = vshll.u32 %v8675_v43, 16 }
 0x12e   :  { %13978 = vst [vmem:[#allocation38_spill] sm:$0xff] %v9513_v51  ;;  %v9517_v11 = vpop.f32.mrb[38].mxu1 }
 0x12f   :  { %13979 = vst [vmem:[#allocation39_spill] sm:$0xff] %v9517_v11  ;;  %v9525_v23 = vpop.f32.mrb[39].mxu1  ;;  %v2341_v11 = vrot.slane %v2339_v34, 4 }
 0x130   :  { %13983 = vst [vmem:[#allocation16_spill] sm:$0xff] %v9525_v23  ;;  %v2336_v23 = vrot.slane %v2334_v53, 4  ;;  %v13987_v53 = vshll.u32 %v13889_v13, 16 }
 0x131   :  { %7343 = vmatmul.mubr.msk.bf16.vlgmr.msra.gmra.mrb[64].mxu1 %vm507_vm2, %v8874_v58  ;;  %v2345_v58 = vrot.slane %v2343_v6, 5  ;;  %v2361_v6 = vrot.slane %v13985_v63, 6 }
 0x132   :  { %6859 = vmatmul.mubr.msk.bf16.gmra.mrb[36].mxu0 %vm507_vm2, %v9515_v61  ;;  %7375 = vmatpush3.bf16.msra.mxu1 %v9285_v56  ;;  %v2354_v56 = vrot.slane %v2352_v47, 5  ;;  %v2366_v9 = vrot.slane %v13987_v53, 6  ;;  %v2388_v53 = vshll.u32 %v9139_v41, 16 }
 0x133   :  { %7346 = vmatprep.mubr.msk.bf16.mxu1 %vm507_vm2, %v8924_v12  ;;  %2686 = vmatprep.mubr.bf16.mxu0 %v13863_v62  ;;  %v13984_v12 = vshrl.u32 %v8675_v43, 16  ;;  %v2349_v51 = vor.u32 %v2348_v2, %v2345_v58  ;;  %v13986_v43 = vshrl.u32 %v13889_v13, 16  ;;  %v9582_v58 = vld [vmem:[%s13606_s0 + $0x88] sm:$0x3] }
 0x134   :  { %7376 = vmatprep.subr.bf16.mxu1 %v8129_v31  ;;  %v9549_v55 = vpop.f32.mrb[40].mxu1  ;;  %v2358_v30 = vor.u32 %v2357_v21, %v2354_v56  ;;  %v2376_v63 = vshrl.u32 %v9582_v58, 16 }
 0x135   :  { %v9553_v29 = vpop.f32.mrb[41].mxu1  ;;  %v2360_v17 = vrot.slane %v13984_v12, 5  ;;  %v2365_v47 = vrot.slane %v13986_v43, 5 }
 0x136   :  { %v9559_v22 = vpop.f32.mrb[42].mxu1  ;;  %7377 = vmatpush3.bf16.msra.mxu1 %v8129_v31  ;;  %v2340_v31 = vsel %vm8882_vm9, %v2336_v23, %v2339_v34  ;;  %v13990_v23 = vshrl.u32 %v13894_v26, 16 }
 0x137   :  { %v9561_v24 = vpop.f32.mrb[43].mxu1  ;;  %7410 = vmatprep.subr.bf16.mxu1 %v9547_v42  ;;  %v2362_v8 = vor.u32 %v2361_v6, %v2360_v17  ;;  %v2367_v12 = vor.u32 %v2366_v9, %v2365_v47  ;;  %v2379_v6 = vshll.u32 %v9582_v58, 16 }
 0x138   :  { %v2370_v34 = vrot.slane %v13990_v23, 5 }
 0x139   :  { %7347 = vmatmul.mubr.msk.bf16.gmra.mrb[68].mxu1 %vm507_vm2, %v8961_v0  ;;  %v2350_v0 = vsel %vm8882_vm9, %v2341_v11, %v2349_v51  ;;  %v2364_v21 = vrot.slane %v2362_v8, 4  ;;  %v13991_v51 = vshll.u32 %v13894_v26, 16  ;;  %v2385_v26 = vshrl.u32 %v9139_v41, 16 }
 0x13a   :  { %6860 = vmatmul.mubr.msk.bf16.gmra.mrb[40].mxu0 %vm507_vm2, %v9551_v1  ;;  %7350 = vmatprep.mubr.msk.bf16.mxu1 %vm507_vm2, %v8982_v35  ;;  %v9588_v56 = vcombine.low %v2340_v31, %v2350_v0  ;;  %v2359_v35 = vrot.slane %v2358_v30, 4  ;;  %v2381_v31 = vrot.slane %v2379_v6, 6  ;;  %v13996_v6 = vshll.u32 %v8789_v52, 16 }
 0x13b   :  { %2696 = vmatprep.mubr.bf16.mxu0 %v13863_v62  ;;  %v2371_v11 = vrot.slane %v13991_v51, 6  ;;  %v2368_v47 = vsel %vm8882_vm9, %v2364_v21, %v2367_v12  ;;  %v2387_v23 = vrot.slane %v2385_v26, 5  ;;  %v2390_v51 = vrot.slane %v2388_v53, 6 }
 0x13c   :  { %v9584_v2 = vpop.f32.mrb[44].mxu1  ;;  %v2363_v30 = vsel %vm8882_vm9, %v2359_v35, %v2362_v8  ;;  %v13993_v8 = vshrl.u32 %v8839_v37, 16  ;;  %v13994_v21 = vshll.u32 %v8839_v37, 16 }
 0x13d   :  { %v9586_v13 = vpop.f32.mrb[45].mxu1  ;;  %v2372_v9 = vor.u32 %v2371_v11, %v2370_v34  ;;  %v9613_v0 = vcombine.low %v2363_v30, %v2368_v47  ;;  %v13995_v11 = vshrl.u32 %v8789_v52, 16  ;;  %v2399_v30 = vrot.slane %v13996_v6, 6 }
 0x13e   :  { %13988 = vst [vmem:[#allocation40_spill] sm:$0xff] %v9586_v13  ;;  %v9590_v17 = vpop.f32.mrb[46].mxu1  ;;  %v2393_v35 = vrot.slane %v13993_v8, 5 }
 0x13f   :  { %13989 = vst [vmem:[#allocation41_spill] sm:$0xff] %v9590_v17  ;;  %v9598_v43 = vpop.f32.mrb[47].mxu1  ;;  %v2369_v17 = vrot.slane %v2367_v12, 4  ;;  %v2374_v41 = vrot.slane %v2372_v9, 4  ;;  %v9637_v12 = vld [vmem:[%s13606_s0 + $0x9c] sm:$0x3] }
 0x140   :  { %13992 = vst [vmem:[#allocation42_spill] sm:$0xff] %v9598_v43  ;;  %v2394_v43 = vrot.slane %v13994_v21, 6 }
 0x141   :  { %7351 = vmatmul.mubr.msk.bf16.gmra.mrb[72].mxu1 %vm507_vm2, %v9002_v54  ;;  %v2378_v54 = vrot.slane %v2376_v63, 5  ;;  %v2398_v63 = vrot.slane %v13995_v11, 5  ;;  %v2373_v37 = vsel %vm8882_vm9, %v2369_v17, %v2372_v9  ;;  %v2409_v17 = vshrl.u32 %v9637_v12, 16 }
 0x142   :  { %6861 = vmatmul.mubr.msk.bf16.gmra.mrb[44].mxu0 %vm507_vm2, %v9588_v56  ;;  %7354 = vmatprep.mubr.msk.bf16.mxu1 %vm507_vm2, %v9029_v46  ;;  %v2391_v46 = vor.u32 %v2390_v51, %v2387_v23  ;;  %v2395_v34 = vor.u32 %v2394_v43, %v2393_v35 }
 0x143   :  { %2706 = vmatprep.mubr.bf16.mxu0 %v13863_v62  ;;  %v2382_v13 = vor.u32 %v2381_v31, %v2378_v54  ;;  %v2400_v26 = vor.u32 %v2399_v30, %v2398_v63  ;;  %v13998_v54 = vshll.u32 %v8800_v10, 16  ;;  %v2411_v51 = vrot.slane %v2409_v17, 5 }
 0x144   :  { %v2392_v52 = vrot.slane %v2391_v46, 4  ;;  %v2397_v47 = vrot.slane %v2395_v34, 4 }
 0x145   :  { %v2404_v31 = vrot.slane %v13998_v54, 6 }
 0x146   :  { %v2396_v9 = vsel %vm8882_vm9, %v2392_v52, %v2395_v34 }
 0x149   :  { %7355 = vmatmul.mubr.msk.bf16.gmra.mrb[76].mxu1 %vm507_vm2, %v9053_v32  ;;  %v2383_v32 = vsel %vm8882_vm9, %v2374_v41, %v2382_v13  ;;  %v2412_v13 = vshll.u32 %v9637_v12, 16 }
 0x14a   :  { %6862 = vmatmul.mubr.msk.bf16.gmra.mrb[48].mxu0 %vm507_vm2, %v9613_v0  ;;  %7358 = vmatprep.mubr.msk.bf16.mxu1 %vm507_vm2, %v9069_v40  ;;  %v9639_v43 = vcombine.low %v2373_v37, %v2383_v32  ;;  %v13997_v40 = vshrl.u32 %v8800_v10, 16  ;;  %v2401_v10 = vsel %vm8882_vm9, %v2397_v47, %v2400_v26 }
 0x14b   :  { %2716 = vmatprep.mubr.bf16.mxu0 %v13863_v62  ;;  %v2414_v8 = vrot.slane %v2412_v13, 6  ;;  %v9658_v35 = vcombine.low %v2396_v9, %v2401_v10  ;;  %v14003_v13 = vld [vmem:[#allocation28_spill] sm:$0xff]  ;;  %v14004_v9 = vld [vmem:[#allocation29_spill] sm:$0xff] }
 0x14c   :  { %v2403_v53 = vrot.slane %v13997_v40, 5 }
 0x14d   :  { %v2415_v41 = vor.u32 %v2414_v8, %v2411_v51  ;;  %v8138_v51 = vld [vmem:[%s13606_s0 + $0x18] sm:$0xf] }
 0x14e   :  { %v2405_v23 = vor.u32 %v2404_v31, %v2403_v53  ;;  %v14002_v31 = vld [vmem:[#allocation24_spill] sm:$0xff]  ;;  %v3046_v8 = vrot.slane %v8138_v51, 6 }
 0x14f   :  { %v3042_v17 = vrot.slane %v14002_v31, 6  ;;  %v8143_v51 = vld [vmem:[%s13606_s0 + $0x34] sm:$0xf] }
 0x150   :  { %v2407_v21 = vrot.slane %v2405_v23, 4 }
 0x151   :  { %7359 = vmatmul.mubr.msk.bf16.gmra.mrb[80].mxu1 %vm507_vm2, %v8741_v15  ;;  %v2402_v15 = vrot.slane %v2400_v26, 4  ;;  %v8137_v26 = vld [vmem:[%s13606_s0 + $0xc] sm:$0xf] }
 0x152   :  { %6863 = vmatmul.mubr.msk.bf16.gmra.mrb[52].mxu0 %vm507_vm2, %v9639_v43  ;;  %7362 = vmatprep.mubr.msk.bf16.mxu1 %vm507_vm2, %v9098_v18  ;;  %v8135_v18 = vld [vmem:[%s13606_s0 + $0x4] sm:$0xf]  ;;  %v2416_v11 = vsel %vm8882_vm9, %v2407_v21, %v2415_v41  ;;  %v3039_v40 = vrot.slane %v8137_v26, 6 }
 0x153   :  { %2726 = vmatprep.mubr.bf16.mxu0 %v13863_v62  ;;  %v3033_v46 = vrot.slane %v8135_v18, 6  ;;  %v2406_v34 = vsel %vm8882_vm9, %v2402_v15, %v2405_v23  ;;  %v3005_v15 = vld [vmem:[%s13606_s0 + $0x14] sm:$0xc]  ;;  %v3048_v18 = vrot.slane %v3046_v8, 4  ;;  %vm10901_vm9 = vmand %vm4268_vm15, %vm4269_vm14 }
 0x154   :  { %v9677_v63 = vcombine.low %v2406_v34, %v2416_v11  ;;  %v3041_v54 = vrot.slane %v3039_v40, 4  ;;  %v6883_v41 = vrot.slane %v3005_v15, 10  ;;  %v8131_v11 = vld [vmem:[%s13605_s1 + $0xe0] ss:$12 sps:$4 sm:$0xff]   ;;  %vm10957_vm15 = vmand %vm4271_vm1, %vm4423_vm5 }
 0x155   :  { %v3035_v6 = vrot.slane %v3033_v46, 4 }
 0x156   :  { %v3043_v23 = vsel %vm9682_vm12, %v3041_v54, %v3042_v17 }
 0x159   :  { %7363 = vmatmul.mubr.msk.bf16.gmra.mrb[84].mxu1 %vm507_vm2, %v13888_v44  ;;  %v3004_v44 = vld [vmem:[%s13606_s0] sm:$0xc] }
 0x15a   :  { %6864 = vmatmul.mubr.msk.bf16.gmra.mrb[56].mxu0 %vm507_vm2, %v9658_v35  ;;  %7366 = vmatprep.mubr.msk.bf16.mxu1 %vm507_vm2, %v9127_v49  ;;  %v6882_v30 = vrot.slane %v3004_v44, 10  ;;  %v8136_v49 = vld [vmem:[%s13606_s0 + $0x8] sm:$0xf]  ;;  %v14005_v44 = vld [vmem:[#allocation5_spill] sm:$0xff] }
 0x15b   :  { %2736 = vmatprep.mubr.bf16.mxu0 %v13863_v62  ;;  %v3036_v37 = vrot.slane %v8136_v49, 6  ;;  %v8140_v49 = vld [vmem:[%s13606_s0 + $0x20] sm:$0xf] }
 0x15c   :  { %v3034_v52 = vsel %vm9682_vm12, %v6882_v30, %v3033_v46  ;;  %v8139_v46 = vld [vmem:[%s13606_s0 + $0x1c] sm:$0xf] }
 0x15d   :  { %v3037_v47 = vsel %vm9682_vm12, %v3035_v6, %v3036_v37  ;;  %v3038_v53 = vrot.slane %v3036_v37, 4  ;;  %v3049_v34 = vrot.slane %v8139_v46, 6  ;;  %v3047_v6 = vsel %vm9682_vm12, %v6883_v41, %v3046_v8 }
 0x15e   :  { %v3052_v37 = vrot.slane %v8140_v49, 6  ;;  %v3065_v8 = vrot.slane %v8143_v51, 6 }
 0x15f   :  { %v3040_v10 = vsel %vm9682_vm12, %v3038_v53, %v3039_v40  ;;  %v3050_v30 = vsel %vm9682_vm12, %v3048_v18, %v3049_v34  ;;  %v8141_v53 = vld [vmem:[%s13606_s0 + $0x2c] sm:$0xf]  ;;  %v3068_v18 = vrot.slane %v9320_v33, 6  ;;  %v8144_v33 = vld [vmem:[%s13606_s0 + $0x40] sm:$0xf] }
 0x160   :  { %v9720_v21 = vcombine.low %v3040_v10, %v3043_v23  ;;  %v3059_v54 = vrot.slane %v8141_v53, 6  ;;  %v3067_v41 = vrot.slane %v3065_v8, 4 }
 0x161   :  { %7367 = vmatmul.mubr.msk.bf16.gmra.mrb[88].mxu1 %vm507_vm2, %v13892_v36  ;;  %v9700_v36 = vcombine.low %v3034_v52, %v3037_v47  ;;  %v3054_v52 = vrot.slane %v3052_v37, 4  ;;  %v14006_v47 = vld [vmem:[#allocation26_spill] sm:$0xff] }
 0x162   :  { %6865 = vmatmul.mubr.msk.bf16.gmra.mrb[60].mxu0 %vm507_vm2, %v9677_v63  ;;  %7370 = vmatprep.mubr.msk.bf16.mxu1 %vm507_vm2, %v14001_v38  ;;  %v9743_v38 = vcombine.low %v3047_v6, %v3050_v30  ;;  %v3061_v17 = vrot.slane %v3059_v54, 4  ;;  %v3069_v46 = vsel %vm9682_vm12, %v3067_v41, %v3068_v18  ;;  %v8145_v6 = vld [vmem:[%s13606_s0 + $0x44] sm:$0xf]  ;;  %v3094_v18 = vrot.slane %v9446_v7, 6  ;;  %v8150_v7 = vld [vmem:[%s13606_s0 + $0x68] sm:$0xf] }
 0x163   :  { %3304 = vmatprep.mubr.bf16.mxu0 %v13863_v62  ;;  %v3075_v30 = vrot.slane %v8145_v6, 6 }
 0x169   :  { %7371 = vmatmul.mubr.msk.bf16.gmra.mrb[92].mxu1 %vm507_vm2, %v14003_v13  ;;  %v8142_v13 = vld [vmem:[%s13606_s0 + $0x30] sm:$0xf] }
 0x16a   :  { %6920 = vmatmul.mubr.msk.bf16.vlgmr.msra.gmra.mrb[0].mxu0 %vm507_vm2, %v9700_v36  ;;  %7378 = vmatprep.mubr.msk.bf16.mxu1 %vm507_vm2, %v14004_v9  ;;  %v3062_v9 = vrot.slane %v8142_v13, 6 }
 0x16b   :  { %3314 = vmatprep.mubr.bf16.mxu0 %v13863_v62 }
 0x16c   :  { %v3063_v23 = vsel %vm9682_vm12, %v3061_v17, %v3062_v9  ;;  %v3064_v15 = vrot.slane %v3062_v9, 4 }
 0x171   :  { %7379 = vmatmul.mubr.msk.bf16.vlgmr.msra.gmra.mrb[64].mxu1 %vm507_vm2, %v14005_v44 }
 0x172   :  { %6921 = vmatmul.mubr.msk.bf16.gmra.mrb[4].mxu0 %vm507_vm2, %v9720_v21  ;;  %7411 = vmatpush3.bf16.msra.mxu1 %v9547_v42  ;;  %v3051_v42 = vrot.slane %v3049_v34, 4  ;;  %v3072_v34 = vrot.slane %v8144_v33, 6 }
 0x173   :  { %7382 = vmatprep.mubr.msk.bf16.mxu1 %vm507_vm2, %v9289_v25  ;;  %3324 = vmatprep.mubr.bf16.mxu0 %v13863_v62  ;;  %v3055_v25 = vrot.slane %v14006_v47, 6  ;;  %v3077_v47 = vrot.slane %v3075_v30, 4 }
 0x174   :  { %7412 = vmatprep.subr.bf16.mxu1 %v8131_v11  ;;  %v3053_v26 = vsel %vm9682_vm12, %v3051_v42, %v3052_v37  ;;  %v3074_v44 = vrot.slane %v3072_v34, 4  ;;  %v8146_v42 = vld [vmem:[%s13606_s0 + $0x48] sm:$0xf] }
 0x175   :  { %v3056_v40 = vsel %vm9682_vm12, %v3054_v52, %v3055_v25  ;;  %v3078_v52 = vrot.slane %v8146_v42, 6 }
 0x176   :  { %7413 = vmatpush3.bf16.msra.mxu1 %v8131_v11  ;;  %v9763_v31 = vcombine.low %v3053_v26, %v3056_v40  ;;  %v3076_v37 = vsel %vm9682_vm12, %v3074_v44, %v3075_v30  ;;  %v3081_v26 = vrot.slane %v9383_v39, 6  ;;  %v8147_v39 = vld [vmem:[%s13606_s0 + $0x54] sm:$0xf] }
 0x177   :  { %v3080_v25 = vrot.slane %v3078_v52, 4  ;;  %v3085_v53 = vrot.slane %v8147_v39, 6 }
 0x179   :  { %7383 = vmatmul.mubr.msk.bf16.gmra.mrb[68].mxu1 %vm507_vm2, %v9326_v50  ;;  %v3006_v50 = vld [vmem:[%s13606_s0 + $0x28] sm:$0xc]  ;;  %v3082_v40 = vsel %vm9682_vm12, %v3080_v25, %v3081_v26  ;;  %v8152_v25 = vld [vmem:[%s13606_s0 + $0x70] sm:$0xf] }
 0x17a   :  { %6922 = vmatmul.mubr.msk.bf16.gmra.mrb[8].mxu0 %vm507_vm2, %v9743_v38  ;;  %7386 = vmatprep.mubr.msk.bf16.mxu1 %vm507_vm2, %v9353_v4  ;;  %v6884_v4 = vrot.slane %v3006_v50, 10  ;;  %v3087_v50 = vrot.slane %v3085_v53, 4  ;;  %v3104_v26 = vrot.slane %v8152_v25, 6 }
 0x17b   :  { %3334 = vmatprep.mubr.bf16.mxu0 %v13863_v62 }
 0x17c   :  { %v3060_v10 = vsel %vm9682_vm12, %v6884_v4, %v3059_v54  ;;  %v8148_v4 = vld [vmem:[%s13606_s0 + $0x58] sm:$0xf] }
 0x17d   :  { %v3088_v17 = vrot.slane %v8148_v4, 6 }
 0x17f   :  { %v3089_v9 = vsel %vm9682_vm12, %v3087_v50, %v3088_v17 }
 0x181   :  { %7387 = vmatmul.mubr.msk.bf16.gmra.mrb[72].mxu1 %vm507_vm2, %v9389_v16  ;;  %v9782_v16 = vcombine.low %v3060_v10, %v3063_v23  ;;  %v8149_v10 = vld [vmem:[%s13606_s0 + $0x5c] sm:$0xf] }
 0x182   :  { %6923 = vmatmul.mubr.msk.bf16.gmra.mrb[12].mxu0 %vm507_vm2, %v9763_v31  ;;  %7390 = vmatprep.mubr.msk.bf16.mxu1 %vm507_vm2, %v9416_v19  ;;  %v3066_v19 = vsel %vm9682_vm12, %v3064_v15, %v3065_v8  ;;  %v3091_v23 = vrot.slane %v8149_v10, 6  ;;  %v3090_v15 = vrot.slane %v3088_v17, 4 }
 0x183   :  { %3344 = vmatprep.mubr.bf16.mxu0 %v13863_v62  ;;  %v9802_v11 = vcombine.low %v3066_v19, %v3069_v46 }
 0x184   :  { %v3093_v41 = vrot.slane %v3091_v23, 4  ;;  %v3092_v46 = vsel %vm9682_vm12, %v3090_v15, %v3091_v23 }
 0x186   :  { %v3095_v33 = vsel %vm9682_vm12, %v3093_v41, %v3094_v18  ;;  %v8154_v41 = vld [vmem:[%s13606_s0 + $0x80] sm:$0xf] }
 0x187   :  { %v3114_v18 = vrot.slane %v8154_v41, 6 }
 0x189   :  { %7391 = vmatmul.mubr.msk.bf16.gmra.mrb[76].mxu1 %vm507_vm2, %v9452_v48  ;;  %v3007_v48 = vld [vmem:[%s13606_s0 + $0x3c] sm:$0xc] }
 0x18a   :  { %6924 = vmatmul.mubr.msk.bf16.gmra.mrb[16].mxu0 %vm507_vm2, %v9782_v16  ;;  %7394 = vmatprep.mubr.msk.bf16.mxu1 %vm507_vm2, %v9479_v5  ;;  %v6885_v5 = vrot.slane %v3007_v48, 10 }
 0x18b   :  { %3354 = vmatprep.mubr.bf16.mxu0 %v13863_v62 }
 0x18c   :  { %v3073_v49 = vsel %vm9682_vm12, %v6885_v5, %v3072_v34  ;;  %v3098_v34 = vrot.slane %v8150_v7, 6  ;;  %v9892_v5 = vcombine.low %v3092_v46, %v3095_v33 }
 0x18e   :  { %v3100_v30 = vrot.slane %v3098_v34, 4 }
 0x191   :  { %7395 = vmatmul.mubr.msk.bf16.gmra.mrb[80].mxu1 %vm507_vm2, %v9515_v61  ;;  %v9821_v61 = vcombine.low %v3073_v49, %v3076_v37  ;;  %v8151_v49 = vld [vmem:[%s13606_s0 + $0x6c] sm:$0xf] }
 0x192   :  { %6925 = vmatmul.mubr.msk.bf16.gmra.mrb[20].mxu0 %vm507_vm2, %v9802_v11  ;;  %7398 = vmatprep.mubr.msk.bf16.mxu1 %vm507_vm2, %v9551_v1  ;;  %v3079_v1 = vsel %vm9682_vm12, %v3077_v47, %v3078_v52  ;;  %v3101_v37 = vrot.slane %v8151_v49, 6  ;;  %v3120_v49 = vrot.slane %v9582_v58, 6  ;;  %v8156_v58 = vld [vmem:[%s13606_s0 + $0x90] sm:$0xf] }
 0x193   :  { %3364 = vmatprep.mubr.bf16.mxu0 %v13863_v62  ;;  %v9841_v54 = vcombine.low %v3079_v1, %v3082_v40 }
 0x194   :  { %v3102_v47 = vsel %vm9682_vm12, %v3100_v30, %v3101_v37 }
 0x199   :  { %7399 = vmatmul.mubr.msk.bf16.gmra.mrb[84].mxu1 %vm507_vm2, %v9588_v56  ;;  %v3008_v56 = vld [vmem:[%s13606_s0 + $0x50] sm:$0xc] }
 0x19a   :  { %6926 = vmatmul.mubr.msk.bf16.gmra.mrb[24].mxu0 %vm507_vm2, %v9821_v61  ;;  %7402 = vmatprep.mubr.msk.bf16.mxu1 %vm507_vm2, %v9613_v0  ;;  %v6886_v0 = vrot.slane %v3008_v56, 10  ;;  %v3107_v56 = vrot.slane %v9509_v27, 6  ;;  %v8153_v27 = vld [vmem:[%s13606_s0 + $0x7c] sm:$0xf] }
 0x19b   :  { %3374 = vmatprep.mubr.bf16.mxu0 %v13863_v62  ;;  %v3111_v17 = vrot.slane %v8153_v27, 6 }
 0x19c   :  { %v3086_v13 = vsel %vm9682_vm12, %v6886_v0, %v3085_v53  ;;  %v3106_v53 = vrot.slane %v3104_v26, 4 }
 0x19d   :  { %v9864_v8 = vcombine.low %v3086_v13, %v3089_v9  ;;  %v3113_v15 = vrot.slane %v3111_v17, 4 }
 0x19e   :  { %v3108_v4 = vsel %vm9682_vm12, %v3106_v53, %v3107_v56 }
 0x19f   :  { %v3115_v7 = vsel %vm9682_vm12, %v3113_v15, %v3114_v18 }
 0x1a1   :  { %7403 = vmatmul.mubr.msk.bf16.gmra.mrb[88].mxu1 %vm507_vm2, %v9639_v43 }
 0x1a2   :  { %6927 = vmatmul.mubr.msk.bf16.gmra.mrb[28].mxu0 %vm507_vm2, %v9841_v54  ;;  %7406 = vmatprep.mubr.msk.bf16.mxu1 %vm507_vm2, %v9658_v35 }
 0x1a3   :  { %3384 = vmatprep.mubr.bf16.mxu0 %v13863_v62 }
 0x1a4   :  { %v9860_v43 = vpop.f32.mrb[48].mxu1 }
 0x1a5   :  { %v9862_v51 = vpop.f32.mrb[49].mxu1 }
 0x1a6   :  { %v9866_v35 = vpop.f32.mrb[50].mxu1 }
 0x1a7   :  { %v9869_v19 = vpop.f32.mrb[51].mxu1 }
 0x1a9   :  { %7407 = vmatmul.mubr.msk.bf16.gmra.mrb[92].mxu1 %vm507_vm2, %v9677_v63  ;;  %v3009_v63 = vld [vmem:[%s13606_s0 + $0x64] sm:$0xc] }
 0x1aa   :  { %6928 = vmatmul.mubr.msk.bf16.gmra.mrb[32].mxu0 %vm507_vm2, %v9864_v8  ;;  %7414 = vmatprep.mubr.msk.bf16.mxu1 %vm507_vm2, %v9700_v36  ;;  %v6887_v6 = vrot.slane %v3009_v63, 10 }
 0x1ab   :  { %3394 = vmatprep.mubr.bf16.mxu0 %v13863_v62 }
 0x1ac   :  { %v9888_v48 = vpop.f32.mrb[52].mxu1  ;;  %v3099_v52 = vsel %vm9682_vm12, %v6887_v6, %v3098_v34  ;;  %v8155_v34 = vld [vmem:[%s13606_s0 + $0x84] sm:$0xf] }
 0x1ad   :  { %v9890_v36 = vpop.f32.mrb[53].mxu1  ;;  %v6908_v40 = vcombine.low %v3099_v52, %v3102_v47  ;;  %v3117_v63 = vrot.slane %v8155_v34, 6  ;;  %v3124_v52 = vrot.slane %v8156_v58, 6 }
 0x1ae   :  { %v9894_v44 = vpop.f32.mrb[54].mxu1 }
 0x1af   :  { %v9899_v42 = vpop.f32.mrb[55].mxu1  ;;  %v3119_v30 = vrot.slane %v3117_v63, 4 }
 0x1b1   :  { %7415 = vmatmul.mubr.msk.bf16.vlgmr.msra.gmra.mrb[64].mxu1 %vm507_vm2, %v9720_v21 }
 0x1b2   :  { %6929 = vmatmul.mubr.msk.bf16.gmra.mrb[36].mxu0 %vm507_vm2, %v9892_v5  ;;  %7418 = vmatprep.mubr.msk.bf16.mxu1 %vm507_vm2, %v9743_v38  ;;  %v3103_v38 = vrot.slane %v3101_v37, 4  ;;  %v3121_v37 = vsel %vm9682_vm12, %v3119_v30, %v3120_v49  ;;  %v14016_v49 = vld [vmem:[#allocation18_spill] sm:$0xff] }
 0x1b3   :  { %3404 = vmatprep.mubr.bf16.mxu0 %v13863_v62 }
 0x1b4   :  { %v9915_v21 = vpop.f32.mrb[56].mxu1  ;;  %v3105_v50 = vsel %vm9682_vm12, %v3103_v38, %v3104_v26  ;;  %v8157_v26 = vld [vmem:[%s13606_s0 + $0x94] sm:$0xf] }
 0x1b5   :  { %14007 = vst [vmem:[#allocation15_spill] sm:$0xff] %v9915_v21  ;;  %v9917_v1 = vpop.f32.mrb[57].mxu1  ;;  %v6909_v9 = vcombine.low %v3105_v50, %v3108_v4  ;;  %v3127_v38 = vrot.slane %v8157_v26, 6  ;;  %v8158_v50 = vld [vmem:[%s13606_s0 + $0x98] sm:$0xf] }
 0x1b6   :  { %14008 = vst [vmem:[#allocation24_spill] sm:$0xff] %v9917_v1  ;;  %v9919_v39 = vpop.f32.mrb[58].mxu1  ;;  %v3130_v4 = vrot.slane %v8158_v50, 6 }
 0x1b7   :  { %14009 = vst [vmem:[#allocation28_spill] sm:$0xff] %v9919_v39  ;;  %v9922_v0 = vpop.f32.mrb[59].mxu1 }
 0x1b8   :  { %14010 = vst [vmem:[#allocation29_spill] sm:$0xff] %v9922_v0 }
 0x1b9   :  { %7419 = vmatmul.mubr.msk.bf16.gmra.mrb[68].mxu1 %vm507_vm2, %v9763_v31  ;;  %v3010_v31 = vld [vmem:[%s13606_s0 + $0x78] sm:$0xc] }
 0x1ba   :  { %6930 = vmatmul.mubr.msk.bf16.gmra.mrb[40].mxu0 %vm507_vm2, %v6908_v40  ;;  %7422 = vmatprep.mubr.msk.bf16.mxu1 %vm507_vm2, %v9782_v16  ;;  %v6888_v23 = vrot.slane %v3010_v31, 10  ;;  %v3133_v31 = vrot.slane %v9637_v12, 6  ;;  %v3724_v12 = vlaneseq }
 0x1bb   :  { %3414 = vmatprep.mubr.bf16.mxu0 %v13863_v62 }
 0x1bc   :  { %v9940_v13 = vpop.f32.mrb[60].mxu1  ;;  %v3112_v33 = vsel %vm9682_vm12, %v6888_v23, %v3111_v17  ;;  %v3129_v17 = vrot.slane %v3127_v38, 4 }
 0x1bd   :  { %14011 = vst [vmem:[#allocation5_spill] sm:$0xff] %v9940_v13  ;;  %v9942_v16 = vpop.f32.mrb[61].mxu1  ;;  %v6910_v6 = vcombine.low %v3112_v33, %v3115_v7 }
 0x1be   :  { %14012 = vst [vmem:[#allocation26_spill] sm:$0xff] %v9942_v16  ;;  %v9944_v10 = vpop.f32.mrb[62].mxu1  ;;  %v14062_v16 = vld [vmem:[#allocation16_spill] sm:$0xff] }
 0x1bf   :  { %14013 = vst [vmem:[#allocation43_spill] sm:$0xff] %v9944_v10  ;;  %v9949_v46 = vpop.f32.mrb[63].mxu1 }
 0x1c0   :  { %14014 = vst [vmem:[#allocation44_spill] sm:$0xff] %v9949_v46 }
 0x1c1   :  { %7423 = vmatmul.mubr.msk.bf16.gmra.mrb[72].mxu1 %vm507_vm2, %v9802_v11  ;;  %v3116_v11 = vrot.slane %v3114_v18, 4 }
 0x1c2   :  { %6931 = vmatmul.mubr.msk.bf16.gmra.mrb[44].mxu0 %vm507_vm2, %v6909_v9  ;;  %7426 = vmatprep.mubr.msk.bf16.mxu1 %vm507_vm2, %v9821_v61 }
 0x1c3   :  { %3424 = vmatprep.mubr.bf16.mxu0 %v13863_v62  ;;  %v3118_v61 = vsel %vm9682_vm12, %v3116_v11, %v3117_v63 }
 0x1c4   :  { %v6911_v47 = vcombine.low %v3118_v61, %v3121_v37 }
 0x1c9   :  { %7427 = vmatmul.mubr.msk.bf16.gmra.mrb[76].mxu1 %vm507_vm2, %v9841_v54  ;;  %v3011_v54 = vld [vmem:[%s13606_s0 + $0x8c] sm:$0xc] }
 0x1ca   :  { %6932 = vmatmul.mubr.msk.bf16.gmra.mrb[48].mxu0 %vm507_vm2, %v6910_v6  ;;  %7430 = vmatprep.mubr.msk.bf16.mxu1 %vm507_vm2, %v9864_v8  ;;  %v6889_v25 = vrot.slane %v3011_v54, 10  ;;  %v3126_v8 = vrot.slane %v3124_v52, 4 }
 0x1cb   :  { %3434 = vmatprep.mubr.bf16.mxu0 %v13863_v62 }
 0x1cc   :  { %v3125_v53 = vsel %vm9682_vm12, %v6889_v25, %v3124_v52  ;;  %v3128_v56 = vsel %vm9682_vm12, %v3126_v8, %v3127_v38  ;;  %v14017_v52 = vld [vmem:[#allocation25_spill] sm:$0xff]  ;;  %v14018_v8 = vld [vmem:[#allocation23_spill] sm:$0xff] }
 0x1cd   :  { %v6912_v27 = vcombine.low %v3125_v53, %v3128_v56 }
 0x1d1   :  { %7431 = vmatmul.mubr.msk.bf16.gmra.mrb[80].mxu1 %vm507_vm2, %v9892_v5  ;;  %v3132_v5 = vrot.slane %v3130_v4, 4 }
 0x1d2   :  { %6933 = vmatmul.mubr.msk.bf16.gmra.mrb[52].mxu0 %vm507_vm2, %v6911_v47  ;;  %7434 = vmatprep.mubr.msk.bf16.mxu1 %vm507_vm2, %v6908_v40  ;;  %v3131_v40 = vsel %vm9682_vm12, %v3129_v17, %v3130_v4 }
 0x1d3   :  { %3444 = vmatprep.mubr.bf16.mxu0 %v13863_v62  ;;  %v3134_v23 = vsel %vm9682_vm12, %v3132_v5, %v3133_v31  ;;  %vm4527_vm12 = vsmask.f32 5376 }
 0x1d4   :  { %v6913_v15 = vcombine.low %v3131_v40, %v3134_v23  ;;  %v14019_v23 = vld [vmem:[#allocation3_spill] sm:$0xff]  ;;  %vm10976_vm5 = vmand %vm4526_vm11, %vm4527_vm12 }
 0x1d9   :  { %7435 = vmatmul.mubr.msk.bf16.gmra.mrb[84].mxu1 %vm507_vm2, %v6909_v9  ;;  %v3725_v9 = vshrl.u32 %v3724_v12, 7 }
 0x1da   :  { %6934 = vmatmul.mubr.msk.bf16.gmra.mrb[56].mxu0 %vm507_vm2, %v6912_v27  ;;  %7438 = vmatprep.mubr.msk.bf16.mxu1 %vm507_vm2, %v6910_v6  ;;  %v14015_v6 = vld [vmem:[#allocation20_spill] sm:$0xff] }
 0x1db   :  { %3454 = vmatprep.mubr.bf16.mxu0 %v13863_v62  ;;  %v3734_v41 = vsub.s32 2, %v3725_v9  ;;  %v3722_v62 = vld [vmem:[%s13607_s2] sm:$0x7]  ;;  %v3726_v32 = vsub.s32 0, %v3725_v9  ;;  %v3730_v33 = vsub.s32 1, %v3725_v9  ;;  %s8160_s2 = smov 116  }
 0x1dd   :  { %v10012_v18 = vrot.slane %v3722_v62, %v3734_v41  ;;  %v10014_v7 = vrot.slane %v3722_v62, %v3726_v32  ;;  %v10016_v63 = vrot.slane %v3722_v62, %v3730_v33  ;;  %v14021_v62 = vld [vmem:[#allocation27_spill] sm:$0xff] }
 0x1e1   :  { %7439 = vmatmul.mubr.msk.bf16.gmra.mrb[88].mxu1 %vm507_vm2, %v6911_v47 }
 0x1e2   :  { %6935 = vmatmul.mubr.msk.bf16.gmra.mrb[60].mxu0 %vm507_vm2, %v6913_v15  ;;  %7442 = vmatprep.mubr.msk.bf16.mxu1 %vm507_vm2, %v6912_v27 }
 0x1e9   :  { %7443 = vmatmul.mubr.msk.bf16.gmra.mrb[92].mxu1 %vm507_vm2, %v6913_v15  ;;  %vm4272_vm2 = vsmask.f32 4352 }
 0x1ea   :  { %vm10907_vm10 = vmand %vm4271_vm1, %vm4272_vm2  ;;  %vm5037_vm1 = vsmask.f32 6400 }
 0x1eb   :  { %vm10923_vm2 = vmand %vm13770_vm4, %vm4269_vm14 }
 0x1ec   :  { %vm10966_vm4 = vmand %vm4523_vm6, %vm4524_vm8 }
 0x1ed   :  { %vm10998_vm12 = vmor %vm10907_vm10, %vm10901_vm9 }
 0x1ee   :  { %vm11013_vm14 = vmor %vm10957_vm15, %vm10938_vm7  ;;  %vm14209_vm15 = vcmask 548864  }
 0x1ef   :  { %vm11019_vm9 = vmand %vm4533_vm0, %vm4524_vm8 }
 0x1f0   :  { %vm11039_vm8 = vmor %vm10976_vm5, %vm10966_vm4  ;;  %vm14212_vm5 = vsmask.f32 7942  ;;  %vm14219_vm4 = vcmask 1046534  }
 0x1f1   :  { %vm11051_vm7 = vmand %vm14209_vm15, %vm4421_vm3 }
 0x1f2   :  { %vm11065_vm3 = vmand %vm4523_vm6, %vm14212_vm5  ;;  %vm14215_vm5 = vsmask.f32 2304  ;;  %vm14216_vm6 = vcmask 1042434  }
 0x1f3   :  { %vm11098_vm15 = vmand %vm14216_vm6, %vm14215_vm5  ;;  %vm14223_vm6 = vsmask.f32 7958 }
 0x1f4   :  { %vm11111_vm10 = vmand %vm14219_vm4, %vm5037_vm1  ;;  %vm14229_vm1 = vsmask.f32 7942 }
 0x1f5   :  { %vm11120_vm5 = vmand %vm4526_vm11, %vm14223_vm6 }
 0x1f6   :  { %vm11130_vm4 = vmand %vm4533_vm0, %vm14229_vm1 }
 0x1f7   :  { %vm11150_vm0 = vmor %vm11111_vm10, %vm11098_vm15  ;;  %vm14236_vm10 = vsmask.f32 2304  ;;  %vm14237_vm15 = vcmask 550914  }
 0x1f8   :  { %vm11169_vm6 = vmand %vm14237_vm15, %vm14236_vm10 }
 0x1f9   :  { %vm11186_vm1 = vmor %vm11120_vm5, %vm11065_vm3  ;;  %vm14244_vm3 = vsmask.f32 7946  ;;  %vm14245_vm5 = vcmask 1042434  }
 0x1fa   :  { %vm11215_vm10 = vmand %vm14245_vm5, %vm14244_vm3  ;;  %vm14248_vm3 = vsmask.f32 7962  ;;  %vm14249_vm5 = vcmask 1046534  }
 0x1fb   :  { %vm11235_vm15 = vmand %vm14249_vm5, %vm14248_vm3  ;;  %vm14252_vm3 = vsmask.f32 3328  ;;  %vm14253_vm5 = vcmask 1043459  }
 0x1fc   :  { %vm11262_vm11 = vmand %vm14253_vm5, %vm14252_vm3  ;;  %vm14278_vm5 = vsmask.f32 3328 }
 0x23d   :  { %v3306_v34 = vpop.f32.mrb[0].mxu0 }
 0x23e   :  { %v7450_v11 = vadd.f32 %v3306_v34, %v14015_v6  ;;  %v3308_v30 = vpop.f32.mrb[1].mxu0 }
 0x23f   :  { %v7451_v61 = vadd.f32 %v3308_v30, %v14016_v49  ;;  %v3310_v37 = vpop.f32.mrb[2].mxu0  ;;  %v14024_v30 = vld [vmem:[#allocation6_spill] sm:$0xff] }
 0x240   :  { %v3739_v58 = vadd.f32 %v7450_v11, %v10014_v7  ;;  %v7452_v54 = vadd.f32 %v3310_v37, %v14017_v52  ;;  %v3312_v47 = vpop.f32.mrb[3].mxu0  ;;  %v14026_v52 = vld [vmem:[#allocation2_spill] sm:$0xff] }
 0x241   :  { %v3740_v25 = vadd.f32 %v7451_v61, %v10016_v63  ;;  %v7453_v26 = vadd.f32 %v3312_v47, %v14018_v8 }
 0x242   :  { %v3835_v38 = vmax.f32 %v3739_v58, 0.0  ;;  %v3742_v53 = vadd.f32 %v7452_v54, %v10014_v7 }
 0x243   :  { %v3836_v56 = vmax.f32 %v3740_v25, 0.0  ;;  %v3743_v50 = vadd.f32 %v7453_v26, %v10016_v63 }
 0x244   :  { %v3955_v4 = vrot.slane %v3835_v38, 1  ;;  %v3838_v27 = vmax.f32 %v3742_v53, 0.0 }
 0x245   :  { %v3956_v17 = vrot.slane %v3836_v56, 1  ;;  %v3839_v5 = vmax.f32 %v3743_v50, 0.0  ;;  %v3316_v31 = vpop.f32.mrb[4].mxu0 }
 0x246   :  { %v4706_v40 = vrot.slane %v3838_v27, 1  ;;  %v7454_v15 = vadd.f32 %v3316_v31, %v14019_v23  ;;  %v3318_v12 = vpop.f32.mrb[5].mxu0  ;;  %v10027_v9 = vmax.f32 %v3835_v38, %v3955_v4 }
 0x247   :  { %v4707_v41 = vrot.slane %v3839_v5, 1  ;;  %v7455_v32 = vadd.f32 %v3318_v12, %v14021_v62  ;;  %v3320_v33 = vpop.f32.mrb[6].mxu0  ;;  %v10030_v34 = vmax.f32 %v3836_v56, %v3956_v17 }
 0x248   :  { %14020 = vst [vmem:[#allocation20_spill] sm:$0xff] %v10027_v9  ;;  %v10032_v6 = vmax.f32 %v3838_v27, %v4706_v40  ;;  %v3745_v11 = vadd.f32 %v7454_v15, %v10014_v7  ;;  %v7456_v49 = vadd.f32 %v3320_v33, %v14024_v30  ;;  %v3322_v61 = vpop.f32.mrb[7].mxu0  ;;  %v14030_v33 = vld [vmem:[#allocation7_spill] sm:$0xff] }
 0x249   :  { %14022 = vst [vmem:[#allocation18_spill] sm:$0xff] %v10030_v34  ;;  %v10036_v37 = vmax.f32 %v3839_v5, %v4707_v41  ;;  %v3746_v58 = vadd.f32 %v7455_v32, %v10016_v63  ;;  %v7457_v54 = vadd.f32 %v3322_v61, %v14026_v52  ;;  %v7836_v47 = vpack.i.bf16 %v10030_v34, %v10027_v9  ;;  %v14029_v41 = vld [vmem:[#allocation4_spill] sm:$0xff] }
 0x24a   :  { %14023 = vst [vmem:[#allocation25_spill] sm:$0xff] %v10032_v6  ;;  %v3841_v25 = vmax.f32 %v3745_v11, 0.0  ;;  %v3748_v8 = vadd.f32 %v7456_v49, %v10014_v7 }
 0x24b   :  { %14025 = vst [vmem:[#allocation23_spill] sm:$0xff] %v10036_v37  ;;  %v3842_v26 = vmax.f32 %v3746_v58, 0.0  ;;  %v3749_v38 = vadd.f32 %v7457_v54, %v10016_v63  ;;  %7837 = vrot.lane.b32.xlu0 %v7836_v47, %s8160_s2  ;;  %v7841_v17 = vpack.i.bf16 %v10036_v37, %v10032_v6 }
 0x24c   :  { %v5406_v53 = vrot.slane %v3841_v25, 1  ;;  %v3844_v56 = vmax.f32 %v3748_v8, 0.0 }
 0x24d   :  { %v5407_v50 = vrot.slane %v3842_v26, 1  ;;  %v3845_v4 = vmax.f32 %v3749_v38, 0.0  ;;  %v3326_v27 = vpop.f32.mrb[8].mxu0  ;;  %v14035_v38 = vld [vmem:[#allocation9_spill] sm:$0xff] }
 0x24e   :  { %v10047_v5 = vmax.f32 %v3841_v25, %v5406_v53  ;;  %v6126_v31 = vrot.slane %v3844_v56, 1  ;;  %v10050_v40 = vadd.f32 %v3326_v27, %v9287_v59  ;;  %v3328_v23 = vpop.f32.mrb[9].mxu0  ;;  %v14033_v59 = vld [vmem:[#allocation30_spill] sm:$0xff]  ;;  %v14034_v25 = vld [vmem:[#allocation8_spill] sm:$0xff] }
 0x24f   :  { %v10052_v15 = vmax.f32 %v3842_v26, %v5407_v50  ;;  %v6127_v12 = vrot.slane %v3845_v4, 1  ;;  %v10055_v62 = vadd.f32 %v3328_v23, %v14029_v41  ;;  %v3330_v32 = vpop.f32.mrb[10].mxu0  ;;  %7842 = vrot.lane.b32.xlu0 %v7841_v17, %s8160_s2  ;;  %v14036_v50 = vld [vmem:[#allocation31_spill] sm:$0xff]  ;;  %v14037_v17 = vld [vmem:[#allocation32_spill] sm:$0xff] }
 0x250   :  { %14027 = vst [vmem:[#allocation3_spill] sm:$0xff] %v10047_v5  ;;  %v10059_v11 = vadd.f32 %v3330_v32, %v14030_v33  ;;  %v3332_v30 = vpop.f32.mrb[11].mxu0  ;;  %v10061_v49 = vmax.f32 %v3844_v56, %v6126_v31  ;;  %v14038_v32 = vld [vmem:[#allocation10_spill] sm:$0xff] }
 0x251   :  { %14028 = vst [vmem:[#allocation27_spill] sm:$0xff] %v10052_v15  ;;  %v10063_v61 = vmax.f32 %v3845_v4, %v6127_v12  ;;  %v10066_v58 = vadd.f32 %v3332_v30, %v14033_v59  ;;  %v7846_v52 = vpack.i.bf16 %v10052_v15, %v10047_v5  ;;  %v14043_v15 = vld [vmem:[#allocation14_spill] sm:$0xff] }
 0x252   :  { %14031 = vst [vmem:[#allocation6_spill] sm:$0xff] %v10061_v49 }
 0x253   :  { %14032 = vst [vmem:[#allocation2_spill] sm:$0xff] %v10063_v61  ;;  %7847 = vrot.lane.b32.xlu0 %v7846_v52, %s8160_s2  ;;  %v7851_v47 = vpack.i.bf16 %v10063_v61, %v10061_v49  ;;  %v14039_v52 = vld [vmem:[#allocation11_spill] sm:$0xff] }
 0x255   :  { %v3336_v54 = vpop.f32.mrb[12].mxu0 }
 0x256   :  { %v10074_v8 = vadd.f32 %v3336_v54, %v14034_v25  ;;  %v3338_v26 = vpop.f32.mrb[13].mxu0 }
 0x257   :  { %v10077_v53 = vadd.f32 %v3338_v26, %v14035_v38  ;;  %v3340_v56 = vpop.f32.mrb[14].mxu0  ;;  %7852 = vrot.lane.b32.xlu0 %v7851_v47, %s8160_s2  ;;  %v14040_v26 = vld [vmem:[#allocation33_spill] sm:$0xff] }
 0x258   :  { %v10081_v4 = vadd.f32 %v3340_v56, %v14036_v50  ;;  %v3342_v27 = vpop.f32.mrb[15].mxu0 }
 0x259   :  { %v10084_v31 = vadd.f32 %v3342_v27, %v14037_v17 }
 0x25d   :  { %v3346_v23 = vpop.f32.mrb[16].mxu0 }
 0x25e   :  { %v7466_v12 = vadd.f32 %v3346_v23, %v9351_v45  ;;  %v3348_v41 = vpop.f32.mrb[17].mxu0 }
 0x25f   :  { %v7467_v33 = vadd.f32 %v3348_v41, %v14038_v32  ;;  %v3350_v30 = vpop.f32.mrb[18].mxu0 }
 0x260   :  { %v3763_v59 = vadd.f32 %v7466_v12, %v10014_v7  ;;  %v7468_v54 = vadd.f32 %v3350_v30, %v14039_v52  ;;  %v3352_v25 = vpop.f32.mrb[19].mxu0  ;;  %v14041_v12 = vld [vmem:[#allocation12_spill] sm:$0xff] }
 0x261   :  { %v3764_v47 = vadd.f32 %v7467_v33, %v10016_v63  ;;  %v7469_v38 = vadd.f32 %v3352_v25, %v14040_v26 }
 0x262   :  { %v3859_v56 = vmax.f32 %v3763_v59, 0.0  ;;  %v3766_v50 = vadd.f32 %v7468_v54, %v10014_v7 }
 0x263   :  { %v3860_v27 = vmax.f32 %v3764_v47, 0.0  ;;  %v3767_v17 = vadd.f32 %v7469_v38, %v10016_v63  ;;  %v14046_v38 = vld [vmem:[#allocation34_spill] sm:$0xff] }
 0x264   :  { %v3961_v45 = vrot.slane %v3859_v56, 1  ;;  %v3862_v23 = vmax.f32 %v3766_v50, 0.0 }
 0x265   :  { %v3962_v37 = vrot.slane %v3860_v27, 1  ;;  %v3863_v41 = vmax.f32 %v3767_v17, 0.0  ;;  %v3356_v32 = vpop.f32.mrb[20].mxu0 }
 0x266   :  { %v4712_v61 = vrot.slane %v3862_v23, 1  ;;  %v7470_v34 = vadd.f32 %v3356_v32, %v14041_v12  ;;  %v3358_v30 = vpop.f32.mrb[21].mxu0  ;;  %v10095_v52 = vmax.f32 %v3859_v56, %v3961_v45  ;;  %v14048_v12 = vld [vmem:[#allocation35_spill] sm:$0xff] }
 0x267   :  { %v4713_v33 = vrot.slane %v3863_v41, 1  ;;  %v7471_v25 = vadd.f32 %v3358_v30, %v14043_v15  ;;  %v3360_v59 = vpop.f32.mrb[22].mxu0  ;;  %v10098_v26 = vmax.f32 %v3860_v27, %v3962_v37 }
 0x268   :  { %14042 = vst [vmem:[#allocation4_spill] sm:$0xff] %v10095_v52  ;;  %v10100_v54 = vmax.f32 %v3862_v23, %v4712_v61  ;;  %v3769_v47 = vadd.f32 %v7470_v34, %v10014_v7  ;;  %v7472_v50 = vadd.f32 %v3360_v59, %v14046_v38  ;;  %v3362_v17 = vpop.f32.mrb[23].mxu0 }
 0x269   :  { %14044 = vst [vmem:[#allocation7_spill] sm:$0xff] %v10098_v26  ;;  %v10104_v49 = vmax.f32 %v3863_v41, %v4713_v33  ;;  %v3770_v32 = vadd.f32 %v7471_v25, %v10016_v63  ;;  %v7473_v56 = vadd.f32 %v3362_v17, %v14048_v12  ;;  %v7856_v45 = vpack.i.bf16 %v10098_v26, %v10095_v52  ;;  %v14058_v26 = vld [vmem:[#allocation37_spill] sm:$0xff] }
 0x26a   :  { %14045 = vst [vmem:[#allocation30_spill] sm:$0xff] %v10100_v54  ;;  %v3865_v15 = vmax.f32 %v3769_v47, 0.0  ;;  %v3772_v37 = vadd.f32 %v7472_v50, %v10014_v7 }
 0x26b   :  { %14047 = vst [vmem:[#allocation8_spill] sm:$0xff] %v10104_v49  ;;  %v3866_v27 = vmax.f32 %v3770_v32, 0.0  ;;  %v3773_v61 = vadd.f32 %v7473_v56, %v10016_v63  ;;  %7857 = vrot.lane.b32.xlu1 %v7856_v45, %s8160_s2  ;;  %v7861_v25 = vpack.i.bf16 %v10104_v49, %v10100_v54 }
 0x26c   :  { %v5412_v34 = vrot.slane %v3865_v15, 1  ;;  %v3868_v23 = vmax.f32 %v3772_v37, 0.0 }
 0x26d   :  { %v5413_v30 = vrot.slane %v3866_v27, 1  ;;  %v3869_v41 = vmax.f32 %v3773_v61, 0.0  ;;  %v3366_v33 = vpop.f32.mrb[24].mxu0 }
 0x26e   :  { %v10115_v59 = vmax.f32 %v3865_v15, %v5412_v34  ;;  %v6132_v38 = vrot.slane %v3868_v23, 1  ;;  %v10118_v47 = vadd.f32 %v3366_v33, %v9414_v20  ;;  %v3368_v50 = vpop.f32.mrb[25].mxu0  ;;  %v14053_v20 = vld [vmem:[#allocation17_spill] sm:$0xff]  ;;  %v14054_v33 = vld [vmem:[#allocation19_spill] sm:$0xff] }
 0x26f   :  { %v10120_v17 = vmax.f32 %v3866_v27, %v5413_v30  ;;  %v6133_v32 = vrot.slane %v3869_v41, 1  ;;  %v10123_v12 = vadd.f32 %v3368_v50, %v9418_v14  ;;  %v3370_v56 = vpop.f32.mrb[26].mxu0  ;;  %7862 = vrot.lane.b32.xlu1 %v7861_v25, %s8160_s2  ;;  %v14056_v50 = vld [vmem:[#allocation36_spill] sm:$0xff] }
 0x270   :  { %14049 = vst [vmem:[#allocation9_spill] sm:$0xff] %v10115_v59  ;;  %v10127_v45 = vadd.f32 %v3370_v56, %v9424_v3  ;;  %v3372_v37 = vpop.f32.mrb[27].mxu0  ;;  %v10129_v15 = vmax.f32 %v3868_v23, %v6132_v38  ;;  %v14055_v23 = vld [vmem:[#allocation21_spill] sm:$0xff] }
 0x271   :  { %14050 = vst [vmem:[#allocation31_spill] sm:$0xff] %v10120_v17  ;;  %v10131_v61 = vmax.f32 %v3869_v41, %v6133_v32  ;;  %v10134_v34 = vadd.f32 %v3372_v37, %v14053_v20  ;;  %v7866_v27 = vpack.i.bf16 %v10120_v17, %v10115_v59  ;;  %v14057_v37 = vld [vmem:[#allocation13_spill] sm:$0xff]  ;;  %v10176_v59 = vadd.f32 %v10059_v11, %v10014_v7 }
 0x272   :  { %14051 = vst [vmem:[#allocation32_spill] sm:$0xff] %v10129_v15 }
 0x273   :  { %14052 = vst [vmem:[#allocation10_spill] sm:$0xff] %v10131_v61  ;;  %7867 = vrot.lane.b32.xlu1 %v7866_v27, %s8160_s2  ;;  %v7871_v30 = vpack.i.bf16 %v10131_v61, %v10129_v15  ;;  %v14060_v15 = vld [vmem:[#allocation38_spill] sm:$0xff] }
 0x275   :  { %v3376_v14 = vpop.f32.mrb[28].mxu0 }
 0x276   :  { %v10142_v3 = vadd.f32 %v3376_v14, %v14054_v33  ;;  %v3378_v25 = vpop.f32.mrb[29].mxu0 }
 0x277   :  { %v10145_v38 = vadd.f32 %v3378_v25, %v14055_v23  ;;  %v3380_v41 = vpop.f32.mrb[30].mxu0  ;;  %7872 = vrot.lane.b32.xlu1 %v7871_v30, %s8160_s2  ;;  %v3757_v25 = vadd.f32 %v10074_v8, %v10014_v7 }
 0x278   :  { %v10149_v32 = vadd.f32 %v3380_v41, %v14056_v50  ;;  %v3382_v56 = vpop.f32.mrb[31].mxu0  ;;  %v3751_v50 = vadd.f32 %v10050_v40, %v10014_v7 }
 0x279   :  { %v10152_v20 = vadd.f32 %v3382_v56, %v14057_v37  ;;  %v3853_v56 = vmax.f32 %v3757_v25, 0.0 }
 0x27d   :  { %v3386_v27 = vpop.f32.mrb[32].mxu0 }
 0x27e   :  { %v7482_v49 = vadd.f32 %v3386_v27, %v9477_v57  ;;  %v3388_v61 = vpop.f32.mrb[33].mxu0 }
 0x27f   :  { %v7483_v14 = vadd.f32 %v3388_v61, %v9481_v60  ;;  %v3390_v33 = vpop.f32.mrb[34].mxu0  ;;  %v3760_v60 = vadd.f32 %v10081_v4, %v10014_v7  ;;  %v5409_v4 = vrot.slane %v3853_v56, 1 }
 0x280   :  { %v7484_v23 = vadd.f32 %v3390_v33, %v9487_v28  ;;  %v3392_v30 = vpop.f32.mrb[35].mxu0  ;;  %v3787_v37 = vadd.f32 %v7482_v49, %v10014_v7  ;;  %v14059_v28 = vld [vmem:[#allocation22_spill] sm:$0xff] }
 0x281   :  { %v7485_v41 = vadd.f32 %v3392_v30, %v14058_v26  ;;  %v3788_v57 = vadd.f32 %v7483_v14, %v10016_v63  ;;  %v3847_v30 = vmax.f32 %v3751_v50, 0.0  ;;  %v3856_v6 = vmax.f32 %v3760_v60, 0.0 }
 0x282   :  { %v10184_v11 = vadd.f32 %v7484_v23, %v10014_v7  ;;  %v10198_v23 = vadd.f32 %v10055_v62, %v10016_v63 }
 0x283   :  { %v3884_v5 = vmax.f32 %v3788_v57, 0.0  ;;  %v3958_v10 = vrot.slane %v3847_v30, 1 }
 0x284   :  { %v7416_v27 = vpop.f32.mrb[64].mxu1 }
 0x285   :  { %v3396_v17 = vpop.f32.mrb[36].mxu0  ;;  %v3747_v8 = vadd.f32 %v7416_v27, %v10012_v18  ;;  %v3499_v61 = vpop.f32.mrb[65].mxu1  ;;  %v3968_v60 = vrot.slane %v3884_v5, 1  ;;  %v10203_v0 = vmax.f32 %v3847_v30, %v3958_v10 }
 0x286   :  { %v10168_v33 = vadd.f32 %v3396_v17, %v14059_v28  ;;  %v3398_v26 = vpop.f32.mrb[37].mxu0  ;;  %v3741_v40 = vadd.f32 %v10012_v18, %v3499_v61  ;;  %v7417_v25 = vpop.f32.mrb[66].mxu1  ;;  %v3883_v28 = vmax.f32 %v3787_v37, 0.0  ;;  %v10192_v37 = vadd.f32 %v7485_v41, %v10016_v63 }
 0x287   :  { %v10172_v49 = vadd.f32 %v3398_v26, %v14060_v15  ;;  %v3400_v14 = vpop.f32.mrb[38].mxu0  ;;  %v3843_v54 = vmax.f32 %v3747_v8, 0.0  ;;  %v3750_v27 = vadd.f32 %v7417_v25, %v10012_v18  ;;  %v3502_v52 = vpop.f32.mrb[67].mxu1  ;;  %v14061_v26 = vld [vmem:[#allocation39_spill] sm:$0xff]  ;;  %14066 = vst [vmem:[#allocation14_spill] sm:$0xff] %v10203_v0  ;;  %v10221_v21 = vmax.f32 %v3884_v5, %v3968_v60 }
 0x288   :  { %v3402_v17 = vpop.f32.mrb[39].mxu0  ;;  %v3837_v50 = vmax.f32 %v3741_v40, 0.0  ;;  %v3744_v61 = vadd.f32 %v10012_v18, %v3502_v52  ;;  %v10181_v46 = vadd.f32 %v3400_v14, %v14061_v26  ;;  %v3967_v57 = vrot.slane %v3883_v28, 1 }
 0x289   :  { %v5408_v9 = vrot.slane %v3843_v54, 1  ;;  %v3846_v15 = vmax.f32 %v3750_v27, 0.0  ;;  %v10187_v25 = vadd.f32 %v3402_v17, %v14062_v16  ;;  %v3850_v16 = vmax.f32 %v10176_v59, 0.0  ;;  %14069 = vst [vmem:[#allocation17_spill] sm:$0xff] %v10221_v21 }
 0x28a   :  { %v3957_v8 = vrot.slane %v3837_v50, 1  ;;  %v3840_v14 = vmax.f32 %v3744_v61, 0.0  ;;  %v10201_v17 = vmax.f32 %v3853_v56, %v5409_v4  ;;  %v3886_v61 = vmax.f32 %v10184_v11, 0.0 }
 0x28b   :  { %v10189_v13 = vmax.f32 %v3843_v54, %v5408_v9  ;;  %v6128_v52 = vrot.slane %v3846_v15, 1  ;;  %v6129_v9 = vrot.slane %v3856_v6, 1  ;;  %v3887_v1 = vmax.f32 %v10192_v37, 0.0 }
 0x28c   :  { %v10194_v40 = vmax.f32 %v3837_v50, %v3957_v8  ;;  %v7420_v27 = vpop.f32.mrb[68].mxu1  ;;  %14065 = vst [vmem:[#allocation12_spill] sm:$0xff] %v10201_v17  ;;  %v10207_v50 = vadd.f32 %v10077_v53, %v10016_v63  ;;  %v10219_v53 = vmax.f32 %v3883_v28, %v3967_v57  ;;  %v4708_v11 = vrot.slane %v3840_v14, 1 }
 0x28d   :  { %14063 = vst [vmem:[#allocation11_spill] sm:$0xff] %v10189_v13  ;;  %v3406_v26 = vpop.f32.mrb[40].mxu0  ;;  %v3515_v54 = vpop.f32.mrb[69].mxu1  ;;  %v10212_v59 = vmax.f32 %v3846_v15, %v6128_v52  ;;  %v3759_v56 = vadd.f32 %v7420_v27, %v10012_v18  ;;  %v7876_v10 = vpack.i.bf16 %v10201_v17, %v10189_v13  ;;  %v3848_v37 = vmax.f32 %v10198_v23, 0.0 }
 0x28e   :  { %14064 = vst [vmem:[#allocation33_spill] sm:$0xff] %v10194_v40  ;;  %v3408_v41 = vpop.f32.mrb[41].mxu0  ;;  %v3753_v8 = vadd.f32 %v10012_v18, %v3515_v54  ;;  %v7421_v39 = vpop.f32.mrb[70].mxu1  ;;  %14068 = vst [vmem:[#allocation35_spill] sm:$0xff] %v10219_v53  ;;  %v7881_v54 = vpack.i.bf16 %v10203_v0, %v10194_v40  ;;  %v10226_v15 = vmax.f32 %v3856_v6, %v6129_v9  ;;  %v4709_v17 = vrot.slane %v3850_v16, 1 }
 0x28f   :  { %v3410_v62 = vpop.f32.mrb[42].mxu0  ;;  %14067 = vst [vmem:[#allocation34_spill] sm:$0xff] %v10212_v59  ;;  %v10217_v30 = vpop.f32.mrb[71].mxu1  ;;  %7877 = vrot.lane.b32.xlu1 %v7876_v10, %s8160_s2  ;;  %v10230_v27 = vadd.f32 %v3406_v26, %v9549_v55  ;;  %v3854_v28 = vmax.f32 %v10207_v50, 0.0  ;;  %v4718_v57 = vrot.slane %v3886_v61, 1  ;;  %v4719_v5 = vrot.slane %v3887_v1, 1 }
 0x290   :  { %v3412_v4 = vpop.f32.mrb[43].mxu0  ;;  %14070 = vst [vmem:[#allocation19_spill] sm:$0xff] %v10226_v15  ;;  %v3849_v52 = vmax.f32 %v3753_v8, 0.0  ;;  %7882 = vrot.lane.b32.xlu0 %v7881_v54, %s8160_s2  ;;  %v3855_v60 = vmax.f32 %v3759_v56, 0.0  ;;  %v7891_v0 = vpack.i.bf16 %v10226_v15, %v10212_v59  ;;  %v10237_v6 = vadd.f32 %v3408_v41, %v9553_v29  ;;  %v14083_v59 = vld [vmem:[#allocation42_spill] sm:$0xff] }
 0x291   :  { %v10241_v23 = vadd.f32 %v10084_v31, %v10016_v63  ;;  %v10243_v55 = vmax.f32 %v3840_v14, %v4708_v11  ;;  %v7886_v26 = vpack.i.bf16 %v10221_v21, %v10219_v53  ;;  %v10250_v50 = vadd.f32 %v3410_v62, %v9559_v22 }
 0x292   :  { %v3959_v56 = vrot.slane %v3848_v37, 1  ;;  %v3960_v10 = vrot.slane %v3849_v52, 1  ;;  %v10255_v31 = vmax.f32 %v3850_v16, %v4709_v17  ;;  %v3793_v14 = vadd.f32 %v10168_v33, %v10014_v7 }
 0x293   :  { %14071 = vst [vmem:[#allocation21_spill] sm:$0xff] %v10243_v55  ;;  %7892 = vrot.lane.b32.xlu1 %v7891_v0, %s8160_s2  ;;  %v3794_v11 = vadd.f32 %v10172_v49, %v10016_v63  ;;  %v10263_v22 = vadd.f32 %v3412_v4, %v9561_v24  ;;  %v10267_v0 = vmax.f32 %v3886_v61, %v4718_v57  ;;  %v5411_v16 = vrot.slane %v3855_v60, 1 }
 0x294   :  { %v10247_v9 = vpop.f32.mrb[72].mxu1  ;;  %14072 = vst [vmem:[#allocation36_spill] sm:$0xff] %v10255_v31  ;;  %7887 = vrot.lane.b32.xlu0 %v7886_v26, %s8160_s2  ;;  %v10269_v21 = vmax.f32 %v3887_v1, %v4719_v5  ;;  %v10275_v33 = vadd.f32 %v10066_v58, %v10016_v63  ;;  %v5410_v49 = vrot.slane %v3854_v28, 1  ;;  %v3857_v26 = vmax.f32 %v10241_v23, 0.0 }
 0x295   :  { %v3416_v8 = vpop.f32.mrb[44].mxu0  ;;  %v10253_v29 = vpop.f32.mrb[73].mxu1  ;;  %14073 = vst [vmem:[#allocation13_spill] sm:$0xff] %v10267_v0  ;;  %v7896_v24 = vpack.i.bf16 %v10255_v31, %v10243_v55  ;;  %v10280_v4 = vmax.f32 %v3849_v52, %v3960_v10  ;;  %v10282_v61 = vmax.f32 %v3848_v37, %v3959_v56  ;;  %v3889_v1 = vmax.f32 %v3793_v14, 0.0 }
 0x296   :  { %v3418_v41 = vpop.f32.mrb[45].mxu0  ;;  %v10265_v62 = vpop.f32.mrb[74].mxu1  ;;  %14074 = vst [vmem:[#allocation37_spill] sm:$0xff] %v10269_v21  ;;  %v3890_v57 = vmax.f32 %v3794_v11, 0.0  ;;  %v10285_v5 = vadd.f32 %v7421_v39, %v10012_v18  ;;  %v10290_v58 = vadd.f32 %v10118_v47, %v10014_v7  ;;  %v10294_v23 = vadd.f32 %v10123_v12, %v10016_v63  ;;  %v14079_v11 = vld [vmem:[#allocation40_spill] sm:$0xff] }
 0x297   :  { %v3420_v54 = vpop.f32.mrb[46].mxu0  ;;  %v10271_v17 = vpop.f32.mrb[75].mxu1  ;;  %14075 = vst [vmem:[#allocation22_spill] sm:$0xff] %v10280_v4  ;;  %14076 = vst [vmem:[#allocation38_spill] sm:$0xff] %v10282_v61  ;;  %7897 = vrot.lane.b32.xlu1 %v7896_v24, %s8160_s2  ;;  %v10296_v31 = vmax.f32 %v3855_v60, %v5411_v16  ;;  %v7901_v37 = vpack.i.bf16 %v10269_v21, %v10267_v0  ;;  %v10301_v56 = vmax.f32 %v3854_v28, %v5410_v49 }
 0x298   :  { %v3422_v15 = vpop.f32.mrb[47].mxu0  ;;  %v6130_v39 = vrot.slane %v3857_v26, 1  ;;  %v10305_v10 = vadd.f32 %v10145_v38, %v10016_v63  ;;  %v10309_v12 = vadd.f32 %v10127_v45, %v10014_v7  ;;  %v10313_v60 = vadd.f32 %v3416_v8, %v9584_v2 }
 0x299   :  { %14077 = vst [vmem:[#allocation39_spill] sm:$0xff] %v10296_v31  ;;  %14078 = vst [vmem:[#allocation16_spill] sm:$0xff] %v10301_v56  ;;  %7902 = vrot.lane.b32.xlu0 %v7901_v37, %s8160_s2  ;;  %v7911_v28 = vpack.i.bf16 %v10280_v4, %v10282_v61  ;;  %v10318_v16 = vadd.f32 %v3418_v41, %v14079_v11  ;;  %v5418_v24 = vrot.slane %v3889_v1, 1  ;;  %v5419_v52 = vrot.slane %v3890_v57, 1  ;;  %v14081_v41 = vld [vmem:[#allocation41_spill] sm:$0xff] }
 0x29a   :  { %v3858_v21 = vmax.f32 %v10285_v5, 0.0  ;;  %v3871_v37 = vmax.f32 %v10290_v58, 0.0  ;;  %v7906_v8 = vpack.i.bf16 %v10296_v31, %v10301_v56  ;;  %v10328_v11 = vadd.f32 %v3420_v54, %v14081_v41 }
 0x29b   :  { %14080 = vst [vmem:[#allocation40_spill] sm:$0xff] %v10318_v16  ;;  %7912 = vrot.lane.b32.xlu1 %v7911_v28, %s8160_s2  ;;  %v3878_v5 = vmax.f32 %v10305_v10, 0.0  ;;  %v10334_v58 = vadd.f32 %v3422_v15, %v14083_v59  ;;  %v14085_v2 = vmax.f32 %v10275_v33, 0.0  ;;  %v3874_v40 = vmax.f32 %v10309_v12, 0.0 }
 0x29c   :  { %v7428_v47 = vpop.f32.mrb[76].mxu1  ;;  %14082 = vst [vmem:[#allocation41_spill] sm:$0xff] %v10328_v11  ;;  %v10341_v54 = vadd.f32 %v10134_v34, %v10016_v63  ;;  %v10345_v41 = vmax.f32 %v3889_v1, %v5418_v24  ;;  %v10349_v15 = vmax.f32 %v3857_v26, %v6130_v39  ;;  %v3964_v56 = vrot.slane %v3871_v37, 1 }
 0x29d   :  { %v3426_v14 = vpop.f32.mrb[48].mxu0  ;;  %v3547_v49 = vpop.f32.mrb[77].mxu1  ;;  %v3783_v45 = vadd.f32 %v7428_v47, %v10012_v18  ;;  %v3756_v47 = vadd.f32 %v10012_v18, %v10217_v30  ;;  %14084 = vst [vmem:[#allocation42_spill] sm:$0xff] %v10334_v58  ;;  %v4710_v28 = vrot.slane %v14085_v2, 1  ;;  %7907 = vrot.lane.b32.xlu0 %v7906_v8, %s8160_s2  ;;  %v10347_v30 = vmax.f32 %v3890_v57, %v5419_v52 }
 0x29e   :  { %v3428_v38 = vpop.f32.mrb[49].mxu0  ;;  %v7429_v0 = vpop.f32.mrb[78].mxu1  ;;  %v3777_v10 = vadd.f32 %v10012_v18, %v3547_v49  ;;  %14086 = vst [vmem:[#allocation45_spill] sm:$0xff] %v10345_v41  ;;  %14088 = vst [vmem:[#allocation47_spill] sm:$0xff] %v10349_v15  ;;  %v10353_v12 = vadd.f32 %v10142_v3, %v10014_v7  ;;  %v10357_v34 = vadd.f32 %v10181_v46, %v10014_v7  ;;  %v14089_v2 = vmax.f32 %v10294_v23, 0.0 }
 0x29f   :  { %v3430_v53 = vpop.f32.mrb[50].mxu0  ;;  %v3550_v61 = vpop.f32.mrb[79].mxu1  ;;  %v3879_v55 = vmax.f32 %v3783_v45, 0.0  ;;  %14087 = vst [vmem:[#allocation46_spill] sm:$0xff] %v10347_v30  ;;  %v6131_v45 = vrot.slane %v3858_v21, 1  ;;  %v5416_v1 = vrot.slane %v3878_v5, 1  ;;  %v10363_v57 = vadd.f32 %v10187_v25, %v10016_v63 }
 0x2a0   :  { %v3432_v4 = vpop.f32.mrb[51].mxu0  ;;  %v3965_v49 = vrot.slane %v14089_v2, 1  ;;  %v3852_v52 = vmax.f32 %v3756_v47, 0.0  ;;  %v4715_v24 = vrot.slane %v3874_v40, 1  ;;  %v3873_v8 = vmax.f32 %v3777_v10, 0.0 }
 0x2a1   :  { %v5417_v59 = vrot.slane %v3879_v55, 1  ;;  %v10369_v31 = vadd.f32 %v7429_v0, %v10012_v18  ;;  %v10377_v2 = vadd.f32 %v10152_v20, %v10016_v63  ;;  %v10379_v25 = vmax.f32 %v3858_v21, %v6131_v45 }
 0x2a2   :  { %v7916_v58 = vpack.i.bf16 %v10347_v30, %v10345_v41  ;;  %v3892_v11 = vmax.f32 %v10357_v34, 0.0  ;;  %v10390_v16 = vadd.f32 %v3426_v14, %v9860_v43  ;;  %v10393_v20 = vadd.f32 %v3428_v38, %v9862_v51 }
 0x2a3   :  { %v10381_v47 = vmax.f32 %v3879_v55, %v5417_v59  ;;  %v10397_v45 = vmax.f32 %v3878_v5, %v5416_v1  ;;  %v3893_v59 = vmax.f32 %v10363_v57, 0.0  ;;  %v4711_v30 = vrot.slane %v3852_v52, 1 }
 0x2a4   :  { %v7432_v26 = vpop.f32.mrb[80].mxu1  ;;  %7917 = vrot.lane.b32.xlu0 %v7916_v58, %s8160_s2  ;;  %v10402_v0 = vadd.f32 %v3430_v53, %v9866_v35  ;;  %v10406_v43 = vadd.f32 %v10149_v32, %v10014_v7  ;;  %v3966_v14 = vrot.slane %v3873_v8, 1  ;;  %v3882_v51 = vmax.f32 %v10369_v31, 0.0 }
 0x2a5   :  { %v10365_v39 = vpop.f32.mrb[52].mxu0  ;;  %v10371_v46 = vpop.f32.mrb[81].mxu1  ;;  %14090 = vst [vmem:[#allocation48_spill] sm:$0xff] %v10381_v47  ;;  %14091 = vst [vmem:[#allocation49_spill] sm:$0xff] %v10397_v45  ;;  %v10410_v38 = vadd.f32 %v3432_v4, %v9869_v19  ;;  %v3881_v5 = vmax.f32 %v10377_v2, 0.0  ;;  %v10415_v34 = vadd.f32 %v10247_v9, %v10012_v18  ;;  %v7921_v35 = vpack.i.bf16 %v10379_v25, %v10349_v15 }
 0x2a6   :  { %v10373_v13 = vpop.f32.mrb[53].mxu0  ;;  %v10385_v3 = vpop.f32.mrb[82].mxu1  ;;  %v7956_v53 = vpack.i.bf16 %v10381_v47, %v10397_v45  ;;  %v14092_v32 = vmax.f32 %v10275_v33, 0.0  ;;  %v10425_v31 = vmax.f32 %v3871_v37, %v3964_v56  ;;  %v6138_v19 = vrot.slane %v3892_v11, 1  ;;  %v14119_v47 = vld [vmem:[#allocation28_spill] sm:$0xff] }
 0x2a7   :  { %v3440_v10 = vpop.f32.mrb[54].mxu0  ;;  %v10395_v21 = vpop.f32.mrb[83].mxu1  ;;  %v10428_v4 = vadd.f32 %v10012_v18, %v3550_v61  ;;  %v14095_v1 = vmax.f32 %v10294_v23, 0.0  ;;  %v14097_v57 = vmax.f32 %v10341_v54, 0.0  ;;  %v6139_v41 = vrot.slane %v3893_v59, 1 }
 0x2a8   :  { %v3442_v55 = vpop.f32.mrb[55].mxu0  ;;  %v10423_v58 = vmax.f32 %v14092_v32, %v4710_v28  ;;  %14094 = vst [vmem:[#allocation51_spill] sm:$0xff] %v10425_v31  ;;  %v10436_v15 = vmax.f32 %v3852_v52, %v4711_v30  ;;  %7922 = vrot.lane.b32.xlu0 %v7921_v35, %s8160_s2  ;;  %7957 = vrot.lane.b32.xlu1 %v7956_v53, %s8160_s2  ;;  %v14100_v23 = vmax.f32 %v10353_v12, 0.0  ;;  %v6136_v35 = vrot.slane %v3881_v5, 1 }
 0x2a9   :  { %v10432_v9 = vmax.f32 %v14095_v1, %v3965_v49  ;;  %v4716_v2 = vrot.slane %v14097_v57, 1  ;;  %v10444_v61 = vmax.f32 %v3874_v40, %v4715_v24  ;;  %v10448_v28 = vmax.f32 %v3873_v8, %v3966_v14 }
 0x2aa   :  { %14093 = vst [vmem:[#allocation50_spill] sm:$0xff] %v10423_v58  ;;  %14098 = vst [vmem:[#allocation53_spill] sm:$0xff] %v10436_v15  ;;  %v5415_v37 = vrot.slane %v14100_v23, 1  ;;  %v6137_v49 = vrot.slane %v3882_v51, 1  ;;  %v3867_v53 = vmax.f32 %v10415_v34, 0.0  ;;  %v3765_v1 = vadd.f32 %v10012_v18, %v10253_v29 }
 0x2ab   :  { %14096 = vst [vmem:[#allocation52_spill] sm:$0xff] %v10432_v9  ;;  %14099 = vst [vmem:[#allocation54_spill] sm:$0xff] %v10444_v61  ;;  %v10462_v57 = vmax.f32 %v3892_v11, %v6138_v19  ;;  %v10466_v8 = vadd.f32 %v10230_v27, %v10014_v7  ;;  %v3876_v14 = vmax.f32 %v10428_v4, 0.0  ;;  %v3795_v23 = vadd.f32 %v7432_v26, %v10012_v18 }
 0x2ac   :  { %v10440_v33 = vpop.f32.mrb[84].mxu1  ;;  %14101 = vst [vmem:[#allocation55_spill] sm:$0xff] %v10448_v28  ;;  %v10474_v45 = vmax.f32 %v3893_v59, %v6139_v41  ;;  %v10478_v29 = vadd.f32 %v10237_v6, %v10016_v63  ;;  %v10482_v11 = vadd.f32 %v10313_v60, %v10014_v7  ;;  %v7926_v27 = vpack.i.bf16 %v10436_v15, %v10423_v58  ;;  %v14117_v15 = vld [vmem:[#allocation15_spill] sm:$0xff] }
 0x2ad   :  { %v10442_v56 = vpop.f32.mrb[56].mxu0  ;;  %v10450_v32 = vpop.f32.mrb[85].mxu1  ;;  %14102 = vst [vmem:[#allocation56_spill] sm:$0xff] %v10462_v57  ;;  %v10486_v19 = vmax.f32 %v3882_v51, %v6137_v49  ;;  %v10490_v26 = vadd.f32 %v10365_v39, %v9888_v48  ;;  %v7961_v41 = vpack.i.bf16 %v10448_v28, %v10432_v9  ;;  %v10496_v6 = vadd.f32 %v10373_v13, %v9890_v36 }
 0x2ae   :  { %v10452_v30 = vpop.f32.mrb[57].mxu0  ;;  %v10458_v40 = vpop.f32.mrb[86].mxu1  ;;  %14103 = vst [vmem:[#allocation57_spill] sm:$0xff] %v10474_v45  ;;  %v10498_v59 = vmax.f32 %v3881_v5, %v6136_v35  ;;  %v5414_v60 = vrot.slane %v3867_v53, 1  ;;  %v3861_v4 = vmax.f32 %v3765_v1, 0.0  ;;  %7927 = vrot.lane.b32.xlu0 %v7926_v27, %s8160_s2  ;;  %v10502_v51 = vadd.f32 %v3440_v10, %v9894_v44 }
 0x2af   :  { %v10460_v24 = vpop.f32.mrb[58].mxu0  ;;  %v10470_v52 = vpop.f32.mrb[87].mxu1  ;;  %14104 = vst [vmem:[#allocation58_spill] sm:$0xff] %v10486_v19  ;;  %v4717_v48 = vrot.slane %v3876_v14, 1  ;;  %v3891_v39 = vmax.f32 %v3795_v23, 0.0  ;;  %7962 = vrot.lane.b32.xlu1 %v7961_v41, %s8160_s2  ;;  %v10507_v9 = vadd.f32 %v3442_v55, %v9899_v42  ;;  %v14106_v36 = vmax.f32 %v10341_v54, 0.0 }
 0x2b0   :  { %v10472_v34 = vpop.f32.mrb[59].mxu0  ;;  %14105 = vst [vmem:[#allocation59_spill] sm:$0xff] %v10498_v59  ;;  %v10515_v5 = vadd.f32 %v10250_v50, %v10014_v7  ;;  %v10519_v44 = vadd.f32 %v10265_v62, %v10012_v18  ;;  %v7931_v10 = vpack.i.bf16 %v10474_v45, %v10462_v57  ;;  %v3901_v54 = vmax.f32 %v10482_v11, 0.0 }
 0x2b1   :  { %v10511_v13 = vmax.f32 %v14106_v36, %v4716_v2  ;;  %v10531_v55 = vadd.f32 %v10012_v18, %v10371_v46  ;;  %v7966_v50 = vpack.i.bf16 %v10486_v19, %v10498_v59  ;;  %v14108_v23 = vmax.f32 %v10353_v12, 0.0 }
 0x2b2   :  { %v10543_v41 = vmax.f32 %v3867_v53, %v5414_v60  ;;  %v3963_v36 = vrot.slane %v3861_v4, 1  ;;  %v3768_v11 = vadd.f32 %v10012_v18, %v10271_v17  ;;  %7932 = vrot.lane.b32.xlu0 %v7931_v10, %s8160_s2  ;;  %v14110_v49 = vmax.f32 %v10406_v43, 0.0 }
 0x2b3   :  { %14107 = vst [vmem:[#allocation60_spill] sm:$0xff] %v10511_v13  ;;  %v10541_v27 = vmax.f32 %v14108_v23, %v5415_v37  ;;  %v14111_v59 = vmax.f32 %v10466_v8, 0.0  ;;  %v10556_v37 = vmax.f32 %v3876_v14, %v4717_v48  ;;  %v5420_v53 = vrot.slane %v3891_v39, 1  ;;  %7967 = vrot.lane.b32.xlu1 %v7966_v50, %s8160_s2 }
 0x2b4   :  { %v10523_v35 = vpop.f32.mrb[88].mxu1  ;;  %v6135_v45 = vrot.slane %v14110_v49, 1  ;;  %v3898_v10 = vmax.f32 %v10515_v5, 0.0  ;;  %v10566_v23 = vadd.f32 %v10263_v22, %v10016_v63  ;;  %v3870_v49 = vmax.f32 %v10519_v44, 0.0  ;;  %v14115_v22 = vld [vmem:[#allocation40_spill] sm:$0xff] }
 0x2b5   :  { %v10525_v1 = vpop.f32.mrb[60].mxu0  ;;  %v10535_v62 = vpop.f32.mrb[89].mxu1  ;;  %14109 = vst [vmem:[#allocation61_spill] sm:$0xff] %v10541_v27  ;;  %v3970_v12 = vrot.slane %v14111_v59, 1  ;;  %14112 = vst [vmem:[#allocation62_spill] sm:$0xff] %v10556_v37  ;;  %v3811_v59 = vadd.f32 %v10390_v16, %v10014_v7  ;;  %v14113_v14 = vmax.f32 %v10478_v29, 0.0  ;;  %v3812_v50 = vadd.f32 %v10393_v20, %v10016_v63 }
 0x2b6   :  { %v10537_v2 = vpop.f32.mrb[61].mxu0  ;;  %v10548_v46 = vpop.f32.mrb[90].mxu1  ;;  %v5421_v57 = vrot.slane %v3901_v54, 1  ;;  %v3885_v19 = vmax.f32 %v10531_v55, 0.0  ;;  %v10576_v28 = vmax.f32 %v3861_v4, %v3963_v36  ;;  %v3864_v5 = vmax.f32 %v3768_v11, 0.0  ;;  %v14118_v55 = vld [vmem:[#allocation24_spill] sm:$0xff] }
 0x2b7   :  { %v10550_v42 = vpop.f32.mrb[62].mxu0  ;;  %v10559_v60 = vpop.f32.mrb[91].mxu1  ;;  %v3971_v48 = vrot.slane %v14113_v14, 1  ;;  %v10580_v58 = vadd.f32 %v14115_v22, %v10016_v63  ;;  %v7936_v44 = vpack.i.bf16 %v10541_v27, %v10543_v41  ;;  %v10584_v16 = vmax.f32 %v3891_v39, %v5420_v53 }
 0x2b8   :  { %v10561_v17 = vpop.f32.mrb[63].mxu0  ;;  %14114 = vst [vmem:[#allocation63_spill] sm:$0xff] %v10576_v28  ;;  %v10588_v14 = vadd.f32 %v10442_v56, %v14117_v15  ;;  %v7971_v20 = vpack.i.bf16 %v10556_v37, %v10511_v13  ;;  %v10594_v4 = vadd.f32 %v10452_v30, %v14118_v55  ;;  %v4721_v36 = vrot.slane %v3898_v10, 1  ;;  %v14121_v13 = vld [vmem:[#allocation29_spill] sm:$0xff] }
 0x2b9   :  { %14116 = vst [vmem:[#allocation40_spill] sm:$0xff] %v10584_v16  ;;  %v6134_v11 = vrot.slane %v3870_v49, 1  ;;  %v3907_v22 = vmax.f32 %v3811_v59, 0.0  ;;  %7937 = vrot.lane.b32.xlu0 %v7936_v44, %s8160_s2  ;;  %v10599_v39 = vadd.f32 %v10460_v24, %v14119_v47  ;;  %v10603_v15 = vmax.f32 %v3901_v54, %v5421_v57 }
 0x2ba   :  { %v3908_v56 = vmax.f32 %v3812_v50, 0.0  ;;  %v3969_v27 = vrot.slane %v3885_v19, 1  ;;  %7972 = vrot.lane.b32.xlu1 %v7971_v20, %s8160_s2  ;;  %v10608_v30 = vadd.f32 %v10472_v34, %v14121_v13  ;;  %v3899_v59 = vmax.f32 %v10566_v23, 0.0 }
 0x2bb   :  { %14120 = vst [vmem:[#allocation15_spill] sm:$0xff] %v10603_v15  ;;  %v4714_v44 = vrot.slane %v3864_v5, 1  ;;  %v3807_v47 = vadd.f32 %v10440_v33, %v10012_v18  ;;  %v7941_v24 = vpack.i.bf16 %v10425_v31, %v10576_v28  ;;  %v14122_v54 = vmax.f32 %v10406_v43, 0.0  ;;  %v14125_v43 = vld [vmem:[#allocation41_spill] sm:$0xff] }
 0x2bc   :  { %v10601_v53 = vpop.f32.mrb[92].mxu1  ;;  %v3902_v34 = vmax.f32 %v10580_v58, 0.0  ;;  %v3798_v13 = vadd.f32 %v10385_v3, %v10012_v18  ;;  %v7976_v23 = vpack.i.bf16 %v10603_v15, %v10584_v16  ;;  %v14123_v33 = vmax.f32 %v10466_v8, 0.0 }
 0x2bd   :  { %v10610_v55 = vpop.f32.mrb[93].mxu1  ;;  %v10621_v50 = vmax.f32 %v14122_v54, %v6135_v45  ;;  %v10634_v28 = vmax.f32 %v3870_v49, %v6134_v11  ;;  %v3808_v45 = vadd.f32 %v14125_v43, %v10014_v7  ;;  %v3973_v54 = vrot.slane %v3907_v22, 1  ;;  %7942 = vrot.lane.b32.xlu0 %v7941_v24, %s8160_s2  ;;  %v14130_v24 = vld [vmem:[#allocation42_spill] sm:$0xff] }
 0x2be   :  { %v10617_v57 = vpop.f32.mrb[94].mxu1  ;;  %v10632_v37 = vmax.f32 %v14123_v33, %v3970_v12  ;;  %v14126_v58 = vmax.f32 %v10478_v29, 0.0  ;;  %v10643_v31 = vmax.f32 %v3898_v10, %v4721_v36  ;;  %v3974_v15 = vrot.slane %v3908_v56, 1  ;;  %7977 = vrot.lane.b32.xlu1 %v7976_v23, %s8160_s2  ;;  %v14134_v23 = vld [vmem:[#allocation26_spill] sm:$0xff] }
 0x2bf   :  { %v10628_v20 = vpop.f32.mrb[95].mxu1  ;;  %v10645_v16 = vmax.f32 %v3885_v19, %v3969_v27  ;;  %v4722_v8 = vrot.slane %v3899_v59, 1  ;;  %v10648_v12 = vmax.f32 %v3864_v5, %v4714_v44  ;;  %v3903_v49 = vmax.f32 %v3807_v47, 0.0 }
 0x2c0   :  { %14124 = vst [vmem:[#allocation24_spill] sm:$0xff] %v10632_v37  ;;  %v10641_v3 = vmax.f32 %v14126_v58, %v3971_v48  ;;  %14128 = vst [vmem:[#allocation29_spill] sm:$0xff] %v10643_v31  ;;  %v3801_v11 = vadd.f32 %v10012_v18, %v10450_v32  ;;  %v5422_v33 = vrot.slane %v3902_v34, 1  ;;  %v3809_v29 = vadd.f32 %v14130_v24, %v10016_v63  ;;  %v14133_v32 = vld [vmem:[#allocation5_spill] sm:$0xff] }
 0x2c1   :  { %14129 = vst [vmem:[#allocation41_spill] sm:$0xff] %v10648_v12  ;;  %v3894_v48 = vmax.f32 %v3798_v13, 0.0  ;;  %v3792_v10 = vadd.f32 %v10012_v18, %v10395_v21  ;;  %v3904_v36 = vmax.f32 %v3808_v45, 0.0  ;;  %v10656_v19 = vmax.f32 %v3907_v22, %v3973_v54 }
 0x2c2   :  { %14127 = vst [vmem:[#allocation28_spill] sm:$0xff] %v10641_v3  ;;  %v3814_v27 = vadd.f32 %v10402_v0, %v10014_v7  ;;  %v7946_v5 = vpack.i.bf16 %v10621_v50, %v10634_v28  ;;  %v10662_v44 = vmax.f32 %v3908_v56, %v3974_v15  ;;  %v10666_v47 = vadd.f32 %v10525_v1, %v14133_v32  ;;  %v14135_v15 = vld [vmem:[#allocation43_spill] sm:$0xff] }
 0x2c3   :  { %14131 = vst [vmem:[#allocation42_spill] sm:$0xff] %v10656_v19  ;;  %v7981_v13 = vpack.i.bf16 %v10632_v37, %v10645_v16  ;;  %v10672_v21 = vadd.f32 %v10537_v2, %v14134_v23  ;;  %v5423_v22 = vrot.slane %v3903_v49, 1  ;;  %v3897_v43 = vmax.f32 %v3801_v11, 0.0  ;;  %v14136_v2 = vld [vmem:[#allocation44_spill] sm:$0xff] }
 0x2c4   :  { %14132 = vst [vmem:[#allocation64_spill] sm:$0xff] %v10662_v44  ;;  %v3810_v0 = vadd.f32 %v10458_v40, %v10012_v18  ;;  %7947 = vrot.lane.b32.xlu0 %v7946_v5, %s8160_s2  ;;  %v10679_v56 = vadd.f32 %v10550_v42, %v14135_v15  ;;  %v3815_v1 = vadd.f32 %v10410_v38, %v10016_v63  ;;  %v6140_v45 = vrot.slane %v3894_v48, 1 }
 0x2c5   :  { %v3888_v54 = vmax.f32 %v3792_v10, 0.0  ;;  %7982 = vrot.lane.b32.xlu1 %v7981_v13, %s8160_s2  ;;  %v10686_v58 = vadd.f32 %v10561_v17, %v14136_v2  ;;  %v10688_v11 = vmax.f32 %v3899_v59, %v4722_v8  ;;  %v3905_v40 = vmax.f32 %v3809_v29, 0.0 }
 0x2c6   :  { %v3817_v24 = vadd.f32 %v10490_v26, %v10014_v7  ;;  %v7951_v42 = vpack.i.bf16 %v10444_v61, %v10648_v12  ;;  %v10694_v5 = vmax.f32 %v3902_v34, %v5422_v33  ;;  %v6141_v38 = vrot.slane %v3904_v36, 1 }
 0x2c7   :  { %14137 = vst [vmem:[#allocation5_spill] sm:$0xff] %v10688_v11  ;;  %v3910_v32 = vmax.f32 %v3814_v27, 0.0  ;;  %v7986_v10 = vpack.i.bf16 %v10662_v44, %v10656_v19  ;;  %v10698_v13 = vmax.f32 %v3903_v49, %v5423_v22  ;;  %v3972_v17 = vrot.slane %v3897_v43, 1 }
 0x2c8   :  { %14138 = vst [vmem:[#allocation26_spill] sm:$0xff] %v10694_v5  ;;  %v3906_v23 = vmax.f32 %v3810_v0, 0.0  ;;  %v3804_v59 = vadd.f32 %v10012_v18, %v10470_v52  ;;  %7952 = vrot.lane.b32.xlu0 %v7951_v42, %s8160_s2  ;;  %v3911_v26 = vmax.f32 %v3815_v1, 0.0  ;;  %v10703_v8 = vmax.f32 %v3894_v48, %v6140_v45 }
 0x2c9   :  { %14139 = vst [vmem:[#allocation43_spill] sm:$0xff] %v10698_v13  ;;  %v4720_v29 = vrot.slane %v3888_v54, 1  ;;  %v3818_v34 = vadd.f32 %v10496_v6, %v10016_v63  ;;  %7987 = vrot.lane.b32.xlu1 %v7986_v10, %s8160_s2  ;;  %v6142_v33 = vrot.slane %v3905_v40, 1  ;;  %v3913_v27 = vmax.f32 %v3817_v24, 0.0 }
 0x2ca   :  { %14140 = vst [vmem:[#allocation44_spill] sm:$0xff] %v10703_v8  ;;  %v3820_v49 = vadd.f32 %v10502_v51, %v10014_v7  ;;  %v3821_v22 = vadd.f32 %v10507_v9, %v10016_v63  ;;  %v10712_v52 = vmax.f32 %v3904_v36, %v6141_v38  ;;  %v4724_v0 = vrot.slane %v3910_v32, 1 }
 0x2cb   :  { %v3823_v48 = vadd.f32 %v10588_v14, %v10014_v7  ;;  %v3813_v15 = vadd.f32 %v10012_v18, %v10535_v62  ;;  %v10718_v6 = vmax.f32 %v3897_v43, %v3972_v17  ;;  %v6143_v1 = vrot.slane %v3906_v23, 1 }
 0x2cc   :  { %14141 = vst [vmem:[#allocation65_spill] sm:$0xff] %v10712_v52  ;;  %v3900_v45 = vmax.f32 %v3804_v59, 0.0  ;;  %v8006_v2 = vpack.i.bf16 %v10698_v13, %v10694_v5  ;;  %v4725_v51 = vrot.slane %v3911_v26, 1  ;;  %v10722_v24 = vmax.f32 %v3888_v54, %v4720_v29 }
 0x2cd   :  { %14142 = vst [vmem:[#allocation66_spill] sm:$0xff] %v10718_v6  ;;  %v3914_v9 = vmax.f32 %v3818_v34, 0.0  ;;  %v7991_v36 = vpack.i.bf16 %v10712_v52, %v10703_v8  ;;  %v10726_v42 = vmax.f32 %v3905_v40, %v6142_v33  ;;  %v5424_v14 = vrot.slane %v3913_v27, 1 }
 0x2ce   :  { %14143 = vst [vmem:[#allocation67_spill] sm:$0xff] %v10722_v24  ;;  %v3916_v38 = vmax.f32 %v3820_v49, 0.0  ;;  %v3917_v10 = vmax.f32 %v3821_v22, 0.0  ;;  %8007 = vrot.lane.b32.xlu0 %v8006_v2, %s8160_s2  ;;  %v3919_v62 = vmax.f32 %v3823_v48, 0.0  ;;  %v3826_v43 = vadd.f32 %v10599_v39, %v10014_v7 }
 0x2cf   :  { %14144 = vst [vmem:[#allocation68_spill] sm:$0xff] %v10726_v42  ;;  %v3909_v17 = vmax.f32 %v3813_v15, 0.0  ;;  %v3816_v54 = vadd.f32 %v10012_v18, %v10559_v60  ;;  %7992 = vrot.lane.b32.xlu1 %v7991_v36, %s8160_s2  ;;  %v10734_v59 = vmax.f32 %v3910_v32, %v4724_v0  ;;  %v10736_v29 = vmax.f32 %v3906_v23, %v6143_v1 }
 0x2d0   :  { %v4723_v40 = vrot.slane %v3900_v45, 1  ;;  %v8011_v34 = vpack.i.bf16 %v10718_v6, %v10641_v3  ;;  %v10740_v33 = vmax.f32 %v3911_v26, %v4725_v51  ;;  %v5425_v49 = vrot.slane %v3914_v9, 1 }
 0x2d1   :  { %14145 = vst [vmem:[#allocation69_spill] sm:$0xff] %v10734_v59  ;;  %14146 = vst [vmem:[#allocation70_spill] sm:$0xff] %v10736_v29  ;;  %v3825_v39 = vadd.f32 %v10012_v18, %v10610_v55  ;;  %v7996_v22 = vpack.i.bf16 %v10643_v31, %v10722_v24  ;;  %v10746_v60 = vmax.f32 %v3913_v27, %v5424_v14  ;;  %v6144_v48 = vrot.slane %v3916_v38, 1  ;;  %v14227_v24 = vld [vmem:[#allocation34_spill] sm:$0xff] }
 0x2d2   :  { %14147 = vst [vmem:[#allocation71_spill] sm:$0xff] %v10740_v33  ;;  %v6145_v32 = vrot.slane %v3917_v10, 1  ;;  %v3824_v23 = vadd.f32 %v10594_v4, %v10016_v63  ;;  %8012 = vrot.lane.b32.xlu0 %v8011_v34, %s8160_s2  ;;  %v3976_v0 = vrot.slane %v3919_v62, 1  ;;  %v3922_v15 = vmax.f32 %v3826_v43, 0.0 }
 0x2d3   :  { %14148 = vst [vmem:[#allocation72_spill] sm:$0xff] %v10746_v60  ;;  %v3975_v26 = vrot.slane %v3909_v17, 1  ;;  %v3912_v1 = vmax.f32 %v3816_v54, 0.0  ;;  %7997 = vrot.lane.b32.xlu1 %v7996_v22, %s8160_s2  ;;  %v10752_v2 = vmax.f32 %v3900_v45, %v4723_v40  ;;  %v3829_v55 = vadd.f32 %v10666_v47, %v10014_v7 }
 0x2d4   :  { %v3831_v27 = vadd.f32 %v10601_v53, %v10012_v18  ;;  %v8021_v51 = vpack.i.bf16 %v10736_v29, %v10726_v42  ;;  %v10760_v4 = vmax.f32 %v3914_v9, %v5425_v49  ;;  %v3830_v36 = vadd.f32 %v10672_v21, %v10016_v63  ;;  %v14226_v29 = vld [vmem:[#allocation2_spill] sm:$0xff] }
 0x2d5   :  { %14149 = vst [vmem:[#allocation73_spill] sm:$0xff] %v10752_v2  ;;  %v3921_v14 = vmax.f32 %v3825_v39, 0.0  ;;  %v8001_v43 = vpack.i.bf16 %v10740_v33, %v10734_v59  ;;  %v10766_v45 = vmax.f32 %v3916_v38, %v6144_v48  ;;  %v10768_v54 = vmax.f32 %v3917_v10, %v6145_v32  ;;  %v14195_v33 = vld [vmem:[#allocation27_spill] sm:$0xff] }
 0x2d6   :  { %14150 = vst [vmem:[#allocation74_spill] sm:$0xff] %v10760_v4  ;;  %v3920_v47 = vmax.f32 %v3824_v23, 0.0  ;;  %v3819_v53 = vadd.f32 %v10523_v35, %v10012_v18  ;;  %8022 = vrot.lane.b32.xlu0 %v8021_v51, %s8160_s2  ;;  %v10773_v40 = vmax.f32 %v3919_v62, %v3976_v0  ;;  %v4727_v9 = vrot.slane %v3922_v15, 1 }
 0x2d7   :  { %14151 = vst [vmem:[#allocation75_spill] sm:$0xff] %v10766_v45  ;;  %14152 = vst [vmem:[#allocation76_spill] sm:$0xff] %v10768_v54  ;;  %v10775_v34 = vmax.f32 %v3909_v17, %v3975_v26  ;;  %v4726_v21 = vrot.slane %v3912_v1, 1  ;;  %8002 = vrot.lane.b32.xlu1 %v8001_v43, %s8160_s2  ;;  %v3925_v49 = vmax.f32 %v3829_v55, 0.0  ;;  %v3927_v39 = vmax.f32 %v3831_v27, 0.0 }
 0x2d8   :  { %14153 = vst [vmem:[#allocation77_spill] sm:$0xff] %v10773_v40  ;;  %v3832_v38 = vadd.f32 %v10679_v56, %v10014_v7  ;;  %v8026_v10 = vpack.i.bf16 %v10752_v2, %v10688_v11  ;;  %v3926_v22 = vmax.f32 %v3830_v36, 0.0  ;;  %v3978_v35 = vrot.slane %v3921_v14, 1 }
 0x2d9   :  { %14154 = vst [vmem:[#allocation78_spill] sm:$0xff] %v10775_v34  ;;  %v3828_v62 = vadd.f32 %v10012_v18, %v10628_v20  ;;  %v8016_v17 = vpack.i.bf16 %v10760_v4, %v10746_v60  ;;  %v3977_v48 = vrot.slane %v3920_v47, 1  ;;  %v3915_v32 = vmax.f32 %v3819_v53, 0.0  ;;  %v14198_v60 = vld [vmem:[#allocation9_spill] sm:$0xff]  ;;  %v14284_v4 = vld [vmem:[#allocation39_spill] sm:$0xff] }
 0x2da   :  { %v3827_v23 = vadd.f32 %v10608_v30, %v10016_v63  ;;  %v3822_v0 = vadd.f32 %v10548_v46, %v10012_v18  ;;  %8027 = vrot.lane.b32.xlu0 %v8026_v10, %s8160_s2  ;;  %v10791_v7 = vmax.f32 %v3922_v15, %v4727_v9  ;;  %v10793_v56 = vmax.f32 %v3912_v1, %v4726_v21 }
 0x2db   :  { %v3833_v20 = vadd.f32 %v10686_v58, %v10016_v63  ;;  %v3834_v26 = vadd.f32 %v10617_v57, %v10012_v18  ;;  %8017 = vrot.lane.b32.xlu1 %v8016_v17, %s8160_s2  ;;  %v5427_v55 = vrot.slane %v3925_v49, 1  ;;  %v5429_v27 = vrot.slane %v3927_v39, 1 }
 0x2dc   :  { %14155 = vst [vmem:[#allocation79_spill] sm:$0xff] %v10791_v7  ;;  %14156 = vst [vmem:[#allocation80_spill] sm:$0xff] %v10793_v56  ;;  %v3928_v30 = vmax.f32 %v3832_v38, 0.0  ;;  %v8036_v46 = vpack.i.bf16 %v10773_v40, %v10775_v34  ;;  %v5428_v51 = vrot.slane %v3926_v22, 1  ;;  %v10802_v36 = vmax.f32 %v3921_v14, %v3978_v35  ;;  %v14199_v34 = vld [vmem:[#allocation32_spill] sm:$0xff] }
 0x2dd   :  { %v3924_v15 = vmax.f32 %v3828_v62, 0.0  ;;  %v8031_v1 = vpack.i.bf16 %v10768_v54, %v10766_v45  ;;  %v5426_v43 = vrot.slane %v3915_v32, 1  ;;  %v3918_v63 = vmax.f32 %v3822_v0, 0.0  ;;  %v4275_v45 = vld [vmem:[%s13608_s3] sm:$0x11] }
 0x2de   :  { %14157 = vst [vmem:[#allocation81_spill] sm:$0xff] %v10802_v36  ;;  %8037 = vrot.lane.b32.xlu0 %v8036_v46, %s8160_s2  ;;  %v10807_v18 = vmax.f32 %v3920_v47, %v3977_v48  ;;  %v3923_v57 = vmax.f32 %v3827_v23, 0.0  ;;  %v3930_v58 = vmax.f32 %v3834_v26, 0.0  ;;  %v10810_v53 = vmax.f32 %v3925_v49, %v5427_v55 }
 0x2df   :  { %8032 = vrot.lane.b32.xlu1 %v8031_v1, %s8160_s2  ;;  %v6147_v9 = vrot.slane %v3928_v30, 1  ;;  %v3929_v21 = vmax.f32 %v3833_v20, 0.0  ;;  %v8041_v14 = vpack.i.bf16 %v10791_v7, %v10793_v56  ;;  %v10814_v38 = vmax.f32 %v3926_v22, %v5428_v51  ;;  %v10830_v20 = vpop.permute.xlu0 %7837 }
 0x2e0   :  { %14158 = vst [vmem:[#allocation82_spill] sm:$0xff] %v10807_v18  ;;  %14159 = vst [vmem:[#allocation83_spill] sm:$0xff] %v10810_v53  ;;  %v10816_v10 = vmax.f32 %v3927_v39, %v5429_v27  ;;  %v4729_v35 = vrot.slane %v3924_v15, 1  ;;  %v8046_v47 = vpack.i.bf16 %v10802_v36, %v10807_v18  ;;  %v10820_v62 = vmax.f32 %v3915_v32, %v5426_v43 }
 0x2e1   :  { %14160 = vst [vmem:[#allocation84_spill] sm:$0xff] %v10814_v38  ;;  %v6146_v17 = vrot.slane %v3918_v63, 1  ;;  %v4728_v49 = vrot.slane %v3923_v57, 1  ;;  %v10824_v48 = vmax.f32 %v3928_v30, %v6147_v9  ;;  %v6148_v23 = vrot.slane %v3929_v21, 1 }
 0x2e2   :  { %14161 = vst [vmem:[#allocation85_spill] sm:$0xff] %v10816_v10  ;;  %14162 = vst [vmem:[#allocation86_spill] sm:$0xff] %v10820_v62  ;;  %8042 = vrot.lane.b32.xlu0 %v8041_v14, %s8160_s2  ;;  %v8051_v22 = vpack.i.bf16 %v10810_v53, %v10820_v62  ;;  %v6149_v39 = vrot.slane %v3930_v58, 1  ;;  %v10828_v0 = vmax.f32 %v3924_v15, %v4729_v35  ;;  %v10849_v15 = vpop.permute.xlu1 %7857  ;;  %v7839_v14 = vunpack.i.l.bf16 %v10830_v20  ;;  %v5721_v62 = vld [vmem:[%s13608_s3 + $0x14] sm:$0x1] }
 0x2e3   :  { %8047 = vrot.lane.b32.xlu1 %v8046_v47, %s8160_s2  ;;  %14163 = vst [vmem:[#allocation87_spill] sm:$0xff] %v10824_v48  ;;  %v8056_v32 = vpack.i.bf16 %v10816_v10, %v10814_v38  ;;  %v10834_v26 = vmax.f32 %v3918_v63, %v6146_v17  ;;  %v10837_v55 = vmax.f32 %v3923_v57, %v4728_v49  ;;  %v10851_v1 = vpop.permute.xlu0 %7842  ;;  %v14176_v7 = vunpack.i.h.bf16 %v10849_v15  ;;  %v14188_v10 = vld [vmem:[#allocation4_spill] sm:$0xff] }
 0x2e4   :  { %14164 = vst [vmem:[#allocation88_spill] sm:$0xff] %v10828_v0  ;;  %v10842_v30 = vmax.f32 %v3929_v21, %v6148_v23  ;;  %v10844_v46 = vmax.f32 %v3930_v58, %v6149_v39  ;;  %v13759_v21 = vunpack.i.h.bf16 %v10830_v20  ;;  %v13760_v35 = vunpack.i.h.bf16 %v10851_v1 }
 0x2e5   :  { %14165 = vst [vmem:[#allocation89_spill] sm:$0xff] %v10834_v26  ;;  %14166 = vst [vmem:[#allocation90_spill] sm:$0xff] %v10837_v55  ;;  %v8066_v27 = vpack.i.bf16 %v10824_v48, %v10834_v26  ;;  %v8061_v51 = vpack.i.bf16 %v10828_v0, %v10837_v55  ;;  %v7844_v47 = vunpack.i.l.bf16 %v10851_v1  ;;  %v14207_v31 = vmov 0 }
 0x2e6   :  { %8052 = vrot.lane.b32.xlu0 %v8051_v22, %s8160_s2  ;;  %14167 = vst [vmem:[#allocation91_spill] sm:$0xff] %v10842_v30  ;;  %14168 = vst [vmem:[#allocation92_spill] sm:$0xff] %v10844_v46  ;;  %v8071_v43 = vpack.i.bf16 %v10844_v46, %v10842_v30  ;;  %v10857_v63 = vpop.permute.xlu1 %7862  ;;  %v14175_v46 = vld [vmem:[#allocation3_spill] sm:$0xff]  ;;  %v14208_v31 = vsel %vm11039_vm8, 4294967295, %v14207_v31  ;;  %v14210_v40 = vmov 0 }
 0x2e7   :  { %8057 = vrot.lane.b32.xlu1 %v8056_v32, %s8160_s2  ;;  %v10859_v57 = vpop.permute.xlu0 %7847  ;;  %v10878_v32 = vsel %vm13814_vm13, %v7839_v14, %v13759_v21  ;;  %v7864_v14 = vunpack.i.l.bf16 %v10857_v63  ;;  %v14174_v21 = vld [vmem:[#allocation25_spill] sm:$0xff]  ;;  %v14180_v48 = vunpack.i.h.bf16 %v10857_v63  ;;  %v14211_v40 = vsel %vm11051_vm7, 4294967295, %v14210_v40 }
 0x2e8   :  { %v7850_v17 = vunpack.i.h.bf16 %v10859_v57  ;;  %v7849_v49 = vunpack.i.l.bf16 %v10859_v57 }
 0x2ea   :  { %8067 = vrot.lane.b32.xlu0 %v8066_v27, %s8160_s2  ;;  %v10861_v58 = vpop.permute.xlu1 %7867  ;;  %v10883_v27 = vsel %vm13814_vm13, %v7844_v47, %v13760_v35  ;;  %v5550_v57 = vsel %vm13814_vm13, %v7849_v49, %v7850_v17  ;;  %v14203_v49 = vmov 0 }
 0x2eb   :  { %8062 = vrot.lane.b32.xlu1 %v8061_v51, %s8160_s2  ;;  %v10863_v9 = vpop.permute.xlu0 %7852  ;;  %v7869_v47 = vunpack.i.l.bf16 %v10861_v58  ;;  %v5590_v55 = vmax.f32 %v14175_v46, %v5550_v57  ;;  %v10934_v46 = vsel %vm13814_vm13, %v7864_v14, %v14180_v48  ;;  %v14184_v38 = vunpack.i.h.bf16 %v10861_v58 }
 0x2ec   :  { %v13763_v22 = vunpack.i.h.bf16 %v10863_v9  ;;  %v7854_v23 = vunpack.i.l.bf16 %v10863_v9  ;;  %v14204_v49 = vsel %vm11013_vm14, 4294967295, %v14203_v49  ;;  %v14222_v42 = vunpack.i.h.bf16 %v10863_v9 }
 0x2ed   :  { %v14230_v9 = vmov 0 }
 0x2ee   :  { %v10873_v39 = vpop.permute.xlu1 %7872  ;;  %v10891_v30 = vsel %vm13814_vm13, %v7854_v23, %v13763_v22  ;;  %v14173_v22 = vld [vmem:[#allocation20_spill] sm:$0xff]  ;;  %v14231_v9 = vsel %vm11130_vm4, 4294967295, %v14230_v9 }
 0x2ef   :  { %8072 = vrot.lane.b32.xlu1 %v8071_v43, %s8160_s2  ;;  %v7859_v43 = vunpack.i.l.bf16 %v10849_v15  ;;  %v7874_v51 = vunpack.i.l.bf16 %v10873_v39  ;;  %v4140_v35 = vmax.f32 %v14173_v22, %v10878_v32  ;;  %v14179_v22 = vld [vmem:[#allocation6_spill] sm:$0xff]  ;;  %14181 = vst [vmem:[#allocation20_spill] sm:$0xff] %v10934_v46  ;;  %v10948_v32 = vsel %vm13814_vm13, %v7869_v47, %v14184_v38  ;;  %v14191_v47 = vld [vmem:[#allocation11_spill] sm:$0xff] }
 0x2f0   :  { %v14185_v48 = vunpack.i.h.bf16 %v10873_v39 }
 0x2f1   :  { %v10919_v0 = vsel %vm13814_vm13, %v7859_v43, %v14176_v7 }
 0x2f2   :  { %v10953_v14 = vsel %vm13814_vm13, %v7874_v51, %v14185_v48 }
 0x301   :  { %v10927_v26 = vpop.permute.xlu1 %7877 }
 0x302   :  { %v7879_v43 = vunpack.i.l.bf16 %v10927_v26  ;;  %v10943_v57 = vpop.permute.xlu0 %7882 }
 0x303   :  { %v7884_v53 = vunpack.i.l.bf16 %v10943_v57 }
 0x304   :  { %v5551_v51 = vsel %vm13814_vm13, %v7850_v17, %v7879_v43  ;;  %v5592_v48 = vmax.f32 %v14191_v47, %v7879_v43  ;;  %v14196_v17 = vunpack.i.h.bf16 %v10830_v20  ;;  %v14197_v47 = vld [vmem:[#allocation33_spill] sm:$0xff] }
 0x305   :  { %v5591_v36 = vmax.f32 %v14195_v33, %v5551_v51  ;;  %v4142_v56 = vmax.f32 %v14197_v47, %v7884_v53  ;;  %v10988_v18 = vpop.permute.xlu1 %7892  ;;  %v14200_v33 = vmov 0  ;;  %v4280_v51 = vld [vmem:[%s13608_s3 + $0x8] sm:$0x1] }
 0x306   :  { %v4101_v43 = vsel %vm13814_vm13, %v14196_v17, %v7884_v53  ;;  %v14201_v33 = vsel %vm10998_vm12, 4294967295, %v14200_v33  ;;  %v5718_v53 = vld [vmem:[%s13608_s3 + $0xc] sm:$0x11]  ;;  %v7145_v20 = vpack.c.bf16 %v5592_v48, %v5592_v48  ;;  %v14202_v17 = vld [vmem:[#allocation18_spill] sm:$0xff]  ;;  %v5961_v48 = vld [vmem:[%s13608_s3 + $0x14] sm:$0x2]  ;;  %v11033_v44 = vpop.permute.xlu0 %7887  ;;  %v7894_v7 = vunpack.i.l.bf16 %v10988_v18 }
 0x307   :  { %v4141_v47 = vmax.f32 %v14202_v17, %v4101_v43  ;;  %v7144_v17 = vpack.c.bf16 %v5591_v36, %v5590_v55  ;;  %v11031_v11 = vpack.c.bf16 %v4142_v56, %v4142_v56  ;;  %v5958_v36 = vld [vmem:[%s13608_s3 + $0xc] sm:$0x22] }
 0x308   :  { %v5722_v55 = vsel %vm10923_vm2, %v7145_v20, %v5721_v62  ;;  %v7065_v56 = vrot.slane %v7145_v20, 9  ;;  %v5772_v59 = vshll.u32 %v7145_v20, 16  ;;  %v6312_v3 = vmax.f32 %v14227_v24, %v7894_v7 }
 0x309   :  { %v7112_v43 = vpack.c.bf16 %v4141_v47, %v4140_v35  ;;  %v5719_v38 = vsel %vm10998_vm12, %v7144_v17, %v5718_v53  ;;  %5723 = vst [vmem:[%s13608_s3 + $0x14] sm:$0x1] %v5722_v55  ;;  %v7064_v62 = vrot.slane %v7144_v17, 9  ;;  %v4281_v35 = vsel %vm10923_vm2, %v11031_v11, %v4280_v51  ;;  %v11080_v2 = vpop.permute.xlu1 %7897 }
 0x30a   :  { %5720 = vst [vmem:[%s13608_s3 + $0xc] sm:$0x11] %v5719_v38  ;;  %v5767_v53 = vshll.u32 %v7144_v17, 16  ;;  %v5962_v20 = vsel %vm11019_vm9, %v7065_v56, %v5961_v48  ;;  %4282 = vst [vmem:[%s13608_s3 + $0x8] sm:$0x1] %v4281_v35  ;;  %v4331_v35 = vshll.u32 %v11031_v11, 16  ;;  %v6271_v56 = vsel %vm13814_vm13, %v14222_v42, %v7894_v7 }
 0x30b   :  { %v4276_v55 = vsel %vm10998_vm12, %v7112_v43, %v4275_v45  ;;  %v5959_v38 = vsel %vm11039_vm8, %v7064_v62, %v5958_v36  ;;  %5963 = vst [vmem:[%s13608_s3 + $0x14] sm:$0x2] %v5962_v20  ;;  %v4530_v48 = vld [vmem:[%s13608_s3] sm:$0x22]  ;;  %v4535_v17 = vld [vmem:[%s13608_s3 + $0x8] sm:$0x2]  ;;  %v7889_v62 = vunpack.i.l.bf16 %v11033_v44  ;;  %v11126_v19 = vpop.permute.xlu0 %7902 }
 0x30c   :  { %4277 = vst [vmem:[%s13608_s3] sm:$0x11] %v4276_v55  ;;  %v4326_v45 = vshll.u32 %v7112_v43, 16  ;;  %5960 = vst [vmem:[%s13608_s3 + $0xc] sm:$0x22] %v5959_v38  ;;  %v6984_v20 = vrot.slane %v7112_v43, 9  ;;  %v6985_v55 = vrot.slane %v11031_v11, 9  ;;  %v6311_v11 = vmax.f32 %v14226_v29, %v6271_v56 }
 0x30d   :  { %v7049_v38 = vrot.slane %v5772_v59, 9  ;;  %v7081_v43 = vrot.slane %v5772_v59, 10  ;;  %14228 = vst [vmem:[#allocation25_spill] sm:$0xff] %v11126_v19  ;;  %v7048_v42 = vrot.slane %v5767_v53, 9  ;;  %v7080_v37 = vrot.slane %v5767_v53, 10 }
 0x30e   :  { %v4531_v6 = vsel %vm11039_vm8, %v6984_v20, %v4530_v48  ;;  %v4536_v59 = vsel %vm11019_vm9, %v6985_v55, %v4535_v17  ;;  %v6968_v29 = vrot.slane %v4326_v45, 9  ;;  %v11144_v24 = vrot.slane %v4326_v45, 10  ;;  %v6454_v53 = vld [vmem:[%s13608_s3 + $0xc] sm:$0x44]  ;;  %v11162_v45 = vpop.permute.xlu1 %7912 }
 0x30f   :  { %4532 = vst [vmem:[%s13608_s3] sm:$0x22] %v4531_v6  ;;  %4537 = vst [vmem:[%s13608_s3 + $0x8] sm:$0x2] %v4536_v59  ;;  %v14232_v7 = vmov 0  ;;  %v14235_v6 = vmax.f32 %v14179_v22, %v10891_v30  ;;  %v11160_v17 = vpack.c.bf16 %v6312_v3, %v6312_v3  ;;  %v6969_v36 = vrot.slane %v4331_v35, 9 }
 0x310   :  { %v14233_v7 = vsel %vm11150_vm0, 4294967295, %v14232_v7  ;;  %v5865_v51 = vld [vmem:[%s13608_s3 + $0x14] sm:$0x1]  ;;  %v7001_v56 = vrot.slane %v4331_v35, 10  ;;  %v6457_v30 = vld [vmem:[%s13608_s3 + $0x14] sm:$0x4]  ;;  %v14240_v3 = vunpack.i.h.bf16 %v11033_v44  ;;  %v7899_v55 = vunpack.i.l.bf16 %v11080_v2 }
 0x311   :  { %14234 = vst [vmem:[#allocation3_spill] sm:$0xff] %v14233_v7  ;;  %v7160_v48 = vpack.c.bf16 %v6311_v11, %v14235_v6  ;;  %v5862_v11 = vld [vmem:[%s13608_s3 + $0xc] sm:$0x11]  ;;  %v5866_v59 = vsel %vm11051_vm7, %v7049_v38, %v5865_v51  ;;  %v6423_v47 = vrot.slane %v11160_v17, 6  ;;  %vm14258_vm8 = vcmask 1047559  }
 0x312   :  { %v11179_v22 = vsel %vm13814_vm13, %v7889_v62, %v14240_v3  ;;  %v4430_v62 = vld [vmem:[%s13608_s3 + $0x8] sm:$0x1]  ;;  %v5863_v3 = vsel %vm11013_vm14, %v7048_v42, %v5862_v11  ;;  %5867 = vst [vmem:[%s13608_s3 + $0x14] sm:$0x1] %v5866_v59  ;;  %v6057_v38 = vld [vmem:[%s13608_s3 + $0x14] sm:$0x2] }
 0x313   :  { %14241 = vst [vmem:[#allocation6_spill] sm:$0xff] %v11179_v22  ;;  %v6422_v6 = vrot.slane %v7160_v48, 6  ;;  %v4426_v51 = vld [vmem:[%s13608_s3] sm:$0x11]  ;;  %v4431_v8 = vsel %vm11051_vm7, %v6969_v36, %v4430_v62  ;;  %v6503_v42 = vshll.u32 %v7160_v48, 16  ;;  %v6058_v36 = vsel %vm11130_vm4, %v7081_v43, %v6057_v38  ;;  %v11243_v43 = vpop.permute.xlu0 %7907  ;;  %v14261_v38 = vld [vmem:[#allocation23_spill] sm:$0xff] }
 0x314   :  { %5864 = vst [vmem:[%s13608_s3 + $0xc] sm:$0x11] %v5863_v3  ;;  %v6054_v59 = vld [vmem:[%s13608_s3 + $0xc] sm:$0x22]  ;;  %v4427_v62 = vsel %vm11013_vm14, %v6968_v29, %v4426_v51  ;;  %4432 = vst [vmem:[%s13608_s3 + $0x8] sm:$0x1] %v4431_v8  ;;  %v6458_v11 = vsel %vm11169_vm6, %v6423_v47, %v6457_v30 }
 0x315   :  { %v6455_v3 = vsel %vm11150_vm0, %v6422_v6, %v6454_v53  ;;  %v6055_v29 = vsel %vm11186_vm1, %v7080_v37, %v6054_v59  ;;  %6059 = vst [vmem:[%s13608_s3 + $0x14] sm:$0x2] %v6058_v36  ;;  %4428 = vst [vmem:[%s13608_s3] sm:$0x11] %v4427_v62  ;;  %v6507_v8 = vshll.u32 %v11160_v17, 16  ;;  %v14256_v53 = vunpack.i.h.bf16 %v10851_v1  ;;  %v14264_v36 = vld [vmem:[#allocation22_spill] sm:$0xff] }
 0x316   :  { %6456 = vst [vmem:[%s13608_s3 + $0xc] sm:$0x44] %v6455_v3  ;;  %6459 = vst [vmem:[%s13608_s3 + $0x14] sm:$0x4] %v6458_v11  ;;  %v7904_v6 = vunpack.i.l.bf16 %v11126_v19  ;;  %vm14257_vm14 = vsmask.f32 7424  ;;  %v14263_v59 = vunpack.i.h.bf16 %v11162_v45 }
 0x317   :  { %v4851_v30 = vsel %vm13814_vm13, %v14256_v53, %v7899_v55  ;;  %6056 = vst [vmem:[%s13608_s3 + $0xc] sm:$0x22] %v6055_v29  ;;  %vm11275_vm7 = vmand %vm14258_vm8, %vm14257_vm14  ;;  %v14262_v11 = vld [vmem:[#allocation21_spill] sm:$0xff]  ;;  %v4633_v3 = vld [vmem:[%s13608_s3] sm:$0x22]  ;;  %v14280_v37 = vmov 0 }
 0x318   :  { %v4891_v51 = vmax.f32 %v14261_v38, %v4851_v30  ;;  %v4892_v1 = vmax.f32 %v14262_v11, %v7899_v55  ;;  %v4145_v62 = vmax.f32 %v14264_v36, %v14263_v59  ;;  %v4637_v29 = vld [vmem:[%s13608_s3 + $0x8] sm:$0x2]  ;;  %vm11295_vm14 = vmor %vm11235_vm15, %vm11215_vm10  ;;  %v6505_v55 = vrot.slane %v6503_v42, 7  ;;  %v5267_v17 = vld [vmem:[%s13608_s3 + $0x8] sm:$0x8] }
 0x319   :  { %v7914_v11 = vunpack.i.l.bf16 %v11162_v45  ;;  %v7910_v59 = vunpack.i.h.bf16 %v11243_v43  ;;  %v4634_v36 = vsel %vm11186_vm1, %v11144_v24, %v4633_v3  ;;  %v4638_v52 = vsel %vm11130_vm4, %v7001_v56, %v4637_v29  ;;  %v4286_v24 = vld [vmem:[%s13608_s3 + $0x20] sm:$0x1]  ;;  %vm11340_vm3 = vmor %vm11275_vm7, %vm11262_vm11  ;;  %v5306_v35 = vld [vmem:[%s13608_s3 + $0xa8] sm:$0x88] }
 0x31a   :  { %vm14268_vm8 = vsmask.f32 7946  ;;  %vm14269_vm10 = vcmask 550914   ;;  %v14272_v42 = vmax.f32 %v14174_v21, %v10883_v27  ;;  %v11319_v47 = vpack.c.bf16 %v4892_v1, %v4892_v1  ;;  %4635 = vst [vmem:[%s13608_s3] sm:$0x22] %v4634_v36  ;;  %4639 = vst [vmem:[%s13608_s3 + $0x8] sm:$0x2] %v4638_v52 }
 0x31b   :  { %vm11310_vm15 = vmand %vm14269_vm10, %vm14268_vm8  ;;  %v6509_v56 = vrot.slane %v6507_v8, 7  ;;  %v5040_v21 = vld [vmem:[%s13608_s3] sm:$0x44]  ;;  %v5045_v27 = vld [vmem:[%s13608_s3 + $0x8] sm:$0x4]  ;;  %v14276_v1 = vunpack.i.h.bf16 %v11126_v19  ;;  %v7115_v3 = vpack.c.bf16 %v4145_v62, %v4145_v62  ;;  %v7909_v29 = vunpack.i.l.bf16 %v11243_v43  ;;  %v11370_v19 = vpop.permute.xlu0 %7917 }
 0x31c   :  { %v11317_v38 = vpack.c.bf16 %v4891_v51, %v14272_v42  ;;  %v14273_v51 = vmov 0  ;;  %v5262_v36 = vld [vmem:[%s13608_s3] sm:$0x88]  ;;  %vm14279_vm8 = vcmask 551939   ;;  %v5003_v62 = vrot.slane %v11319_v47, 6 }
 0x31d   :  { %v14274_v51 = vsel %vm11340_vm3, 4294967295, %v14273_v51  ;;  %v11347_v8 = vsel %vm13814_vm13, %v7904_v6, %v14276_v1  ;;  %vm11355_vm10 = vmand %vm14279_vm8, %vm14278_vm5  ;;  %v14282_v43 = vunpack.i.h.bf16 %v10943_v57  ;;  %v14283_v42 = vunpack.i.h.bf16 %v11162_v45  ;;  %v6582_v57 = vld [vmem:[%s13608_s3 + $0xc] sm:$0x44]  ;;  %v6585_v45 = vld [vmem:[%s13608_s3 + $0x14] sm:$0x4] }
 0x31e   :  { %14275 = vst [vmem:[#allocation4_spill] sm:$0xff] %v14274_v51  ;;  %14277 = vst [vmem:[#allocation11_spill] sm:$0xff] %v11347_v8  ;;  %v14281_v37 = vsel %vm11355_vm10, 4294967295, %v14280_v37  ;;  %v5002_v6 = vrot.slane %v11317_v38, 6  ;;  %v5224_v5 = vrot.slane %v11317_v38, 7  ;;  %v5225_v13 = vrot.slane %v11319_v47, 7 }
 0x31f   :  { %v4102_v52 = vsel %vm13814_vm13, %v14282_v43, %v7914_v11  ;;  %v4103_v1 = vsel %vm13814_vm13, %v7914_v11, %v14283_v42  ;;  %v4287_v46 = vsel %vm10923_vm2, %v7115_v3, %v4286_v24  ;;  %v5595_v61 = vmax.f32 %v14284_v4, %v7910_v59 }
 0x320   :  { %v5041_v11 = vsel %vm11150_vm0, %v5002_v6, %v5040_v21  ;;  %v5046_v43 = vsel %vm11169_vm6, %v5003_v62, %v5045_v27  ;;  %v13816_v42 = vshll.u32 %v11317_v38, 16  ;;  %v13815_v24 = vshll.u32 %v11319_v47, 16  ;;  %4288 = vst [vmem:[%s13608_s3 + $0x20] sm:$0x1] %v4287_v46  ;;  %v5727_v6 = vld [vmem:[%s13608_s3 + $0x2c] sm:$0x1] }
 0x321   :  { %v6583_v4 = vsel %vm11295_vm14, %v6505_v55, %v6582_v57  ;;  %v6586_v12 = vsel %vm11310_vm15, %v6509_v56, %v6585_v45  ;;  %5042 = vst [vmem:[%s13608_s3] sm:$0x44] %v5041_v11  ;;  %5047 = vst [vmem:[%s13608_s3 + $0x8] sm:$0x4] %v5046_v43  ;;  %v5263_v21 = vsel %vm11340_vm3, %v5224_v5, %v5262_v36  ;;  %v4541_v55 = vld [vmem:[%s13608_s3 + $0x20] sm:$0x2]  ;;  %vm14286_vm11 = vcmask 1043459  }
 0x322   :  { %v5268_v46 = vsel %vm11355_vm10, %v5225_v13, %v5267_v17  ;;  %6584 = vst [vmem:[%s13608_s3 + $0xc] sm:$0x44] %v6583_v4  ;;  %6587 = vst [vmem:[%s13608_s3 + $0x14] sm:$0x4] %v6586_v12  ;;  %vm14285_vm7 = vsmask.f32 7950  ;;  %v11440_v11 = vpack.c.bf16 %v5595_v61, %v5595_v61  ;;  %v14296_v43 = vunpack.i.h.bf16 %v10927_v26  ;;  %v7923_v13 = vpop.permute.xlu0 %7922 }
 0x323   :  { %vm11417_vm5 = vmand %vm14286_vm11, %vm14285_vm7  ;;  %5264 = vst [vmem:[%s13608_s3] sm:$0x88] %v5263_v21  ;;  %v4341_v27 = vshll.u32 %v7115_v3, 16  ;;  %v6987_v36 = vrot.slane %v7115_v3, 9  ;;  %v14290_v12 = vld [vmem:[#allocation14_spill] sm:$0xff]  ;;  %vm14291_vm8 = vsmask.f32 7966 }
 0x324   :  { %5269 = vst [vmem:[%s13608_s3 + $0x8] sm:$0x8] %v5268_v46  ;;  %v4143_v17 = vmax.f32 %v14290_v12, %v4102_v52  ;;  %vm14292_vm7 = vcmask 1047559   ;;  %v14295_v57 = vld [vmem:[#allocation38_spill] sm:$0xff]  ;;  %v5552_v3 = vsel %vm13814_vm13, %v14296_v43, %v7909_v29  ;;  %v5553_v52 = vsel %vm13814_vm13, %v7909_v29, %v7910_v59  ;;  %v4283_v21 = vld [vmem:[%s13608_s3 + $0x18] sm:$0x11] }
 0x325   :  { %vm11435_vm11 = vmand %vm14292_vm7, %vm14291_vm8  ;;  %v4144_v45 = vmax.f32 %v14295_v57, %v4103_v1  ;;  %v5093_v4 = vrot.slane %v13816_v42, 7  ;;  %v4542_v46 = vsel %vm11019_vm9, %v6987_v36, %v4541_v55  ;;  %v14297_v12 = vld [vmem:[#allocation12_spill] sm:$0xff]  ;;  %v5097_v26 = vrot.slane %v13815_v24, 7  ;;  %v5724_v29 = vld [vmem:[%s13608_s3 + $0x24] sm:$0x11] }
 0x326   :  { %v5593_v1 = vmax.f32 %v14297_v12, %v5552_v3  ;;  %v14298_v61 = vld [vmem:[#allocation16_spill] sm:$0xff]  ;;  %4543 = vst [vmem:[%s13608_s3 + $0x20] sm:$0x2] %v4542_v46  ;;  %v5967_v55 = vld [vmem:[%s13608_s3 + $0x2c] sm:$0x2]  ;;  %v5728_v36 = vsel %vm10923_vm2, %v11440_v11, %v5727_v6  ;;  %v7067_v43 = vrot.slane %v11440_v11, 9  ;;  %vm11474_vm8 = vmor %vm11435_vm11, %vm11417_vm5  ;;  %vm14306_vm11 = vnez %v14208_v31 }
 0x327   :  { %v5594_v57 = vmax.f32 %v14298_v61, %v5553_v52  ;;  %v7114_v59 = vpack.c.bf16 %v4144_v45, %v4143_v17  ;;  %v14299_v17 = vmov 0  ;;  %v4538_v45 = vld [vmem:[%s13608_s3 + $0x18] sm:$0x22]  ;;  %v6971_v3 = vrot.slane %v4341_v27, 9  ;;  %5729 = vst [vmem:[%s13608_s3 + $0x2c] sm:$0x1] %v5728_v36 }
 0x328   :  { %v14300_v17 = vsel %vm11474_vm8, 4294967295, %v14299_v17  ;;  %v7003_v52 = vrot.slane %v4341_v27, 10  ;;  %v5782_v6 = vshll.u32 %v11440_v11, 16  ;;  %vm14301_vm7 = vsmask.f32 7950 }
 0x329   :  { %v11485_v46 = vpack.c.bf16 %v5594_v57, %v5593_v1  ;;  %vm14302_vm13 = vcmask 551939   ;;  %v4436_v62 = vld [vmem:[%s13608_s3 + $0x20] sm:$0x1]  ;;  %v4284_v27 = vsel %vm10998_vm12, %v7114_v59, %v4283_v21  ;;  %v6986_v12 = vrot.slane %v7114_v59, 9  ;;  %v5175_v11 = vld [vmem:[%s13608_s3] sm:$0x44] }
 0x32a   :  { %vm11489_vm5 = vmand %vm14302_vm13, %vm14301_vm7  ;;  %v7925_v61 = vunpack.i.h.bf16 %v7923_v13  ;;  %v7924_v36 = vunpack.i.l.bf16 %v7923_v13  ;;  %v5179_v1 = vld [vmem:[%s13608_s3 + $0x8] sm:$0x4]  ;;  %vm14305_vm13 = vnez %v14211_v40  ;;  %4285 = vst [vmem:[%s13608_s3 + $0x18] sm:$0x11] %v4284_v27  ;;  %v4336_v24 = vshll.u32 %v7114_v59, 16 }
 0x32b   :  { %v4437_v57 = vsel %vm14305_vm13, %v6971_v3, %v4436_v62  ;;  %v5968_v21 = vsel %vm11019_vm9, %v7067_v43, %v5967_v55  ;;  %v5725_v13 = vsel %vm10998_vm12, %v11485_v46, %v5724_v29  ;;  %v5176_v42 = vsel %vm11295_vm14, %v5093_v4, %v5175_v11  ;;  %v5333_v3 = vld [vmem:[%s13608_s3] sm:$0x88]  ;;  %v5337_v59 = vld [vmem:[%s13608_s3 + $0x8] sm:$0x8] }
 0x32c   :  { %v5180_v8 = vsel %vm11310_vm15, %v5097_v26, %v5179_v1  ;;  %4438 = vst [vmem:[%s13608_s3 + $0x20] sm:$0x1] %v4437_v57  ;;  %v4539_v29 = vsel %vm14306_vm11, %v6986_v12, %v4538_v45  ;;  %5969 = vst [vmem:[%s13608_s3 + $0x2c] sm:$0x2] %v5968_v21  ;;  %v13822_v4 = vunpack.i.h.bf16 %v11370_v19  ;;  %v14307_v26 = vshll.u32 %v11317_v38, 16  ;;  %v11569_v1 = vpop.permute.xlu1 %7957 }
 0x32d   :  { %5726 = vst [vmem:[%s13608_s3 + $0x24] sm:$0x11] %v5725_v13  ;;  %5177 = vst [vmem:[%s13608_s3] sm:$0x44] %v5176_v42  ;;  %v14308_v43 = vshll.u32 %v11319_v47, 16  ;;  %v5964_v42 = vld [vmem:[%s13608_s3 + $0x24] sm:$0x22]  ;;  %v7919_v38 = vunpack.i.l.bf16 %v11370_v19  ;;  %v6315_v27 = vmax.f32 %v10379_v25, %v7925_v61  ;;  %v14309_v12 = vunpack.i.h.bf16 %v10988_v18 }
 0x32e   :  { %5181 = vst [vmem:[%s13608_s3 + $0x8] sm:$0x4] %v5180_v8  ;;  %v5334_v55 = vsel %vm11474_vm8, %v14307_v26, %v5333_v3  ;;  %4540 = vst [vmem:[%s13608_s3 + $0x18] sm:$0x22] %v4539_v29  ;;  %v5777_v8 = vshll.u32 %v11485_v46, 16  ;;  %v7051_v47 = vrot.slane %v5782_v6, 9  ;;  %v7928_v29 = vpop.permute.xlu0 %7927 }
 0x32f   :  { %v5338_v45 = vsel %vm11489_vm5, %v14308_v43, %v5337_v59  ;;  %5335 = vst [vmem:[%s13608_s3] sm:$0x88] %v5334_v55  ;;  %v7066_v62 = vrot.slane %v11485_v46, 9  ;;  %vm14310_vm7 = vcmask 949248   ;;  %v4643_v57 = vld [vmem:[%s13608_s3 + $0x20] sm:$0x2]  ;;  %v6970_v21 = vrot.slane %v4336_v24, 9 }
 0x330   :  { %5339 = vst [vmem:[%s13608_s3 + $0x8] sm:$0x8] %v5338_v45  ;;  %v6272_v11 = vsel %vm14310_vm7, %v14309_v12, %v7924_v36  ;;  %v7002_v13 = vrot.slane %v4336_v24, 10  ;;  %v7083_v3 = vrot.slane %v5782_v6, 10  ;;  %vm14311_vm12 = vmmov %vm14310_vm7  ;;  %v4644_v46 = vsel %vm11130_vm4, %v7003_v52, %v4643_v57  ;;  %v5871_v25 = vld [vmem:[%s13608_s3 + $0x2c] sm:$0x1] }
 0x331   :  { %v6273_v59 = vsel %vm14311_vm12, %v7924_v36, %v7925_v61  ;;  %v5965_v18 = vsel %vm14306_vm11, %v7066_v62, %v5964_v42  ;;  %v7163_v26 = vpack.c.bf16 %v6315_v27, %v6315_v27  ;;  %v14312_v55 = vld [vmem:[#allocation19_spill] sm:$0xff]  ;;  %4645 = vst [vmem:[%s13608_s3 + $0x20] sm:$0x2] %v4644_v46  ;;  %v5872_v24 = vsel %vm14305_vm13, %v7051_v47, %v5871_v25  ;;  %v4433_v42 = vld [vmem:[%s13608_s3 + $0x18] sm:$0x11]  ;;  %vm14319_vm11 = vmmov %vm14310_vm7 }
 0x332   :  { %v6313_v43 = vmax.f32 %v14312_v55, %v6272_v11  ;;  %v7050_v6 = vrot.slane %v5777_v8, 9  ;;  %5966 = vst [vmem:[%s13608_s3 + $0x24] sm:$0x22] %v5965_v18  ;;  %v6463_v52 = vld [vmem:[%s13608_s3 + $0x2c] sm:$0x4]  ;;  %v7960_v45 = vunpack.i.h.bf16 %v11569_v1  ;;  %v13823_v62 = vunpack.i.l.bf16 %v11569_v1  ;;  %v14315_v18 = vld [vmem:[#allocation48_spill] sm:$0xff] }
 0x333   :  { %v14313_v61 = vld [vmem:[#allocation47_spill] sm:$0xff]  ;;  %5873 = vst [vmem:[%s13608_s3 + $0x2c] sm:$0x1] %v5872_v24  ;;  %v6425_v47 = vrot.slane %v7163_v26, 6  ;;  %v7930_v27 = vunpack.i.h.bf16 %v7928_v29  ;;  %v7929_v12 = vunpack.i.l.bf16 %v7928_v29  ;;  %vm14314_vm12 = vnez %v14204_v49 }
 0x334   :  { %v6314_v36 = vmax.f32 %v14313_v61, %v6273_v59  ;;  %v4434_v11 = vsel %vm14314_vm12, %v6970_v21, %v4433_v42  ;;  %v6063_v57 = vld [vmem:[%s13608_s3 + $0x2c] sm:$0x2]  ;;  %v5868_v59 = vld [vmem:[%s13608_s3 + $0x24] sm:$0x11]  ;;  %v11614_v46 = vsel %vm14310_vm7, %v7919_v38, %v13822_v4  ;;  %v6460_v29 = vld [vmem:[%s13608_s3 + $0x24] sm:$0x44]  ;;  %v5601_v21 = vmax.f32 %v14315_v18, %v7960_v45 }
 0x335   :  { %4435 = vst [vmem:[%s13608_s3 + $0x18] sm:$0x11] %v4434_v11  ;;  %v4640_v55 = vld [vmem:[%s13608_s3 + $0x18] sm:$0x22]  ;;  %v6064_v24 = vsel %vm11130_vm4, %v7083_v3, %v6063_v57  ;;  %v5869_v38 = vsel %vm14314_vm12, %v7050_v6, %v5868_v59  ;;  %v7082_v61 = vrot.slane %v5777_v8, 10  ;;  %v6515_v8 = vshll.u32 %v7163_v26, 16  ;;  %vm14318_vm12 = vmmov %vm14310_vm7 }
 0x336   :  { %v7162_v25 = vpack.c.bf16 %v6314_v36, %v6313_v43  ;;  %v6464_v43 = vsel %vm11169_vm6, %v6425_v47, %v6463_v52  ;;  %v5739_v36 = vld [vmem:[%s13608_s3 + $0x5c] sm:$0x1]  ;;  %v4641_v42 = vsel %vm11186_vm1, %v7002_v13, %v4640_v55  ;;  %6065 = vst [vmem:[%s13608_s3 + $0x2c] sm:$0x2] %v6064_v24  ;;  %5870 = vst [vmem:[%s13608_s3 + $0x24] sm:$0x11] %v5869_v38  ;;  %v11646_v52 = vpop.permute.xlu1 %7962  ;;  %v14317_v57 = vunpack.i.h.bf16 %v11080_v2 }
 0x337   :  { %6465 = vst [vmem:[%s13608_s3 + $0x2c] sm:$0x4] %v6464_v43  ;;  %v7151_v6 = vpack.c.bf16 %v5601_v21, %v5601_v21  ;;  %4642 = vst [vmem:[%s13608_s3 + $0x18] sm:$0x22] %v4641_v42  ;;  %v11654_v13 = vsel %vm14310_vm7, %v13823_v62, %v7960_v45  ;;  %v14316_v47 = vld [vmem:[#allocation53_spill] sm:$0xff]  ;;  %v4853_v26 = vsel %vm14319_vm11, %v7929_v12, %v7930_v27  ;;  %v14322_v43 = vld [vmem:[#allocation50_spill] sm:$0xff] }
 0x338   :  { %v6424_v3 = vrot.slane %v7162_v25, 6  ;;  %v4895_v11 = vmax.f32 %v14316_v47, %v7930_v27  ;;  %v4852_v59 = vsel %vm14318_vm12, %v14317_v57, %v7929_v12  ;;  %v14320_v18 = vld [vmem:[#allocation45_spill] sm:$0xff]  ;;  %v6511_v24 = vshll.u32 %v7162_v25, 16  ;;  %vm14327_vm11 = vmmov %vm14310_vm7 }
 0x339   :  { %v5979_v45 = vld [vmem:[%s13608_s3 + $0x5c] sm:$0x2]  ;;  %v5740_v38 = vsel %vm10923_vm2, %v7151_v6, %v5739_v36  ;;  %v6060_v2 = vld [vmem:[%s13608_s3 + $0x24] sm:$0x22]  ;;  %v7071_v27 = vrot.slane %v7151_v6, 9  ;;  %v4894_v42 = vmax.f32 %v14322_v43, %v4853_v26  ;;  %v11683_v36 = vpop.permute.xlu0 %7932  ;;  %v6517_v47 = vrot.slane %v6515_v8, 7  ;;  %vm14329_vm12 = vmmov %vm14310_vm7 }
 0x33a   :  { %v6461_v55 = vsel %vm11150_vm0, %v6424_v3, %v6460_v29  ;;  %5741 = vst [vmem:[%s13608_s3 + $0x5c] sm:$0x1] %v5740_v38  ;;  %v11679_v12 = vpack.c.bf16 %v4895_v11, %v4895_v11  ;;  %v14321_v29 = vld [vmem:[#allocation36_spill] sm:$0xff]  ;;  %14323 = vst [vmem:[#allocation27_spill] sm:$0xff] %v11683_v36  ;;  %v6061_v3 = vsel %vm11186_vm1, %v7082_v61, %v6060_v2  ;;  %v14324_v57 = vld [vmem:[#allocation49_spill] sm:$0xff]  ;;  %v5802_v26 = vshll.u32 %v7151_v6, 16 }
 0x33b   :  { %6462 = vst [vmem:[%s13608_s3 + $0x24] sm:$0x44] %v6461_v55  ;;  %v4893_v25 = vmax.f32 %v14321_v29, %v4852_v59  ;;  %v5051_v38 = vld [vmem:[%s13608_s3 + $0x20] sm:$0x4]  ;;  %v5273_v11 = vld [vmem:[%s13608_s3 + $0x20] sm:$0x8]  ;;  %v7965_v59 = vunpack.i.h.bf16 %v11646_v52  ;;  %v5980_v61 = vsel %vm11019_vm9, %v7071_v27, %v5979_v45  ;;  %v11713_v45 = vpop.permute.xlu1 %7967 }
 0x33c   :  { %6062 = vst [vmem:[%s13608_s3 + $0x24] sm:$0x22] %v6061_v3  ;;  %v5005_v8 = vrot.slane %v11679_v12, 6  ;;  %v5227_v2 = vrot.slane %v11679_v12, 7  ;;  %v6513_v29 = vrot.slane %v6511_v24, 7  ;;  %v14325_v3 = vld [vmem:[#allocation55_spill] sm:$0xff] }
 0x33d   :  { %5981 = vst [vmem:[%s13608_s3 + $0x5c] sm:$0x2] %v5980_v61  ;;  %v5048_v43 = vld [vmem:[%s13608_s3 + $0x18] sm:$0x44]  ;;  %v11709_v21 = vpack.c.bf16 %v4894_v42, %v4893_v25  ;;  %v4151_v6 = vmax.f32 %v14325_v3, %v7965_v59  ;;  %v5270_v27 = vld [vmem:[%s13608_s3 + $0x18] sm:$0x88] }
 0x33e   :  { %v6591_v24 = vld [vmem:[%s13608_s3 + $0x2c] sm:$0x4]  ;;  %v5052_v61 = vsel %vm11169_vm6, %v5005_v8, %v5051_v38  ;;  %v5103_v25 = vshll.u32 %v11679_v12, 16  ;;  %v5274_v42 = vsel %vm11355_vm10, %v5227_v2, %v5273_v11  ;;  %v4298_v11 = vld [vmem:[%s13608_s3 + $0x50] sm:$0x1]  ;;  %v7934_v8 = vunpack.i.l.bf16 %v11683_v36 }
 0x33f   :  { %v6592_v55 = vsel %vm11310_vm15, %v6517_v47, %v6591_v24  ;;  %5053 = vst [vmem:[%s13608_s3 + $0x20] sm:$0x4] %v5052_v61  ;;  %5275 = vst [vmem:[%s13608_s3 + $0x20] sm:$0x8] %v5274_v42  ;;  %v5004_v38 = vrot.slane %v11709_v21, 6  ;;  %v5226_v12 = vrot.slane %v11709_v21, 7  ;;  %v7119_v24 = vpack.c.bf16 %v4151_v6, %v4151_v6  ;;  %v7938_v42 = vpop.permute.xlu0 %7937 }
 0x340   :  { %6593 = vst [vmem:[%s13608_s3 + $0x2c] sm:$0x4] %v6592_v55  ;;  %v7055_v47 = vrot.slane %v5802_v26, 9  ;;  %v7970_v61 = vunpack.i.h.bf16 %v11713_v45  ;;  %v7087_v4 = vrot.slane %v5802_v26, 10  ;;  %v14326_v6 = vunpack.i.l.bf16 %v11646_v52  ;;  %v4553_v26 = vld [vmem:[%s13608_s3 + $0x50] sm:$0x2] }
 0x341   :  { %v5883_v3 = vld [vmem:[%s13608_s3 + $0x5c] sm:$0x1]  ;;  %v5049_v5 = vsel %vm11150_vm0, %v5004_v38, %v5048_v43  ;;  %v5271_v55 = vsel %vm11340_vm3, %v5226_v12, %v5270_v27  ;;  %v4361_v43 = vshll.u32 %v7119_v24, 16  ;;  %v14331_v12 = vshll.u32 %v11709_v21, 16 }
 0x342   :  { %v6588_v62 = vld [vmem:[%s13608_s3 + $0x24] sm:$0x44]  ;;  %v11759_v2 = vsel %vm14327_vm11, %v14326_v6, %v7965_v59  ;;  %v5884_v30 = vsel %vm14305_vm13, %v7055_v47, %v5883_v3  ;;  %5050 = vst [vmem:[%s13608_s3 + $0x18] sm:$0x44] %v5049_v5  ;;  %5272 = vst [vmem:[%s13608_s3 + $0x18] sm:$0x88] %v5271_v55  ;;  %v4299_v59 = vsel %vm10923_vm2, %v7119_v24, %v4298_v11  ;;  %v7940_v47 = vunpack.i.h.bf16 %v7938_v42 }
 0x343   :  { %v6589_v22 = vsel %vm11295_vm14, %v6513_v29, %v6588_v62  ;;  %5885 = vst [vmem:[%s13608_s3 + $0x5c] sm:$0x1] %v5884_v30  ;;  %v5105_v5 = vrot.slane %v5103_v25, 7  ;;  %4300 = vst [vmem:[%s13608_s3 + $0x50] sm:$0x1] %v4299_v59  ;;  %v6991_v62 = vrot.slane %v7119_v24, 9  ;;  %v14328_v29 = vunpack.i.h.bf16 %v11683_v36  ;;  %v11825_v59 = vpop.permute.xlu1 %7972  ;;  %v11827_v11 = vpop.permute.xlu0 %7942 }
 0x344   :  { %6590 = vst [vmem:[%s13608_s3 + $0x24] sm:$0x44] %v6589_v22  ;;  %v14330_v3 = vld [vmem:[#allocation58_spill] sm:$0xff]  ;;  %v6075_v22 = vld [vmem:[%s13608_s3 + $0x5c] sm:$0x2]  ;;  %v5101_v30 = vrot.slane %v14331_v12, 7  ;;  %v7939_v55 = vunpack.i.l.bf16 %v7938_v42  ;;  %vm14335_vm11 = vmmov %vm14310_vm7  ;;  %v7945_v7 = vunpack.i.h.bf16 %v11827_v11 }
 0x345   :  { %v11788_v27 = vsel %vm14329_vm12, %v7934_v8, %v14328_v29  ;;  %v6321_v38 = vmax.f32 %v14330_v3, %v7970_v61  ;;  %v6076_v24 = vsel %vm11130_vm4, %v7087_v4, %v6075_v22  ;;  %v4554_v8 = vsel %vm11019_vm9, %v6991_v62, %v4553_v26  ;;  %v14332_v6 = vld [vmem:[#allocation52_spill] sm:$0xff]  ;;  %v6475_v29 = vld [vmem:[%s13608_s3 + $0x5c] sm:$0x4]  ;;  %vm14337_vm12 = vmmov %vm14310_vm7 }
 0x346   :  { %6077 = vst [vmem:[%s13608_s3 + $0x5c] sm:$0x2] %v6076_v24  ;;  %v5185_v42 = vld [vmem:[%s13608_s3 + $0x20] sm:$0x4]  ;;  %v5343_v4 = vld [vmem:[%s13608_s3 + $0x20] sm:$0x8]  ;;  %v14333_v62 = vunpack.i.h.bf16 %v10861_v58  ;;  %v14334_v22 = vunpack.i.l.bf16 %v11569_v1  ;;  %v5598_v24 = vmax.f32 %v10543_v41, %v7939_v55  ;;  %v14336_v41 = vunpack.i.l.bf16 %v11713_v45 }
 0x347   :  { %v7167_v3 = vpack.c.bf16 %v6321_v38, %v6321_v38  ;;  %v6975_v26 = vrot.slane %v4361_v43, 9  ;;  %4555 = vst [vmem:[%s13608_s3 + $0x50] sm:$0x2] %v4554_v8  ;;  %v5186_v36 = vsel %vm11310_vm15, %v5105_v5, %v5185_v42  ;;  %v5344_v8 = vsel %vm11489_vm5, %v5103_v25, %v5343_v4  ;;  %v5730_v5 = vld [vmem:[%s13608_s3 + $0x3c] sm:$0x11] }
 0x348   :  { %v5555_v38 = vsel %vm14310_vm7, %v14333_v62, %v7939_v55  ;;  %v5556_v12 = vsel %vm14335_vm11, %v7940_v47, %v14334_v22  ;;  %v7007_v51 = vrot.slane %v4361_v43, 10  ;;  %5187 = vst [vmem:[%s13608_s3 + $0x20] sm:$0x4] %v5186_v36  ;;  %5345 = vst [vmem:[%s13608_s3 + $0x20] sm:$0x8] %v5344_v8  ;;  %v11842_v1 = vsel %vm14337_vm12, %v14336_v41, %v7970_v61  ;;  %v14338_v43 = vld [vmem:[#allocation31_spill] sm:$0xff] }
 0x349   :  { %v6429_v58 = vrot.slane %v7167_v3, 6  ;;  %v5733_v25 = vld [vmem:[%s13608_s3 + $0x44] sm:$0x1]  ;;  %v5736_v36 = vld [vmem:[%s13608_s3 + $0x54] sm:$0x11]  ;;  %v5597_v47 = vmax.f32 %v14338_v43, %v5555_v38  ;;  %v7149_v4 = vpack.c.bf16 %v5598_v24, %v5598_v24  ;;  %v6531_v8 = vshll.u32 %v7167_v3, 16 }
 0x34a   :  { %v14339_v55 = vld [vmem:[#allocation61_spill] sm:$0xff]  ;;  %v7975_v41 = vunpack.i.h.bf16 %v11825_v59  ;;  %v4448_v43 = vld [vmem:[%s13608_s3 + $0x50] sm:$0x1]  ;;  %vm14343_vm7 = vnez %v14201_v33  ;;  %vm14346_vm11 = vnez %v14208_v31 }
 0x34b   :  { %v5599_v42 = vmax.f32 %v14339_v55, %v5556_v12  ;;  %v5182_v61 = vld [vmem:[%s13608_s3 + $0x18] sm:$0x44]  ;;  %v5340_v62 = vld [vmem:[%s13608_s3 + $0x18] sm:$0x88]  ;;  %v6476_v22 = vsel %vm11169_vm6, %v6429_v58, %v6475_v29  ;;  %v14340_v12 = vshll.u32 %v11709_v21, 16  ;;  %v14342_v21 = vmax.f32 %v14324_v57, %v11654_v13 }
 0x34c   :  { %v5183_v38 = vsel %vm11295_vm14, %v5101_v30, %v5182_v61  ;;  %6477 = vst [vmem:[%s13608_s3 + $0x5c] sm:$0x4] %v6476_v22  ;;  %v5973_v29 = vld [vmem:[%s13608_s3 + $0x44] sm:$0x2]  ;;  %v14341_v30 = vmax.f32 %v14198_v60, %v10948_v32  ;;  %v4449_v55 = vsel %vm14305_vm13, %v6975_v26, %v4448_v43  ;;  %v5734_v61 = vsel %vm10923_vm2, %v7149_v4, %v5733_v25  ;;  %v5970_v13 = vld [vmem:[%s13608_s3 + $0x3c] sm:$0x22] }
 0x34d   :  { %v5341_v24 = vsel %vm11474_vm8, %v14340_v12, %v5340_v62  ;;  %v7150_v58 = vpack.c.bf16 %v14342_v21, %v5599_v42  ;;  %5184 = vst [vmem:[%s13608_s3 + $0x18] sm:$0x44] %v5183_v38  ;;  %v5792_v60 = vshll.u32 %v7149_v4, 16  ;;  %v7069_v32 = vrot.slane %v7149_v4, 9  ;;  %4450 = vst [vmem:[%s13608_s3 + $0x50] sm:$0x1] %v4449_v55  ;;  %v11933_v55 = vpop.permute.xlu1 %7977 }
 0x34e   :  { %v7148_v3 = vpack.c.bf16 %v5597_v47, %v14341_v30  ;;  %5342 = vst [vmem:[%s13608_s3 + $0x18] sm:$0x88] %v5341_v24  ;;  %v5976_v57 = vld [vmem:[%s13608_s3 + $0x54] sm:$0x22]  ;;  %5735 = vst [vmem:[%s13608_s3 + $0x44] sm:$0x1] %v5734_v61  ;;  %v13832_v21 = vunpack.i.l.bf16 %v11825_v59 }
 0x34f   :  { %v5737_v25 = vsel %vm14343_vm7, %v7150_v58, %v5736_v36  ;;  %v5797_v42 = vshll.u32 %v7150_v58, 16  ;;  %v4655_v4 = vld [vmem:[%s13608_s3 + $0x50] sm:$0x2]  ;;  %v7070_v38 = vrot.slane %v7150_v58, 9  ;;  %v5974_v36 = vsel %vm11019_vm9, %v7069_v32, %v5973_v29  ;;  %v14345_v43 = vld [vmem:[#allocation59_spill] sm:$0xff]  ;;  %v14347_v61 = vld [vmem:[#allocation62_spill] sm:$0xff] }
 0x350   :  { %v5731_v26 = vsel %vm14343_vm7, %v7148_v3, %v5730_v5  ;;  %v5787_v47 = vshll.u32 %v7148_v3, 16  ;;  %v14344_v62 = vld [vmem:[#allocation56_spill] sm:$0xff]  ;;  %5738 = vst [vmem:[%s13608_s3 + $0x54] sm:$0x11] %v5737_v25  ;;  %v7068_v5 = vrot.slane %v7148_v3, 9  ;;  %v4656_v12 = vsel %vm11130_vm4, %v7007_v51, %v4655_v4  ;;  %vm14352_vm8 = vmmov %vm14337_vm12 }
 0x351   :  { %5732 = vst [vmem:[%s13608_s3 + $0x3c] sm:$0x11] %v5731_v26  ;;  %v6533_v24 = vrot.slane %v6531_v8, 7  ;;  %v6320_v30 = vmax.f32 %v14345_v43, %v11842_v1  ;;  %5975 = vst [vmem:[%s13608_s3 + $0x44] sm:$0x2] %v5974_v36  ;;  %v7053_v3 = vrot.slane %v5792_v60, 9  ;;  %v5977_v8 = vsel %vm14346_vm11, %v7070_v38, %v5976_v57 }
 0x352   :  { %4657 = vst [vmem:[%s13608_s3 + $0x50] sm:$0x2] %v4656_v12  ;;  %v7052_v29 = vrot.slane %v5787_v47, 9  ;;  %v5971_v51 = vsel %vm14346_vm11, %v7068_v5, %v5970_v13  ;;  %v7054_v58 = vrot.slane %v5797_v42, 9  ;;  %5978 = vst [vmem:[%s13608_s3 + $0x54] sm:$0x22] %v5977_v8  ;;  %v4901_v32 = vmax.f32 %v14347_v61, %v7975_v41 }
 0x353   :  { %5972 = vst [vmem:[%s13608_s3 + $0x3c] sm:$0x22] %v5971_v51  ;;  %v7944_v26 = vunpack.i.l.bf16 %v11827_v11  ;;  %v14348_v13 = vunpack.i.l.bf16 %v11646_v52  ;;  %v6603_v57 = vld [vmem:[%s13608_s3 + $0x5c] sm:$0x4]  ;;  %v7084_v4 = vrot.slane %v5787_v47, 10  ;;  %v7085_v5 = vrot.slane %v5792_v60, 10 }
 0x354   :  { %v5063_v38 = vld [vmem:[%s13608_s3 + $0x50] sm:$0x4]  ;;  %v14349_v36 = vld [vmem:[#allocation51_spill] sm:$0xff]  ;;  %v7979_v51 = vunpack.i.l.bf16 %v11933_v55  ;;  %v6604_v11 = vsel %vm11310_vm15, %v6533_v24, %v6603_v57  ;;  %v11968_v52 = vpack.c.bf16 %v4901_v32, %v4901_v32  ;;  %v4289_v60 = vld [vmem:[%s13608_s3 + $0x30] sm:$0x11]  ;;  %v14350_v8 = vunpack.i.h.bf16 %v10849_v15 }
 0x355   :  { %v4106_v25 = vsel %vm14337_vm12, %v7945_v7, %v14348_v13  ;;  %v5285_v7 = vld [vmem:[%s13608_s3 + $0x50] sm:$0x8]  ;;  %v4292_v47 = vld [vmem:[%s13608_s3 + $0x38] sm:$0x1]  ;;  %v14351_v13 = vld [vmem:[#allocation63_spill] sm:$0xff]  ;;  %v11991_v57 = vsel %vm14352_vm8, %v13832_v21, %v7975_v41 }
 0x356   :  { %v4149_v12 = vmax.f32 %v14349_v36, %v4106_v25  ;;  %v4105_v61 = vsel %vm14337_vm12, %v14350_v8, %v7944_v26  ;;  %v4148_v24 = vmax.f32 %v14351_v13, %v7944_v26  ;;  %6605 = vst [vmem:[%s13608_s3 + $0x5c] sm:$0x4] %v6604_v11  ;;  %v5877_v32 = vld [vmem:[%s13608_s3 + $0x44] sm:$0x1]  ;;  %v7086_v25 = vrot.slane %v5797_v42, 10  ;;  %v14353_v26 = vld [vmem:[#allocation7_spill] sm:$0xff] }
 0x357   :  { %v4295_v15 = vld [vmem:[%s13608_s3 + $0x48] sm:$0x11]  ;;  %v4147_v36 = vmax.f32 %v14353_v26, %v4105_v61  ;;  %v14354_v11 = vmax.f32 %v14332_v6, %v11759_v2  ;;  %v5878_v13 = vsel %vm14305_vm13, %v7053_v3, %v5877_v32  ;;  %v5880_v41 = vld [vmem:[%s13608_s3 + $0x54] sm:$0x11]  ;;  %v5009_v22 = vrot.slane %v11968_v52, 6 }
 0x358   :  { %v5874_v42 = vld [vmem:[%s13608_s3 + $0x3c] sm:$0x11]  ;;  %v7117_v21 = vpack.c.bf16 %v4148_v24, %v4148_v24  ;;  %v14355_v61 = vunpack.i.h.bf16 %v11370_v19  ;;  %vm14356_vm12 = vnez %v14204_v49  ;;  %5879 = vst [vmem:[%s13608_s3 + $0x44] sm:$0x1] %v5878_v13  ;;  %v5231_v24 = vrot.slane %v11968_v52, 7 }
 0x359   :  { %v12000_v8 = vpack.c.bf16 %v14354_v11, %v4149_v12  ;;  %v5875_v6 = vsel %vm14356_vm12, %v7052_v29, %v5874_v42  ;;  %v5881_v3 = vsel %vm14356_vm12, %v7054_v58, %v5880_v41  ;;  %v6069_v12 = vld [vmem:[%s13608_s3 + $0x44] sm:$0x2]  ;;  %v14357_v19 = vmax.f32 %v14188_v10, %v10919_v0  ;;  %v4547_v10 = vld [vmem:[%s13608_s3 + $0x38] sm:$0x2]  ;;  %v12088_v41 = vpop.permute.xlu0 %7947 }
 0x35a   :  { %v12014_v2 = vsel %vm14352_vm8, %v14355_v61, %v7979_v51  ;;  %5876 = vst [vmem:[%s13608_s3 + $0x3c] sm:$0x11] %v5875_v6  ;;  %5882 = vst [vmem:[%s13608_s3 + $0x54] sm:$0x11] %v5881_v3  ;;  %v6070_v29 = vsel %vm11130_vm4, %v7085_v5, %v6069_v12  ;;  %v5064_v58 = vsel %vm11169_vm6, %v5009_v22, %v5063_v38  ;;  %v5119_v26 = vshll.u32 %v11968_v52, 16 }
 0x35b   :  { %v7116_v32 = vpack.c.bf16 %v4147_v36, %v14357_v19  ;;  %v4293_v0 = vsel %vm10923_vm2, %v7117_v21, %v4292_v47  ;;  %v6066_v36 = vld [vmem:[%s13608_s3 + $0x3c] sm:$0x22]  ;;  %6071 = vst [vmem:[%s13608_s3 + $0x44] sm:$0x2] %v6070_v29  ;;  %v6072_v22 = vld [vmem:[%s13608_s3 + $0x54] sm:$0x22]  ;;  %v5286_v5 = vsel %vm11355_vm10, %v5231_v24, %v5285_v7  ;;  %v4296_v47 = vsel %vm14343_vm7, %v12000_v8, %v4295_v15  ;;  %vm14364_vm10 = vmmov %vm14352_vm8 }
 0x35c   :  { %5065 = vst [vmem:[%s13608_s3 + $0x50] sm:$0x4] %v5064_v58  ;;  %4294 = vst [vmem:[%s13608_s3 + $0x38] sm:$0x1] %v4293_v0  ;;  %v6067_v42 = vsel %vm11186_vm1, %v7084_v4, %v6066_v36  ;;  %v6073_v13 = vsel %vm11186_vm1, %v7086_v25, %v6072_v22  ;;  %v4544_v7 = vld [vmem:[%s13608_s3 + $0x30] sm:$0x22]  ;;  %v7980_v58 = vunpack.i.h.bf16 %v11933_v55  ;;  %v12103_v0 = vpop.permute.xlu1 %7982 }
 0x35d   :  { %v4290_v38 = vsel %vm14343_vm7, %v7116_v32, %v4289_v60  ;;  %v4346_v11 = vshll.u32 %v7116_v32, 16  ;;  %5287 = vst [vmem:[%s13608_s3 + $0x50] sm:$0x8] %v5286_v5  ;;  %v4550_v60 = vld [vmem:[%s13608_s3 + $0x48] sm:$0x22]  ;;  %v4351_v4 = vshll.u32 %v7117_v21, 16 }
 0x35e   :  { %4291 = vst [vmem:[%s13608_s3 + $0x30] sm:$0x11] %v4290_v38  ;;  %4297 = vst [vmem:[%s13608_s3 + $0x48] sm:$0x11] %v4296_v47  ;;  %v14358_v25 = vld [vmem:[#allocation40_spill] sm:$0xff]  ;;  %v4356_v61 = vshll.u32 %v12000_v8, 16 }
 0x35f   :  { %v5604_v15 = vmax.f32 %v14358_v25, %v7979_v51  ;;  %6068 = vst [vmem:[%s13608_s3 + $0x3c] sm:$0x22] %v6067_v42  ;;  %6074 = vst [vmem:[%s13608_s3 + $0x54] sm:$0x22] %v6073_v13  ;;  %v6988_v6 = vrot.slane %v7116_v32, 9  ;;  %v6989_v3 = vrot.slane %v7117_v21, 9  ;;  %v7950_v42 = vunpack.i.h.bf16 %v12088_v41 }
 0x360   :  { %v6990_v12 = vrot.slane %v12000_v8, 9  ;;  %v5121_v24 = vrot.slane %v5119_v26, 7  ;;  %v14359_v51 = vld [vmem:[#allocation60_spill] sm:$0xff]  ;;  %v6972_v29 = vrot.slane %v4346_v11, 9  ;;  %v6973_v36 = vrot.slane %v4351_v4, 9  ;;  %v14360_v5 = vld [vmem:[#allocation46_spill] sm:$0xff] }
 0x361   :  { %v4900_v19 = vmax.f32 %v14359_v51, %v11991_v57  ;;  %v4545_v22 = vsel %vm14346_vm11, %v6988_v6, %v4544_v7  ;;  %v4548_v21 = vsel %vm11019_vm9, %v6989_v3, %v4547_v10  ;;  %v5745_v32 = vld [vmem:[%s13608_s3 + $0x74] sm:$0x1]  ;;  %v5742_v10 = vld [vmem:[%s13608_s3 + $0x6c] sm:$0x11]  ;;  %v5603_v38 = vmax.f32 %v14360_v5, %v12014_v2  ;;  %v5985_v6 = vld [vmem:[%s13608_s3 + $0x74] sm:$0x2] }
 0x362   :  { %v4551_v8 = vsel %vm14346_vm11, %v6990_v12, %v4550_v60  ;;  %4546 = vst [vmem:[%s13608_s3 + $0x30] sm:$0x22] %v4545_v22  ;;  %4549 = vst [vmem:[%s13608_s3 + $0x38] sm:$0x2] %v4548_v21  ;;  %v7153_v47 = vpack.c.bf16 %v5604_v15, %v5604_v15  ;;  %v7949_v13 = vunpack.i.l.bf16 %v12088_v41  ;;  %v6974_v7 = vrot.slane %v4356_v61, 9  ;;  %v12147_v21 = vpop.permute.xlu0 %7952 }
 0x363   :  { %4552 = vst [vmem:[%s13608_s3 + $0x48] sm:$0x22] %v4551_v8  ;;  %v7004_v60 = vrot.slane %v4346_v11, 10  ;;  %v7005_v25 = vrot.slane %v4351_v4, 10  ;;  %v7984_v3 = vunpack.i.l.bf16 %v12103_v0  ;;  %v5197_v12 = vld [vmem:[%s13608_s3 + $0x50] sm:$0x4]  ;;  %v14361_v15 = vmax.f32 %v14320_v18, %v11614_v46 }
 0x364   :  { %v4442_v2 = vld [vmem:[%s13608_s3 + $0x38] sm:$0x1]  ;;  %v5746_v11 = vsel %vm10923_vm2, %v7153_v47, %v5745_v32  ;;  %v5812_v4 = vshll.u32 %v7153_v47, 16  ;;  %v7073_v22 = vrot.slane %v7153_v47, 9  ;;  %v5198_v8 = vsel %vm11310_vm15, %v5121_v24, %v5197_v12  ;;  %v5355_v5 = vld [vmem:[%s13608_s3 + $0x50] sm:$0x8] }
 0x365   :  { %v12143_v41 = vpack.c.bf16 %v5603_v38, %v14361_v15  ;;  %v4439_v46 = vld [vmem:[%s13608_s3 + $0x30] sm:$0x11]  ;;  %v4443_v18 = vsel %vm14305_vm13, %v6973_v36, %v4442_v2  ;;  %v4445_v32 = vld [vmem:[%s13608_s3 + $0x48] sm:$0x11]  ;;  %5747 = vst [vmem:[%s13608_s3 + $0x74] sm:$0x1] %v5746_v11  ;;  %v14362_v24 = vunpack.i.h.bf16 %v10873_v39  ;;  %v14363_v47 = vunpack.i.l.bf16 %v11713_v45 }
 0x366   :  { %5199 = vst [vmem:[%s13608_s3 + $0x50] sm:$0x4] %v5198_v8  ;;  %v5356_v36 = vsel %vm11489_vm5, %v5119_v26, %v5355_v5  ;;  %v4440_v2 = vsel %vm14356_vm12, %v6972_v29, %v4439_v46  ;;  %4444 = vst [vmem:[%s13608_s3 + $0x38] sm:$0x1] %v4443_v18  ;;  %v4446_v39 = vsel %vm14356_vm12, %v6974_v7, %v4445_v32  ;;  %v5982_v45 = vld [vmem:[%s13608_s3 + $0x6c] sm:$0x22]  ;;  %v14366_v46 = vunpack.i.h.bf16 %v11033_v44 }
 0x367   :  { %v6275_v38 = vsel %vm14352_vm8, %v14362_v24, %v7949_v13  ;;  %v6276_v12 = vsel %vm14364_vm10, %v7950_v42, %v14363_v47  ;;  %v5743_v52 = vsel %vm14343_vm7, %v12143_v41, %v5742_v10  ;;  %5357 = vst [vmem:[%s13608_s3 + $0x50] sm:$0x8] %v5356_v36  ;;  %4441 = vst [vmem:[%s13608_s3 + $0x30] sm:$0x11] %v4440_v2  ;;  %v7006_v26 = vrot.slane %v4356_v61, 10  ;;  %v14365_v15 = vld [vmem:[#allocation10_spill] sm:$0xff] }
 0x368   :  { %4447 = vst [vmem:[%s13608_s3 + $0x48] sm:$0x11] %v4446_v39  ;;  %5744 = vst [vmem:[%s13608_s3 + $0x6c] sm:$0x11] %v5743_v52  ;;  %v7072_v29 = vrot.slane %v12143_v41, 9  ;;  %v5986_v10 = vsel %vm11019_vm9, %v7073_v22, %v5985_v6  ;;  %v7954_v42 = vunpack.i.l.bf16 %v12147_v21  ;;  %v5807_v7 = vshll.u32 %v12143_v41, 16 }
 0x369   :  { %5987 = vst [vmem:[%s13608_s3 + $0x74] sm:$0x2] %v5986_v10  ;;  %v6317_v11 = vmax.f32 %v14365_v15, %v6275_v38  ;;  %v6318_v61 = vmax.f32 %v10634_v28, %v7949_v13  ;;  %v6319_v8 = vmax.f32 %v10621_v50, %v6276_v12  ;;  %v4646_v5 = vld [vmem:[%s13608_s3 + $0x30] sm:$0x22]  ;;  %v4649_v6 = vld [vmem:[%s13608_s3 + $0x38] sm:$0x2]  ;;  %vm14367_vm10 = vmmov %vm14352_vm8  ;;  %v4154_v50 = vmax.f32 %v10645_v16, %v7984_v3 }
 0x36a   :  { %v4652_v41 = vld [vmem:[%s13608_s3 + $0x48] sm:$0x22]  ;;  %v5983_v22 = vsel %vm14346_vm11, %v7072_v29, %v5982_v45  ;;  %v4109_v28 = vsel %vm14367_vm10, %v14366_v46, %v7984_v3  ;;  %v7955_v13 = vunpack.i.h.bf16 %v12147_v21  ;;  %v4647_v18 = vsel %vm11186_vm1, %v7004_v60, %v4646_v5  ;;  %v6469_v16 = vld [vmem:[%s13608_s3 + $0x44] sm:$0x4]  ;;  %v6466_v60 = vld [vmem:[%s13608_s3 + $0x3c] sm:$0x44] }
 0x36b   :  { %v4650_v32 = vsel %vm11130_vm4, %v7005_v25, %v4649_v6  ;;  %v4653_v24 = vsel %vm11186_vm1, %v7006_v26, %v4652_v41  ;;  %v7057_v38 = vrot.slane %v5812_v4, 9  ;;  %5984 = vst [vmem:[%s13608_s3 + $0x6c] sm:$0x22] %v5983_v22  ;;  %4648 = vst [vmem:[%s13608_s3 + $0x30] sm:$0x22] %v4647_v18  ;;  %v7089_v44 = vrot.slane %v5812_v4, 10 }
 0x36c   :  { %4651 = vst [vmem:[%s13608_s3 + $0x38] sm:$0x2] %v4650_v32  ;;  %4654 = vst [vmem:[%s13608_s3 + $0x48] sm:$0x22] %v4653_v24  ;;  %v6472_v25 = vld [vmem:[%s13608_s3 + $0x54] sm:$0x44]  ;;  %v14368_v3 = vmax.f32 %v14199_v34, %v10953_v14  ;;  %v7165_v12 = vpack.c.bf16 %v6318_v61, %v6318_v61  ;;  %v7166_v36 = vpack.c.bf16 %v6320_v30, %v6319_v8  ;;  %v14370_v34 = vunpack.i.h.bf16 %v10857_v63 }
 0x36d   :  { %v7056_v2 = vrot.slane %v5807_v7, 9  ;;  %v5889_v4 = vld [vmem:[%s13608_s3 + $0x74] sm:$0x1]  ;;  %v4304_v39 = vld [vmem:[%s13608_s3 + $0x68] sm:$0x1]  ;;  %v14369_v45 = vld [vmem:[#allocation17_spill] sm:$0xff]  ;;  %v12270_v26 = vpack.c.bf16 %v4154_v50, %v4154_v50 }
 0x36e   :  { %v7164_v47 = vpack.c.bf16 %v6317_v11, %v14368_v3  ;;  %v4153_v52 = vmax.f32 %v14369_v45, %v4109_v28  ;;  %v4855_v14 = vsel %vm14352_vm8, %v14370_v34, %v7954_v42  ;;  %v5890_v1 = vsel %vm14305_vm13, %v7057_v38, %v5889_v4  ;;  %v4301_v10 = vld [vmem:[%s13608_s3 + $0x60] sm:$0x11]  ;;  %v14371_v8 = vld [vmem:[#allocation35_spill] sm:$0xff]  ;;  %vm14376_vm10 = vmmov %vm14352_vm8  ;;  %v12350_v34 = vpop.permute.xlu0 %8007 }
 0x36f   :  { %v6427_v30 = vrot.slane %v7165_v12, 6  ;;  %v6428_v29 = vrot.slane %v7166_v36, 6  ;;  %v5886_v15 = vld [vmem:[%s13608_s3 + $0x6c] sm:$0x11]  ;;  %5891 = vst [vmem:[%s13608_s3 + $0x74] sm:$0x1] %v5890_v1 }
 0x370   :  { %v6426_v43 = vrot.slane %v7164_v47, 6  ;;  %v6519_v63 = vshll.u32 %v7164_v47, 16  ;;  %v6523_v11 = vshll.u32 %v7165_v12, 16  ;;  %v6527_v61 = vshll.u32 %v7166_v36, 16  ;;  %v14372_v5 = vld [vmem:[#allocation6_spill] sm:$0xff] }
 0x371   :  { %v14373_v6 = vmax.f32 %v14371_v8, %v14372_v5  ;;  %v5887_v22 = vsel %vm14356_vm12, %v7056_v2, %v5886_v15  ;;  %v6081_v46 = vld [vmem:[%s13608_s3 + $0x74] sm:$0x2]  ;;  %v6470_v18 = vsel %vm11169_vm6, %v6427_v30, %v6469_v16  ;;  %v6473_v32 = vsel %vm11150_vm0, %v6428_v29, %v6472_v25  ;;  %v4559_v16 = vld [vmem:[%s13608_s3 + $0x68] sm:$0x2]  ;;  %v4556_v47 = vld [vmem:[%s13608_s3 + $0x60] sm:$0x22] }
 0x372   :  { %v6467_v50 = vsel %vm11150_vm0, %v6426_v43, %v6466_v60  ;;  %5888 = vst [vmem:[%s13608_s3 + $0x6c] sm:$0x11] %v5887_v22  ;;  %v7088_v24 = vrot.slane %v5807_v7, 10  ;;  %v6082_v38 = vsel %vm11130_vm4, %v7089_v44, %v6081_v46  ;;  %6471 = vst [vmem:[%s13608_s3 + $0x44] sm:$0x4] %v6470_v18  ;;  %v14375_v7 = vunpack.i.l.bf16 %v11825_v59  ;;  %v14377_v60 = vld [vmem:[#allocation8_spill] sm:$0xff] }
 0x373   :  { %v7120_v41 = vpack.c.bf16 %v4153_v52, %v14373_v6  ;;  %6468 = vst [vmem:[%s13608_s3 + $0x3c] sm:$0x44] %v6467_v50  ;;  %6474 = vst [vmem:[%s13608_s3 + $0x54] sm:$0x44] %v6473_v32  ;;  %v4897_v25 = vmax.f32 %v14377_v60, %v4855_v14  ;;  %v6078_v3 = vld [vmem:[%s13608_s3 + $0x6c] sm:$0x22]  ;;  %v4305_v59 = vsel %vm10923_vm2, %v12270_v26, %v4304_v39  ;;  %v7985_v30 = vunpack.i.h.bf16 %v12103_v0  ;;  %v12366_v6 = vpop.permute.xlu1 %7987 }
 0x374   :  { %v4856_v44 = vsel %vm14376_vm10, %v7955_v13, %v14375_v7  ;;  %6083 = vst [vmem:[%s13608_s3 + $0x74] sm:$0x2] %v6082_v38  ;;  %v4371_v36 = vshll.u32 %v12270_v26, 16  ;;  %v6079_v2 = vsel %vm11186_vm1, %v7088_v24, %v6078_v3  ;;  %4306 = vst [vmem:[%s13608_s3 + $0x68] sm:$0x1] %v4305_v59  ;;  %v6993_v45 = vrot.slane %v12270_v26, 9 }
 0x375   :  { %v4302_v12 = vsel %vm14343_vm7, %v7120_v41, %v4301_v10  ;;  %v4366_v13 = vshll.u32 %v7120_v41, 16  ;;  %v6992_v4 = vrot.slane %v7120_v41, 9  ;;  %v14378_v39 = vld [vmem:[#allocation41_spill] sm:$0xff]  ;;  %6080 = vst [vmem:[%s13608_s3 + $0x6c] sm:$0x22] %v6079_v2  ;;  %v6521_v14 = vrot.slane %v6519_v63, 7  ;;  %vm14385_vm10 = vmmov %vm14352_vm8 }
 0x376   :  { %4303 = vst [vmem:[%s13608_s3 + $0x60] sm:$0x11] %v4302_v12  ;;  %v4898_v52 = vmax.f32 %v14378_v39, %v7954_v42  ;;  %v6525_v1 = vrot.slane %v6523_v11, 7  ;;  %v6529_v43 = vrot.slane %v6527_v61, 7  ;;  %v4560_v26 = vsel %vm11019_vm9, %v6993_v45, %v4559_v16  ;;  %v14379_v21 = vld [vmem:[#allocation54_spill] sm:$0xff]  ;;  %v14381_v15 = vld [vmem:[#allocation20_spill] sm:$0xff] }
 0x377   :  { %v4557_v29 = vsel %vm14346_vm11, %v6992_v4, %v4556_v47  ;;  %v4899_v10 = vmax.f32 %v14379_v21, %v4856_v44  ;;  %v14380_v42 = vld [vmem:[#allocation30_spill] sm:$0xff]  ;;  %v6976_v63 = vrot.slane %v4366_v13, 9  ;;  %v6977_v11 = vrot.slane %v4371_v36, 9  ;;  %4561 = vst [vmem:[%s13608_s3 + $0x68] sm:$0x2] %v4560_v26 }
 0x378   :  { %v14382_v8 = vmax.f32 %v14380_v42, %v14381_v15  ;;  %4558 = vst [vmem:[%s13608_s3 + $0x60] sm:$0x22] %v4557_v29  ;;  %v5054_v61 = vld [vmem:[%s13608_s3 + $0x30] sm:$0x44]  ;;  %v5057_v41 = vld [vmem:[%s13608_s3 + $0x38] sm:$0x4]  ;;  %v12380_v22 = vpack.c.bf16 %v4898_v52, %v4898_v52  ;;  %v8010_v46 = vunpack.i.h.bf16 %v12350_v34  ;;  %v7990_v57 = vunpack.i.h.bf16 %v12366_v6 }
 0x379   :  { %v7008_v50 = vrot.slane %v4366_v13, 10  ;;  %v5276_v18 = vld [vmem:[%s13608_s3 + $0x30] sm:$0x88]  ;;  %v12389_v32 = vpack.c.bf16 %v4900_v19, %v4899_v10  ;;  %v6597_v7 = vld [vmem:[%s13608_s3 + $0x44] sm:$0x4]  ;;  %v7989_v51 = vunpack.i.l.bf16 %v12366_v6  ;;  %v14383_v19 = vld [vmem:[#allocation43_spill] sm:$0xff] }
 0x37a   :  { %v12364_v5 = vpack.c.bf16 %v4897_v25, %v14382_v8  ;;  %v6594_v16 = vld [vmem:[%s13608_s3 + $0x3c] sm:$0x44]  ;;  %v6600_v44 = vld [vmem:[%s13608_s3 + $0x54] sm:$0x44]  ;;  %v5607_v60 = vmax.f32 %v14383_v19, %v8010_v46  ;;  %v8009_v25 = vunpack.i.l.bf16 %v12350_v34  ;;  %v6598_v47 = vsel %vm11310_vm15, %v6525_v1, %v6597_v7  ;;  %v5060_v59 = vld [vmem:[%s13608_s3 + $0x48] sm:$0x44]  ;;  %v12494_v7 = vpop.permute.xlu0 %8012 }
 0x37b   :  { %v6595_v3 = vsel %vm11295_vm14, %v6521_v14, %v6594_v16  ;;  %v6601_v12 = vsel %vm11295_vm14, %v6529_v43, %v6600_v44  ;;  %v5007_v13 = vrot.slane %v12380_v22, 6  ;;  %6599 = vst [vmem:[%s13608_s3 + $0x44] sm:$0x4] %v6598_v47  ;;  %v4454_v4 = vld [vmem:[%s13608_s3 + $0x68] sm:$0x1]  ;;  %v5008_v45 = vrot.slane %v12389_v32, 6  ;;  %v12492_v16 = vpop.permute.xlu1 %7992 }
 0x37c   :  { %v5006_v24 = vrot.slane %v12364_v5, 6  ;;  %v5228_v38 = vrot.slane %v12364_v5, 7  ;;  %6596 = vst [vmem:[%s13608_s3 + $0x3c] sm:$0x44] %v6595_v3  ;;  %6602 = vst [vmem:[%s13608_s3 + $0x54] sm:$0x44] %v6601_v12  ;;  %v4455_v29 = vsel %vm14305_vm13, %v6977_v11, %v4454_v4  ;;  %v5561_v12 = vsel %vm14385_vm10, %v8009_v25, %v8010_v46 }
 0x37d   :  { %v4451_v2 = vld [vmem:[%s13608_s3 + $0x60] sm:$0x11]  ;;  %v5107_v52 = vshll.u32 %v12364_v5, 16  ;;  %v14384_v14 = vld [vmem:[#allocation4_spill] sm:$0xff]  ;;  %v7009_v26 = vrot.slane %v4371_v36, 10  ;;  %v5058_v10 = vsel %vm11169_vm6, %v5007_v13, %v5057_v41  ;;  %v5061_v42 = vsel %vm11150_vm0, %v5008_v45, %v5060_v59  ;;  %v14387_v59 = vld [vmem:[#allocation15_spill] sm:$0xff] }
 0x37e   :  { %v5055_v39 = vsel %vm11150_vm0, %v5006_v24, %v5054_v61  ;;  %v5277_v1 = vsel %vm11340_vm3, %v5228_v38, %v5276_v18  ;;  %v4452_v43 = vsel %vm14356_vm12, %v6976_v63, %v4451_v2  ;;  %v5279_v21 = vld [vmem:[%s13608_s3 + $0x38] sm:$0x8]  ;;  %4456 = vst [vmem:[%s13608_s3 + $0x68] sm:$0x1] %v4455_v29  ;;  %v5282_v36 = vld [vmem:[%s13608_s3 + $0x48] sm:$0x88]  ;;  %v12473_v5 = vsel %vm14352_vm8, %v7989_v51, %v7990_v57 }
 0x37f   :  { %5056 = vst [vmem:[%s13608_s3 + $0x30] sm:$0x44] %v5055_v39  ;;  %5278 = vst [vmem:[%s13608_s3 + $0x30] sm:$0x88] %v5277_v1  ;;  %v5229_v15 = vrot.slane %v12380_v22, 7  ;;  %v5230_v8 = vrot.slane %v12389_v32, 7  ;;  %v7155_v24 = vpack.c.bf16 %v5607_v60, %v5607_v60  ;;  %v5560_v38 = vsel %vm14385_vm10, %v7980_v58, %v8009_v25 }
 0x380   :  { %4453 = vst [vmem:[%s13608_s3 + $0x60] sm:$0x11] %v4452_v43  ;;  %5059 = vst [vmem:[%s13608_s3 + $0x38] sm:$0x4] %v5058_v10  ;;  %v5751_v63 = vld [vmem:[%s13608_s3 + $0x8c] sm:$0x1]  ;;  %vm14386_vm8 = vnez %v14281_v37  ;;  %v5605_v13 = vmax.f32 %v14387_v59, %v5560_v38  ;;  %v7994_v2 = vunpack.i.l.bf16 %v12492_v16  ;;  %v8015_v4 = vunpack.i.h.bf16 %v12494_v7 }
 0x381   :  { %v4658_v11 = vld [vmem:[%s13608_s3 + $0x60] sm:$0x22]  ;;  %v4661_v61 = vld [vmem:[%s13608_s3 + $0x68] sm:$0x2]  ;;  %5062 = vst [vmem:[%s13608_s3 + $0x48] sm:$0x44] %v5061_v42  ;;  %v5280_v3 = vsel %vm14386_vm8, %v5229_v15, %v5279_v21  ;;  %v5283_v58 = vsel %vm11340_vm3, %v5230_v8, %v5282_v36  ;;  %vm14393_vm8 = vnez %v14300_v17 }
 0x382   :  { %v5111_v41 = vshll.u32 %v12380_v22, 16  ;;  %v5115_v18 = vshll.u32 %v12389_v32, 16  ;;  %v4659_v44 = vsel %vm11186_vm1, %v7008_v50, %v4658_v11  ;;  %v4662_v51 = vsel %vm11130_vm4, %v7009_v26, %v4661_v61  ;;  %v5991_v55 = vld [vmem:[%s13608_s3 + $0x8c] sm:$0x2]  ;;  %5281 = vst [vmem:[%s13608_s3 + $0x38] sm:$0x8] %v5280_v3 }
 0x383   :  { %v5109_v19 = vrot.slane %v5107_v52, 7  ;;  %4660 = vst [vmem:[%s13608_s3 + $0x60] sm:$0x22] %v4659_v44  ;;  %4663 = vst [vmem:[%s13608_s3 + $0x68] sm:$0x2] %v4662_v51  ;;  %v5752_v50 = vsel %vm10923_vm2, %v7155_v24, %v5751_v63  ;;  %v5822_v60 = vshll.u32 %v7155_v24, 16  ;;  %v8014_v63 = vunpack.i.l.bf16 %v12494_v7 }
 0x384   :  { %v7075_v47 = vrot.slane %v7155_v24, 9  ;;  %5284 = vst [vmem:[%s13608_s3 + $0x48] sm:$0x88] %v5283_v58  ;;  %5753 = vst [vmem:[%s13608_s3 + $0x8c] sm:$0x1] %v5752_v50  ;;  %v5113_v45 = vrot.slane %v5111_v41, 7 }
 0x385   :  { %v5117_v39 = vrot.slane %v5115_v18, 7  ;;  %v14388_v43 = vld [vmem:[#allocation26_spill] sm:$0xff]  ;;  %v14389_v26 = vld [vmem:[#allocation27_spill] sm:$0xff]  ;;  %v14391_v36 = vld [vmem:[#allocation44_spill] sm:$0xff]  ;;  %v7059_v58 = vrot.slane %v5822_v60, 9  ;;  %v7091_v59 = vrot.slane %v5822_v60, 10 }
 0x386   :  { %v5992_v1 = vsel %vm11019_vm9, %v7075_v47, %v5991_v55  ;;  %v5606_v29 = vmax.f32 %v14388_v43, %v5561_v12  ;;  %v5188_v34 = vld [vmem:[%s13608_s3 + $0x30] sm:$0x44]  ;;  %v5346_v46 = vld [vmem:[%s13608_s3 + $0x30] sm:$0x88]  ;;  %v5748_v25 = vld [vmem:[%s13608_s3 + $0x84] sm:$0x11]  ;;  %v14390_v21 = vunpack.i.h.bf16 %v14389_v26  ;;  %v6324_v42 = vmax.f32 %v14391_v36, %v7994_v2 }
 0x387   :  { %5993 = vst [vmem:[%s13608_s3 + $0x8c] sm:$0x2] %v5992_v1  ;;  %v14392_v15 = vld [vmem:[#allocation66_spill] sm:$0xff]  ;;  %v5189_v11 = vsel %vm11295_vm14, %v5109_v19, %v5188_v34  ;;  %v5191_v61 = vld [vmem:[%s13608_s3 + $0x38] sm:$0x4]  ;;  %v5347_v24 = vsel %vm14393_vm8, %v5107_v52, %v5346_v46  ;;  %v4110_v46 = vsel %vm14385_vm10, %v7985_v30, %v8014_v63 }
 0x388   :  { %v6279_v10 = vsel %vm14385_vm10, %v14390_v21, %v7994_v2  ;;  %v4157_v8 = vmax.f32 %v14392_v15, %v8015_v4  ;;  %v7154_v38 = vpack.c.bf16 %v5606_v29, %v5605_v13  ;;  %v14394_v44 = vld [vmem:[#allocation57_spill] sm:$0xff]  ;;  %v4310_v3 = vld [vmem:[%s13608_s3 + $0x80] sm:$0x1]  ;;  %5190 = vst [vmem:[%s13608_s3 + $0x30] sm:$0x44] %v5189_v11  ;;  %v5192_v19 = vsel %vm11310_vm15, %v5113_v45, %v5191_v61  ;;  %v12659_v61 = vpop.permute.xlu0 %8022 }
 0x389   :  { %v6323_v51 = vmax.f32 %v14394_v44, %v6279_v10  ;;  %v5194_v55 = vld [vmem:[%s13608_s3 + $0x48] sm:$0x44]  ;;  %5348 = vst [vmem:[%s13608_s3 + $0x30] sm:$0x88] %v5347_v24  ;;  %v5988_v52 = vld [vmem:[%s13608_s3 + $0x84] sm:$0x22]  ;;  %v7169_v50 = vpack.c.bf16 %v6324_v42, %v6324_v42  ;;  %v4111_v44 = vsel %vm14385_vm10, %v8014_v63, %v8015_v4 }
 0x38a   :  { %v7123_v47 = vpack.c.bf16 %v4157_v8, %v4157_v8  ;;  %5193 = vst [vmem:[%s13608_s3 + $0x38] sm:$0x4] %v5192_v19  ;;  %v5195_v12 = vsel %vm11295_vm14, %v5117_v39, %v5194_v55  ;;  %v5749_v13 = vsel %vm14343_vm7, %v7154_v38, %v5748_v25  ;;  %v7074_v2 = vrot.slane %v7154_v38, 9  ;;  %v6481_v45 = vld [vmem:[%s13608_s3 + $0x74] sm:$0x4]  ;;  %v12612_v25 = vpop.permute.xlu1 %7997 }
 0x38b   :  { %5196 = vst [vmem:[%s13608_s3 + $0x48] sm:$0x44] %v5195_v12  ;;  %v5349_v1 = vld [vmem:[%s13608_s3 + $0x38] sm:$0x8]  ;;  %5750 = vst [vmem:[%s13608_s3 + $0x84] sm:$0x11] %v5749_v13  ;;  %v14395_v39 = vmax.f32 %v14344_v62, %v11788_v27  ;;  %v8025_v12 = vunpack.i.h.bf16 %v12659_v61 }
 0x38c   :  { %v6478_v60 = vld [vmem:[%s13608_s3 + $0x6c] sm:$0x44]  ;;  %v6431_v29 = vrot.slane %v7169_v50, 6  ;;  %v4311_v34 = vsel %vm10923_vm2, %v7123_v47, %v4310_v3  ;;  %v5350_v26 = vsel %vm11489_vm5, %v5111_v41, %v5349_v1  ;;  %v5352_v27 = vld [vmem:[%s13608_s3 + $0x48] sm:$0x88]  ;;  %v5817_v21 = vshll.u32 %v7154_v38, 16 }
 0x38d   :  { %v7168_v43 = vpack.c.bf16 %v6323_v51, %v14395_v39  ;;  %v5895_v62 = vld [vmem:[%s13608_s3 + $0x8c] sm:$0x1]  ;;  %v5989_v0 = vsel %vm14346_vm11, %v7074_v2, %v5988_v52  ;;  %v6539_v30 = vshll.u32 %v7169_v50, 16  ;;  %4312 = vst [vmem:[%s13608_s3 + $0x80] sm:$0x1] %v4311_v34  ;;  %v5353_v22 = vsel %vm14393_vm8, %v5115_v18, %v5352_v27  ;;  %v14397_v3 = vld [vmem:[#allocation42_spill] sm:$0xff] }
 0x38e   :  { %5351 = vst [vmem:[%s13608_s3 + $0x38] sm:$0x8] %v5350_v26  ;;  %v5896_v41 = vsel %vm14305_vm13, %v7059_v58, %v5895_v62  ;;  %5990 = vst [vmem:[%s13608_s3 + $0x84] sm:$0x22] %v5989_v0  ;;  %v6482_v36 = vsel %vm11169_vm6, %v6431_v29, %v6481_v45  ;;  %v4565_v42 = vld [vmem:[%s13608_s3 + $0x80] sm:$0x2]  ;;  %v7995_v18 = vunpack.i.h.bf16 %v12492_v16  ;;  %v4158_v19 = vmax.f32 %v14397_v3, %v12473_v5 }
 0x38f   :  { %v6430_v10 = vrot.slane %v7168_v43, 6  ;;  %5354 = vst [vmem:[%s13608_s3 + $0x48] sm:$0x88] %v5353_v22  ;;  %5897 = vst [vmem:[%s13608_s3 + $0x8c] sm:$0x1] %v5896_v41  ;;  %v6535_v15 = vshll.u32 %v7168_v43, 16 }
 0x390   :  { %v6087_v32 = vld [vmem:[%s13608_s3 + $0x8c] sm:$0x2]  ;;  %6483 = vst [vmem:[%s13608_s3 + $0x74] sm:$0x4] %v6482_v36  ;;  %v4381_v8 = vshll.u32 %v7123_v47, 16  ;;  %v6995_v11 = vrot.slane %v7123_v47, 9  ;;  %v7999_v47 = vunpack.i.l.bf16 %v12612_v25 }
 0x391   :  { %v6088_v24 = vsel %vm11130_vm4, %v7091_v59, %v6087_v32  ;;  %v6479_v38 = vsel %vm11150_vm0, %v6430_v10, %v6478_v60  ;;  %v14396_v16 = vld [vmem:[#allocation24_spill] sm:$0xff]  ;;  %v7058_v55 = vrot.slane %v5817_v21, 9  ;;  %v7090_v52 = vrot.slane %v5817_v21, 10  ;;  %v4307_v4 = vld [vmem:[%s13608_s3 + $0x78] sm:$0x11]  ;;  %v12688_v59 = vpop.permute.xlu1 %8002  ;;  %v14401_v27 = vld [vmem:[#allocation67_spill] sm:$0xff]  ;;  %v12719_v32 = vpop.permute.xlu0 %8027 }
 0x392   :  { %v4155_v51 = vmax.f32 %v14396_v16, %v4110_v46  ;;  %6089 = vst [vmem:[%s13608_s3 + $0x8c] sm:$0x2] %v6088_v24  ;;  %6480 = vst [vmem:[%s13608_s3 + $0x6c] sm:$0x44] %v6479_v38  ;;  %v4566_v7 = vsel %vm11019_vm9, %v6995_v11, %v4565_v42  ;;  %v6541_v58 = vrot.slane %v6539_v30, 7  ;;  %v14398_v63 = vld [vmem:[#allocation28_spill] sm:$0xff]  ;;  %v8024_v60 = vunpack.i.l.bf16 %v12659_v61 }
 0x393   :  { %4567 = vst [vmem:[%s13608_s3 + $0x80] sm:$0x2] %v4566_v7  ;;  %v4156_v50 = vmax.f32 %v14398_v63, %v4111_v44  ;;  %v5892_v13 = vld [vmem:[%s13608_s3 + $0x84] sm:$0x11]  ;;  %v6537_v2 = vrot.slane %v6535_v15, 7  ;;  %v6979_v45 = vrot.slane %v4381_v8, 9  ;;  %v4904_v62 = vmax.f32 %v14401_v27, %v7999_v47 }
 0x394   :  { %v7011_v1 = vrot.slane %v4381_v8, 10  ;;  %v5893_v39 = vsel %vm14356_vm12, %v7058_v55, %v5892_v13  ;;  %v4460_v43 = vld [vmem:[%s13608_s3 + $0x80] sm:$0x1]  ;;  %v14399_v34 = vld [vmem:[#allocation25_spill] sm:$0xff]  ;;  %v8005_v42 = vunpack.i.h.bf16 %v12688_v59  ;;  %v8004_v24 = vunpack.i.l.bf16 %v12688_v59  ;;  %v5069_v44 = vld [vmem:[%s13608_s3 + $0x68] sm:$0x4] }
 0x395   :  { %v12699_v29 = vpack.c.bf16 %v4156_v50, %v4155_v51  ;;  %v14400_v46 = vunpack.i.h.bf16 %v14399_v34  ;;  %5894 = vst [vmem:[%s13608_s3 + $0x84] sm:$0x11] %v5893_v39  ;;  %v6084_v21 = vld [vmem:[%s13608_s3 + $0x84] sm:$0x22]  ;;  %v4562_v0 = vld [vmem:[%s13608_s3 + $0x78] sm:$0x22]  ;;  %v4461_v30 = vsel %vm14305_vm13, %v6979_v45, %v4460_v43  ;;  %v6280_v45 = vsel %vm14385_vm10, %v7995_v18, %v8024_v60 }
 0x396   :  { %v14402_v22 = vld [vmem:[#allocation37_spill] sm:$0xff]  ;;  %v14403_v10 = vld [vmem:[#allocation70_spill] sm:$0xff]  ;;  %v6085_v15 = vsel %vm11186_vm1, %v7090_v52, %v6084_v21  ;;  %4462 = vst [vmem:[%s13608_s3 + $0x80] sm:$0x1] %v4461_v30  ;;  %v5291_v16 = vld [vmem:[%s13608_s3 + $0x68] sm:$0x8]  ;;  %v8030_v39 = vunpack.i.h.bf16 %v12719_v32  ;;  %v12794_v30 = vpop.permute.xlu1 %8017 }
 0x397   :  { %v4859_v26 = vsel %vm14385_vm10, %v14400_v46, %v7999_v47  ;;  %v6327_v36 = vmax.f32 %v14403_v10, %v8025_v12  ;;  %v6609_v8 = vld [vmem:[%s13608_s3 + $0x74] sm:$0x4]  ;;  %v4308_v11 = vsel %vm14343_vm7, %v12699_v29, %v4307_v4  ;;  %v6994_v61 = vrot.slane %v12699_v29, 9  ;;  %6086 = vst [vmem:[%s13608_s3 + $0x84] sm:$0x22] %v6085_v15  ;;  %v14404_v51 = vld [vmem:[#allocation13_spill] sm:$0xff] }
 0x398   :  { %v4903_v41 = vmax.f32 %v14402_v22, %v4859_v26  ;;  %v6610_v38 = vsel %vm11310_vm15, %v6541_v58, %v6609_v8  ;;  %4309 = vst [vmem:[%s13608_s3 + $0x78] sm:$0x11] %v4308_v11  ;;  %v14405_v55 = vld [vmem:[#allocation11_spill] sm:$0xff]  ;;  %v12753_v4 = vpack.c.bf16 %v4904_v62, %v4904_v62  ;;  %v4376_v50 = vshll.u32 %v12699_v29, 16  ;;  %v5066_v13 = vld [vmem:[%s13608_s3 + $0x60] sm:$0x44] }
 0x399   :  { %v14406_v52 = vmax.f32 %v14404_v51, %v14405_v55  ;;  %v7171_v58 = vpack.c.bf16 %v6327_v36, %v6327_v36  ;;  %v6606_v63 = vld [vmem:[%s13608_s3 + $0x6c] sm:$0x44]  ;;  %6611 = vst [vmem:[%s13608_s3 + $0x74] sm:$0x4] %v6610_v38  ;;  %v4563_v47 = vsel %vm14346_vm11, %v6994_v61, %v4562_v0  ;;  %v5288_v29 = vld [vmem:[%s13608_s3 + $0x60] sm:$0x88]  ;;  %v6281_v26 = vsel %vm14385_vm10, %v8024_v60, %v8025_v12 }
 0x39a   :  { %v6607_v43 = vsel %vm11295_vm14, %v6537_v2, %v6606_v63  ;;  %v4667_v34 = vld [vmem:[%s13608_s3 + $0x80] sm:$0x2]  ;;  %4564 = vst [vmem:[%s13608_s3 + $0x78] sm:$0x22] %v4563_v47  ;;  %v5011_v18 = vrot.slane %v12753_v4, 6  ;;  %v5233_v21 = vrot.slane %v12753_v4, 7  ;;  %vm14407_vm10 = vnez %v14281_v37 }
 0x39b   :  { %v12751_v7 = vpack.c.bf16 %v4903_v41, %v14406_v52  ;;  %6608 = vst [vmem:[%s13608_s3 + $0x6c] sm:$0x44] %v6607_v43  ;;  %v4668_v2 = vsel %vm11130_vm4, %v7011_v1, %v4667_v34  ;;  %v6487_v0 = vld [vmem:[%s13608_s3 + $0x8c] sm:$0x4]  ;;  %v5127_v60 = vshll.u32 %v12753_v4, 16  ;;  %v6433_v22 = vrot.slane %v7171_v58, 6 }
 0x39c   :  { %4669 = vst [vmem:[%s13608_s3 + $0x80] sm:$0x2] %v4668_v2  ;;  %v5070_v1 = vsel %vm11169_vm6, %v5011_v18, %v5069_v44  ;;  %v8000_v41 = vunpack.i.h.bf16 %v12612_v25  ;;  %v5292_v36 = vsel %vm14407_vm10, %v5233_v21, %v5291_v16  ;;  %v6547_v15 = vshll.u32 %v7171_v58, 16  ;;  %v14408_v11 = vld [vmem:[#allocation65_spill] sm:$0xff]  ;;  %v14409_v38 = vld [vmem:[#allocation68_spill] sm:$0xff]  ;;  %v12859_v18 = vpop.permute.xlu1 %8032 }
 0x39d   :  { %v5010_v46 = vrot.slane %v12751_v7, 6  ;;  %v5123_v27 = vshll.u32 %v12751_v7, 16  ;;  %v5232_v62 = vrot.slane %v12751_v7, 7  ;;  %5071 = vst [vmem:[%s13608_s3 + $0x68] sm:$0x4] %v5070_v1  ;;  %v6978_v8 = vrot.slane %v4376_v50, 9 }
 0x39e   :  { %5293 = vst [vmem:[%s13608_s3 + $0x68] sm:$0x8] %v5292_v36  ;;  %v6488_v25 = vsel %vm11169_vm6, %v6433_v22, %v6487_v0  ;;  %v6325_v61 = vmax.f32 %v14408_v11, %v6280_v45  ;;  %v6326_v44 = vmax.f32 %v14409_v38, %v6281_v26  ;;  %v7010_v51 = vrot.slane %v4376_v50, 10  ;;  %v14411_v52 = vld [vmem:[#allocation73_spill] sm:$0xff]  ;;  %v5075_v0 = vld [vmem:[%s13608_s3 + $0x80] sm:$0x4] }
 0x39f   :  { %v5067_v12 = vsel %vm11150_vm0, %v5010_v46, %v5066_v13  ;;  %v5289_v10 = vsel %vm11340_vm3, %v5232_v62, %v5288_v29  ;;  %v4457_v16 = vld [vmem:[%s13608_s3 + $0x78] sm:$0x11]  ;;  %6489 = vst [vmem:[%s13608_s3 + $0x8c] sm:$0x4] %v6488_v25  ;;  %vm14410_vm4 = vcmask 949248   ;;  %v4907_v4 = vmax.f32 %v14411_v52, %v8030_v39  ;;  %v12857_v46 = vpop.permute.xlu0 %8037  ;;  %v14419_v3 = vld [vmem:[#allocation72_spill] sm:$0xff] }
 0x3a0   :  { %5068 = vst [vmem:[%s13608_s3 + $0x60] sm:$0x44] %v5067_v12  ;;  %5290 = vst [vmem:[%s13608_s3 + $0x60] sm:$0x88] %v5289_v10  ;;  %v12834_v55 = vsel %vm14410_vm4, %v8004_v24, %v8005_v42  ;;  %v8029_v58 = vunpack.i.l.bf16 %v12719_v32  ;;  %v4458_v63 = vsel %vm14356_vm12, %v6978_v8, %v4457_v16  ;;  %v5125_v47 = vrot.slane %v5123_v27, 7  ;;  %v14413_v62 = vld [vmem:[#allocation69_spill] sm:$0xff] }
 0x3a1   :  { %v5129_v50 = vrot.slane %v5127_v60, 7  ;;  %v12842_v13 = vpack.c.bf16 %v6326_v44, %v6325_v61  ;;  %4459 = vst [vmem:[%s13608_s3 + $0x78] sm:$0x11] %v4458_v63  ;;  %v4664_v24 = vld [vmem:[%s13608_s3 + $0x78] sm:$0x22]  ;;  %v6549_v45 = vrot.slane %v6547_v15, 7  ;;  %v12853_v43 = vpack.c.bf16 %v4907_v4, %v4907_v4  ;;  %vm14412_vm12 = vmmov %vm14410_vm4 }
 0x3a2   :  { %v6484_v32 = vld [vmem:[%s13608_s3 + $0x84] sm:$0x44]  ;;  %v4860_v34 = vsel %vm14410_vm4, %v8000_v41, %v8029_v58  ;;  %v4861_v29 = vsel %vm14412_vm12, %v8029_v58, %v8030_v39  ;;  %v4665_v26 = vsel %vm11186_vm1, %v7010_v51, %v4664_v24  ;;  %v4908_v21 = vmax.f32 %v14413_v62, %v12834_v55  ;;  %v14414_v12 = vld [vmem:[#allocation29_spill] sm:$0xff]  ;;  %v5297_v39 = vld [vmem:[%s13608_s3 + $0x80] sm:$0x8] }
 0x3a3   :  { %v6432_v2 = vrot.slane %v12842_v13, 6  ;;  %v4905_v1 = vmax.f32 %v14414_v12, %v4860_v34  ;;  %4666 = vst [vmem:[%s13608_s3 + $0x78] sm:$0x22] %v4665_v26  ;;  %v5013_v22 = vrot.slane %v12853_v43, 6  ;;  %v5235_v41 = vrot.slane %v12853_v43, 7  ;;  %v14415_v10 = vld [vmem:[#allocation5_spill] sm:$0xff]  ;;  %vm14416_vm12 = vmmov %vm14410_vm4 }
 0x3a4   :  { %v4906_v36 = vmax.f32 %v14415_v10, %v4861_v29  ;;  %v8020_v15 = vunpack.i.h.bf16 %v12794_v30  ;;  %v5203_v25 = vld [vmem:[%s13608_s3 + $0x68] sm:$0x4]  ;;  %v8019_v61 = vunpack.i.l.bf16 %v12794_v30  ;;  %v8040_v38 = vunpack.i.h.bf16 %v12857_v46  ;;  %v14417_v26 = vld [vmem:[#allocation78_spill] sm:$0xff]  ;;  %v5081_v59 = vld [vmem:[%s13608_s3 + $0x98] sm:$0x4] }
 0x3a5   :  { %v6485_v11 = vsel %vm11150_vm0, %v6432_v2, %v6484_v32  ;;  %v8039_v44 = vunpack.i.l.bf16 %v12857_v46  ;;  %v5204_v51 = vsel %vm11310_vm15, %v5129_v50, %v5203_v25  ;;  %v5361_v4 = vld [vmem:[%s13608_s3 + $0x68] sm:$0x8]  ;;  %v6543_v58 = vshll.u32 %v12842_v13, 16  ;;  %v12951_v2 = vpop.permute.xlu0 %8042  ;;  %v5300_v30 = vld [vmem:[%s13608_s3 + $0x90] sm:$0x88] }
 0x3a6   :  { %6486 = vst [vmem:[%s13608_s3 + $0x84] sm:$0x44] %v6485_v11  ;;  %v5076_v63 = vsel %vm11169_vm6, %v5013_v22, %v5075_v0  ;;  %5205 = vst [vmem:[%s13608_s3 + $0x68] sm:$0x4] %v5204_v51  ;;  %v5362_v50 = vsel %vm11489_vm5, %v5127_v60, %v5361_v4  ;;  %v6615_v13 = vld [vmem:[%s13608_s3 + $0x8c] sm:$0x4]  ;;  %v5298_v24 = vsel %vm14407_vm10, %v5235_v41, %v5297_v39  ;;  %v12953_v0 = vpop.permute.xlu1 %8047 }
 0x3a7   :  { %v5200_v8 = vld [vmem:[%s13608_s3 + $0x60] sm:$0x44]  ;;  %v5358_v52 = vld [vmem:[%s13608_s3 + $0x60] sm:$0x88]  ;;  %5077 = vst [vmem:[%s13608_s3 + $0x80] sm:$0x4] %v5076_v63  ;;  %v12927_v32 = vpack.c.bf16 %v4906_v36, %v4905_v1  ;;  %v6616_v7 = vsel %vm11310_vm15, %v6549_v45, %v6615_v13  ;;  %v4113_v29 = vsel %vm14416_vm12, %v7990_v57, %v8039_v44  ;;  %v4160_v45 = vmax.f32 %v14417_v26, %v8039_v44  ;;  %vm14420_vm12 = vmmov %vm14410_vm4 }
 0x3a8   :  { %v5201_v16 = vsel %vm11295_vm14, %v5125_v47, %v5200_v8  ;;  %v5359_v47 = vsel %vm14393_vm8, %v5123_v27, %v5358_v52  ;;  %5363 = vst [vmem:[%s13608_s3 + $0x68] sm:$0x8] %v5362_v50  ;;  %v5072_v27 = vld [vmem:[%s13608_s3 + $0x78] sm:$0x44]  ;;  %v5294_v60 = vld [vmem:[%s13608_s3 + $0x78] sm:$0x88]  ;;  %v12963_v6 = vsel %vm14410_vm4, %v8019_v61, %v8020_v15  ;;  %v8035_v36 = vunpack.i.h.bf16 %v12859_v18 }
 0x3a9   :  { %5202 = vst [vmem:[%s13608_s3 + $0x60] sm:$0x44] %v5201_v16  ;;  %5360 = vst [vmem:[%s13608_s3 + $0x60] sm:$0x88] %v5359_v47  ;;  %v5135_v34 = vshll.u32 %v12853_v43, 16  ;;  %v5012_v43 = vrot.slane %v12927_v32, 6  ;;  %v7125_v10 = vpack.c.bf16 %v4160_v45, %v4160_v45  ;;  %v8034_v8 = vunpack.i.l.bf16 %v12859_v18 }
 0x3aa   :  { %5299 = vst [vmem:[%s13608_s3 + $0x80] sm:$0x8] %v5298_v24  ;;  %6617 = vst [vmem:[%s13608_s3 + $0x8c] sm:$0x4] %v6616_v7  ;;  %v5234_v12 = vrot.slane %v12927_v32, 7  ;;  %v14418_v1 = vld [vmem:[#allocation64_spill] sm:$0xff]  ;;  %v13023_v26 = vpop.permute.xlu1 %8057 }
 0x3ab   :  { %v4316_v57 = vld [vmem:[%s13608_s3 + $0x98] sm:$0x1]  ;;  %v4159_v39 = vmax.f32 %v14418_v1, %v4113_v29  ;;  %v5131_v22 = vshll.u32 %v12927_v32, 16  ;;  %v4313_v41 = vld [vmem:[%s13608_s3 + $0x90] sm:$0x11]  ;;  %v6545_v25 = vrot.slane %v6543_v58, 7  ;;  %v5073_v11 = vsel %vm11150_vm0, %v5012_v43, %v5072_v27  ;;  %v13021_v29 = vpop.permute.xlu0 %8052 }
 0x3ac   :  { %v5295_v61 = vsel %vm11340_vm3, %v5234_v12, %v5294_v60  ;;  %v4571_v44 = vld [vmem:[%s13608_s3 + $0x98] sm:$0x2]  ;;  %v5137_v51 = vrot.slane %v5135_v34, 7  ;;  %5074 = vst [vmem:[%s13608_s3 + $0x78] sm:$0x44] %v5073_v11  ;;  %v4317_v4 = vsel %vm10923_vm2, %v7125_v10, %v4316_v57  ;;  %v4391_v58 = vshll.u32 %v7125_v10, 16 }
 0x3ad   :  { %v7124_v16 = vpack.c.bf16 %v4159_v39, %v4158_v19  ;;  %5296 = vst [vmem:[%s13608_s3 + $0x78] sm:$0x88] %v5295_v61  ;;  %v4568_v52 = vld [vmem:[%s13608_s3 + $0x90] sm:$0x22]  ;;  %v6997_v63 = vrot.slane %v7125_v10, 9  ;;  %v5608_v19 = vmax.f32 %v14419_v3, %v12963_v6  ;;  %v5133_v7 = vrot.slane %v5131_v22, 7 }
 0x3ae   :  { %v6612_v5 = vld [vmem:[%s13608_s3 + $0x84] sm:$0x44]  ;;  %4318 = vst [vmem:[%s13608_s3 + $0x98] sm:$0x1] %v4317_v4  ;;  %v5209_v32 = vld [vmem:[%s13608_s3 + $0x80] sm:$0x4]  ;;  %v13019_v60 = vsel %vm14420_vm12, %v8034_v8, %v8035_v36  ;;  %v8050_v10 = vunpack.i.h.bf16 %v12953_v0  ;;  %v8049_v8 = vunpack.i.l.bf16 %v12953_v0  ;;  %v8054_v61 = vunpack.i.l.bf16 %v13021_v29  ;;  %vm14423_vm12 = vmmov %vm14410_vm4 }
 0x3af   :  { %v4314_v47 = vsel %vm14343_vm7, %v7124_v16, %v4313_v41  ;;  %v4386_v50 = vshll.u32 %v7124_v16, 16  ;;  %v6996_v13 = vrot.slane %v7124_v16, 9  ;;  %v6613_v24 = vsel %vm11295_vm14, %v6545_v25, %v6612_v5  ;;  %v14421_v16 = vld [vmem:[#allocation80_spill] sm:$0xff]  ;;  %v5757_v6 = vld [vmem:[%s13608_s3 + $0xa4] sm:$0x1] }
 0x3b0   :  { %4315 = vst [vmem:[%s13608_s3 + $0x90] sm:$0x11] %v4314_v47  ;;  %v4572_v27 = vsel %vm11019_vm9, %v6997_v63, %v4571_v44  ;;  %6614 = vst [vmem:[%s13608_s3 + $0x84] sm:$0x44] %v6613_v24  ;;  %v5210_v45 = vsel %vm11310_vm15, %v5137_v51, %v5209_v32  ;;  %v6981_v12 = vrot.slane %v4391_v58, 9  ;;  %v7013_v1 = vrot.slane %v4391_v58, 10 }
 0x3b1   :  { %v5367_v43 = vld [vmem:[%s13608_s3 + $0x80] sm:$0x8]  ;;  %v4569_v57 = vsel %vm14346_vm11, %v6996_v13, %v4568_v52  ;;  %4573 = vst [vmem:[%s13608_s3 + $0x98] sm:$0x2] %v4572_v27  ;;  %5211 = vst [vmem:[%s13608_s3 + $0x80] sm:$0x4] %v5210_v45  ;;  %v8044_v41 = vunpack.i.l.bf16 %v12951_v2  ;;  %v4114_v0 = vsel %vm14423_vm12, %v8040_v38, %v8049_v8  ;;  %v4115_v47 = vsel %vm14410_vm4, %v8049_v8, %v8050_v10 }
 0x3b2   :  { %v5368_v39 = vsel %vm11489_vm5, %v5135_v34, %v5367_v43  ;;  %4570 = vst [vmem:[%s13608_s3 + $0x90] sm:$0x22] %v4569_v57  ;;  %v6980_v25 = vrot.slane %v4386_v50, 9  ;;  %v7012_v11 = vrot.slane %v4386_v50, 10  ;;  %v8060_v34 = vunpack.i.h.bf16 %v13023_v26  ;;  %v14422_v52 = vld [vmem:[#allocation81_spill] sm:$0xff]  ;;  %vm14426_vm12 = vmmov %vm14410_vm4  ;;  %v14428_v8 = vld [vmem:[#allocation74_spill] sm:$0xff] }
 0x3b3   :  { %5369 = vst [vmem:[%s13608_s3 + $0x80] sm:$0x8] %v5368_v39  ;;  %v4863_v44 = vsel %vm14410_vm4, %v8005_v42, %v8044_v41  ;;  %v4910_v51 = vmax.f32 %v14421_v16, %v8044_v41  ;;  %v4163_v4 = vmax.f32 %v14422_v52, %v8050_v10  ;;  %v5206_v58 = vld [vmem:[%s13608_s3 + $0x78] sm:$0x44]  ;;  %v14424_v42 = vld [vmem:[#allocation71_spill] sm:$0xff]  ;;  %v5563_v38 = vsel %vm14426_vm12, %v8020_v15, %v8054_v61  ;;  %v14427_v41 = vld [vmem:[#allocation82_spill] sm:$0xff] }
 0x3b4   :  { %v5364_v63 = vld [vmem:[%s13608_s3 + $0x78] sm:$0x88]  ;;  %v4909_v5 = vmax.f32 %v14424_v42, %v4863_v44  ;;  %v5207_v13 = vsel %vm11295_vm14, %v5133_v7, %v5206_v58  ;;  %v5078_v27 = vld [vmem:[%s13608_s3 + $0x90] sm:$0x44]  ;;  %v4322_v39 = vld [vmem:[%s13608_s3 + $0xb0] sm:$0x1]  ;;  %v4162_v10 = vmax.f32 %v14427_v41, %v4115_v47  ;;  %v5609_v44 = vmax.f32 %v14428_v8, %v5563_v38 }
 0x3b5   :  { %v14425_v50 = vld [vmem:[#allocation77_spill] sm:$0xff]  ;;  %v5365_v24 = vsel %vm14393_vm8, %v5131_v22, %v5364_v63  ;;  %v13090_v45 = vpack.c.bf16 %v4910_v51, %v4910_v51  ;;  %v13092_v15 = vpack.c.bf16 %v4163_v4, %v4163_v4  ;;  %5208 = vst [vmem:[%s13608_s3 + $0x78] sm:$0x44] %v5207_v13  ;;  %vm14429_vm4 = vnez %v14204_v49  ;;  %v4577_v47 = vld [vmem:[%s13608_s3 + $0xb0] sm:$0x2] }
 0x3b6   :  { %v4161_v46 = vmax.f32 %v14425_v50, %v4114_v0  ;;  %v4466_v32 = vld [vmem:[%s13608_s3 + $0x98] sm:$0x1]  ;;  %5366 = vst [vmem:[%s13608_s3 + $0x78] sm:$0x88] %v5365_v24  ;;  %v5303_v43 = vld [vmem:[%s13608_s3 + $0x98] sm:$0x8]  ;;  %v13111_v57 = vpack.c.bf16 %v4909_v5, %v4908_v21  ;;  %vm14430_vm12 = vnez %v14231_v9  ;;  %v8055_v38 = vunpack.i.h.bf16 %v13021_v29 }
 0x3b7   :  { %v4463_v22 = vld [vmem:[%s13608_s3 + $0x90] sm:$0x11]  ;;  %v4467_v7 = vsel %vm14305_vm13, %v6981_v12, %v4466_v32  ;;  %v5015_v62 = vrot.slane %v13090_v45, 6  ;;  %v5143_v21 = vshll.u32 %v13090_v45, 16  ;;  %v5237_v16 = vrot.slane %v13090_v45, 7  ;;  %v13288_v45 = vpop.permute.xlu1 %8062 }
 0x3b8   :  { %v4464_v12 = vsel %vm14429_vm4, %v6980_v25, %v4463_v22  ;;  %4468 = vst [vmem:[%s13608_s3 + $0x98] sm:$0x1] %v4467_v7  ;;  %v4673_v55 = vld [vmem:[%s13608_s3 + $0x98] sm:$0x2]  ;;  %v5014_v52 = vrot.slane %v13111_v57, 6  ;;  %v5139_v4 = vshll.u32 %v13111_v57, 16  ;;  %v4323_v50 = vsel %vm10923_vm2, %v13092_v15, %v4322_v39 }
 0x3b9   :  { %4465 = vst [vmem:[%s13608_s3 + $0x90] sm:$0x11] %v4464_v12  ;;  %v4670_v25 = vld [vmem:[%s13608_s3 + $0x90] sm:$0x22]  ;;  %v4674_v51 = vsel %vm14430_vm12, %v7013_v1, %v4673_v55  ;;  %v5236_v0 = vrot.slane %v13111_v57, 7  ;;  %v5082_v63 = vsel %vm11169_vm6, %v5015_v62, %v5081_v59  ;;  %v5304_v42 = vsel %vm14407_vm10, %v5237_v16, %v5303_v43 }
 0x3ba   :  { %v4671_v58 = vsel %vm11186_vm1, %v7012_v11, %v4670_v25  ;;  %4675 = vst [vmem:[%s13608_s3 + $0x98] sm:$0x2] %v4674_v51  ;;  %v8059_v1 = vunpack.i.l.bf16 %v13023_v26  ;;  %v5079_v5 = vsel %vm11150_vm0, %v5014_v52, %v5078_v27  ;;  %5083 = vst [vmem:[%s13608_s3 + $0x98] sm:$0x4] %v5082_v63  ;;  %v4319_v59 = vld [vmem:[%s13608_s3 + $0xa8] sm:$0x11]  ;;  %v7126_v32 = vpack.c.bf16 %v4162_v10, %v4161_v46 }
 0x3bb   :  { %4672 = vst [vmem:[%s13608_s3 + $0x90] sm:$0x22] %v4671_v58  ;;  %v5301_v11 = vsel %vm11340_vm3, %v5236_v0, %v5300_v30  ;;  %5305 = vst [vmem:[%s13608_s3 + $0x98] sm:$0x8] %v5304_v42  ;;  %v4401_v13 = vshll.u32 %v13092_v15, 16  ;;  %v6999_v24 = vrot.slane %v13092_v15, 9  ;;  %v13195_v43 = vpack.c.bf16 %v5609_v44, %v5608_v19 }
 0x3bc   :  { %5080 = vst [vmem:[%s13608_s3 + $0x90] sm:$0x44] %v5079_v5  ;;  %5302 = vst [vmem:[%s13608_s3 + $0x90] sm:$0x88] %v5301_v11  ;;  %v5754_v29 = vld [vmem:[%s13608_s3 + $0x9c] sm:$0x11]  ;;  %v4320_v41 = vsel %vm14343_vm7, %v7126_v32, %v4319_v59 }
 0x3bd   :  { %4324 = vst [vmem:[%s13608_s3 + $0xb0] sm:$0x1] %v4323_v50  ;;  %v14431_v27 = vld [vmem:[#allocation86_spill] sm:$0xff]  ;;  %v5141_v22 = vrot.slane %v5139_v4, 7  ;;  %v5145_v7 = vrot.slane %v5143_v21, 7  ;;  %v14432_v46 = vld [vmem:[#allocation85_spill] sm:$0xff]  ;;  %v5755_v26 = vsel %vm14343_vm7, %v13195_v43, %v5754_v29 }
 0x3be   :  { %v5610_v30 = vmax.f32 %v14431_v27, %v8054_v61  ;;  %v5613_v15 = vmax.f32 %v14432_v46, %v8060_v34  ;;  %v4574_v39 = vld [vmem:[%s13608_s3 + $0xa8] sm:$0x22]  ;;  %v4578_v61 = vsel %vm11019_vm9, %v6999_v24, %v4577_v47  ;;  %vm14433_vm3 = vcmask 949248   ;;  %4321 = vst [vmem:[%s13608_s3 + $0xa8] sm:$0x11] %v4320_v41  ;;  %v14437_v27 = vld [vmem:[#allocation84_spill] sm:$0xff] }
 0x3bf   :  { %v5564_v3 = vsel %vm14433_vm3, %v8055_v38, %v8059_v1  ;;  %vm14434_vm10 = vmmov %vm14433_vm3  ;;  %4579 = vst [vmem:[%s13608_s3 + $0xb0] sm:$0x2] %v4578_v61  ;;  %v4396_v10 = vshll.u32 %v7126_v32, 16  ;;  %v6998_v8 = vrot.slane %v7126_v32, 9  ;;  %v5994_v44 = vld [vmem:[%s13608_s3 + $0x9c] sm:$0x22] }
 0x3c0   :  { %v5565_v19 = vsel %vm14434_vm10, %v8059_v1, %v8060_v34  ;;  %v13223_v12 = vpack.c.bf16 %v5610_v30, %v5610_v30  ;;  %v5763_v34 = vld [vmem:[%s13608_s3 + $0xbc] sm:$0x1]  ;;  %v6983_v55 = vrot.slane %v4401_v13, 9  ;;  %v7015_v62 = vrot.slane %v4401_v13, 10  ;;  %5756 = vst [vmem:[%s13608_s3 + $0x9c] sm:$0x11] %v5755_v26 }
 0x3c1   :  { %v7076_v16 = vrot.slane %v13195_v43, 9  ;;  %v13235_v25 = vpack.c.bf16 %v5613_v15, %v5613_v15  ;;  %v4575_v51 = vsel %vm14346_vm11, %v6998_v8, %v4574_v39  ;;  %v5827_v0 = vshll.u32 %v13195_v43, 16  ;;  %v14435_v58 = vld [vmem:[#allocation83_spill] sm:$0xff]  ;;  %v5215_v42 = vld [vmem:[%s13608_s3 + $0x98] sm:$0x4] }
 0x3c2   :  { %v5758_v52 = vsel %vm10923_vm2, %v13223_v12, %v5757_v6  ;;  %v5611_v63 = vmax.f32 %v14435_v58, %v5564_v3  ;;  %v5373_v1 = vld [vmem:[%s13608_s3 + $0x98] sm:$0x8]  ;;  %v6982_v5 = vrot.slane %v4396_v10, 9  ;;  %4576 = vst [vmem:[%s13608_s3 + $0xa8] sm:$0x22] %v4575_v51  ;;  %v5832_v11 = vshll.u32 %v13223_v12, 16 }
 0x3c3   :  { %5759 = vst [vmem:[%s13608_s3 + $0xa4] sm:$0x1] %v5758_v52  ;;  %v5995_v59 = vsel %vm14346_vm11, %v7076_v16, %v5994_v44  ;;  %v5764_v47 = vsel %vm10923_vm2, %v13235_v25, %v5763_v34  ;;  %v14436_v50 = vld [vmem:[#allocation75_spill] sm:$0xff]  ;;  %v5212_v13 = vld [vmem:[%s13608_s3 + $0x90] sm:$0x44]  ;;  %v5216_v24 = vsel %vm11310_vm15, %v5145_v7, %v5215_v42  ;;  %v5374_v54 = vsel %vm11489_vm5, %v5143_v21, %v5373_v1  ;;  %v13286_v7 = vpop.permute.xlu0 %8067  ;;  %vm14438_vm2 = vmmov %vm14433_vm3 }
 0x3c4   :  { %v6328_v38 = vmax.f32 %v14436_v50, %v13019_v60  ;;  %v5370_v32 = vld [vmem:[%s13608_s3 + $0x90] sm:$0x88]  ;;  %v4472_v29 = vld [vmem:[%s13608_s3 + $0xb0] sm:$0x1]  ;;  %5996 = vst [vmem:[%s13608_s3 + $0x9c] sm:$0x22] %v5995_v59  ;;  %v5612_v30 = vmax.f32 %v14437_v27, %v5565_v19  ;;  %v5213_v21 = vsel %vm11295_vm14, %v5141_v22, %v5212_v13  ;;  %v8069_v44 = vunpack.i.l.bf16 %v13286_v7 }
 0x3c5   :  { %5765 = vst [vmem:[%s13608_s3 + $0xbc] sm:$0x1] %v5764_v47  ;;  %5217 = vst [vmem:[%s13608_s3 + $0x98] sm:$0x4] %v5216_v24  ;;  %v5371_v43 = vsel %vm14393_vm8, %v5139_v4, %v5370_v32  ;;  %v4473_v46 = vsel %vm14305_vm13, %v6983_v55, %v4472_v29  ;;  %v7014_v15 = vrot.slane %v4396_v10, 10  ;;  %v7060_v57 = vrot.slane %v5827_v0, 9 }
 0x3c6   :  { %5375 = vst [vmem:[%s13608_s3 + $0x98] sm:$0x8] %v5374_v54  ;;  %v5997_v22 = vld [vmem:[%s13608_s3 + $0xa4] sm:$0x2]  ;;  %v5760_v39 = vld [vmem:[%s13608_s3 + $0xb4] sm:$0x11]  ;;  %v13333_v8 = vpack.c.bf16 %v5612_v30, %v5611_v63  ;;  %v8065_v26 = vunpack.i.h.bf16 %v13288_v45  ;;  %v8064_v60 = vunpack.i.l.bf16 %v13288_v45  ;;  %vm14443_vm3 = vnez %v14281_v37 }
 0x3c7   :  { %5214 = vst [vmem:[%s13608_s3 + $0x90] sm:$0x44] %v5213_v21  ;;  %5372 = vst [vmem:[%s13608_s3 + $0x90] sm:$0x88] %v5371_v43  ;;  %v7061_v4 = vrot.slane %v5832_v11, 9  ;;  %v7077_v61 = vrot.slane %v13223_v12, 9 }
 0x3c8   :  { %4474 = vst [vmem:[%s13608_s3 + $0xb0] sm:$0x1] %v4473_v46  ;;  %v6003_v41 = vld [vmem:[%s13608_s3 + $0xbc] sm:$0x2]  ;;  %v5842_v6 = vshll.u32 %v13235_v25, 16  ;;  %v7079_v10 = vrot.slane %v13235_v25, 9  ;;  %v5761_v63 = vsel %vm14343_vm7, %v13333_v8, %v5760_v39  ;;  %v8073_v46 = vpop.permute.xlu1 %8072  ;;  %vm14448_vm7 = vmmov %vm14438_vm2 }
 0x3c9   :  { %v4679_v3 = vld [vmem:[%s13608_s3 + $0xb0] sm:$0x2]  ;;  %v4469_v19 = vld [vmem:[%s13608_s3 + $0xa8] sm:$0x11]  ;;  %v5898_v16 = vld [vmem:[%s13608_s3 + $0x9c] sm:$0x11]  ;;  %v5998_v51 = vsel %vm11019_vm9, %v7077_v61, %v5997_v22  ;;  %v8070_v61 = vunpack.i.h.bf16 %v13286_v7 }
 0x3ca   :  { %v4680_v34 = vsel %vm14430_vm12, %v7015_v62, %v4679_v3  ;;  %v4470_v55 = vsel %vm14429_vm4, %v6982_v5, %v4469_v19  ;;  %v7092_v25 = vrot.slane %v5827_v0, 10  ;;  %v5899_v62 = vsel %vm14429_vm4, %v7060_v57, %v5898_v16  ;;  %5999 = vst [vmem:[%s13608_s3 + $0xa4] sm:$0x2] %v5998_v51  ;;  %v6000_v52 = vld [vmem:[%s13608_s3 + $0xb4] sm:$0x22] }
 0x3cb   :  { %4681 = vst [vmem:[%s13608_s3 + $0xb0] sm:$0x2] %v4680_v34  ;;  %4471 = vst [vmem:[%s13608_s3 + $0xa8] sm:$0x11] %v4470_v55  ;;  %v7063_v0 = vrot.slane %v5842_v6, 9  ;;  %v6004_v58 = vsel %vm11019_vm9, %v7079_v10, %v6003_v41  ;;  %v5837_v33 = vshll.u32 %v13333_v8, 16  ;;  %v6283_v5 = vsel %vm14438_vm2, %v8035_v36, %v8069_v44 }
 0x3cc   :  { %v4676_v42 = vld [vmem:[%s13608_s3 + $0xa8] sm:$0x22]  ;;  %5900 = vst [vmem:[%s13608_s3 + $0x9c] sm:$0x11] %v5899_v62  ;;  %v5901_v1 = vld [vmem:[%s13608_s3 + $0xa4] sm:$0x1]  ;;  %vm14442_vm9 = vmmov %vm14438_vm2 }
 0x3cd   :  { %6005 = vst [vmem:[%s13608_s3 + $0xbc] sm:$0x2] %v6004_v58  ;;  %5762 = vst [vmem:[%s13608_s3 + $0xb4] sm:$0x11] %v5761_v63  ;;  %v7078_v23 = vrot.slane %v13333_v8, 9  ;;  %v14439_v59 = vld [vmem:[#allocation89_spill] sm:$0xff]  ;;  %v4677_v13 = vsel %vm11186_vm1, %v7014_v15, %v4676_v42  ;;  %v5902_v24 = vsel %vm14305_vm13, %v7061_v4, %v5901_v1  ;;  %v8045_v15 = vunpack.i.h.bf16 %v12951_v2 }
 0x3ce   :  { %v6330_v47 = vmax.f32 %v14439_v59, %v8069_v44  ;;  %v6090_v32 = vld [vmem:[%s13608_s3 + $0x9c] sm:$0x22]  ;;  %v5907_v54 = vld [vmem:[%s13608_s3 + $0xbc] sm:$0x1]  ;;  %v14440_v29 = vld [vmem:[#allocation76_spill] sm:$0xff]  ;;  %v7093_v2 = vrot.slane %v5832_v11, 10  ;;  %v8075_v11 = vunpack.i.h.bf16 %v8073_v46  ;;  %v8074_v8 = vunpack.i.l.bf16 %v8073_v46 }
 0x3cf   :  { %v6329_v18 = vmax.f32 %v14440_v29, %v6283_v5  ;;  %v14441_v36 = vld [vmem:[#allocation88_spill] sm:$0xff]  ;;  %4678 = vst [vmem:[%s13608_s3 + $0xa8] sm:$0x22] %v4677_v13  ;;  %5903 = vst [vmem:[%s13608_s3 + $0xa4] sm:$0x1] %v5902_v24  ;;  %v6091_v30 = vsel %vm11186_vm1, %v7092_v25, %v6090_v32  ;;  %v5908_v21 = vsel %vm14305_vm13, %v7063_v0, %v5907_v54  ;;  %v7095_v39 = vrot.slane %v5842_v6, 10 }
 0x3d0   :  { %v4913_v27 = vmax.f32 %v14441_v36, %v8065_v26  ;;  %v6001_v43 = vsel %vm14346_vm11, %v7078_v23, %v6000_v52  ;;  %6092 = vst [vmem:[%s13608_s3 + $0x9c] sm:$0x22] %v6091_v30  ;;  %5909 = vst [vmem:[%s13608_s3 + $0xbc] sm:$0x1] %v5908_v21  ;;  %v7173_v40 = vpack.c.bf16 %v6330_v47, %v6330_v47  ;;  %v6490_v57 = vld [vmem:[%s13608_s3 + $0x9c] sm:$0x44] }
 0x3d1   :  { %6002 = vst [vmem:[%s13608_s3 + $0xb4] sm:$0x22] %v6001_v43  ;;  %v7172_v31 = vpack.c.bf16 %v6329_v18, %v6328_v38  ;;  %v6493_v4 = vld [vmem:[%s13608_s3 + $0xa4] sm:$0x4]  ;;  %v7062_v50 = vrot.slane %v5837_v33, 9  ;;  %v4864_v10 = vsel %vm14442_vm9, %v8045_v15, %v8064_v60  ;;  %v7094_v16 = vrot.slane %v5837_v33, 10  ;;  %vm14444_vm13 = vmmov %vm14438_vm2 }
 0x3d2   :  { %v13425_v22 = vpack.c.bf16 %v4913_v27, %v4913_v27  ;;  %v6435_v41 = vrot.slane %v7173_v40, 6  ;;  %v5087_v12 = vld [vmem:[%s13608_s3 + $0xb0] sm:$0x4]  ;;  %v6093_v6 = vld [vmem:[%s13608_s3 + $0xa4] sm:$0x2]  ;;  %v6555_v49 = vshll.u32 %v7173_v40, 16  ;;  %v4865_v63 = vsel %vm14444_vm13, %v8064_v60, %v8065_v26  ;;  %vm14449_vm11 = vmmov %vm14438_vm2 }
 0x3d3   :  { %v6434_v38 = vrot.slane %v7172_v31, 6  ;;  %v5309_v3 = vld [vmem:[%s13608_s3 + $0xb0] sm:$0x8]  ;;  %v6094_v44 = vsel %vm14430_vm12, %v7093_v2, %v6093_v6  ;;  %v6551_v0 = vshll.u32 %v7172_v31, 16  ;;  %v14445_v42 = vld [vmem:[#allocation79_spill] sm:$0xff]  ;;  %v14446_v23 = vld [vmem:[#allocation90_spill] sm:$0xff]  ;;  %v6284_v37 = vsel %vm14448_vm7, %v8070_v61, %v8074_v8 }
 0x3d4   :  { %v5017_v7 = vrot.slane %v13425_v22, 6  ;;  %v5239_v19 = vrot.slane %v13425_v22, 7  ;;  %v6099_v34 = vld [vmem:[%s13608_s3 + $0xbc] sm:$0x2]  ;;  %v5904_v55 = vld [vmem:[%s13608_s3 + $0xb4] sm:$0x11]  ;;  %v6494_v25 = vsel %vm11169_vm6, %v6435_v41, %v6493_v4  ;;  %v4911_v1 = vmax.f32 %v14445_v42, %v4864_v10 }
 0x3d5   :  { %v6491_v51 = vsel %vm11150_vm0, %v6434_v38, %v6490_v57  ;;  %6095 = vst [vmem:[%s13608_s3 + $0xa4] sm:$0x2] %v6094_v44  ;;  %v6100_v62 = vsel %vm14430_vm12, %v7095_v39, %v6099_v34  ;;  %v5905_v52 = vsel %vm14429_vm4, %v7062_v50, %v5904_v55  ;;  %6495 = vst [vmem:[%s13608_s3 + $0xa4] sm:$0x4] %v6494_v25  ;;  %v14447_v59 = vld [vmem:[#allocation92_spill] sm:$0xff]  ;;  %v5151_v13 = vshll.u32 %v13425_v22, 16 }
 0x3d6   :  { %6492 = vst [vmem:[%s13608_s3 + $0x9c] sm:$0x44] %v6491_v51  ;;  %v5088_v58 = vsel %vm11169_vm6, %v5017_v7, %v5087_v12  ;;  %6101 = vst [vmem:[%s13608_s3 + $0xbc] sm:$0x2] %v6100_v62  ;;  %v5310_v9 = vsel %vm14443_vm3, %v5239_v19, %v5309_v3  ;;  %v4912_v5 = vmax.f32 %v14446_v23, %v4865_v63  ;;  %v14450_v24 = vld [vmem:[#allocation87_spill] sm:$0xff]  ;;  %v6553_v30 = vrot.slane %v6551_v0, 7 }
 0x3d7   :  { %5906 = vst [vmem:[%s13608_s3 + $0xb4] sm:$0x11] %v5905_v52  ;;  %5089 = vst [vmem:[%s13608_s3 + $0xb0] sm:$0x4] %v5088_v58  ;;  %v6333_v47 = vmax.f32 %v14447_v59, %v8075_v11  ;;  %v6285_v45 = vsel %vm14449_vm11, %v8074_v8, %v8075_v11  ;;  %v6331_v32 = vmax.f32 %v14450_v24, %v6284_v37  ;;  %v14451_v54 = vld [vmem:[#allocation91_spill] sm:$0xff]  ;;  %v6557_v46 = vrot.slane %v6555_v49, 7 }
 0x3d8   :  { %v6096_v33 = vld [vmem:[%s13608_s3 + $0xb4] sm:$0x22]  ;;  %5311 = vst [vmem:[%s13608_s3 + $0xb0] sm:$0x8] %v5310_v9  ;;  %v6332_v29 = vmax.f32 %v14451_v54, %v6285_v45  ;;  %v5084_v18 = vld [vmem:[%s13608_s3 + $0xa8] sm:$0x44]  ;;  %v7142_v36 = vpack.c.bf16 %v4912_v5, %v4911_v1 }
 0x3d9   :  { %v6097_v26 = vsel %vm11186_vm1, %v7094_v16, %v6096_v33  ;;  %v7175_v27 = vpack.c.bf16 %v6333_v47, %v6333_v47  ;;  %v6499_v21 = vld [vmem:[%s13608_s3 + $0xbc] sm:$0x4]  ;;  %v6496_v40 = vld [vmem:[%s13608_s3 + $0xb4] sm:$0x44]  ;;  %v5153_v57 = vrot.slane %v5151_v13, 7  ;;  %vm14452_vm1 = vnez %v14384_v14 }
 0x3da   :  { %6098 = vst [vmem:[%s13608_s3 + $0xb4] sm:$0x22] %v6097_v26  ;;  %v7174_v43 = vpack.c.bf16 %v6332_v29, %v6331_v32  ;;  %v5016_v15 = vrot.slane %v7142_v36, 6  ;;  %v5238_v31 = vrot.slane %v7142_v36, 7  ;;  %v5147_v20 = vshll.u32 %v7142_v36, 16 }
 0x3db   :  { %v6437_v22 = vrot.slane %v7175_v27, 6  ;;  %v6563_v56 = vshll.u32 %v7175_v27, 16 }
 0x3dc   :  { %v6621_v39 = vld [vmem:[%s13608_s3 + $0xa4] sm:$0x4]  ;;  %v6436_v4 = vrot.slane %v7174_v43, 6  ;;  %v5085_v38 = vsel %vm11150_vm0, %v5016_v15, %v5084_v18  ;;  %v5307_v11 = vsel %vm14452_vm1, %v5238_v31, %v5306_v35  ;;  %v6559_v7 = vshll.u32 %v7174_v43, 16 }
 0x3dd   :  { %v6618_v2 = vld [vmem:[%s13608_s3 + $0x9c] sm:$0x44]  ;;  %v6622_v60 = vsel %vm11310_vm15, %v6557_v46, %v6621_v39  ;;  %5086 = vst [vmem:[%s13608_s3 + $0xa8] sm:$0x44] %v5085_v38  ;;  %v6500_v6 = vsel %vm11169_vm6, %v6437_v22, %v6499_v21  ;;  %5308 = vst [vmem:[%s13608_s3 + $0xa8] sm:$0x88] %v5307_v11 }
 0x3de   :  { %v6619_v61 = vsel %vm11295_vm14, %v6553_v30, %v6618_v2  ;;  %v5221_v50 = vld [vmem:[%s13608_s3 + $0xb0] sm:$0x4]  ;;  %6623 = vst [vmem:[%s13608_s3 + $0xa4] sm:$0x4] %v6622_v60  ;;  %6501 = vst [vmem:[%s13608_s3 + $0xbc] sm:$0x4] %v6500_v6  ;;  %v6497_v14 = vsel %vm11150_vm0, %v6436_v4, %v6496_v40 }
 0x3df   :  { %6620 = vst [vmem:[%s13608_s3 + $0x9c] sm:$0x44] %v6619_v61  ;;  %v5222_v41 = vsel %vm11310_vm15, %v5153_v57, %v5221_v50  ;;  %v5379_v12 = vld [vmem:[%s13608_s3 + $0xb0] sm:$0x8]  ;;  %6498 = vst [vmem:[%s13608_s3 + $0xb4] sm:$0x44] %v6497_v14 }
 0x3e0   :  { %5223 = vst [vmem:[%s13608_s3 + $0xb0] sm:$0x4] %v5222_v41  ;;  %v5380_v3 = vsel %vm11489_vm5, %v5151_v13, %v5379_v12  ;;  %v5149_v19 = vrot.slane %v5147_v20, 7  ;;  %v6565_v8 = vrot.slane %v6563_v56, 7  ;;  %v6561_v55 = vrot.slane %v6559_v7, 7 }
 0x3e1   :  { %5381 = vst [vmem:[%s13608_s3 + $0xb0] sm:$0x8] %v5380_v3 }
 0x3e4   :  { %v5218_v10 = vld [vmem:[%s13608_s3 + $0xa8] sm:$0x44]  ;;  %v5376_v44 = vld [vmem:[%s13608_s3 + $0xa8] sm:$0x88] }
 0x3e5   :  { %v5219_v28 = vsel %vm11295_vm14, %v5149_v19, %v5218_v10  ;;  %v6627_v34 = vld [vmem:[%s13608_s3 + $0xbc] sm:$0x4]  ;;  %v5377_v16 = vsel %vm14393_vm8, %v5147_v20, %v5376_v44 }
 0x3e6   :  { %5220 = vst [vmem:[%s13608_s3 + $0xa8] sm:$0x44] %v5219_v28  ;;  %v6628_v51 = vsel %vm11310_vm15, %v6565_v8, %v6627_v34  ;;  %v6624_v25 = vld [vmem:[%s13608_s3 + $0xb4] sm:$0x44]  ;;  %5378 = vst [vmem:[%s13608_s3 + $0xa8] sm:$0x88] %v5377_v16 }
 0x3e7   :  { %6629 = vst [vmem:[%s13608_s3 + $0xbc] sm:$0x4] %v6628_v51  ;;  %v6625_v62 = vsel %vm11295_vm14, %v6561_v55, %v6624_v25 }
 0x3e8   :  { %6626 = vst [vmem:[%s13608_s3 + $0xb4] sm:$0x44] %v6625_v62 }

// kernel: tile.18
= control target key start
LH: loop header
LB: loop body
LE: loop exit
PB: predicated region body
PF: predicated region fallthrough
CT: control target
= control target key end

     0   :  { %s28_s0 = inlined_call_operand.vmem [shape: f32[12], index: 0, kind: input, shape index: {}]   ;;  %s29_s1 = inlined_call_operand.vmem [shape: f32[14,12], index: 1, kind: output, shape index: {}]  }
   0x1   :  { %v4_v0 = vld [vmem:[%s28_s0] ss:$0 sm:$0xff] }
   0x2   :  { %5 = vst [vmem:[%s29_s1] sm:$0xff] %v4_v0  ;;  %8 = vst [vmem:[%s29_s1 + $0x8] sm:$0xff] %v4_v0 }

// kernel: tile.19
= control target key start
LH: loop header
LB: loop body
LE: loop exit
PB: predicated region body
PF: predicated region fallthrough
CT: control target
= control target key end

     0   :  { %vm9_vm0 = vcmask 64512   ;;  %s132_s12 = smov 120   ;;  %s133_s13 = smov 96   ;;  %vm3_vm1 = vcmask 97280   ;;  %vm13_vm2 = vcmask 31744   ;;  %vm16_vm3 = vcmask 1048512   ;;  %s206_s0 = inlined_call_operand.vmem [shape: f32[14,12], index: 0, kind: input, shape index: {}]   ;;  %s207_s1 = inlined_call_operand.vmem [shape: f32[1,168], index: 1, kind: output, shape index: {}]  }
   0x1   :  { %v104_v0 = vld [vmem:[%s206_s0 + $0xa] sm:$0x1]   ;;  %v107_v3 = vld [vmem:[%s206_s0 + $0x8] sm:$0x1]   ;;  %v106_v4 = vld [vmem:[%s206_s0 + $0x9] sm:$0x1]  }
   0x2   :  { %v105_v1 = vld [vmem:[%s206_s0 + $0xa] sm:$0x1]   ;;  %26 = vrot.lane.b32.xlu1 %v107_v3, %s133_s13  ;;  %v108_v5 = vld [vmem:[%s206_s0 + $0x7] sm:$0x1]   ;;  %s134_s18 = smov 108   ;;  %s135_s19 = smov 84  }
   0x3   :  { %v10_v2 = vsel %vm9_vm0, %v105_v1, %v104_v0  ;;  %v109_v6 = vld [vmem:[%s206_s0 + $0x6] sm:$0x1]   ;;  %v110_v7 = vld [vmem:[%s206_s0 + $0x5] sm:$0x1]   ;;  %v2_v8 = vld [vmem:[%s206_s0] sm:$0x1]  }
   0x4   :  { %11 = vrot.lane.b32.xlu0 %v10_v2, %s132_s12  ;;  %4 = vst.msk [vmem:[#allocation0] sm:$0x1] %vm3_vm1, %v2_v8   ;;  %s136_s26 = smov 72   ;;  %s137_s27 = smov 60   ;;  %v111_v9 = vld [vmem:[%s206_s0 + $0x4] sm:$0x1]  }
   0x5   :  { %v112_v10 = vld [vmem:[%s206_s0 + $0x3] sm:$0x1]   ;;  %s138_s3 = smov 48   ;;  %s139_s4 = smov 36   ;;  %v113_v11 = vld [vmem:[%s206_s0 + $0xd] sm:$0x1]  }
   0x6   :  { %32 = vrot.lane.b32.xlu1 %v108_v5, %s135_s19  ;;  %v114_v12 = vld [vmem:[%s206_s0 + $0x2] sm:$0x1]   ;;  %s140_s9 = smov 28   ;;  %s141_s10 = smov 24   ;;  %v115_v13 = vld [vmem:[%s206_s0 + $0xc] sm:$0x1]  }
   0x7   :  { %v116_v14 = vld [vmem:[%s206_s0 + $0x1] sm:$0x1]   ;;  %s142_s15 = smov 16   ;;  %s143_s16 = smov 12   ;;  %v117_v15 = vld [vmem:[%s206_s0 + $0xb] sm:$0x1]  }
   0x8   :  { %20 = vrot.lane.b32.xlu0 %v106_v4, %s134_s18  ;;  %s144_s0 = smov 4   ;;  %vm22_vm4 = vcmask 982880   ;;  %vm28_vm5 = vcmask 884480   ;;  %vm34_vm6 = vcmask 786080   ;;  %vm40_vm7 = vcmask 687680  }
   0x9   :  { %vm46_vm8 = vcmask 589280   ;;  %vm52_vm9 = vcmask 490880   ;;  %vm58_vm10 = vcmask 392480   ;;  %vm64_vm11 = vcmask 326880  }
   0xa   :  { %44 = vrot.lane.b32.xlu1 %v110_v7, %s137_s27  ;;  %vm71_vm12 = vcmask 294080   ;;  %vm77_vm13 = vcmask 228480   ;;  %vm84_vm14 = vcmask 195680   ;;  %vm90_vm15 = vcmask 130080  }
   0xc   :  { %38 = vrot.lane.b32.xlu0 %v109_v6, %s136_s26 }
   0xe   :  { %56 = vrot.lane.b32.xlu1 %v112_v10, %s139_s4 }
  0x10   :  { %50 = vrot.lane.b32.xlu0 %v111_v9, %s138_s3 }
  0x12   :  { %69 = vrot.lane.b32.xlu1 %v114_v12, %s141_s10 }
  0x14   :  { %62 = vrot.lane.b32.xlu0 %v113_v11, %s140_s9 }
  0x16   :  { %82 = vrot.lane.b32.xlu1 %v116_v14, %s143_s16 }
  0x18   :  { %75 = vrot.lane.b32.xlu0 %v115_v13, %s142_s15 }
  0x1c   :  { %88 = vrot.lane.b32.xlu0 %v117_v15, %s144_s0 }
  0x74   :  { %v27_v17 = vpop.permute.xlu1 %26  }
  0x76   :  { %v12_v16 = vpop.permute.xlu0 %11  }
  0x77   :  { %15 = vst.msk [vmem:[#allocation0 + $0x8] sm:$0x1] %vm13_vm2, %v12_v16  }
  0x78   :  { %17 = vst.msk [vmem:[#allocation0] sm:$0x1] %vm16_vm3, %v12_v16   ;;  %v33_v19 = vpop.permute.xlu1 %32  }
  0x7a   :  { %v21_v18 = vpop.permute.xlu0 %20  }
  0x7b   :  { %23 = vst.msk [vmem:[#allocation0] sm:$0x1] %vm22_vm4, %v21_v18  }
  0x7c   :  { %29 = vst.msk [vmem:[#allocation0] sm:$0x1] %vm28_vm5, %v27_v17   ;;  %v45_v21 = vpop.permute.xlu1 %44  }
  0x7d   :  { %35 = vst.msk [vmem:[#allocation0] sm:$0x1] %vm34_vm6, %v33_v19  }
  0x7e   :  { %v39_v20 = vpop.permute.xlu0 %38  }
  0x7f   :  { %41 = vst.msk [vmem:[#allocation0] sm:$0x1] %vm40_vm7, %v39_v20  }
  0x80   :  { %47 = vst.msk [vmem:[#allocation0] sm:$0x1] %vm46_vm8, %v45_v21   ;;  %v57_v23 = vpop.permute.xlu1 %56  }
  0x82   :  { %v51_v22 = vpop.permute.xlu0 %50  }
  0x83   :  { %53 = vst.msk [vmem:[#allocation0] sm:$0x1] %vm52_vm9, %v51_v22  }
  0x84   :  { %59 = vst.msk [vmem:[#allocation0] sm:$0x1] %vm58_vm10, %v57_v23   ;;  %v70_v25 = vpop.permute.xlu1 %69  }
  0x85   :  { %72 = vst.msk [vmem:[#allocation0] sm:$0x1] %vm71_vm12, %v70_v25  }
  0x86   :  { %v63_v24 = vpop.permute.xlu0 %62  }
  0x87   :  { %66 = vst.msk [vmem:[#allocation0 + $0x8] sm:$0x1] %vm64_vm11, %v63_v24  }
  0x88   :  { %v83_v27 = vpop.permute.xlu1 %82  }
  0x89   :  { %85 = vst.msk [vmem:[#allocation0] sm:$0x1] %vm84_vm14, %v83_v27  }
  0x8a   :  { %v76_v26 = vpop.permute.xlu0 %75  }
  0x8b   :  { %79 = vst.msk [vmem:[#allocation0 + $0x8] sm:$0x1] %vm77_vm13, %v76_v26  }
  0x8e   :  { %v89_v28 = vpop.permute.xlu0 %88  }
  0x8f   :  { %92 = vst.msk [vmem:[#allocation0 + $0x8] sm:$0x1] %vm90_vm15, %v89_v28  }
  0x90   :  { %v96_v29 = vld [vmem:[#allocation0] sm:$0x1] }
  0x91   :  { %98 = vst [vmem:[%s207_s1] sm:$0x1] %v96_v29 }
  0x96   :  { %v100_v30 = vld [vmem:[#allocation0 + $0x8] sm:$0x1] }
  0x97   :  { %118 = vst [vmem:[%s207_s1 + $0x1] sm:$0x1] %v100_v30 }

// kernel: cnn_forward.3
= control target key start
LH: loop header
LB: loop body
LE: loop exit
PB: predicated region body
PF: predicated region fallthrough
CT: control target
= control target key end

     0   :  { %vm78_vm0 = vsmask.f32 3328  ;;  %vm79_vm1 = vsmask.f32 7440  ;;  %vm492_vm3 = vcmask 719872   ;;  %vm517_vm4 = vcmask 1043456   ;;  %s7610_s1 = inlined_call_operand.vmem [shape: bf16[5,216,168], index: 1, kind: input, shape index: {}]   ;;  %s7611_s0 = inlined_call_operand.vmem [shape: bf16[8,20,216], index: 0, kind: input, shape index: {}]   ;;  %s7612_s2 = inlined_call_operand.vmem [shape: f32[1,168], index: 2, kind: input, shape index: {}]   ;;  %s7613_s3 = inlined_call_operand.vmem [shape: bf16[7,156,10], index: 3, kind: input, shape index: {}]   ;;  %s7614_s5 = inlined_call_operand.vmem [shape: f32[10,10], index: 5, kind: input, shape index: {}]   ;;  %s7615_s4 = inlined_call_operand.vmem [shape: f32[1,10], index: 4, kind: input, shape index: {}]   ;;  %s7616_s6 = inlined_call_operand.vmem [shape: f32[1,10], index: 6, kind: input, shape index: {}]   ;;  %s7617_s7 = inlined_call_operand.vmem [shape: f32[8,10], index: 7, kind: output, shape index: {}]  }
   0x1   :  { %v5079_v0 = vld [vmem:[%s7610_s1 + $0xdc] ss:$8 sps:$4 sm:$0xff]   ;;  %v5081_v1 = vld [vmem:[%s7610_s1 + $0xd8] ss:$8 sps:$4 sm:$0xff]   ;;  %v5082_v2 = vld [vmem:[%s7610_s1 + $0xec] ss:$8 sps:$4 sm:$0xff]  }
   0x2   :  { %524 = vmatprep.subr.bf16.mxu0 %v5079_v0  ;;  %v5084_v3 = vld [vmem:[%s7610_s1 + $0xe8] ss:$8 sps:$4 sm:$0xff]   ;;  %v5085_v4 = vld [vmem:[%s7610_s1 + $0xfc] ss:$8 sps:$4 sm:$0xff]   ;;  %v5087_v5 = vld [vmem:[%s7610_s1 + $0xf8] ss:$8 sps:$4 sm:$0xff]  }
   0x3   :  { %525 = vmatpush1.bf16.msra.mxu0 %v5081_v1  ;;  %v5088_v6 = vld [vmem:[%s7610_s1 + $0x10c] ss:$8 sps:$4 sm:$0xff]   ;;  %v5090_v7 = vld [vmem:[%s7610_s1 + $0x108] ss:$8 sps:$4 sm:$0xff]   ;;  %v5091_v8 = vld [vmem:[%s7610_s1 + $0x11c] ss:$8 sps:$4 sm:$0xff]  }
   0x4   :  { %526 = vmatprep.subr.bf16.mxu0 %v5082_v2  ;;  %v5093_v9 = vld [vmem:[%s7610_s1 + $0x118] ss:$8 sps:$4 sm:$0xff]   ;;  %v5094_v10 = vld [vmem:[%s7610_s1 + $0x12c] ss:$8 sps:$4 sm:$0xff]   ;;  %v5096_v11 = vld [vmem:[%s7610_s1 + $0x128] ss:$8 sps:$4 sm:$0xff]  }
   0x5   :  { %v5466_v12 = vld [vmem:[%s7611_s0] sm:$0xff]  ;;  %v5471_v13 = vld [vmem:[%s7611_s0 + $0x8] sm:$0xff]  ;;  %v70_v14 = vld [vmem:[%s7611_s0 + $0x10] sm:$0x11]  ;;  %vm2077_vm5 = vcmask 1041408   ;;  %vm2078_vm6 = vcmask 1045508  }
   0x6   :  { %v82_v15 = vshrl.u32 %v5466_v12, 16  ;;  %v85_v16 = vshll.u32 %v5466_v12, 16  ;;  %v91_v17 = vshll.u32 %v5471_v13, 16  ;;  %v95_v18 = vshrl.u32 %v5471_v13, 16  ;;  %v5097_v20 = vld [vmem:[%s7610_s1 + $0x13c] ss:$8 sps:$4 sm:$0xff]   ;;  %vm5492_vm2 = vmor %vm78_vm0, %vm79_vm1 }
   0x7   :  { %527 = vmatpush1.bf16.msra.mxu0 %v5084_v3  ;;  %v101_v19 = vshll.u32 %v70_v14, 16  ;;  %v5099_v26 = vld [vmem:[%s7610_s1 + $0x138] ss:$8 sps:$4 sm:$0xff]   ;;  %v5100_v30 = vld [vmem:[%s7610_s1 + $0x14c] ss:$8 sps:$4 sm:$0xff]   ;;  %vm6071_vm7 = vmor %vm2077_vm5, %vm2078_vm6  ;;  %vm1011_vm8 = vcmask 1042432  }
   0x8   :  { %528 = vmatprep.subr.bf16.mxu0 %v5085_v4  ;;  %v84_v21 = vrot.slane %v82_v15, 4  ;;  %v87_v22 = vrot.slane %v85_v16, 5  ;;  %v93_v23 = vrot.slane %v91_v17, 5  ;;  %v97_v24 = vrot.slane %v95_v18, 4  ;;  %v5102_v34 = vld [vmem:[%s7610_s1 + $0x148] ss:$8 sps:$4 sm:$0xff]  }
   0x9   :  { %v103_v29 = vrot.slane %v101_v19, 5  ;;  %v5103_v36 = vld [vmem:[%s7610_s1 + $0x15c] ss:$8 sps:$4 sm:$0xff]   ;;  %v5105_v38 = vld [vmem:[%s7610_s1 + $0x158] ss:$8 sps:$4 sm:$0xff]   ;;  %v5555_v54 = vld [vmem:[%s7611_s0 + $0x30] sm:$0xff] }
   0xa   :  { %v88_v25 = vor.u32 %v87_v22, %v84_v21  ;;  %v98_v28 = vor.u32 %v97_v24, %v93_v23  ;;  %v5106_v39 = vld [vmem:[%s7610_s1 + $0x16c] ss:$8 sps:$4 sm:$0xff]   ;;  %v5525_v40 = vld [vmem:[%s7611_s0 + $0x18] sm:$0xff]  ;;  %v5530_v41 = vld [vmem:[%s7611_s0 + $0x20] sm:$0xff]  ;;  %v130_v60 = vshrl.u32 %v5555_v54, 16  ;;  %v133_v61 = vshll.u32 %v5555_v54, 16 }
   0xb   :  { %529 = vmatpush1.bf16.msra.mxu0 %v5087_v5  ;;  %v5108_v42 = vld [vmem:[%s7610_s1 + $0x168] ss:$8 sps:$4 sm:$0xff]   ;;  %v106_v43 = vshrl.u32 %v5525_v40, 16  ;;  %v109_v44 = vshll.u32 %v5525_v40, 16  ;;  %v5109_v45 = vld [vmem:[%s7610_s1 + $0x17c] ss:$8 sps:$4 sm:$0xff]  }
   0xc   :  { %530 = vmatprep.subr.bf16.mxu0 %v5088_v6  ;;  %v89_v31 = vrot.slane %v88_v25, 4  ;;  %v99_v32 = vrot.slane %v98_v28, 4  ;;  %v7630_v46 = vshll.u32 %v5530_v41, 16  ;;  %v7631_v47 = vshrl.u32 %v5530_v41, 16  ;;  %v5111_v48 = vld [vmem:[%s7610_s1 + $0x178] ss:$8 sps:$4 sm:$0xff]  }
   0xd   :  { %v108_v49 = vrot.slane %v106_v43, 4  ;;  %v111_v50 = vrot.slane %v109_v44, 5  ;;  %v5112_v51 = vld [vmem:[%s7610_s1 + $0x18c] ss:$8 sps:$4 sm:$0xff]   ;;  %v5563_v56 = vld [vmem:[%s7611_s0 + $0x38] sm:$0xff]  ;;  %vm1012_vm9 = vcmask 1046532  }
   0xe   :  { %v5501_v33 = vsel %vm5492_vm2, %v89_v31, %v93_v23  ;;  %v5508_v35 = vsel %vm5492_vm2, %v99_v32, %v103_v29  ;;  %v117_v52 = vrot.slane %v7630_v46, 5  ;;  %v121_v53 = vrot.slane %v7631_v47, 4  ;;  %v71_v55 = vld [vmem:[%s7611_s0 + $0x28] sm:$0x11]  ;;  %v5115_v62 = vld [vmem:[%s7610_s1 + $0x19c] ss:$8 sps:$4 sm:$0xff]   ;;  %vm6201_vm10 = vmor %vm1011_vm8, %vm1012_vm9 }
   0xf   :  { %531 = vmatpush1.bf16.msra.mxu0 %v5090_v7  ;;  %v4261_v37 = vcombine.high %v5501_v33, %v5508_v35  ;;  %v5114_v57 = vld [vmem:[%s7610_s1 + $0x188] ss:$8 sps:$4 sm:$0xff]   ;;  %v112_v59 = vor.u32 %v111_v50, %v108_v49  ;;  %v125_v0 = vshll.u32 %v71_v55, 16  ;;  %v7628_v1 = vshll.u32 %v5563_v56, 16  ;;  %v5117_v3 = vld [vmem:[%s7610_s1 + $0x198] ss:$8 sps:$4 sm:$0xff]  }
  0x10   :  { %532 = vmatprep.subr.bf16.mxu0 %v5091_v8  ;;  %v4259_v58 = vld [vmem:[%s7610_s1 + $0x1a8] sm:$0xff]  ;;  %v122_v63 = vor.u32 %v121_v53, %v117_v52  ;;  %v7629_v2 = vshrl.u32 %v5563_v56, 16  ;;  %v72_v7 = vld [vmem:[%s7611_s0 + $0x40] sm:$0x11]  ;;  %v132_v8 = vrot.slane %v130_v60, 4  ;;  %v5596_v19 = vld [vmem:[%s7611_s0 + $0x50] sm:$0xff]  ;;  %v4260_v32 = vcombine.low %v5501_v33, %v5508_v35 }
  0x11   :  { %4305 = vmatprep.mubr.msk.bf16.mxu0 %vm492_vm3, %v4261_v37  ;;  %v4302_v4 = vcombine.low %v4259_v58, %v4259_v58  ;;  %v4303_v5 = vcombine.high %v4259_v58, %v4259_v58  ;;  %v113_v6 = vrot.slane %v112_v59, 4  ;;  %v141_v14 = vrot.slane %v7628_v1, 5  ;;  %v5591_v16 = vld [vmem:[%s7611_s0 + $0x48] sm:$0xff]  ;;  %v6092_v1 = vld [vmem:[%s7611_s0 + $0x70] sm:$0x33] }
  0x12   :  { %v145_v15 = vrot.slane %v7629_v2, 4  ;;  %v149_v21 = vshll.u32 %v72_v7, 16  ;;  %v154_v24 = vshrl.u32 %v5591_v16, 16  ;;  %v157_v25 = vshll.u32 %v5591_v16, 16  ;;  %v5636_v49 = vld [vmem:[%s7611_s0 + $0x68] sm:$0xff] }
  0x13   :  { %533 = vmatpush1.bf16.msra.mxu0 %v5093_v9  ;;  %v135_v9 = vrot.slane %v133_v61, 5  ;;  %v118_v22 = vsel %vm5492_vm2, %v113_v6, %v117_v52  ;;  %v7627_v31 = vshrl.u32 %v5596_v19, 16  ;;  %v5128_v58 = vld [vmem:[%s7610_s1 + $0x24] ss:$8 sps:$4 sm:$0xff]   ;;  %v7624_v61 = vshll.u32 %v5636_v49, 16 }
  0x14   :  { %534 = vmatprep.subr.bf16.mxu0 %v5094_v10  ;;  %v123_v10 = vrot.slane %v122_v63, 4  ;;  %v146_v29 = vor.u32 %v145_v15, %v141_v14  ;;  %v151_v37 = vrot.slane %v149_v21, 5  ;;  %v156_v43 = vrot.slane %v154_v24, 4  ;;  %v5126_v63 = vld [vmem:[%s7610_s1 + $0x20] ss:$8 sps:$4 sm:$0xff]   ;;  %v5672_v15 = vld [vmem:[%s7611_s0 + $0x78] sm:$0xff] }
  0x15   :  { %v136_v23 = vor.u32 %v135_v9, %v132_v8  ;;  %v159_v44 = vrot.slane %v157_v25, 5  ;;  %v202_v25 = vshrl.u32 %v5672_v15, 16  ;;  %vm1472_vm11 = vsmask.f32 2304 }
  0x16   :  { %v147_v33 = vrot.slane %v146_v29, 4  ;;  %vm1473_vm12 = vsmask.f32 6416  ;;  %vm2949_vm14 = vcmask 1045504   ;;  %vm2718_vm15 = vcmask 949248  }
  0x17   :  { %535 = vmatpush1.bf16.msra.mxu0 %v5096_v11  ;;  %v127_v11 = vrot.slane %v125_v0, 5  ;;  %v160_v53 = vor.u32 %v159_v44, %v156_v43  ;;  %v5704_v44 = vld [vmem:[%s7611_s0 + $0x88] sm:$0x11]  ;;  %vm6435_vm13 = vmor %vm1472_vm11, %vm1473_vm12  ;;  %vm2850_vm0 = vcmask 1041409   ;;  %vm2852_vm1 = vcmask 1042434  }
  0x18   :  { %536 = vmatprep.subr.bf16.mxu0 %v5097_v20  ;;  %v519_v20 = vsel %vm517_vm4, %v4302_v4, 0  ;;  %v152_v59 = vsel %vm5492_vm2, %v147_v33, %v151_v37  ;;  %v5132_v37 = vld [vmem:[%s7610_s1 + $0x40] ss:$8 sps:$4 sm:$0xff]   ;;  %vm2864_vm6 = vcmask 1046534   ;;  %vm2945_vm8 = vcmask 228352  }
  0x19   :  { %v128_v28 = vsel %vm5492_vm2, %v123_v10, %v127_v11  ;;  %v161_v7 = vrot.slane %v160_v53, 4  ;;  %v189_v11 = vrot.slane %v7624_v61, 5  ;;  %vm5384_vm9 = vmmov 1  }
  0x1a   :  { %v4262_v0 = vcombine.low %v118_v22, %v128_v28  ;;  %vm5385_vm11 = vmmov 0  }
  0x1b   :  { %537 = vmatpush1.bf16.msra.mxu0 %v5099_v26  ;;  %v5122_v26 = vld [vmem:[%s7610_s1 + $0x4] ss:$8 sps:$4 sm:$0xff]  }
  0x1c   :  { %538 = vmatprep.subr.bf16.mxu0 %v5100_v30  ;;  %v7626_v30 = vshll.u32 %v5596_v19, 16 }
  0x1e   :  { %v165_v35 = vrot.slane %v7626_v30, 5 }
  0x1f   :  { %539 = vmatpush1.bf16.msra.mxu0 %v5102_v34  ;;  %v5120_v34 = vld [vmem:[%s7610_s1] ss:$8 sps:$4 sm:$0xff]  }
  0x20   :  { %540 = vmatprep.subr.bf16.mxu0 %v5103_v36  ;;  %v5125_v36 = vld [vmem:[%s7610_s1 + $0x14] ss:$8 sps:$4 sm:$0xff]  }
  0x23   :  { %541 = vmatpush1.bf16.msra.mxu0 %v5105_v38  ;;  %v4263_v38 = vcombine.high %v118_v22, %v128_v28  ;;  %v5129_v22 = vld [vmem:[%s7610_s1 + $0x30] ss:$8 sps:$4 sm:$0xff]   ;;  %v5134_v28 = vld [vmem:[%s7610_s1 + $0x44] ss:$8 sps:$4 sm:$0xff]  }
  0x24   :  { %542 = vmatprep.subr.bf16.mxu0 %v5106_v39  ;;  %v137_v39 = vrot.slane %v136_v23, 4  ;;  %v166_v23 = vsel %vm5492_vm2, %v161_v7, %v165_v35 }
  0x26   :  { %v142_v52 = vsel %vm5492_vm2, %v137_v39, %v141_v14  ;;  %v5137_v39 = vld [vmem:[%s7610_s1 + $0x54] ss:$8 sps:$4 sm:$0xff]  }
  0x27   :  { %543 = vmatpush1.bf16.msra.mxu0 %v5108_v42  ;;  %v5622_v42 = vld [vmem:[%s7611_s0 + $0x58] sm:$0x11]  ;;  %v4265_v6 = vcombine.high %v142_v52, %v152_v59 }
  0x28   :  { %544 = vmatprep.subr.bf16.mxu0 %v5109_v45  ;;  %v169_v45 = vrot.slane %v7627_v31, 4  ;;  %v173_v50 = vshll.u32 %v5622_v42, 16 }
  0x2a   :  { %v170_v60 = vor.u32 %v169_v45, %v165_v35  ;;  %v175_v4 = vrot.slane %v173_v50, 5  ;;  %v204_v45 = vrot.slane %v202_v25, 4 }
  0x2b   :  { %545 = vmatpush1.bf16.msra.mxu0 %v5111_v48  ;;  %v5631_v48 = vld [vmem:[%s7611_s0 + $0x60] sm:$0xff] }
  0x2c   :  { %546 = vmatprep.subr.bf16.mxu0 %v5112_v51  ;;  %v5123_v51 = vld [vmem:[%s7610_s1 + $0x10] ss:$8 sps:$4 sm:$0xff]   ;;  %v178_v55 = vshrl.u32 %v5631_v48, 16  ;;  %v171_v10 = vrot.slane %v170_v60, 4 }
  0x2e   :  { %v180_v8 = vrot.slane %v178_v55, 4  ;;  %v176_v29 = vsel %vm5492_vm2, %v171_v10, %v175_v4  ;;  %v5140_v4 = vld [vmem:[%s7610_s1 + $0x64] ss:$8 sps:$4 sm:$0xff]   ;;  %v5138_v10 = vld [vmem:[%s7610_s1 + $0x60] ss:$8 sps:$4 sm:$0xff]  }
  0x2f   :  { %547 = vmatpush1.bf16.msra.mxu0 %v5114_v57  ;;  %v181_v57 = vshll.u32 %v5631_v48, 16  ;;  %v4267_v33 = vcombine.high %v166_v23, %v176_v29 }
  0x30   :  { %548 = vmatprep.subr.bf16.mxu0 %v5115_v62  ;;  %v7625_v62 = vshrl.u32 %v5636_v49, 16 }
  0x31   :  { %v183_v9 = vrot.slane %v181_v57, 5  ;;  %v5718_v57 = vld [vmem:[%s7611_s0 + $0x98] sm:$0xff] }
  0x32   :  { %v193_v14 = vrot.slane %v7625_v62, 4  ;;  %v5194_v62 = vld [vmem:[%s7610_s1 + $0x224] ss:$8 sps:$4 sm:$0xff]  }
  0x33   :  { %549 = vmatpush1.bf16.msra.mxu0 %v5117_v3  ;;  %v5131_v3 = vld [vmem:[%s7610_s1 + $0x34] ss:$8 sps:$4 sm:$0xff]   ;;  %v184_v24 = vor.u32 %v183_v9, %v180_v8 }
  0x34   :  { %4304 = vmatprep.subr.msk.bf16.mxu0 %vm517_vm4, %v4303_v5  ;;  %v5663_v5 = vld [vmem:[%s7611_s0 + $0x70] sm:$0x11] }
  0x35   :  { %v197_v21 = vshll.u32 %v5663_v5, 16  ;;  %v185_v35 = vrot.slane %v184_v24, 4 }
  0x37   :  { %551 = vmatpush1.bf16.msra.mxu0 %v519_v20  ;;  %v5677_v20 = vld [vmem:[%s7611_s0 + $0x80] sm:$0xff]  ;;  %v199_v43 = vrot.slane %v197_v21, 5  ;;  %v5143_v21 = vld [vmem:[%s7610_s1 + $0x74] ss:$8 sps:$4 sm:$0xff]  }
  0x38   :  { %874 = vmatprep.subr.bf16.mxu0 %v5122_v26  ;;  %v205_v26 = vshll.u32 %v5672_v15, 16 }
  0x3a   :  { %557 = vmatmul.mubr.bf16.vlgmr.msra.gmra.mrb[0].mxu0 %v4260_v32  ;;  %v194_v32 = vor.u32 %v193_v14, %v189_v11  ;;  %v207_v50 = vrot.slane %v205_v26, 5  ;;  %v4266_v14 = vcombine.low %v166_v23, %v176_v29  ;;  %v5754_v23 = vld [vmem:[%s7611_s0 + $0xa8] sm:$0xff]  ;;  %v5759_v29 = vld [vmem:[%s7611_s0 + $0xb0] sm:$0xff] }
  0x3b   :  { %875 = vmatpush1.bf16.msra.mxu0 %v5120_v34  ;;  %4306 = vmatprep.mubr.msk.bf16.mxu0 %vm492_vm3, %v4263_v38  ;;  %v7622_v34 = vshll.u32 %v5677_v20, 16  ;;  %v4264_v38 = vcombine.low %v142_v52, %v152_v59  ;;  %v4328_v47 = vcombine.high %v5754_v23, %v5759_v29 }
  0x3c   :  { %876 = vmatprep.subr.bf16.mxu0 %v5125_v36  ;;  %v7623_v36 = vshrl.u32 %v5677_v20, 16  ;;  %v195_v52 = vrot.slane %v194_v32, 4  ;;  %v208_v8 = vor.u32 %v207_v50, %v204_v45  ;;  %v250_v50 = vshrl.u32 %v5754_v23, 16 }
  0x3d   :  { %v213_v53 = vrot.slane %v7622_v34, 5  ;;  %v6068_v34 = vld [vmem:[%s7611_s0 + $0x58] sm:$0x33] }
  0x3e   :  { %v217_v55 = vrot.slane %v7623_v36, 4  ;;  %v200_v7 = vsel %vm5492_vm2, %v195_v52, %v199_v43  ;;  %v209_v32 = vrot.slane %v208_v8, 4  ;;  %v253_v52 = vshll.u32 %v5754_v23, 16  ;;  %v5149_v8 = vld [vmem:[%s7610_s1 + $0x94] ss:$8 sps:$4 sm:$0xff]  }
  0x3f   :  { %877 = vmatpush1.bf16.msra.mxu0 %v5123_v51  ;;  %v5709_v51 = vld [vmem:[%s7611_s0 + $0x90] sm:$0xff]  ;;  %v2106_v61 = vrot.slane %v6068_v34, 6 }
  0x40   :  { %878 = vmatprep.subr.bf16.mxu0 %v5128_v58  ;;  %v5135_v58 = vld [vmem:[%s7610_s1 + $0x50] ss:$8 sps:$4 sm:$0xff]   ;;  %v226_v59 = vshrl.u32 %v5709_v51, 16  ;;  %v229_v60 = vshll.u32 %v5709_v51, 16  ;;  %v218_v9 = vor.u32 %v217_v55, %v213_v53  ;;  %v214_v55 = vsel %vm5492_vm2, %v209_v32, %v213_v53  ;;  %v5806_v32 = vld [vmem:[%s7610_s1 + $0x374] ss:$8 sps:$4 sm:$0xff]  }
  0x41   :  { %v5786_v53 = vld [vmem:[%s7611_s0 + $0xb8] sm:$0x11]  ;;  %v4325_v2 = vcombine.low %v5709_v51, %v5718_v57 }
  0x42   :  { %567 = vmatmul.mubr.bf16.gmra.mrb[4].mxu0 %v4262_v0  ;;  %v7620_v0 = vshll.u32 %v5718_v57, 16  ;;  %v231_v24 = vrot.slane %v229_v60, 5  ;;  %v7619_v60 = vshrl.u32 %v5759_v29, 16 }
  0x43   :  { %879 = vmatpush1.bf16.msra.mxu0 %v5126_v63  ;;  %4307 = vmatprep.mubr.msk.bf16.mxu0 %vm492_vm3, %v4265_v6  ;;  %v221_v63 = vshll.u32 %v5704_v44, 16  ;;  %v190_v6 = vsel %vm5492_vm2, %v185_v35, %v189_v11  ;;  %v228_v11 = vrot.slane %v226_v59, 4  ;;  %v5146_v35 = vld [vmem:[%s7610_s1 + $0x84] ss:$8 sps:$4 sm:$0xff]   ;;  %v7618_v59 = vshll.u32 %v5759_v29, 16 }
  0x44   :  { %880 = vmatprep.subr.bf16.mxu0 %v5131_v3  ;;  %v7621_v3 = vshrl.u32 %v5718_v57, 16  ;;  %v4269_v25 = vcombine.high %v190_v6, %v200_v7  ;;  %v237_v26 = vrot.slane %v7620_v0, 5 }
  0x45   :  { %v232_v43 = vor.u32 %v231_v24, %v228_v11  ;;  %v252_v11 = vrot.slane %v250_v50, 4  ;;  %v255_v24 = vrot.slane %v253_v52, 5  ;;  %v5824_v50 = vld [vmem:[%s7610_s1 + $0x370] ss:$8 sps:$4 sm:$0xff]   ;;  %v5150_v52 = vld [vmem:[%s7610_s1 + $0xa0] ss:$8 sps:$4 sm:$0xff]  }
  0x47   :  { %881 = vmatpush1.bf16.msra.mxu0 %v5129_v22  ;;  %v5745_v22 = vld [vmem:[%s7611_s0 + $0xa0] sm:$0x11] }
  0x48   :  { %882 = vmatprep.subr.bf16.mxu0 %v5134_v28  ;;  %v241_v28 = vrot.slane %v7621_v3, 4  ;;  %v4319_v3 = vcombine.low %v5591_v16, %v5596_v19 }
  0x4a   :  { %577 = vmatmul.mubr.bf16.gmra.mrb[8].mxu0 %v4264_v38  ;;  %v223_v38 = vrot.slane %v221_v63, 5  ;;  %v242_v45 = vor.u32 %v241_v28, %v237_v26  ;;  %v5144_v63 = vld [vmem:[%s7610_s1 + $0x80] ss:$8 sps:$4 sm:$0xff]  }
  0x4b   :  { %883 = vmatpush1.bf16.msra.mxu0 %v5132_v37  ;;  %4308 = vmatprep.mubr.msk.bf16.mxu0 %vm492_vm3, %v4267_v33  ;;  %v219_v37 = vrot.slane %v218_v9, 4  ;;  %v245_v33 = vshll.u32 %v5745_v22, 16  ;;  %v233_v9 = vrot.slane %v232_v43, 4  ;;  %v5800_v28 = vld [vmem:[%s7610_s1 + $0x360] ss:$8 sps:$4 sm:$0xff]   ;;  %v269_v43 = vshll.u32 %v5786_v53, 16 }
  0x4c   :  { %884 = vmatprep.subr.bf16.mxu0 %v5137_v39  ;;  %v5141_v39 = vld [vmem:[%s7610_s1 + $0x70] ss:$8 sps:$4 sm:$0xff]  }
  0x4f   :  { %885 = vmatpush1.bf16.msra.mxu0 %v5135_v58  ;;  %v224_v58 = vsel %vm5492_vm2, %v219_v37, %v223_v38  ;;  %v5147_v37 = vld [vmem:[%s7610_s1 + $0x90] ss:$8 sps:$4 sm:$0xff]   ;;  %v5152_v38 = vld [vmem:[%s7610_s1 + $0xa4] ss:$8 sps:$4 sm:$0xff]  }
  0x50   :  { %886 = vmatprep.subr.bf16.mxu0 %v5140_v4  ;;  %v4268_v4 = vcombine.low %v190_v6, %v200_v7  ;;  %v261_v6 = vrot.slane %v7618_v59, 5  ;;  %v265_v7 = vrot.slane %v7619_v60, 4  ;;  %v4568_v59 = vld [vmem:[%s7610_s1 + $0x430] sm:$0xff]  ;;  %v2056_v60 = vld [vmem:[%s7611_s0 + $0x48] sm:$0xcc] }
  0x51   :  { %v4537_v0 = vrot.slane %v2056_v60, 10 }
  0x52   :  { %587 = vmatmul.mubr.bf16.gmra.mrb[12].mxu0 %v4266_v14  ;;  %v4271_v14 = vcombine.high %v214_v55, %v224_v58 }
  0x53   :  { %887 = vmatpush1.bf16.msra.mxu0 %v5138_v10  ;;  %4309 = vmatprep.mubr.msk.bf16.mxu0 %vm492_vm3, %v4269_v25  ;;  %v247_v10 = vrot.slane %v245_v33, 5  ;;  %v5795_v25 = vld [vmem:[%s7610_s1 + $0x364] ss:$8 sps:$4 sm:$0xff]  }
  0x54   :  { %888 = vmatprep.subr.bf16.mxu0 %v5143_v21  ;;  %v243_v21 = vrot.slane %v242_v45, 4  ;;  %4837 = vmatprep.subr.bf16.mxu1 %v5795_v25  ;;  %v266_v45 = vor.u32 %v265_v7, %v261_v6  ;;  %v5158_v7 = vld [vmem:[%s7610_s1 + $0xc4] ss:$8 sps:$4 sm:$0xff]  }
  0x55   :  { %4851 = vmatpush1.bf16.msra.mxu1 %v5800_v28 }
  0x56   :  { %v248_v33 = vsel %vm5492_vm2, %v243_v21, %v247_v10  ;;  %4838 = vmatprep.subr.bf16.mxu1 %v5806_v32  ;;  %v267_v10 = vrot.slane %v266_v45, 4  ;;  %v5153_v21 = vld [vmem:[%s7610_s1 + $0xb0] ss:$8 sps:$4 sm:$0xff]  }
  0x57   :  { %889 = vmatpush1.bf16.msra.mxu0 %v5141_v39  ;;  %v238_v39 = vsel %vm5492_vm2, %v233_v9, %v237_v26  ;;  %v4270_v26 = vcombine.low %v214_v55, %v224_v58  ;;  %v5842_v55 = vld [vmem:[%s7610_s1 + $0x380] ss:$8 sps:$4 sm:$0xff]   ;;  %v5848_v58 = vld [vmem:[%s7610_s1 + $0x394] ss:$8 sps:$4 sm:$0xff]  }
  0x58   :  { %890 = vmatprep.subr.bf16.mxu0 %v5146_v35  ;;  %v256_v35 = vor.u32 %v255_v24, %v252_v11 }
  0x59   :  { %4852 = vmatpush1.bf16.msra.mxu1 %v5824_v50 }
  0x5a   :  { %597 = vmatmul.mubr.bf16.gmra.mrb[16].mxu0 %v4268_v4  ;;  %v4273_v4 = vcombine.high %v238_v39, %v248_v33  ;;  %v257_v9 = vrot.slane %v256_v35, 4 }
  0x5b   :  { %891 = vmatpush1.bf16.msra.mxu0 %v5144_v63  ;;  %4310 = vmatprep.mubr.msk.bf16.mxu0 %vm492_vm3, %v4271_v14  ;;  %v5155_v63 = vld [vmem:[%s7610_s1 + $0xb4] ss:$8 sps:$4 sm:$0xff]   ;;  %v5837_v14 = vld [vmem:[%s7610_s1 + $0x384] ss:$8 sps:$4 sm:$0xff]  }
  0x5c   :  { %892 = vmatprep.subr.bf16.mxu0 %v5149_v8  ;;  %v271_v8 = vrot.slane %v269_v43, 5  ;;  %4839 = vmatprep.subr.bf16.mxu1 %v5837_v14  ;;  %v262_v11 = vsel %vm5492_vm2, %v257_v9, %v261_v6  ;;  %v4272_v6 = vcombine.low %v238_v39, %v248_v33  ;;  %v5156_v43 = vld [vmem:[%s7610_s1 + $0xc0] ss:$8 sps:$4 sm:$0xff]   ;;  %v5889_v33 = vld [vmem:[%s7610_s1 + $0x3b4] ss:$8 sps:$4 sm:$0xff]   ;;  %v1485_v9 = vrot.slane %v91_v17, 6 }
  0x5d   :  { %4853 = vmatpush1.bf16.msra.mxu1 %v5842_v55  ;;  %v5883_v39 = vld [vmem:[%s7610_s1 + $0x3a0] ss:$8 sps:$4 sm:$0xff]   ;;  %v5925_v17 = vld [vmem:[%s7610_s1 + $0x3d4] ss:$8 sps:$4 sm:$0xff]  }
  0x5e   :  { %v272_v24 = vsel %vm5492_vm2, %v267_v10, %v271_v8  ;;  %4840 = vmatprep.subr.bf16.mxu1 %v5848_v58  ;;  %v1484_v8 = vrot.slane %v95_v18, 5  ;;  %v5919_v18 = vld [vmem:[%s7610_s1 + $0x3c0] ss:$8 sps:$4 sm:$0xff]   ;;  %vm2855_vm2 = vcmask 1043459  }
  0x5f   :  { %893 = vmatpush1.bf16.msra.mxu0 %v5147_v37  ;;  %v5865_v37 = vld [vmem:[%s7610_s1 + $0x390] ss:$8 sps:$4 sm:$0xff]   ;;  %v4275_v27 = vcombine.high %v262_v11, %v272_v24  ;;  %v4274_v10 = vcombine.low %v262_v11, %v272_v24 }
  0x60   :  { %894 = vmatprep.subr.bf16.mxu0 %v5152_v38  ;;  %v69_v38 = vld [vmem:[%s7610_s1 + $0xd0] sm:$0xff]  ;;  %v5927_v11 = vor.u32 %v1485_v9, %v1484_v8  ;;  %v4315_v8 = vcombine.low %v5525_v40, %v5530_v41 }
  0x61   :  { %v4356_v35 = vcombine.high %v69_v38, %v69_v38  ;;  %v4355_v45 = vcombine.low %v69_v38, %v69_v38  ;;  %4854 = vmatpush1.bf16.msra.mxu1 %v5865_v37  ;;  %v5934_v24 = vld [vmem:[%s7610_s1 + $0x3d0] ss:$8 sps:$4 sm:$0xff]   ;;  %v4313_v38 = vcombine.low %v5466_v12, %v5471_v13 }
  0x62   :  { %607 = vmatmul.mubr.bf16.gmra.mrb[20].mxu0 %v4270_v26  ;;  %v5171_v9 = vld [vmem:[%s7610_s1 + $0x1d0] ss:$8 sps:$4 sm:$0xff]  }
  0x63   :  { %4311 = vmatprep.mubr.msk.bf16.mxu0 %vm492_vm3, %v4273_v4  ;;  %895 = vmatpush1.bf16.msra.mxu0 %v5150_v52  ;;  %v5878_v52 = vld [vmem:[%s7610_s1 + $0x3a4] ss:$8 sps:$4 sm:$0xff]   ;;  %v869_v26 = vsel %vm517_vm4, %v4355_v45, 0  ;;  %v5901_v4 = vld [vmem:[%s7610_s1 + $0x3b0] ss:$8 sps:$4 sm:$0xff]  }
  0x64   :  { %896 = vmatprep.subr.bf16.mxu0 %v5155_v63  ;;  %4841 = vmatprep.subr.bf16.mxu1 %v5878_v52  ;;  %v5165_v63 = vld [vmem:[%s7610_s1 + $0x1b4] ss:$8 sps:$4 sm:$0xff]  }
  0x65   :  { %4855 = vmatpush1.bf16.msra.mxu1 %v5883_v39  ;;  %v5966_v45 = vld [vmem:[%s7610_s1 + $0x3f4] ss:$8 sps:$4 sm:$0xff]  }
  0x66   :  { %4842 = vmatprep.subr.bf16.mxu1 %v5889_v33 }
  0x67   :  { %897 = vmatpush1.bf16.msra.mxu0 %v5153_v21  ;;  %v4314_v21 = vcombine.high %v5466_v12, %v5471_v13  ;;  %v5956_v12 = vld [vmem:[%s7610_s1 + $0x3e0] ss:$8 sps:$4 sm:$0xff]  }
  0x68   :  { %898 = vmatprep.subr.bf16.mxu0 %v5158_v7  ;;  %v5914_v7 = vld [vmem:[%s7610_s1 + $0x3c4] ss:$8 sps:$4 sm:$0xff]   ;;  %v5166_v13 = vld [vmem:[%s7610_s1 + $0x1c0] ss:$8 sps:$4 sm:$0xff]  }
  0x69   :  { %4856 = vmatpush1.bf16.msra.mxu1 %v5901_v4 }
  0x6a   :  { %617 = vmatmul.mubr.bf16.gmra.mrb[24].mxu0 %v4272_v6  ;;  %4843 = vmatprep.subr.bf16.mxu1 %v5914_v7  ;;  %v5163_v6 = vld [vmem:[%s7610_s1 + $0x1b0] ss:$8 sps:$4 sm:$0xff]  }
  0x6b   :  { %4312 = vmatprep.mubr.msk.bf16.mxu0 %vm492_vm3, %v4275_v27  ;;  %899 = vmatpush1.bf16.msra.mxu0 %v5156_v43  ;;  %v4316_v27 = vcombine.high %v5525_v40, %v5530_v41  ;;  %v5168_v43 = vld [vmem:[%s7610_s1 + $0x1c4] ss:$8 sps:$4 sm:$0xff]   ;;  %v5997_v40 = vld [vmem:[%s7610_s1 + $0x400] ss:$8 sps:$4 sm:$0xff]  }
  0x6c   :  { %4357 = vmatprep.subr.msk.bf16.mxu0 %vm517_vm4, %v4356_v35  ;;  %v5951_v35 = vld [vmem:[%s7610_s1 + $0x3e4] ss:$8 sps:$4 sm:$0xff]   ;;  %7653 = vst [vmem:[#allocation3_spill] sm:$0xff] %v5997_v40 }
  0x6d   :  { %4857 = vmatpush1.bf16.msra.mxu1 %v5919_v18 }
  0x6e   :  { %4844 = vmatprep.subr.bf16.mxu1 %v5925_v17 }
  0x6f   :  { %901 = vmatpush1.bf16.msra.mxu0 %v869_v26  ;;  %v5173_v26 = vld [vmem:[%s7610_s1 + $0x1d4] ss:$8 sps:$4 sm:$0xff]  }
  0x70   :  { %1319 = vmatprep.subr.bf16.mxu0 %v5165_v63  ;;  %v5975_v63 = vld [vmem:[%s7610_s1 + $0x3f0] ss:$8 sps:$4 sm:$0xff]  }
  0x71   :  { %4858 = vmatpush1.bf16.msra.mxu1 %v5934_v24 }
  0x72   :  { %627 = vmatmul.mubr.bf16.gmra.mrb[28].mxu0 %v4274_v10  ;;  %4845 = vmatprep.subr.bf16.mxu1 %v5951_v35  ;;  %v4318_v10 = vcombine.high %v5555_v54, %v5563_v56 }
  0x73   :  { %4358 = vmatprep.mubr.msk.bf16.mxu0 %vm492_vm3, %v4314_v21  ;;  %v5176_v21 = vld [vmem:[%s7610_s1 + $0x1e4] ss:$8 sps:$4 sm:$0xff]  }
  0x75   :  { %4859 = vmatpush1.bf16.msra.mxu1 %v5956_v12 }
  0x76   :  { %4846 = vmatprep.subr.bf16.mxu1 %v5966_v45 }
  0x79   :  { %4860 = vmatpush1.bf16.msra.mxu1 %v5975_v63 }
  0x7a   :  { %907 = vmatmul.mubr.bf16.vlgmr.msra.gmra.mrb[0].mxu0 %v4313_v38  ;;  %v5992_v38 = vld [vmem:[%s7610_s1 + $0x404] ss:$8 sps:$4 sm:$0xff]  }
  0x7b   :  { %1320 = vmatpush1.bf16.msra.mxu0 %v5163_v6  ;;  %4359 = vmatprep.mubr.msk.bf16.mxu0 %vm492_vm3, %v4316_v27  ;;  %7652 = vst [vmem:[#allocation2_spill] sm:$0xff] %v5992_v38  ;;  %v5174_v6 = vld [vmem:[%s7610_s1 + $0x1e0] ss:$8 sps:$4 sm:$0xff]   ;;  %v6007_v27 = vld [vmem:[%s7610_s1 + $0x414] ss:$8 sps:$4 sm:$0xff]  }
  0x7c   :  { %1321 = vmatprep.subr.bf16.mxu0 %v5168_v43  ;;  %4847 = vmatprep.subr.bf16.mxu1 %v5992_v38  ;;  %7654 = vst [vmem:[#allocation4_spill] sm:$0xff] %v6007_v27  ;;  %v5181_v43 = vld [vmem:[%s7610_s1 + $0x1f4] ss:$8 sps:$4 sm:$0xff]  }
  0x7d   :  { %4861 = vmatpush1.bf16.msra.mxu1 %v5997_v40 }
  0x7e   :  { %4848 = vmatprep.subr.bf16.mxu1 %v6007_v27 }
  0x7f   :  { %1322 = vmatpush1.bf16.msra.mxu0 %v5166_v13  ;;  %v6016_v13 = vld [vmem:[%s7610_s1 + $0x410] ss:$8 sps:$4 sm:$0xff]  }
  0x80   :  { %1323 = vmatprep.subr.bf16.mxu0 %v5173_v26  ;;  %7655 = vst [vmem:[#allocation5_spill] sm:$0xff] %v6016_v13  ;;  %v4317_v26 = vcombine.low %v5555_v54, %v5563_v56  ;;  %v6038_v54 = vld [vmem:[%s7610_s1 + $0x420] ss:$8 sps:$4 sm:$0xff]  }
  0x81   :  { %4862 = vmatpush1.bf16.msra.mxu1 %v6016_v13  ;;  %7657 = vst [vmem:[#allocation7_spill] sm:$0xff] %v6038_v54 }
  0x82   :  { %917 = vmatmul.mubr.bf16.gmra.mrb[4].mxu0 %v4315_v8  ;;  %v5179_v8 = vld [vmem:[%s7610_s1 + $0x1f0] ss:$8 sps:$4 sm:$0xff]  }
  0x83   :  { %1324 = vmatpush1.bf16.msra.mxu0 %v5171_v9  ;;  %4360 = vmatprep.mubr.msk.bf16.mxu0 %vm492_vm3, %v4318_v10  ;;  %v4320_v9 = vcombine.high %v5591_v16, %v5596_v19  ;;  %v5185_v10 = vld [vmem:[%s7610_s1 + $0x204] ss:$8 sps:$4 sm:$0xff]   ;;  %v5187_v16 = vld [vmem:[%s7610_s1 + $0x210] ss:$8 sps:$4 sm:$0xff]  }
  0x84   :  { %1325 = vmatprep.subr.bf16.mxu0 %v5176_v21  ;;  %v6033_v21 = vld [vmem:[%s7610_s1 + $0x424] ss:$8 sps:$4 sm:$0xff]  }
  0x85   :  { %7656 = vst [vmem:[#allocation6_spill] sm:$0xff] %v6033_v21  ;;  %4849 = vmatprep.subr.bf16.mxu1 %v6033_v21  ;;  %v6209_v21 = vld [vmem:[%s7611_s0 + $0xb8] sm:$0x33] }
  0x86   :  { %4863 = vmatpush1.bf16.msra.mxu1 %v6038_v54 }
  0x87   :  { %1326 = vmatpush1.bf16.msra.mxu0 %v5174_v6  ;;  %v2103_v6 = vrot.slane %v5596_v19, 6 }
  0x88   :  { %1327 = vmatprep.subr.bf16.mxu0 %v5181_v43  ;;  %v5183_v43 = vld [vmem:[%s7610_s1 + $0x200] ss:$8 sps:$4 sm:$0xff]  }
  0x89   :  { %v2105_v60 = vrot.slane %v2103_v6, 4  ;;  %v2104_v36 = vsel %vm6071_vm7, %v4537_v0, %v2103_v6  ;;  %v5192_v0 = vld [vmem:[%s7610_s1 + $0x220] ss:$8 sps:$4 sm:$0xff]  }
  0x8a   :  { %927 = vmatmul.mubr.bf16.gmra.mrb[8].mxu0 %v4317_v26  ;;  %v5189_v26 = vld [vmem:[%s7610_s1 + $0x214] ss:$8 sps:$4 sm:$0xff]   ;;  %v2057_v6 = vld [vmem:[%s7611_s0 + $0x60] sm:$0xcc] }
  0x8b   :  { %1328 = vmatpush1.bf16.msra.mxu0 %v5179_v8  ;;  %4361 = vmatprep.mubr.msk.bf16.mxu0 %vm492_vm3, %v4320_v9  ;;  %v6056_v8 = vcombine.high %v4568_v59, %v4568_v59  ;;  %v4611_v9 = vcombine.low %v4568_v59, %v4568_v59  ;;  %v7660_v59 = vmov 0 }
  0x8c   :  { %1329 = vmatprep.subr.bf16.mxu0 %v5185_v10  ;;  %v7661_v59 = vsel %vm6071_vm7, 4294967295, %v7660_v59 }
  0x8d   :  { %7658 = vst [vmem:[#allocation8_spill] sm:$0xff] %v6056_v8  ;;  %4850 = vmatprep.subr.msk.bf16.mxu1 %vm517_vm4, %v6056_v8  ;;  %v6063_v10 = vsel %vm517_vm4, %v4611_v9, 0  ;;  %7662 = vst [vmem:[#allocation10_spill] sm:$0xff] %v7661_v59  ;;  %v4322_v9 = vcombine.high %v5631_v48, %v5636_v49 }
  0x8e   :  { %7659 = vst [vmem:[#allocation9_spill] sm:$0xff] %v6063_v10  ;;  %4864 = vmatpush1.bf16.msra.mxu1 %v6063_v10 }
  0x8f   :  { %1330 = vmatpush1.bf16.msra.mxu0 %v5183_v43  ;;  %v2107_v43 = vsel %vm6071_vm7, %v2105_v60, %v2106_v61  ;;  %v2110_v61 = vrot.slane %v5636_v49, 6 }
  0x90   :  { %1331 = vmatprep.subr.bf16.mxu0 %v5189_v26  ;;  %v4575_v30 = vcombine.low %v2104_v36, %v2107_v43  ;;  %v4576_v31 = vcombine.high %v2104_v36, %v2107_v43  ;;  %v2113_v36 = vrot.slane %v6092_v1, 6  ;;  %v4538_v26 = vrot.slane %v2057_v6, 10 }
  0x91   :  { %v2112_v60 = vrot.slane %v2110_v61, 4  ;;  %v4324_v43 = vcombine.high %v5672_v15, %v5677_v20 }
  0x92   :  { %937 = vmatmul.mubr.bf16.gmra.mrb[12].mxu0 %v4319_v3  ;;  %v5197_v3 = vld [vmem:[%s7610_s1 + $0x234] ss:$8 sps:$4 sm:$0xff]   ;;  %4617 = vmatprep.mubr.msk.bf16.mxu1 %vm492_vm3, %v4576_v31 }
  0x93   :  { %1332 = vmatpush1.bf16.msra.mxu0 %v5187_v16  ;;  %4362 = vmatprep.mubr.msk.bf16.mxu0 %vm492_vm3, %v4322_v9  ;;  %v4321_v16 = vcombine.low %v5631_v48, %v5636_v49  ;;  %v2111_v9 = vsel %vm6071_vm7, %v4538_v26, %v2110_v61  ;;  %v2114_v31 = vsel %vm6071_vm7, %v2112_v60, %v2113_v36  ;;  %v5200_v61 = vld [vmem:[%s7610_s1 + $0x240] ss:$8 sps:$4 sm:$0xff]   ;;  %v2058_v36 = vld [vmem:[%s7611_s0 + $0x78] sm:$0xcc] }
  0x94   :  { %1333 = vmatprep.subr.bf16.mxu0 %v5194_v62  ;;  %2448 = vmatmul.mubr.bf16.vlgmr.msra.gmra.mrb[0].mxu1 %v4575_v30  ;;  %v5195_v62 = vld [vmem:[%s7610_s1 + $0x230] ss:$8 sps:$4 sm:$0xff]   ;;  %v5202_v30 = vld [vmem:[%s7610_s1 + $0x244] ss:$8 sps:$4 sm:$0xff]   ;;  %v4578_v48 = vcombine.high %v2111_v9, %v2114_v31  ;;  %v4577_v6 = vcombine.low %v2111_v9, %v2114_v31  ;;  %v5205_v60 = vld [vmem:[%s7610_s1 + $0x254] ss:$8 sps:$4 sm:$0xff]  }
  0x95   :  { %v5203_v31 = vld [vmem:[%s7610_s1 + $0x250] ss:$8 sps:$4 sm:$0xff]  }
  0x96   :  { %4618 = vmatprep.mubr.msk.bf16.mxu1 %vm492_vm3, %v4578_v48 }
  0x97   :  { %1334 = vmatpush1.bf16.msra.mxu0 %v5192_v0  ;;  %v6125_v0 = vld [vmem:[%s7611_s0 + $0x88] sm:$0x33] }
  0x98   :  { %1335 = vmatprep.subr.bf16.mxu0 %v5197_v3  ;;  %v2117_v3 = vrot.slane %v5677_v20, 6  ;;  %v2120_v26 = vrot.slane %v6125_v0, 6 }
  0x9a   :  { %947 = vmatmul.mubr.bf16.gmra.mrb[16].mxu0 %v4321_v16  ;;  %v4539_v16 = vrot.slane %v2058_v36, 10  ;;  %v2119_v9 = vrot.slane %v2117_v3, 4 }
  0x9b   :  { %1336 = vmatpush1.bf16.msra.mxu0 %v5195_v62  ;;  %4363 = vmatprep.mubr.msk.bf16.mxu0 %vm492_vm3, %v4324_v43  ;;  %v4323_v62 = vcombine.low %v5672_v15, %v5677_v20 }
  0x9c   :  { %1337 = vmatprep.subr.bf16.mxu0 %v5202_v30  ;;  %2458 = vmatmul.mubr.bf16.gmra.mrb[4].mxu1 %v4577_v6  ;;  %v2118_v43 = vsel %vm6071_vm7, %v4539_v16, %v2117_v3  ;;  %v4326_v30 = vcombine.high %v5709_v51, %v5718_v57  ;;  %v2121_v48 = vsel %vm6071_vm7, %v2119_v9, %v2120_v26  ;;  %v5210_v6 = vld [vmem:[%s7610_s1 + $0x264] ss:$8 sps:$4 sm:$0xff]   ;;  %v2124_v3 = vrot.slane %v5718_v57, 6  ;;  %v5208_v26 = vld [vmem:[%s7610_s1 + $0x260] ss:$8 sps:$4 sm:$0xff]  }
  0x9d   :  { %v4580_v15 = vcombine.high %v2118_v43, %v2121_v48  ;;  %v4579_v36 = vcombine.low %v2118_v43, %v2121_v48  ;;  %v2059_v9 = vld [vmem:[%s7611_s0 + $0x90] sm:$0xcc]  ;;  %v6183_v48 = vld [vmem:[%s7611_s0] sm:$0xee] }
  0x9e   :  { %v5214_v43 = vld [vmem:[%s7610_s1 + $0x274] ss:$8 sps:$4 sm:$0xff]  }
  0x9f   :  { %1338 = vmatpush1.bf16.msra.mxu0 %v5200_v61  ;;  %4619 = vmatprep.mubr.msk.bf16.mxu1 %vm492_vm3, %v4580_v15  ;;  %v6157_v61 = vld [vmem:[%s7611_s0 + $0xa0] sm:$0x33]  ;;  %v2126_v15 = vrot.slane %v2124_v3, 4 }
  0xa0   :  { %1339 = vmatprep.subr.bf16.mxu0 %v5205_v60  ;;  %v6167_v60 = vld [vmem:[%s7611_s0 + $0x8] sm:$0xff] }
  0xa1   :  { %7663 = vst [vmem:[#allocation11_spill] sm:$0xff] %v6167_v60  ;;  %v1016_v16 = vrot.slane %v6167_v60, 5 }
  0xa2   :  { %957 = vmatmul.mubr.bf16.gmra.mrb[20].mxu0 %v4323_v62  ;;  %v2127_v62 = vrot.slane %v6157_v61, 6 }
  0xa3   :  { %4364 = vmatprep.mubr.msk.bf16.mxu0 %vm492_vm3, %v4326_v30  ;;  %1340 = vmatpush1.bf16.msra.mxu0 %v5203_v31  ;;  %v4540_v31 = vrot.slane %v2059_v9, 10  ;;  %v4400_v30 = vld [vmem:[%s7610_s1 + $0x280] sm:$0xff]  ;;  %v5375_v9 = vld [vmem:[%s7611_s0 + $0x10] sm:$0x11]  ;;  %v1018_v10 = vrot.slane %v1016_v16, 4 }
  0xa4   :  { %1341 = vmatprep.subr.bf16.mxu0 %v5210_v6  ;;  %2468 = vmatmul.mubr.bf16.gmra.mrb[8].mxu1 %v4579_v36  ;;  %v1019_v46 = vrot.slane %v5375_v9, 5  ;;  %v5212_v36 = vld [vmem:[%s7610_s1 + $0x270] ss:$8 sps:$4 sm:$0xff]   ;;  %v2128_v51 = vsel %vm6071_vm7, %v2126_v15, %v2127_v62  ;;  %v4444_v8 = vcombine.high %v4400_v30, %v4400_v30  ;;  %v2131_v62 = vrot.slane %v5759_v29, 6 }
  0xa5   :  { %v2125_v6 = vsel %vm6071_vm7, %v4540_v31, %v2124_v3  ;;  %v4443_v3 = vcombine.low %v4400_v30, %v4400_v30  ;;  %v4366_v31 = vrot.slane %v6183_v48, 9 }
  0xa6   :  { %v4582_v54 = vcombine.high %v2125_v6, %v2128_v51  ;;  %v4581_v9 = vcombine.low %v2125_v6, %v2128_v51  ;;  %v1020_v6 = vsel %vm6201_vm10, %v1018_v10, %v1019_v46 }
  0xa7   :  { %1342 = vmatpush1.bf16.msra.mxu0 %v5208_v26  ;;  %v1314_v15 = vsel %vm517_vm4, %v4443_v3, 0  ;;  %v4327_v3 = vcombine.low %v5754_v23, %v5759_v29  ;;  %v5274_v26 = vld [vmem:[%s7610_s1 + $0x34c] ss:$8 sps:$4 sm:$0xff]  }
  0xa8   :  { %1343 = vmatprep.subr.bf16.mxu0 %v5214_v43  ;;  %4620 = vmatprep.mubr.msk.bf16.mxu1 %vm492_vm3, %v4582_v54  ;;  %v6216_v43 = vld [vmem:[%s7611_s0 + $0x20] sm:$0xff]  ;;  %v2134_v54 = vrot.slane %v6209_v21, 6 }
  0xa9   :  { %7666 = vst [vmem:[#allocation12_spill] sm:$0xff] %v6216_v43  ;;  %v1023_v30 = vrot.slane %v6216_v43, 5  ;;  %v6235_v43 = vld [vmem:[%s7611_s0 + $0x18] sm:$0xee] }
  0xaa   :  { %967 = vmatmul.mubr.bf16.gmra.mrb[24].mxu0 %v4325_v2  ;;  %v2060_v2 = vld [vmem:[%s7611_s0 + $0xa8] sm:$0xcc]  ;;  %v1502_v40 = vshll.u32 %v6235_v43, 16 }
  0xab   :  { %4365 = vmatprep.mubr.msk.bf16.mxu0 %vm492_vm3, %v4328_v47  ;;  %1344 = vmatpush1.bf16.msra.mxu0 %v5212_v36  ;;  %v1017_v47 = vsel %vm6201_vm10, %v4366_v31, %v1016_v16  ;;  %v5220_v36 = vld [vmem:[%s7610_s1 + $0x28c] ss:$8 sps:$4 sm:$0xff]   ;;  %v4541_v51 = vrot.slane %v2060_v2, 10  ;;  %v4367_v31 = vrot.slane %v6235_v43, 9  ;;  %v1025_v2 = vrot.slane %v1023_v30, 4 }
  0xac   :  { %4445 = vmatprep.subr.msk.bf16.mxu0 %vm517_vm4, %v4444_v8  ;;  %2478 = vmatmul.mubr.bf16.gmra.mrb[12].mxu1 %v4581_v9  ;;  %v2133_v8 = vrot.slane %v2131_v62, 4  ;;  %v4402_v46 = vcombine.high %v1017_v47, %v1020_v6  ;;  %v5377_v9 = vld [vmem:[%s7611_s0 + $0x28] sm:$0x11] }
  0xad   :  { %v2132_v16 = vsel %vm6071_vm7, %v4541_v51, %v2131_v62  ;;  %v1026_v13 = vrot.slane %v5377_v9, 5  ;;  %v1024_v23 = vsel %vm6201_vm10, %v4367_v31, %v1023_v30  ;;  %v5218_v30 = vld [vmem:[%s7610_s1 + $0x288] ss:$8 sps:$4 sm:$0xff]  }
  0xae   :  { %v2135_v10 = vsel %vm6071_vm7, %v2133_v8, %v2134_v54  ;;  %v6256_v54 = vld [vmem:[%s7611_s0 + $0x38] sm:$0xff]  ;;  %v5380_v31 = vld [vmem:[%s7611_s0 + $0x50] sm:$0xff]  ;;  %v6291_v9 = vld [vmem:[%s7611_s0 + $0x48] sm:$0xee] }
  0xaf   :  { %1346 = vmatpush1.bf16.msra.mxu0 %v1314_v15  ;;  %v4584_v60 = vcombine.high %v2132_v16, %v2135_v10  ;;  %v4583_v27 = vcombine.low %v2132_v16, %v2135_v10  ;;  %v1027_v62 = vsel %vm6201_vm10, %v1025_v2, %v1026_v13  ;;  %7667 = vst [vmem:[#allocation13_spill] sm:$0xff] %v6256_v54  ;;  %v1030_v15 = vrot.slane %v6256_v54, 5  ;;  %v5223_v13 = vld [vmem:[%s7610_s1 + $0x29c] ss:$8 sps:$4 sm:$0xff]  }
  0xb0   :  { %1908 = vmatprep.subr.bf16.mxu0 %v5220_v36  ;;  %v6262_v36 = vld [vmem:[%s7611_s0 + $0x30] sm:$0xee]  ;;  %v4404_v51 = vcombine.high %v1024_v23, %v1027_v62  ;;  %v5379_v16 = vld [vmem:[%s7611_s0 + $0x40] sm:$0x11]  ;;  %v1037_v2 = vrot.slane %v5380_v31, 5 }
  0xb1   :  { %4621 = vmatprep.mubr.msk.bf16.mxu1 %vm492_vm3, %v4584_v60  ;;  %v4401_v60 = vcombine.low %v1017_v47, %v1020_v6  ;;  %v4368_v8 = vrot.slane %v6262_v36, 9  ;;  %v5226_v47 = vld [vmem:[%s7610_s1 + $0x2ac] ss:$8 sps:$4 sm:$0xff]   ;;  %v5230_v31 = vld [vmem:[%s7610_s1 + $0x2c8] ss:$8 sps:$4 sm:$0xff]  }
  0xb2   :  { %977 = vmatmul.mubr.bf16.gmra.mrb[28].mxu0 %v4327_v3  ;;  %v1032_v3 = vrot.slane %v1030_v15, 4 }
  0xb3   :  { %4446 = vmatprep.mubr.msk.bf16.mxu0 %vm492_vm3, %v4402_v46  ;;  %v1033_v46 = vrot.slane %v5379_v16, 5  ;;  %v1031_v6 = vsel %vm6201_vm10, %v4368_v8, %v1030_v15  ;;  %v1039_v8 = vrot.slane %v1037_v2, 4 }
  0xb4   :  { %2488 = vmatmul.mubr.bf16.gmra.mrb[16].mxu1 %v4583_v27  ;;  %v5221_v27 = vld [vmem:[%s7610_s1 + $0x298] ss:$8 sps:$4 sm:$0xff]  }
  0xb5   :  { %v1034_v10 = vsel %vm6201_vm10, %v1032_v3, %v1033_v46  ;;  %v1040_v3 = vrot.slane %v5622_v42, 5  ;;  %v1044_v42 = vrot.slane %v5636_v49, 5 }
  0xb6   :  { %v4406_v15 = vcombine.high %v1031_v6, %v1034_v10 }
  0xb7   :  { %v1041_v46 = vsel %vm6201_vm10, %v1039_v8, %v1040_v3  ;;  %v6341_v3 = vld [vmem:[%s7611_s0 + $0x78] sm:$0xee] }
  0xba   :  { %1352 = vmatmul.mubr.bf16.vlgmr.msra.gmra.mrb[0].mxu0 %v4401_v60  ;;  %v4403_v60 = vcombine.low %v1024_v23, %v1027_v62  ;;  %v5227_v23 = vld [vmem:[%s7610_s1 + $0x2b8] ss:$8 sps:$4 sm:$0xff]   ;;  %v5232_v62 = vld [vmem:[%s7610_s1 + $0x2cc] ss:$8 sps:$4 sm:$0xff]  }
  0xbb   :  { %1909 = vmatpush1.bf16.msra.mxu0 %v5218_v30  ;;  %4447 = vmatprep.mubr.msk.bf16.mxu0 %vm492_vm3, %v4404_v51  ;;  %v5224_v30 = vld [vmem:[%s7610_s1 + $0x2a8] ss:$8 sps:$4 sm:$0xff]   ;;  %v5229_v51 = vld [vmem:[%s7610_s1 + $0x2bc] ss:$8 sps:$4 sm:$0xff]  }
  0xbc   :  { %1910 = vmatprep.subr.bf16.mxu0 %v5223_v13  ;;  %v4369_v13 = vrot.slane %v6291_v9, 9 }
  0xbe   :  { %v1038_v16 = vsel %vm6201_vm10, %v4369_v13, %v1037_v2  ;;  %v5235_v2 = vld [vmem:[%s7610_s1 + $0x2dc] ss:$8 sps:$4 sm:$0xff]  }
  0xbf   :  { %1911 = vmatpush1.bf16.msra.mxu0 %v5221_v27  ;;  %v6316_v27 = vld [vmem:[%s7611_s0 + $0x60] sm:$0xee] }
  0xc0   :  { %1912 = vmatprep.subr.bf16.mxu0 %v5226_v47  ;;  %v4405_v47 = vcombine.low %v1031_v6, %v1034_v10  ;;  %v5233_v6 = vld [vmem:[%s7610_s1 + $0x2d8] ss:$8 sps:$4 sm:$0xff]   ;;  %v5238_v10 = vld [vmem:[%s7610_s1 + $0x2ec] ss:$8 sps:$4 sm:$0xff]  }
  0xc2   :  { %1362 = vmatmul.mubr.bf16.gmra.mrb[4].mxu0 %v4403_v60  ;;  %v4408_v60 = vcombine.high %v1038_v16, %v1041_v46 }
  0xc3   :  { %1913 = vmatpush1.bf16.msra.mxu0 %v5224_v30  ;;  %4448 = vmatprep.mubr.msk.bf16.mxu0 %vm492_vm3, %v4406_v15  ;;  %v4370_v30 = vrot.slane %v6316_v27, 9  ;;  %v1046_v15 = vrot.slane %v1044_v42, 4 }
  0xc4   :  { %1914 = vmatprep.subr.bf16.mxu0 %v5229_v51  ;;  %v1047_v51 = vrot.slane %v5663_v5, 5  ;;  %v1051_v5 = vrot.slane %v5677_v20, 5 }
  0xc5   :  { %v1045_v13 = vsel %vm6201_vm10, %v4370_v30, %v1044_v42  ;;  %v5241_v42 = vld [vmem:[%s7610_s1 + $0x2fc] ss:$8 sps:$4 sm:$0xff]  }
  0xc6   :  { %v1048_v8 = vsel %vm6201_vm10, %v1046_v15, %v1047_v51  ;;  %v6366_v51 = vld [vmem:[%s7611_s0 + $0x90] sm:$0xee] }
  0xc7   :  { %1915 = vmatpush1.bf16.msra.mxu0 %v5227_v23  ;;  %v4407_v23 = vcombine.low %v1038_v16, %v1041_v46  ;;  %v5239_v16 = vld [vmem:[%s7610_s1 + $0x2f8] ss:$8 sps:$4 sm:$0xff]   ;;  %v5249_v46 = vld [vmem:[%s7610_s1 + $0x30c] ss:$8 sps:$4 sm:$0xff]  }
  0xc8   :  { %1916 = vmatprep.subr.bf16.mxu0 %v5232_v62  ;;  %v5236_v62 = vld [vmem:[%s7610_s1 + $0x2e8] ss:$8 sps:$4 sm:$0xff]  }
  0xca   :  { %1372 = vmatmul.mubr.bf16.gmra.mrb[8].mxu0 %v4405_v47  ;;  %v4410_v47 = vcombine.high %v1045_v13, %v1048_v8 }
  0xcb   :  { %1917 = vmatpush1.bf16.msra.mxu0 %v5230_v31  ;;  %4449 = vmatprep.mubr.msk.bf16.mxu0 %vm492_vm3, %v4408_v60  ;;  %v4371_v31 = vrot.slane %v6341_v3, 9  ;;  %v1053_v60 = vrot.slane %v1051_v5, 4 }
  0xcc   :  { %1918 = vmatprep.subr.bf16.mxu0 %v5235_v2  ;;  %v1054_v2 = vrot.slane %v5704_v44, 5  ;;  %v1058_v44 = vrot.slane %v5718_v57, 5 }
  0xcd   :  { %v1052_v30 = vsel %vm6201_vm10, %v4371_v31, %v1051_v5  ;;  %v5256_v5 = vld [vmem:[%s7610_s1 + $0x31c] ss:$8 sps:$4 sm:$0xff]   ;;  %v1065_v31 = vrot.slane %v5759_v29, 5 }
  0xce   :  { %v1055_v15 = vsel %vm6201_vm10, %v1053_v60, %v1054_v2  ;;  %v5254_v60 = vld [vmem:[%s7610_s1 + $0x318] ss:$8 sps:$4 sm:$0xff]   ;;  %v6386_v2 = vld [vmem:[%s7611_s0 + $0xa8] sm:$0xee] }
  0xcf   :  { %1919 = vmatpush1.bf16.msra.mxu0 %v5233_v6  ;;  %v4409_v6 = vcombine.low %v1045_v13, %v1048_v8  ;;  %v1476_v13 = vshrl.u32 %v6183_v48, 16  ;;  %v1479_v8 = vshll.u32 %v6183_v48, 16 }
  0xd0   :  { %1920 = vmatprep.subr.bf16.mxu0 %v5238_v10  ;;  %v5247_v10 = vld [vmem:[%s7610_s1 + $0x308] ss:$8 sps:$4 sm:$0xff]  }
  0xd1   :  { %v1478_v54 = vrot.slane %v1476_v13, 5  ;;  %v1481_v59 = vrot.slane %v1479_v8, 6 }
  0xd2   :  { %1382 = vmatmul.mubr.bf16.gmra.mrb[12].mxu0 %v4407_v23  ;;  %v4412_v23 = vcombine.high %v1052_v30, %v1055_v15 }
  0xd3   :  { %1921 = vmatpush1.bf16.msra.mxu0 %v5236_v62  ;;  %4450 = vmatprep.mubr.msk.bf16.mxu0 %vm492_vm3, %v4410_v47  ;;  %v4372_v62 = vrot.slane %v6366_v51, 9  ;;  %v1060_v47 = vrot.slane %v1058_v44, 4  ;;  %v1482_v8 = vor.u32 %v1481_v59, %v1478_v54  ;;  %v6429_v59 = vld [vmem:[%s7611_s0 + $0x28] sm:$0x33] }
  0xd4   :  { %1922 = vmatprep.subr.bf16.mxu0 %v5241_v42  ;;  %v1061_v42 = vrot.slane %v5745_v22, 5  ;;  %v5262_v22 = vld [vmem:[%s7610_s1 + $0x32c] ss:$8 sps:$4 sm:$0xff]   ;;  %7669 = vst [vmem:[#allocation15_spill] sm:$0xff] %v6429_v59  ;;  %v1516_v38 = vshll.u32 %v6429_v59, 16 }
  0xd5   :  { %v1059_v48 = vsel %vm6201_vm10, %v4372_v62, %v1058_v44  ;;  %v5260_v44 = vld [vmem:[%s7610_s1 + $0x328] ss:$8 sps:$4 sm:$0xff]  }
  0xd7   :  { %1923 = vmatpush1.bf16.msra.mxu0 %v5239_v16  ;;  %v1062_v16 = vsel %vm6201_vm10, %v1060_v47, %v1061_v42 }
  0xd8   :  { %1924 = vmatprep.subr.bf16.mxu0 %v5249_v46  ;;  %v6398_v46 = vld [vmem:[%s7611_s0 + $0x10] sm:$0x33]  ;;  %v4414_v62 = vcombine.high %v1059_v48, %v1062_v16 }
  0xd9   :  { %7668 = vst [vmem:[#allocation14_spill] sm:$0xff] %v6398_v46  ;;  %v1490_v47 = vshrl.u32 %v6398_v46, 16  ;;  %v1493_v42 = vshll.u32 %v6398_v46, 16  ;;  %v1499_v46 = vshrl.u32 %v6235_v43, 16  ;;  %v5272_v43 = vld [vmem:[%s7610_s1 + $0x348] ss:$8 sps:$4 sm:$0xff]  }
  0xda   :  { %1392 = vmatmul.mubr.bf16.gmra.mrb[16].mxu0 %v4409_v6  ;;  %v4411_v6 = vcombine.low %v1052_v30, %v1055_v15  ;;  %v5266_v30 = vld [vmem:[%s7610_s1 + $0x338] ss:$8 sps:$4 sm:$0xff]  }
  0xdb   :  { %1925 = vmatpush1.bf16.msra.mxu0 %v5247_v10  ;;  %4451 = vmatprep.mubr.msk.bf16.mxu0 %vm492_vm3, %v4412_v23  ;;  %v1068_v10 = vrot.slane %v5786_v53, 5  ;;  %v4373_v23 = vrot.slane %v6386_v2, 9  ;;  %v5268_v53 = vld [vmem:[%s7610_s1 + $0x33c] ss:$8 sps:$4 sm:$0xff]  }
  0xdc   :  { %1926 = vmatprep.subr.bf16.mxu0 %v5256_v5  ;;  %v1067_v5 = vrot.slane %v1065_v31, 4 }
  0xdd   :  { %v1066_v15 = vsel %vm6201_vm10, %v4373_v23, %v1065_v31  ;;  %v4413_v31 = vcombine.low %v1059_v48, %v1062_v16  ;;  %v1501_v48 = vrot.slane %v1499_v46, 5  ;;  %v1504_v16 = vrot.slane %v1502_v40, 6 }
  0xde   :  { %v1069_v13 = vsel %vm6201_vm10, %v1067_v5, %v1068_v10  ;;  %v1483_v5 = vrot.slane %v1482_v8, 4  ;;  %v7673_v8 = vshll.u32 %v5530_v41, 16  ;;  %v1525_v40 = vshll.u32 %v6262_v36, 16  ;;  %vm4835_vm10 = vmpackc.low %vm2077_vm5, %vm5384_vm9 }
  0xdf   :  { %1927 = vmatpush1.bf16.msra.mxu0 %v5254_v60  ;;  %v4480_v60 = vld [vmem:[%s7610_s1 + $0x358] sm:$0xff]  ;;  %v4416_v54 = vcombine.high %v1066_v15, %v1069_v13  ;;  %vm4137_vm5 = vcmask 80896  }
  0xe0   :  { %1928 = vmatprep.subr.bf16.mxu0 %v5262_v22  ;;  %v1492_v22 = vrot.slane %v1490_v47, 5  ;;  %v4524_v10 = vcombine.high %v4480_v60, %v4480_v60  ;;  %v4523_v23 = vcombine.low %v4480_v60, %v4480_v60  ;;  %v1513_v60 = vshrl.u32 %v6429_v59, 16  ;;  %v7693_v47 = vld [vmem:[#allocation7_spill] sm:$0xff] }
  0xe1   :  { %v1527_v59 = vrot.slane %v1525_v40, 6 }
  0xe2   :  { %1402 = vmatmul.mubr.bf16.gmra.mrb[20].mxu0 %v4411_v6  ;;  %v1495_v6 = vrot.slane %v1493_v42, 6  ;;  %v7672_v42 = vshrl.u32 %v5530_v41, 16  ;;  %v1903_v46 = vsel %vm517_vm4, %v4523_v23, 0 }
  0xe3   :  { %4452 = vmatprep.mubr.msk.bf16.mxu0 %vm492_vm3, %v4414_v62  ;;  %1929 = vmatpush1.bf16.msra.mxu0 %v5260_v44  ;;  %v1488_v44 = vrot.slane %v5927_v11, 4 }
  0xe4   :  { %1930 = vmatprep.subr.bf16.mxu0 %v5268_v53  ;;  %v1496_v62 = vor.u32 %v1495_v6, %v1492_v22  ;;  %v1507_v53 = vrot.slane %v7672_v42, 5  ;;  %v1522_v22 = vshrl.u32 %v6262_v36, 16  ;;  %v1487_v6 = vsel %vm6435_vm13, %v1483_v5, %v5927_v11  ;;  %v6458_v36 = vld [vmem:[%s7611_s0 + $0x40] sm:$0x33] }
  0xe5   :  { %v1515_v42 = vrot.slane %v1513_v60, 5  ;;  %v7674_v11 = vshrl.u32 %v5563_v56, 16 }
  0xe6   :  { %v1497_v41 = vsel %vm6435_vm13, %v1488_v44, %v1496_v62  ;;  %v7675_v44 = vshll.u32 %v5563_v56, 16  ;;  %v1536_v62 = vshrl.u32 %v6458_v36, 16 }
  0xe7   :  { %1931 = vmatpush1.bf16.msra.mxu0 %v5266_v30  ;;  %v1508_v30 = vrot.slane %v7673_v8, 6  ;;  %v1518_v8 = vrot.slane %v1516_v38, 6  ;;  %v4482_v23 = vcombine.high %v1487_v6, %v1497_v41  ;;  %v1530_v5 = vrot.slane %v7674_v11, 5 }
  0xe8   :  { %1932 = vmatprep.subr.bf16.mxu0 %v5274_v26  ;;  %v1505_v26 = vor.u32 %v1504_v16, %v1501_v48  ;;  %v1539_v38 = vshll.u32 %v6458_v36, 16  ;;  %v1538_v56 = vrot.slane %v1536_v62, 5 }
  0xea   :  { %1412 = vmatmul.mubr.bf16.gmra.mrb[24].mxu0 %v4413_v31  ;;  %v1509_v31 = vor.u32 %v1508_v30, %v1507_v53  ;;  %v1506_v48 = vrot.slane %v1505_v26, 4  ;;  %v1519_v53 = vor.u32 %v1518_v8, %v1515_v42  ;;  %v7676_v8 = vshrl.u32 %v5596_v19, 16 }
  0xeb   :  { %4453 = vmatprep.mubr.msk.bf16.mxu0 %vm492_vm3, %v4416_v54  ;;  %1933 = vmatpush1.bf16.msra.mxu0 %v5272_v43  ;;  %v4415_v54 = vcombine.low %v1066_v15, %v1069_v13  ;;  %v1524_v43 = vrot.slane %v1522_v22, 5  ;;  %v1545_v15 = vshrl.u32 %v6291_v9, 16  ;;  %v1548_v13 = vshll.u32 %v6291_v9, 16 }
  0xec   :  { %4525 = vmatprep.subr.msk.bf16.mxu0 %vm517_vm4, %v4524_v10  ;;  %v1531_v10 = vrot.slane %v7675_v44, 6  ;;  %v1511_v16 = vrot.slane %v1509_v31, 4  ;;  %v1541_v22 = vrot.slane %v1539_v38, 6  ;;  %v1510_v40 = vsel %vm6435_vm13, %v1506_v48, %v1509_v31 }
  0xed   :  { %v1528_v30 = vor.u32 %v1527_v59, %v1524_v43  ;;  %v1547_v26 = vrot.slane %v1545_v15, 5  ;;  %v1550_v42 = vrot.slane %v1548_v13, 6  ;;  %v1553_v11 = vrot.slane %v7676_v8, 5 }
  0xee   :  { %v1532_v60 = vor.u32 %v1531_v10, %v1530_v5  ;;  %v7677_v9 = vshll.u32 %v5596_v19, 16  ;;  %v1559_v59 = vshrl.u32 %v6068_v34, 16  ;;  %v1542_v31 = vor.u32 %v1541_v22, %v1538_v56 }
  0xef   :  { %1935 = vmatpush1.bf16.msra.mxu0 %v1903_v46  ;;  %v4481_v46 = vcombine.low %v1487_v6, %v1497_v41  ;;  %v1529_v5 = vrot.slane %v1528_v30, 4  ;;  %v1551_v10 = vor.u32 %v1550_v42, %v1547_v26  ;;  %v1571_v48 = vshll.u32 %v6316_v27, 16 }
  0xf0   :  { %2385 = vmatprep.subr.bf16.mxu0 %v5795_v25  ;;  %v1520_v25 = vsel %vm6435_vm13, %v1511_v16, %v1519_v53  ;;  %v1534_v44 = vrot.slane %v1532_v60, 4  ;;  %v1561_v6 = vrot.slane %v1559_v59, 5  ;;  %v7678_v56 = vshrl.u32 %v5636_v49, 16 }
  0xf1   :  { %v4484_v43 = vcombine.high %v1510_v40, %v1520_v25  ;;  %v1533_v19 = vsel %vm6435_vm13, %v1529_v5, %v1532_v60  ;;  %v4483_v16 = vcombine.low %v1510_v40, %v1520_v25  ;;  %v1552_v15 = vrot.slane %v1551_v10, 4 }
  0xf2   :  { %1422 = vmatmul.mubr.bf16.gmra.mrb[28].mxu0 %v4415_v54  ;;  %v1554_v54 = vrot.slane %v7677_v9, 6  ;;  %v1543_v38 = vsel %vm6435_vm13, %v1534_v44, %v1542_v31  ;;  %v1576_v60 = vrot.slane %v7678_v56, 5  ;;  %v7679_v22 = vshll.u32 %v5636_v49, 16 }
  0xf3   :  { %4526 = vmatprep.mubr.msk.bf16.mxu0 %vm492_vm3, %v4482_v23  ;;  %v1562_v23 = vshll.u32 %v6068_v34, 16  ;;  %v1568_v34 = vshrl.u32 %v6316_v27, 16  ;;  %v4486_v53 = vcombine.high %v1533_v19, %v1543_v38  ;;  %v1582_v26 = vshrl.u32 %v6092_v1, 16 }
  0xf4   :  { %v1555_v62 = vor.u32 %v1554_v54, %v1553_v11  ;;  %v1585_v27 = vshll.u32 %v6092_v1, 16  ;;  %v1591_v40 = vshrl.u32 %v6341_v3, 16  ;;  %v1594_v25 = vshll.u32 %v6341_v3, 16 }
  0xf5   :  { %v1564_v41 = vrot.slane %v1562_v23, 6  ;;  %v7680_v3 = vshrl.u32 %v5677_v20, 16  ;;  %v1605_v23 = vshrl.u32 %v6125_v0, 16  ;;  %v4485_v5 = vcombine.low %v1533_v19, %v1543_v38 }
  0xf6   :  { %v1557_v13 = vrot.slane %v1555_v62, 4  ;;  %v1556_v49 = vsel %vm6435_vm13, %v1552_v15, %v1555_v62  ;;  %v1587_v8 = vrot.slane %v1585_v27, 6  ;;  %v1593_v11 = vrot.slane %v1591_v40, 5 }
  0xf7   :  { %v1565_v30 = vor.u32 %v1564_v41, %v1561_v6  ;;  %v1596_v9 = vrot.slane %v1594_v25, 6  ;;  %v1599_v54 = vrot.slane %v7680_v3, 5  ;;  %v1607_v41 = vrot.slane %v1605_v23, 5 }
  0xf8   :  { %v1631_v56 = vshll.u32 %v6157_v61, 16 }
  0xf9   :  { %v1597_v62 = vor.u32 %v1596_v9, %v1593_v11 }
  0xfa   :  { %1941 = vmatmul.mubr.bf16.vlgmr.msra.gmra.mrb[0].mxu0 %v4481_v46  ;;  %v1577_v46 = vrot.slane %v7679_v22, 6 }
  0xfb   :  { %2386 = vmatpush1.bf16.msra.mxu0 %v5800_v28  ;;  %4527 = vmatprep.mubr.msk.bf16.mxu0 %vm492_vm3, %v4484_v43  ;;  %v1570_v28 = vrot.slane %v1568_v34, 5  ;;  %v1608_v43 = vshll.u32 %v6125_v0, 16  ;;  %v1598_v19 = vrot.slane %v1597_v62, 4  ;;  %v7690_v62 = vld [vmem:[#allocation5_spill] sm:$0xff] }
  0xfc   :  { %2387 = vmatprep.subr.bf16.mxu0 %v5806_v32  ;;  %v1573_v32 = vrot.slane %v1571_v48, 6  ;;  %v1578_v42 = vor.u32 %v1577_v46, %v1576_v60  ;;  %v1617_v48 = vshll.u32 %v6366_v51, 16 }
  0xfd   :  { %v1610_v34 = vrot.slane %v1608_v43, 6  ;;  %v7687_v43 = vld [vmem:[#allocation3_spill] sm:$0xff] }
  0xfe   :  { %v1574_v1 = vor.u32 %v1573_v32, %v1570_v28  ;;  %v1580_v31 = vrot.slane %v1578_v42, 4  ;;  %v1619_v15 = vrot.slane %v1617_v48, 6  ;;  %v1628_v28 = vshrl.u32 %v6157_v61, 16  ;;  %v7692_v48 = vld [vmem:[#allocation14_spill] sm:$0xff] }
  0xff   :  { %2388 = vmatpush1.bf16.msra.mxu0 %v5824_v50  ;;  %v1566_v50 = vsel %vm6435_vm13, %v1557_v13, %v1565_v30  ;;  %v1637_v32 = vshrl.u32 %v6386_v2, 16  ;;  %v1640_v61 = vshll.u32 %v6386_v2, 16  ;;  %v1651_v2 = vshrl.u32 %v6209_v21, 16 }
 0x100   :  { %2389 = vmatprep.subr.bf16.mxu0 %v5837_v14  ;;  %v1584_v14 = vrot.slane %v1582_v26, 5  ;;  %v4488_v44 = vcombine.high %v1556_v49, %v1566_v50  ;;  %v4487_v0 = vcombine.low %v1556_v49, %v1566_v50 }
 0x101   :  { %v1639_v50 = vrot.slane %v1637_v32, 5  ;;  %v1653_v9 = vrot.slane %v1651_v2, 5 }
 0x102   :  { %1951 = vmatmul.mubr.bf16.gmra.mrb[4].mxu0 %v4483_v16  ;;  %v1588_v10 = vor.u32 %v1587_v8, %v1584_v14  ;;  %v1611_v16 = vor.u32 %v1610_v34, %v1607_v41  ;;  %v7691_v41 = vld [vmem:[#allocation6_spill] sm:$0xff] }
 0x103   :  { %2390 = vmatpush1.bf16.msra.mxu0 %v5842_v55  ;;  %4528 = vmatprep.mubr.msk.bf16.mxu0 %vm492_vm3, %v4486_v53  ;;  %v7681_v55 = vshll.u32 %v5677_v20, 16  ;;  %v1614_v20 = vshrl.u32 %v6366_v51, 16  ;;  %v7682_v51 = vshrl.u32 %v5718_v57, 16 }
 0x104   :  { %2391 = vmatprep.subr.bf16.mxu0 %v5848_v58  ;;  %v1575_v58 = vrot.slane %v1574_v1, 4  ;;  %v7685_v1 = vshll.u32 %v5759_v29, 16 }
 0x105   :  { %v1600_v59 = vrot.slane %v7681_v55, 6  ;;  %v1616_v53 = vrot.slane %v1614_v20, 5  ;;  %v1622_v13 = vrot.slane %v7682_v51, 5  ;;  %v7686_v55 = vld [vmem:[#allocation2_spill] sm:$0xff] }
 0x106   :  { %v1646_v8 = vrot.slane %v7685_v1, 6 }
 0x107   :  { %2392 = vmatpush1.bf16.msra.mxu0 %v5865_v37  ;;  %v1601_v6 = vor.u32 %v1600_v59, %v1599_v54  ;;  %v1579_v37 = vsel %vm6435_vm13, %v1575_v58, %v1578_v42  ;;  %v1620_v46 = vor.u32 %v1619_v15, %v1616_v53  ;;  %v1642_v42 = vrot.slane %v1640_v61, 6  ;;  %v2054_v15 = vld [vmem:[%s7611_s0 + $0x18] sm:$0xcc] }
 0x108   :  { %2393 = vmatprep.subr.bf16.mxu0 %v5878_v52  ;;  %v1589_v52 = vsel %vm6435_vm13, %v1580_v31, %v1588_v10  ;;  %v2053_v31 = vld [vmem:[%s7611_s0] sm:$0xcc] }
 0x109   :  { %v1603_v38 = vrot.slane %v1601_v6, 4  ;;  %v1602_v60 = vsel %vm6435_vm13, %v1598_v19, %v1601_v6  ;;  %v1621_v40 = vrot.slane %v1620_v46, 4  ;;  %v1643_v11 = vor.u32 %v1642_v42, %v1639_v50  ;;  %v7699_v46 = vld [vmem:[#allocation13_spill] sm:$0xff] }
 0x10a   :  { %1961 = vmatmul.mubr.bf16.gmra.mrb[8].mxu0 %v4485_v5  ;;  %v7688_v5 = vld [vmem:[#allocation4_spill] sm:$0xff]  ;;  %v4534_v34 = vrot.slane %v2053_v31, 10 }
 0x10b   :  { %2394 = vmatpush1.bf16.msra.mxu0 %v5883_v39  ;;  %4529 = vmatprep.mubr.msk.bf16.mxu0 %vm492_vm3, %v4488_v44  ;;  %v7683_v39 = vshll.u32 %v5718_v57, 16  ;;  %v1612_v22 = vsel %vm6435_vm13, %v1603_v38, %v1611_v16  ;;  %v1630_v57 = vrot.slane %v1628_v28, 5  ;;  %v7696_v16 = vld [vmem:[#allocation12_spill] sm:$0xff]  ;;  %v7698_v28 = vld [vmem:[#allocation15_spill] sm:$0xff] }
 0x10c   :  { %2395 = vmatprep.subr.bf16.mxu0 %v5889_v33  ;;  %v4490_v33 = vcombine.high %v1579_v37, %v1589_v52  ;;  %v4492_v27 = vcombine.high %v1602_v60, %v1612_v22  ;;  %v4491_v54 = vcombine.low %v1602_v60, %v1612_v22  ;;  %v2089_v53 = vrot.slane %v7696_v16, 6 }
 0x10d   :  { %v1623_v30 = vrot.slane %v7683_v39, 6 }
 0x10f   :  { %2396 = vmatpush1.bf16.msra.mxu0 %v5901_v4  ;;  %v1624_v26 = vor.u32 %v1623_v30, %v1622_v13  ;;  %v1633_v4 = vrot.slane %v1631_v56, 6  ;;  %v7697_v13 = vld [vmem:[#allocation9_spill] sm:$0xff]  ;;  %v4535_v30 = vrot.slane %v2054_v15, 10  ;;  %v2092_v56 = vrot.slane %v7698_v28, 6 }
 0x110   :  { %2397 = vmatprep.subr.bf16.mxu0 %v5914_v7  ;;  %v4489_v7 = vcombine.low %v1579_v37, %v1589_v52  ;;  %v2085_v37 = vrot.slane %v7692_v48, 6  ;;  %v7694_v52 = vld [vmem:[#allocation8_spill] sm:$0xff] }
 0x111   :  { %v1626_v25 = vrot.slane %v1624_v26, 4  ;;  %v1634_v49 = vor.u32 %v1633_v4, %v1630_v57  ;;  %v2090_v60 = vsel %vm6071_vm7, %v4535_v30, %v2089_v53  ;;  %v2055_v57 = vld [vmem:[%s7611_s0 + $0x30] sm:$0xcc] }
 0x112   :  { %1971 = vmatmul.mubr.bf16.gmra.mrb[12].mxu0 %v4487_v0  ;;  %v4536_v61 = vrot.slane %v2055_v57, 10 }
 0x113   :  { %2398 = vmatpush1.bf16.msra.mxu0 %v5919_v18  ;;  %4530 = vmatprep.mubr.msk.bf16.mxu0 %vm492_vm3, %v4490_v33  ;;  %v7684_v18 = vshrl.u32 %v5759_v29, 16  ;;  %v2091_v33 = vrot.slane %v2089_v53, 4 }
 0x114   :  { %2399 = vmatprep.subr.bf16.mxu0 %v5925_v17  ;;  %v1654_v17 = vshll.u32 %v6209_v21, 16 }
 0x115   :  { %v1645_v14 = vrot.slane %v7684_v18, 5  ;;  %v2093_v22 = vsel %vm6071_vm7, %v2091_v33, %v2092_v56 }
 0x116   :  { %v1656_v3 = vrot.slane %v1654_v17, 6  ;;  %v4572_v32 = vcombine.high %v2090_v60, %v2093_v22 }
 0x117   :  { %2400 = vmatpush1.bf16.msra.mxu0 %v5934_v24  ;;  %v1625_v24 = vsel %vm6435_vm13, %v1621_v40, %v1624_v26  ;;  %v1647_v29 = vor.u32 %v1646_v8, %v1645_v14  ;;  %v2096_v26 = vrot.slane %v7699_v46, 6 }
 0x118   :  { %2401 = vmatprep.subr.bf16.mxu0 %v5951_v35  ;;  %v1635_v35 = vsel %vm6435_vm13, %v1626_v25, %v1634_v49  ;;  %v1657_v23 = vor.u32 %v1656_v3, %v1653_v9  ;;  %v4571_v49 = vcombine.low %v2090_v60, %v2093_v22 }
 0x119   :  { %v4494_v21 = vcombine.high %v1625_v24, %v1635_v35  ;;  %v1649_v59 = vrot.slane %v1647_v29, 4  ;;  %v4493_v10 = vcombine.low %v1625_v24, %v1635_v35  ;;  %v2097_v40 = vsel %vm6071_vm7, %v4536_v61, %v2096_v26 }
 0x11a   :  { %1981 = vmatmul.mubr.bf16.gmra.mrb[16].mxu0 %v4489_v7  ;;  %v2098_v7 = vrot.slane %v2096_v26, 4 }
 0x11b   :  { %2402 = vmatpush1.bf16.msra.mxu0 %v5956_v12  ;;  %4531 = vmatprep.mubr.msk.bf16.mxu0 %vm492_vm3, %v4492_v27  ;;  %v1644_v12 = vrot.slane %v1643_v11, 4  ;;  %v1658_v44 = vsel %vm6435_vm13, %v1649_v59, %v1657_v23  ;;  %v2099_v27 = vrot.slane %v6458_v36, 6 }
 0x11c   :  { %2403 = vmatprep.subr.bf16.mxu0 %v5966_v45 }
 0x11d   :  { %v1648_v45 = vsel %vm6435_vm13, %v1644_v12, %v1647_v29  ;;  %v2100_v25 = vsel %vm6071_vm7, %v2098_v7, %v2099_v27 }
 0x11e   :  { %v4496_v6 = vcombine.high %v1648_v45, %v1658_v44  ;;  %v4495_v51 = vcombine.low %v1648_v45, %v1658_v44  ;;  %v4574_v50 = vcombine.high %v2097_v40, %v2100_v25  ;;  %v4573_v42 = vcombine.low %v2097_v40, %v2100_v25 }
 0x11f   :  { %2404 = vmatpush1.bf16.msra.mxu0 %v5975_v63  ;;  %v7689_v63 = vld [vmem:[#allocation11_spill] sm:$0xff] }
 0x120   :  { %2405 = vmatprep.subr.bf16.mxu0 %v7686_v55  ;;  %v2082_v58 = vrot.slane %v7689_v63, 6  ;;  %v2530_v63 = vld [vmem:[%s7612_s2] sm:$0x3]  ;;  %s5381_s2 = smov 116  }
 0x122   :  { %1991 = vmatmul.mubr.bf16.gmra.mrb[20].mxu0 %v4491_v54  ;;  %v2084_v20 = vrot.slane %v2082_v58, 4  ;;  %v2083_v19 = vsel %vm6071_vm7, %v4534_v34, %v2082_v58 }
 0x123   :  { %4532 = vmatprep.mubr.msk.bf16.mxu0 %vm492_vm3, %v4494_v21  ;;  %2406 = vmatpush1.bf16.msra.mxu0 %v7687_v43 }
 0x124   :  { %2407 = vmatprep.subr.bf16.mxu0 %v7688_v5  ;;  %v2086_v38 = vsel %vm6071_vm7, %v2084_v20, %v2085_v37  ;;  %v2532_v5 = vlaneseq  ;;  %vm2867_vm7 = vcmask 1047559  }
 0x125   :  { %v4570_v39 = vcombine.high %v2083_v19, %v2086_v38  ;;  %v4569_v4 = vcombine.low %v2083_v19, %v2086_v38 }
 0x126   :  { %v2533_v45 = vshrl.u32 %v2532_v5, 7 }
 0x127   :  { %2408 = vmatpush1.bf16.msra.mxu0 %v7690_v62 }
 0x128   :  { %2409 = vmatprep.subr.bf16.mxu0 %v7691_v41  ;;  %v2534_v44 = vsub.s32 0, %v2533_v45  ;;  %v2538_v58 = vsub.s32 1, %v2533_v45 }
 0x12a   :  { %2001 = vmatmul.mubr.bf16.gmra.mrb[24].mxu0 %v4493_v10  ;;  %v6620_v31 = vrot.slane %v2530_v63, %v2534_v44  ;;  %v6622_v62 = vrot.slane %v2530_v63, %v2538_v58  ;;  %v7648_v63 = vmov 0   ;;  %v5300_v58 = vld [vmem:[%s7613_s3 + $0x50] sm:$0xff]  }
 0x12b   :  { %4533 = vmatprep.mubr.msk.bf16.mxu0 %vm492_vm3, %v4496_v6  ;;  %2410 = vmatpush1.bf16.msra.mxu0 %v7693_v47 }
 0x12c   :  { %4613 = vmatprep.subr.msk.bf16.mxu0 %vm517_vm4, %v7694_v52  ;;  %2953 = vmatprep.subr.bf16.mxu1 %v7648_v63  ;;  %vm2861_vm4 = vcmask 1045509  }
 0x12d   :  { %2954 = vmatpush1.bf16.msra.mxu1 %v5300_v58 }
 0x12e   :  { %2955 = vmatprep.subr.bf16.mxu1 %v7648_v63 }
 0x12f   :  { %2412 = vmatpush1.bf16.msra.mxu0 %v7697_v13 }
 0x132   :  { %2011 = vmatmul.mubr.bf16.gmra.mrb[28].mxu0 %v4495_v51 }
 0x133   :  { %4614 = vmatprep.mubr.msk.bf16.mxu0 %vm492_vm3, %v4570_v39 }
 0x13a   :  { %2418 = vmatmul.mubr.bf16.vlgmr.msra.gmra.mrb[0].mxu0 %v4569_v4 }
 0x13b   :  { %4615 = vmatprep.mubr.msk.bf16.mxu0 %vm492_vm3, %v4572_v32 }
 0x142   :  { %2428 = vmatmul.mubr.bf16.gmra.mrb[4].mxu0 %v4571_v49 }
 0x143   :  { %4616 = vmatprep.mubr.msk.bf16.mxu0 %vm492_vm3, %v4574_v50  ;;  %vm2858_vm3 = vcmask 1044484  }
 0x14a   :  { %2438 = vmatmul.mubr.bf16.gmra.mrb[8].mxu0 %v4573_v42 }
 0x167   :  { %v2449_v18 = vpop.f32.mrb[0].mxu1 }
 0x168   :  { %v2451_v14 = vpop.f32.mrb[1].mxu1 }
 0x169   :  { %v2453_v1 = vpop.f32.mrb[2].mxu1 }
 0x16a   :  { %v2455_v36 = vpop.f32.mrb[3].mxu1 }
 0x16f   :  { %v2459_v8 = vpop.f32.mrb[4].mxu1 }
 0x170   :  { %v2461_v2 = vpop.f32.mrb[5].mxu1 }
 0x171   :  { %v2463_v17 = vpop.f32.mrb[6].mxu1 }
 0x172   :  { %v2465_v24 = vpop.f32.mrb[7].mxu1 }
 0x177   :  { %v2469_v35 = vpop.f32.mrb[8].mxu1 }
 0x178   :  { %v2471_v11 = vpop.f32.mrb[9].mxu1 }
 0x179   :  { %v2473_v29 = vpop.f32.mrb[10].mxu1 }
 0x17a   :  { %v2475_v9 = vpop.f32.mrb[11].mxu1 }
 0x17f   :  { %v6601_v3 = vpop.f32.mrb[12].mxu1 }
 0x180   :  { %v6603_v54 = vpop.f32.mrb[13].mxu1 }
 0x181   :  { %v6605_v21 = vpop.f32.mrb[14].mxu1 }
 0x182   :  { %v6607_v55 = vpop.f32.mrb[15].mxu1 }
 0x187   :  { %v6609_v12 = vpop.f32.mrb[16].mxu1 }
 0x188   :  { %v6611_v59 = vpop.f32.mrb[17].mxu1 }
 0x189   :  { %v6613_v23 = vpop.f32.mrb[18].mxu1 }
 0x18a   :  { %v6615_v43 = vpop.f32.mrb[19].mxu1 }
 0x1e5   :  { %v1972_v10 = vpop.f32.mrb[12].mxu0 }
 0x1e6   :  { %v4865_v6 = vadd.f32 %v2449_v18, %v1972_v10  ;;  %v1974_v41 = vpop.f32.mrb[13].mxu0 }
 0x1e7   :  { %v4866_v34 = vadd.f32 %v2451_v14, %v1974_v41  ;;  %v1976_v20 = vpop.f32.mrb[14].mxu0 }
 0x1e8   :  { %v2554_v48 = vadd.f32 %v4865_v6, %v6620_v31  ;;  %v4867_v37 = vadd.f32 %v2453_v1, %v1976_v20  ;;  %v1978_v47 = vpop.f32.mrb[15].mxu0 }
 0x1e9   :  { %v2555_v52 = vadd.f32 %v4866_v34, %v6622_v62  ;;  %v4868_v0 = vadd.f32 %v2455_v36, %v1978_v47 }
 0x1ea   :  { %v2586_v19 = vmax.f32 %v2554_v48, 0.0  ;;  %v6662_v6 = vadd.f32 %v4867_v37, %v6620_v31 }
 0x1eb   :  { %v2587_v38 = vmax.f32 %v2555_v52, 0.0  ;;  %v6671_v41 = vadd.f32 %v4868_v0, %v6622_v62 }
 0x1ec   :  { %v2628_v16 = vrot.slane %v2586_v19, 1  ;;  %v2588_v48 = vmax.f32 %v6662_v6, 0.0 }
 0x1ed   :  { %v2629_v53 = vrot.slane %v2587_v38, 1  ;;  %v1982_v15 = vpop.f32.mrb[16].mxu0  ;;  %v2589_v0 = vmax.f32 %v6671_v41, 0.0 }
 0x1ee   :  { %v4869_v51 = vadd.f32 %v2459_v8, %v1982_v15  ;;  %v1984_v13 = vpop.f32.mrb[17].mxu0  ;;  %v6626_v39 = vmax.f32 %v2586_v19, %v2628_v16 }
 0x1ef   :  { %v4870_v30 = vadd.f32 %v2461_v2, %v1984_v13  ;;  %v1986_v33 = vpop.f32.mrb[18].mxu0  ;;  %v6628_v28 = vmax.f32 %v2587_v38, %v2629_v53 }
 0x1f0   :  { %v4871_v56 = vadd.f32 %v2463_v17, %v1986_v33  ;;  %v1988_v60 = vpop.f32.mrb[19].mxu0  ;;  %v5302_v33 = vld [vmem:[%s7613_s3 + $0x60] sm:$0xff]  }
 0x1f1   :  { %v4872_v22 = vadd.f32 %v2465_v24, %v1988_v60  ;;  %v4999_v46 = vpack.i.bf16 %v6628_v28, %v6626_v39  ;;  %v6683_v37 = vadd.f32 %v4870_v30, %v6622_v62 }
 0x1f2   :  { %v6633_v26 = vadd.f32 %v4871_v56, %v6620_v31 }
 0x1f3   :  { %v6636_v57 = vadd.f32 %v4872_v22, %v6622_v62  ;;  %5000 = vrot.lane.b32.xlu1 %v4999_v46, %s5381_s2  ;;  %v2591_v13 = vmax.f32 %v6683_v37, 0.0 }
 0x1f4   :  { %v2592_v56 = vmax.f32 %v6633_v26, 0.0 }
 0x1f5   :  { %v1992_v4 = vpop.f32.mrb[20].mxu0  ;;  %v6717_v22 = vrot.slane %v2591_v13, 1 }
 0x1f6   :  { %v4873_v32 = vadd.f32 %v2469_v35, %v1992_v4  ;;  %v1994_v61 = vpop.f32.mrb[21].mxu0 }
 0x1f7   :  { %v4874_v7 = vadd.f32 %v2471_v11, %v1994_v61  ;;  %v1996_v27 = vpop.f32.mrb[22].mxu0 }
 0x1f8   :  { %v2562_v40 = vadd.f32 %v4873_v32, %v6620_v31  ;;  %v4875_v25 = vadd.f32 %v2473_v29, %v1996_v27  ;;  %v1998_v49 = vpop.f32.mrb[23].mxu0  ;;  %v2593_v32 = vmax.f32 %v6636_v57, 0.0 }
 0x1f9   :  { %v2563_v50 = vadd.f32 %v4874_v7, %v6622_v62  ;;  %v4876_v42 = vadd.f32 %v2475_v9, %v1998_v49  ;;  %v5303_v49 = vld [vmem:[%s7613_s3 + $0x68] sm:$0xff]  }
 0x1fa   :  { %v2594_v18 = vmax.f32 %v2562_v40, 0.0  ;;  %v6642_v14 = vadd.f32 %v4875_v25, %v6620_v31 }
 0x1fb   :  { %v2595_v1 = vmax.f32 %v2563_v50, 0.0  ;;  %v6645_v36 = vadd.f32 %v4876_v42, %v6622_v62 }
 0x1fc   :  { %v2632_v8 = vrot.slane %v2594_v18, 1  ;;  %v2596_v27 = vmax.f32 %v6642_v14, 0.0 }
 0x1fd   :  { %v2633_v2 = vrot.slane %v2595_v1, 1  ;;  %v2002_v17 = vpop.f32.mrb[24].mxu0 }
 0x1fe   :  { %v6647_v24 = vmax.f32 %v2594_v18, %v2632_v8  ;;  %v4877_v35 = vadd.f32 %v6601_v3, %v2002_v17  ;;  %v2004_v11 = vpop.f32.mrb[25].mxu0  ;;  %v6738_v8 = vrot.slane %v2592_v56, 1  ;;  %v6742_v17 = vrot.slane %v2593_v32, 1 }
 0x1ff   :  { %v6650_v29 = vmax.f32 %v2595_v1, %v2633_v2  ;;  %v4878_v9 = vadd.f32 %v6603_v54, %v2004_v11  ;;  %v2006_v5 = vpop.f32.mrb[26].mxu0 }
 0x200   :  { %v4879_v45 = vadd.f32 %v6605_v21, %v2006_v5  ;;  %v2008_v44 = vpop.f32.mrb[27].mxu0  ;;  %v5301_v21 = vld [vmem:[%s7613_s3 + $0x58] sm:$0xff]   ;;  %v6728_v50 = vadd.f32 %v4877_v35, %v6620_v31  ;;  %v7647_v5 = vmax.f32 %v6645_v36, 0.0 }
 0x201   :  { %v4880_v10 = vadd.f32 %v6607_v55, %v2008_v44  ;;  %v5019_v3 = vpack.i.bf16 %v6650_v29, %v6647_v24  ;;  %v6679_v55 = vadd.f32 %v4869_v51, %v6620_v31  ;;  %2956 = vmatpush1.bf16.msra.mxu1 %v5301_v21  ;;  %v6731_v42 = vadd.f32 %v4878_v9, %v6622_v62 }
 0x202   :  { %v6665_v54 = vadd.f32 %v4879_v45, %v6620_v31  ;;  %2957 = vmatprep.subr.bf16.mxu1 %v7648_v63  ;;  %v6750_v9 = vrot.slane %v2596_v27, 1  ;;  %v2598_v44 = vmax.f32 %v6728_v50, 0.0 }
 0x203   :  { %v6674_v34 = vadd.f32 %v4880_v10, %v6622_v62  ;;  %5020 = vrot.lane.b32.xlu1 %v5019_v3, %s5381_s2  ;;  %v2590_v16 = vmax.f32 %v6679_v55, 0.0  ;;  %v2599_v58 = vmax.f32 %v6731_v42, 0.0  ;;  %v5305_v42 = vld [vmem:[%s7613_s3 + $0x78] sm:$0xff]  }
 0x204   :  { %v6892_v57 = vmax.f32 %v2596_v27, %v6750_v9 }
 0x205   :  { %v2012_v20 = vpop.f32.mrb[28].mxu0  ;;  %2958 = vmatpush1.bf16.msra.mxu1 %v5302_v33 }
 0x206   :  { %v4881_v47 = vadd.f32 %v6609_v12, %v2012_v20  ;;  %v2014_v52 = vpop.f32.mrb[29].mxu0  ;;  %2959 = vmatprep.subr.bf16.mxu1 %v7648_v63 }
 0x207   :  { %v4882_v19 = vadd.f32 %v6611_v59, %v2014_v52  ;;  %v2016_v38 = vpop.f32.mrb[30].mxu0  ;;  %v6701_v59 = vrot.slane %v2588_v48, 1  ;;  %v5304_v52 = vld [vmem:[%s7613_s3 + $0x70] sm:$0xff]  }
 0x208   :  { %v4883_v53 = vadd.f32 %v6613_v23, %v2016_v38  ;;  %v2018_v15 = vpop.f32.mrb[31].mxu0  ;;  %v6708_v23 = vrot.slane %v2589_v0, 1  ;;  %v6734_v18 = vadd.f32 %v4881_v47, %v6620_v31 }
 0x209   :  { %v4884_v51 = vadd.f32 %v6615_v43, %v2018_v15  ;;  %v6712_v43 = vrot.slane %v2590_v16, 1  ;;  %2960 = vmatpush1.bf16.msra.mxu1 %v5303_v49  ;;  %v6745_v35 = vadd.f32 %v4882_v19, %v6622_v62 }
 0x20a   :  { %v6694_v12 = vadd.f32 %v4883_v53, %v6620_v31  ;;  %2961 = vmatprep.subr.bf16.mxu1 %v7648_v63  ;;  %v2602_v10 = vmax.f32 %v6734_v18, 0.0 }
 0x20b   :  { %v6697_v30 = vadd.f32 %v4884_v51, %v6622_v62  ;;  %v2603_v19 = vmax.f32 %v6745_v35, 0.0 }
 0x20c   :  { %v2636_v35 = vrot.slane %v2602_v10, 1  ;;  %v2604_v41 = vmax.f32 %v6694_v12, 0.0 }
 0x20d   :  { %v2419_v60 = vpop.f32.mrb[0].mxu0  ;;  %2962 = vmatpush1.bf16.msra.mxu1 %v5304_v52 }
 0x20e   :  { %v2542_v46 = vadd.f32 %v6620_v31, %v2419_v60  ;;  %v2421_v4 = vpop.f32.mrb[1].mxu0  ;;  %v6770_v60 = vrot.slane %v7647_v5, 1  ;;  %2963 = vmatprep.subr.bf16.mxu1 %v7648_v63  ;;  %v3475_v26 = vrot.slane %v2604_v41, 1 }
 0x20f   :  { %v2543_v61 = vadd.f32 %v6622_v62, %v2421_v4  ;;  %v2423_v7 = vpop.f32.mrb[2].mxu0 }
 0x210   :  { %v2574_v40 = vmax.f32 %v2542_v46, 0.0  ;;  %v2425_v25 = vpop.f32.mrb[3].mxu0  ;;  %v6773_v46 = vadd.f32 %v6620_v31, %v2423_v7  ;;  %v6915_v9 = vmax.f32 %v2604_v41, %v3475_v26 }
 0x211   :  { %v2575_v1 = vmax.f32 %v2543_v61, 0.0  ;;  %v2634_v61 = vrot.slane %v2598_v44, 1  ;;  %2964 = vmatpush1.bf16.msra.mxu1 %v5305_v42 }
 0x212   :  { %v2622_v2 = vrot.slane %v2574_v40, 1  ;;  %2965 = vmatprep.subr.bf16.mxu1 %v7648_v63 }
 0x213   :  { %v2623_v11 = vrot.slane %v2575_v1, 1  ;;  %v6809_v37 = vmax.f32 %v2598_v44, %v2634_v61 }
 0x214   :  { %v6753_v45 = vmax.f32 %v2574_v40, %v2622_v2  ;;  %v2600_v40 = vmax.f32 %v6665_v54, 0.0 }
 0x215   :  { %v6758_v3 = vmax.f32 %v2575_v1, %v2623_v11  ;;  %v2429_v21 = vpop.f32.mrb[4].mxu0  ;;  %v2635_v1 = vrot.slane %v2599_v58, 1  ;;  %v2637_v11 = vrot.slane %v2603_v19, 1 }
 0x216   :  { %v2546_v20 = vadd.f32 %v6620_v31, %v2429_v21  ;;  %v2431_v47 = vpop.f32.mrb[5].mxu0 }
 0x217   :  { %v2547_v38 = vadd.f32 %v6622_v62, %v2431_v47  ;;  %v2433_v53 = vpop.f32.mrb[6].mxu0  ;;  %v5004_v15 = vpack.i.bf16 %v6758_v3, %v6753_v45  ;;  %v2545_v47 = vadd.f32 %v6622_v62, %v2425_v25 }
 0x218   :  { %v2578_v51 = vmax.f32 %v2546_v20, 0.0  ;;  %v2435_v33 = vpop.f32.mrb[7].mxu0  ;;  %v2548_v50 = vadd.f32 %v6620_v31, %v2433_v53  ;;  %v2576_v20 = vmax.f32 %v6773_v46, 0.0  ;;  %v6795_v53 = vmax.f32 %v2590_v16, %v6712_v43 }
 0x219   :  { %v2579_v4 = vmax.f32 %v2547_v38, 0.0  ;;  %5005 = vrot.lane.b32.xlu0 %v5004_v15, %s5381_s2  ;;  %v2549_v7 = vadd.f32 %v6622_v62, %v2435_v33  ;;  %v6801_v46 = vmax.f32 %v2591_v13, %v6717_v22  ;;  %v2577_v43 = vmax.f32 %v2545_v47, 0.0 }
 0x21a   :  { %v2624_v49 = vrot.slane %v2578_v51, 1  ;;  %v2580_v15 = vmax.f32 %v2548_v50, 0.0  ;;  %v6811_v13 = vmax.f32 %v2599_v58, %v2635_v1  ;;  %v2601_v47 = vmax.f32 %v6674_v34, 0.0  ;;  %v5306_v34 = vld [vmem:[%s7613_s3 + $0x80] sm:$0xff]  }
 0x21b   :  { %v2625_v2 = vrot.slane %v2579_v4, 1  ;;  %v2581_v25 = vmax.f32 %v2549_v7, 0.0  ;;  %v6825_v58 = vmax.f32 %v2602_v10, %v2636_v35  ;;  %v6827_v1 = vmax.f32 %v2603_v19, %v2637_v11  ;;  %2966 = vmatpush1.bf16.msra.mxu1 %v5306_v34 }
 0x21c   :  { %v6785_v21 = vmax.f32 %v2578_v51, %v2624_v49  ;;  %v3463_v22 = vrot.slane %v2580_v15, 1  ;;  %v6845_v35 = vmax.f32 %v2588_v48, %v6701_v59  ;;  %v6850_v11 = vmax.f32 %v2589_v0, %v6708_v23  ;;  %2967 = vmatprep.subr.bf16.mxu1 %v7648_v63  ;;  %v5307_v48 = vld [vmem:[%s7613_s3 + $0x88] sm:$0xff]  }
 0x21d   :  { %v6789_v52 = vmax.f32 %v2579_v4, %v2625_v2  ;;  %v2439_v38 = vpop.f32.mrb[8].mxu0  ;;  %v3474_v6 = vrot.slane %v2601_v47, 1  ;;  %v2605_v0 = vmax.f32 %v6697_v30, 0.0  ;;  %v6871_v59 = vmax.f32 %v2592_v56, %v6738_v8  ;;  %v5308_v8 = vld [vmem:[%s7613_s3 + $0x90] sm:$0xff]  }
 0x21e   :  { %v2550_v33 = vadd.f32 %v6620_v31, %v2439_v38  ;;  %v2441_v51 = vpop.f32.mrb[9].mxu0  ;;  %v6876_v23 = vmax.f32 %v2593_v32, %v6742_v17  ;;  %v7700_v17 = vmax.f32 %v6645_v36, 0.0 }
 0x21f   :  { %v2551_v4 = vadd.f32 %v6622_v62, %v2441_v51  ;;  %v2443_v49 = vpop.f32.mrb[10].mxu0  ;;  %v5009_v42 = vpack.i.bf16 %v6789_v52, %v6785_v21  ;;  %v3464_v51 = vrot.slane %v2581_v25, 1  ;;  %2968 = vmatpush1.bf16.msra.mxu1 %v5307_v48  ;;  %v3476_v56 = vrot.slane %v2605_v0, 1 }
 0x220   :  { %v2582_v2 = vmax.f32 %v2550_v33, 0.0  ;;  %v2552_v55 = vadd.f32 %v6620_v31, %v2443_v49  ;;  %v2445_v16 = vpop.f32.mrb[11].mxu0  ;;  %v5014_v33 = vpack.i.bf16 %v6801_v46, %v6795_v53  ;;  %v3473_v31 = vrot.slane %v2600_v40, 1  ;;  %2969 = vmatprep.subr.bf16.mxu1 %v7648_v63 }
 0x221   :  { %v2583_v50 = vmax.f32 %v2551_v4, 0.0  ;;  %v2553_v38 = vadd.f32 %v6622_v62, %v2445_v16  ;;  %5010 = vrot.lane.b32.xlu0 %v5009_v42, %s5381_s2  ;;  %v3461_v49 = vrot.slane %v2576_v20, 1  ;;  %v5024_v42 = vpack.i.bf16 %v6811_v13, %v6809_v37 }
 0x222   :  { %v2626_v7 = vrot.slane %v2582_v2, 1  ;;  %v2584_v44 = vmax.f32 %v2552_v55, 0.0  ;;  %v6836_v55 = vmax.f32 %v2581_v25, %v3464_v51  ;;  %v5054_v32 = vpack.i.bf16 %v6876_v23, %v6871_v59 }
 0x223   :  { %v2627_v5 = vrot.slane %v2583_v50, 1  ;;  %v2585_v61 = vmax.f32 %v2553_v38, 0.0  ;;  %v6902_v38 = vmax.f32 %v7700_v17, %v6770_v60  ;;  %v6908_v14 = vmax.f32 %v2601_v47, %v3474_v6  ;;  %2970 = vmatpush1.bf16.msra.mxu1 %v5308_v8 }
 0x224   :  { %v6818_v4 = vmax.f32 %v2582_v2, %v2626_v7  ;;  %v6834_v2 = vmax.f32 %v2580_v15, %v3463_v22  ;;  %v3465_v10 = vrot.slane %v2584_v44, 1  ;;  %v6853_v15 = vmax.f32 %v2576_v20, %v3461_v49  ;;  %2971 = vmatprep.subr.bf16.mxu1 %v7648_v63  ;;  %v5309_v7 = vld [vmem:[%s7613_s3 + $0x98] sm:$0x3f]  }
 0x225   :  { %v6820_v62 = vmax.f32 %v2583_v50, %v2627_v5  ;;  %5015 = vrot.lane.b32.xlu0 %v5014_v33, %s5381_s2  ;;  %v3462_v5 = vrot.slane %v2577_v43, 1  ;;  %v3466_v19 = vrot.slane %v2585_v61, 1  ;;  %v5034_v50 = vpack.i.bf16 %v6827_v1, %v6825_v58 }
 0x226   :  { %v5039_v16 = vpack.i.bf16 %v6836_v55, %v6834_v2  ;;  %v6878_v20 = vmax.f32 %v2584_v44, %v3465_v10  ;;  %v6906_v22 = vmax.f32 %v2600_v40, %v3473_v31  ;;  %v6917_v36 = vmax.f32 %v2605_v0, %v3476_v56 }
 0x227   :  { %v5029_v18 = vpack.i.bf16 %v6820_v62, %v6818_v4  ;;  %v6855_v25 = vmax.f32 %v2577_v43, %v3462_v5  ;;  %v6880_v12 = vmax.f32 %v2585_v61, %v3466_v19  ;;  %v5049_v43 = vpack.i.bf16 %v6850_v11, %v6845_v35 }
 0x228   :  { %v5069_v54 = vpack.i.bf16 %v6908_v14, %v6906_v22  ;;  %v5064_v60 = vpack.i.bf16 %v6902_v38, %v6892_v57  ;;  %v5074_v40 = vpack.i.bf16 %v6917_v36, %v6915_v9  ;;  %v2951_v51 = vsel %vm2949_vm14, %v5309_v7, 0 }
 0x229   :  { %5025 = vrot.lane.b32.xlu0 %v5024_v42, %s5381_s2  ;;  %5030 = vrot.lane.b32.xlu1 %v5029_v18, %s5381_s2  ;;  %v5044_v30 = vpack.i.bf16 %v6855_v25, %v6853_v15  ;;  %v5059_v27 = vpack.i.bf16 %v6880_v12, %v6878_v20 }
 0x22a   :  { %2972 = vmatpush1.bf16.msra.mxu1 %v2951_v51 }
 0x22b   :  { %3089 = vmatprep.subr.bf16.mxu1 %v7648_v63 }
 0x22d   :  { %5040 = vrot.lane.b32.xlu0 %v5039_v16, %s5381_s2  ;;  %5035 = vrot.lane.b32.xlu1 %v5034_v50, %s5381_s2 }
 0x231   :  { %5045 = vrot.lane.b32.xlu0 %v5044_v30, %s5381_s2  ;;  %5050 = vrot.lane.b32.xlu1 %v5049_v43, %s5381_s2 }
 0x235   :  { %5055 = vrot.lane.b32.xlu0 %v5054_v32, %s5381_s2  ;;  %5060 = vrot.lane.b32.xlu1 %v5059_v27, %s5381_s2 }
 0x239   :  { %5070 = vrot.lane.b32.xlu0 %v5069_v54, %s5381_s2  ;;  %5065 = vrot.lane.b32.xlu1 %v5064_v60, %s5381_s2 }
 0x23d   :  { %5075 = vrot.lane.b32.xlu1 %v5074_v40, %s5381_s2 }
 0x265   :  { %v5001_v33 = vpop.permute.xlu1 %5000 }
 0x266   :  { %v5003_v61 = vunpack.i.h.bf16 %v5001_v33  ;;  %v5002_v49 = vunpack.i.l.bf16 %v5001_v33 }
 0x268   :  { %v2750_v19 = vmax.f32 %v6628_v28, %v5003_v61  ;;  %v2722_v16 = vsel %vm2718_vm15, %v5002_v49, %v5003_v61 }
 0x269   :  { %v2749_v30 = vmax.f32 %v6626_v39, %v2722_v16 }
 0x26a   :  { %v2766_v56 = vpack.c.bf16 %v2750_v19, %v2750_v19 }
 0x26b   :  { %v2765_v60 = vpack.c.bf16 %v2749_v30, %v2749_v30 }
 0x26c   :  { %v6949_v7 = vunpack.c.l.b16 %v2766_v56 }
 0x26e   :  { %v2873_v19 = vrot.slane %v6949_v7, 7 }
 0x275   :  { %v5021_v42 = vpop.permute.xlu1 %5020 }
 0x276   :  { %v5023_v18 = vunpack.i.h.bf16 %v5021_v42  ;;  %v5022_v10 = vunpack.i.l.bf16 %v5021_v42 }
 0x278   :  { %v2754_v43 = vmax.f32 %v6650_v29, %v5023_v18 }
 0x27a   :  { %v2770_v39 = vpack.c.bf16 %v2754_v43, %v2754_v43 }
 0x27c   :  { %v6959_v49 = vunpack.c.l.b16 %v2770_v39 }
 0x28b   :  { %v5006_v31 = vpop.permute.xlu0 %5005 }
 0x28c   :  { %v5008_v47 = vunpack.i.h.bf16 %v5006_v31  ;;  %v5007_v44 = vunpack.i.l.bf16 %v5006_v31 }
 0x28e   :  { %v2744_v34 = vmax.f32 %v6758_v3, %v5008_v47  ;;  %v2719_v5 = vsel %vm2718_vm15, %v5007_v44, %v5008_v47  ;;  %v2724_v3 = vsel %vm2718_vm15, %v5022_v10, %v5023_v18 }
 0x28f   :  { %v2743_v50 = vmax.f32 %v6753_v45, %v2719_v5  ;;  %v2753_v54 = vmax.f32 %v6647_v24, %v2724_v3  ;;  %v6957_v24 = vunpack.c.l.b16 %v2765_v60 }
 0x290   :  { %v2760_v48 = vpack.c.bf16 %v2744_v34, %v2744_v34 }
 0x291   :  { %v2759_v32 = vpack.c.bf16 %v2743_v50, %v2743_v50 }
 0x292   :  { %v6943_v17 = vunpack.c.l.b16 %v2760_v48 }
 0x293   :  { %v5011_v6 = vpop.permute.xlu0 %5010 }
 0x294   :  { %v5013_v41 = vunpack.i.h.bf16 %v5011_v6  ;;  %v5012_v0 = vunpack.i.l.bf16 %v5011_v6  ;;  %v3322_v33 = vrot.slane %v6943_v17, 6 }
 0x296   :  { %v2746_v26 = vmax.f32 %v6789_v52, %v5013_v41  ;;  %v2720_v28 = vsel %vm2718_vm15, %v5012_v0, %v5013_v41  ;;  %v6951_v52 = vunpack.c.l.b16 %v2759_v32 }
 0x297   :  { %v5016_v8 = vpop.permute.xlu0 %5015  ;;  %v2745_v27 = vmax.f32 %v6785_v21, %v2720_v28  ;;  %v2769_v21 = vpack.c.bf16 %v2753_v54, %v2753_v54 }
 0x298   :  { %v2762_v45 = vpack.c.bf16 %v2746_v26, %v2746_v26  ;;  %v5018_v47 = vunpack.i.h.bf16 %v5016_v8  ;;  %v5017_v44 = vunpack.i.l.bf16 %v5016_v8  ;;  %v3150_v34 = vrot.slane %v6951_v52, 4 }
 0x299   :  { %v2761_v29 = vpack.c.bf16 %v2745_v27, %v2745_v27  ;;  %v3308_v5 = vrot.slane %v6951_v52, 6  ;;  %v6972_v48 = vunpack.c.l.b16 %v2769_v21  ;;  %v2854_v26 = vrot.slane %v6957_v24, 7 }
 0x29a   :  { %v6947_v40 = vunpack.c.l.b16 %v2762_v45  ;;  %v2752_v16 = vmax.f32 %v6801_v46, %v5018_v47  ;;  %v2723_v50 = vsel %vm2718_vm15, %v5017_v44, %v5018_v47  ;;  %v2877_v8 = vrot.slane %v6959_v49, 5 }
 0x29b   :  { %v5026_v51 = vpop.permute.xlu0 %5025  ;;  %v6955_v61 = vunpack.c.l.b16 %v2761_v29  ;;  %v5031_v30 = vpop.permute.xlu1 %5030  ;;  %v2751_v45 = vmax.f32 %v6795_v53, %v2723_v50 }
 0x29c   :  { %v3323_v31 = vrot.slane %v6947_v40, 5  ;;  %v5028_v56 = vunpack.i.h.bf16 %v5026_v51  ;;  %v5027_v46 = vunpack.i.l.bf16 %v5026_v51  ;;  %v2768_v60 = vpack.c.bf16 %v2752_v16, %v2752_v16 }
 0x29d   :  { %v3151_v18 = vrot.slane %v6955_v61, 3  ;;  %v3309_v10 = vrot.slane %v6955_v61, 5  ;;  %v5033_v39 = vunpack.i.h.bf16 %v5031_v30 }
 0x29e   :  { %v6962_v42 = vsel %vm2850_vm0, %v3323_v31, %v3322_v33  ;;  %v5032_v33 = vunpack.i.l.bf16 %v5031_v30  ;;  %v2725_v21 = vsel %vm2718_vm15, %v5027_v46, %v5028_v56  ;;  %v2870_v30 = vrot.slane %v6947_v40, 1 }
 0x29f   :  { %v6975_v41 = vsel %vm2850_vm0, %v3151_v18, %v3150_v34  ;;  %v6978_v0 = vsel %vm2850_vm0, %v3309_v10, %v3308_v5  ;;  %v5041_v43 = vpop.permute.xlu0 %5040  ;;  %v2748_v53 = vmax.f32 %v6820_v62, %v5033_v39  ;;  %v2869_v34 = vrot.slane %v6943_v17, 2  ;;  %v5036_v16 = vpop.permute.xlu1 %5035 }
 0x2a0   :  { %v5043_v31 = vunpack.i.h.bf16 %v5041_v43  ;;  %v5042_v51 = vunpack.i.l.bf16 %v5041_v43  ;;  %v2848_v5 = vrot.slane %v6951_v52, 2  ;;  %v3007_v18 = vrot.slane %v6947_v40, 7 }
 0x2a1   :  { %v2767_v10 = vpack.c.bf16 %v2751_v45, %v2751_v45  ;;  %v6997_v43 = vunpack.c.l.b16 %v2768_v60  ;;  %v2756_v28 = vmax.f32 %v6811_v13, %v5028_v56  ;;  %v2764_v44 = vpack.c.bf16 %v2748_v53, %v2748_v53 }
 0x2a2   :  { %v2755_v46 = vmax.f32 %v6809_v37, %v2725_v21  ;;  %v2721_v62 = vsel %vm2718_vm15, %v5032_v33, %v5033_v39  ;;  %v3584_v54 = vmax.f32 %v6836_v55, %v5043_v31  ;;  %v3558_v47 = vsel %vm2718_vm15, %v5042_v51, %v5043_v31 }
 0x2a3   :  { %v5046_v50 = vpop.permute.xlu0 %5045  ;;  %v7004_v3 = vunpack.c.l.b16 %v2764_v44  ;;  %v5038_v45 = vunpack.i.h.bf16 %v5036_v16  ;;  %v5037_v32 = vunpack.i.l.bf16 %v5036_v16  ;;  %v3008_v60 = vsel %vm2850_vm0, %v3007_v18, %v6943_v17 }
 0x2a4   :  { %v5048_v63 = vunpack.i.h.bf16 %v5046_v50  ;;  %v2849_v13 = vrot.slane %v6955_v61, 1  ;;  %v7010_v56 = vunpack.c.l.b16 %v2767_v10  ;;  %v2772_v37 = vpack.c.bf16 %v2756_v28, %v2756_v28 }
 0x2a5   :  { %v3325_v55 = vrot.slane %v7004_v3, 4  ;;  %v2747_v39 = vmax.f32 %v6818_v4, %v2721_v62  ;;  %v3583_v33 = vmax.f32 %v6834_v2, %v3558_v47  ;;  %v2875_v51 = vrot.slane %v6997_v43, 6  ;;  %v5051_v62 = vpop.permute.xlu1 %5050 }
 0x2a6   :  { %v2771_v44 = vpack.c.bf16 %v2755_v46, %v2755_v46  ;;  %v3600_v21 = vpack.c.bf16 %v3584_v54, %v3584_v54  ;;  %v2726_v18 = vsel %vm2718_vm15, %v5037_v32, %v5038_v45  ;;  %v3582_v28 = vmax.f32 %v6855_v25, %v5048_v63 }
 0x2a7   :  { %v7019_v53 = vsel %vm2852_vm1, %v3325_v55, %v6962_v42  ;;  %v5047_v10 = vunpack.i.l.bf16 %v5046_v50  ;;  %v2851_v47 = vsel %vm2850_vm0, %v2849_v13, %v2848_v5  ;;  %v7027_v46 = vunpack.c.l.b16 %v2772_v37  ;;  %v5056_v27 = vpop.permute.xlu0 %5055 }
 0x2a8   :  { %v2871_v54 = vsel %vm2850_vm0, %v2870_v30, %v2869_v34  ;;  %v2763_v42 = vpack.c.bf16 %v2747_v39, %v2747_v39  ;;  %v3599_v55 = vpack.c.bf16 %v3583_v33, %v3583_v33  ;;  %v7030_v32 = vunpack.c.l.b16 %v2771_v44 }
 0x2a9   :  { %v3653_v25 = vunpack.c.l.b16 %v3600_v21  ;;  %v2758_v50 = vmax.f32 %v6827_v1, %v5038_v45  ;;  %v2757_v31 = vmax.f32 %v6825_v58, %v2726_v18  ;;  %v3598_v4 = vpack.c.bf16 %v3582_v28, %v3582_v28 }
 0x2aa   :  { %v3557_v16 = vsel %vm2718_vm15, %v5047_v10, %v5048_v63  ;;  %v5053_v29 = vunpack.i.h.bf16 %v5051_v62  ;;  %v5052_v5 = vunpack.i.l.bf16 %v5051_v62  ;;  %v2872_v13 = vsel %vm2852_vm1, %v7004_v3, %v2871_v54 }
 0x2ab   :  { %v3009_v34 = vrot.slane %v7004_v3, 6  ;;  %v3581_v30 = vmax.f32 %v6853_v15, %v3557_v16  ;;  %v5058_v37 = vunpack.i.h.bf16 %v5056_v27  ;;  %v7039_v39 = vunpack.c.l.b16 %v2763_v42  ;;  %v5061_v16 = vpop.permute.xlu1 %5060 }
 0x2ac   :  { %v7041_v33 = vunpack.c.l.b16 %v3599_v55  ;;  %v3651_v1 = vunpack.c.l.b16 %v3598_v4  ;;  %v3560_v58 = vsel %vm2718_vm15, %v5052_v5, %v5053_v29  ;;  %v2879_v45 = vrot.slane %v7027_v46, 4 }
 0x2ad   :  { %v3597_v63 = vpack.c.bf16 %v3581_v30, %v3581_v30  ;;  %v3588_v44 = vmax.f32 %v6850_v11, %v5053_v29  ;;  %v3590_v21 = vmax.f32 %v6876_v23, %v5058_v37  ;;  %v3997_v18 = vrot.slane %v3653_v25, 3 }
 0x2ae   :  { %v2774_v28 = vpack.c.bf16 %v2758_v50, %v2758_v50  ;;  %v3996_v10 = vrot.slane %v3651_v1, 4  ;;  %v3587_v15 = vmax.f32 %v6845_v35, %v3560_v58  ;;  %v2874_v62 = vsel %vm2855_vm2, %v2873_v19, %v2872_v13 }
 0x2af   :  { %v7052_v4 = vsel %vm2852_vm1, %v3009_v34, %v3008_v60  ;;  %v3650_v54 = vunpack.c.l.b16 %v3597_v63  ;;  %v5057_v42 = vunpack.i.l.bf16 %v5056_v27  ;;  %v2853_v11 = vsel %vm2852_vm1, %v7039_v39, %v2851_v47 }
 0x2b0   :  { %v3983_v23 = vrot.slane %v7041_v33, 3  ;;  %v2773_v29 = vpack.c.bf16 %v2757_v31, %v2757_v31  ;;  %v3998_v55 = vsel %vm2850_vm0, %v3997_v18, %v3996_v10  ;;  %v3604_v50 = vpack.c.bf16 %v3588_v44, %v3588_v44 }
 0x2b1   :  { %v3982_v35 = vrot.slane %v3650_v54, 4  ;;  %v3606_v5 = vpack.c.bf16 %v3590_v21, %v3590_v21  ;;  %v5063_v30 = vunpack.i.h.bf16 %v5061_v16  ;;  %v3680_v58 = vrot.slane %v3653_v25, 7 }
 0x2b2   :  { %v7058_v19 = vunpack.c.l.b16 %v2774_v28  ;;  %v3838_v60 = vrot.slane %v3651_v1, 2  ;;  %v3603_v13 = vpack.c.bf16 %v3587_v15, %v3587_v15  ;;  %v7063_v27 = vsel %vm2855_vm2, %v2854_v26, %v2853_v11  ;;  %v5071_v28 = vpop.permute.xlu0 %5070 }
 0x2b3   :  { %v3839_v47 = vrot.slane %v3653_v25, 1  ;;  %v3984_v31 = vsel %vm2850_vm0, %v3983_v23, %v3982_v35  ;;  %v3561_v34 = vsel %vm2718_vm15, %v5057_v42, %v5058_v37  ;;  %v3666_v63 = vrot.slane %v7041_v33, 7  ;;  %v5066_v25 = vpop.permute.xlu1 %5065 }
 0x2b4   :  { %v3825_v44 = vrot.slane %v7041_v33, 1  ;;  %v7069_v21 = vunpack.c.l.b16 %v2773_v29  ;;  %v3681_v18 = vsel %vm2850_vm0, %v3680_v58, %v3651_v1  ;;  %v3657_v10 = vunpack.c.l.b16 %v3604_v50 }
 0x2b5   :  { %v7072_v15 = vunpack.c.l.b16 %v3606_v5  ;;  %v3586_v26 = vmax.f32 %v6880_v12, %v5063_v30  ;;  %v5062_v11 = vunpack.i.l.bf16 %v5061_v16  ;;  %v3667_v23 = vsel %vm2850_vm0, %v3666_v63, %v3650_v54 }
 0x2b6   :  { %v7076_v35 = vunpack.c.l.b16 %v3603_v13  ;;  %v3589_v37 = vmax.f32 %v6871_v59, %v3561_v34  ;;  %v3840_v33 = vsel %vm2850_vm0, %v3839_v47, %v3838_v60  ;;  %v3824_v42 = vrot.slane %v3650_v54, 2 }
 0x2b7   :  { %v3602_v29 = vpack.c.bf16 %v3586_v26, %v3586_v26  ;;  %v3559_v1 = vsel %vm2718_vm15, %v5062_v11, %v5063_v30  ;;  %v5073_v50 = vunpack.i.h.bf16 %v5071_v28  ;;  %v5072_v58 = vunpack.i.l.bf16 %v5071_v28 }
 0x2b8   :  { %v3585_v5 = vmax.f32 %v6878_v20, %v3559_v1  ;;  %v5068_v12 = vunpack.i.h.bf16 %v5066_v25  ;;  %v5067_v16 = vunpack.i.l.bf16 %v5066_v25  ;;  %v3684_v6 = vrot.slane %v3657_v10, 5 }
 0x2b9   :  { %v3842_v2 = vrot.slane %v3657_v10, 7  ;;  %v3844_v13 = vrot.slane %v7072_v15, 6  ;;  %v3655_v63 = vunpack.c.l.b16 %v3602_v29  ;;  %v4001_v59 = vrot.slane %v3657_v10, 1 }
 0x2ba   :  { %v3828_v60 = vrot.slane %v7076_v35, 7  ;;  %v3601_v47 = vpack.c.bf16 %v3585_v5, %v3585_v5  ;;  %v2876_v54 = vsel %vm2858_vm3, %v2875_v51, %v2874_v62  ;;  %v3826_v30 = vsel %vm2850_vm0, %v3825_v44, %v3824_v42 }
 0x2bb   :  { %v3682_v20 = vrot.slane %v3655_v63, 6  ;;  %v3841_v34 = vsel %vm2852_vm1, %v3655_v63, %v3840_v33  ;;  %v3999_v28 = vrot.slane %v3655_v63, 2  ;;  %v3563_v25 = vsel %vm2718_vm15, %v5072_v58, %v5073_v50 }
 0x2bc   :  { %v3843_v26 = vsel %vm2855_vm2, %v3842_v2, %v3841_v34  ;;  %v3654_v11 = vunpack.c.l.b16 %v3601_v47  ;;  %v3562_v10 = vsel %vm2718_vm15, %v5067_v16, %v5068_v12  ;;  %v2878_v62 = vsel %vm2861_vm4, %v2877_v8, %v2876_v54 }
 0x2bd   :  { %v3683_v29 = vsel %vm2852_vm1, %v3682_v20, %v3681_v18  ;;  %v7094_v1 = vsel %vm2858_vm3, %v3844_v13, %v3843_v26  ;;  %v4000_v51 = vsel %vm2852_vm1, %v3999_v28, %v3998_v55  ;;  %v3594_v58 = vmax.f32 %v6908_v14, %v5073_v50 }
 0x2be   :  { %v7101_v44 = vsel %vm2855_vm2, %v3684_v6, %v3683_v29  ;;  %v7104_v2 = vsel %vm2855_vm2, %v4001_v59, %v4000_v51  ;;  %v3668_v33 = vrot.slane %v3654_v11, 6  ;;  %v3827_v42 = vsel %vm2852_vm1, %v3654_v11, %v3826_v30 }
 0x2bf   :  { %v7108_v18 = vsel %vm2855_vm2, %v3828_v60, %v3827_v42  ;;  %v3985_v5 = vrot.slane %v3654_v11, 2  ;;  %v3593_v55 = vmax.f32 %v6906_v22, %v3563_v25  ;;  %v3315_v16 = vrot.slane %v7010_v56, 2  ;;  %v5076_v22 = vpop.permute.xlu1 %5075 }
 0x2c0   :  { %v3017_v8 = vrot.slane %v7027_v46, 2  ;;  %v3605_v6 = vpack.c.bf16 %v3589_v37, %v3589_v37  ;;  %v7115_v13 = vsel %vm2852_vm1, %v3668_v33, %v3667_v23  ;;  %v3592_v59 = vmax.f32 %v6902_v38, %v5068_v12 }
 0x2c1   :  { %v7118_v63 = vsel %vm2852_vm1, %v3985_v5, %v3984_v31  ;;  %v3591_v60 = vmax.f32 %v6892_v57, %v3562_v10  ;;  %v2880_v14 = vsel %vm2864_vm6, %v2879_v45, %v2878_v62  ;;  %v2863_v50 = vrot.slane %v7030_v32, 4 }
 0x2c2   :  { %v2881_v47 = vrot.slane %v7058_v19, 3  ;;  %v7701_v23 = vrot.slane %v7010_v56, 6  ;;  %v7702_v31 = vrot.slane %v6949_v7, 5  ;;  %v2866_v57 = vrot.slane %v7069_v21, 3 }
 0x2c3   :  { %v3610_v12 = vpack.c.bf16 %v3594_v58, %v3594_v58  ;;  %v3609_v54 = vpack.c.bf16 %v3593_v55, %v3593_v55  ;;  %v3019_v45 = vrot.slane %v7058_v19, 1  ;;  %v7703_v20 = vrot.slane %v6972_v48, 5 }
 0x2c4   :  { %v2859_v37 = vsel %vm2858_vm3, %v7701_v23, %v7063_v27  ;;  %v3012_v38 = vsel %vm2855_vm2, %v7702_v31, %v7052_v4  ;;  %v2882_v30 = vsel %vm2867_vm7, %v2881_v47, %v2880_v14  ;;  %v7704_v28 = vrot.slane %v6997_v43, 4 }
 0x2c5   :  { %v2862_v34 = vsel %vm2861_vm4, %v7703_v20, %v2859_v37  ;;  %v5078_v26 = vunpack.i.h.bf16 %v5076_v22  ;;  %v7144_v11 = vunpack.c.l.b16 %v3605_v6  ;;  %v3608_v4 = vpack.c.bf16 %v3592_v59, %v3592_v59  ;;  %v5310_v6 = vld [vmem:[%s7613_s3] sm:$0xff]  }
 0x2c6   :  { %v3014_v27 = vsel %vm2858_vm3, %v7704_v28, %v3012_v38  ;;  %v3607_v25 = vpack.c.bf16 %v3591_v60, %v3591_v60  ;;  %v2884_v10 = vpack.c.b16 %v2882_v30, %v2882_v30  ;;  %v2865_v29 = vsel %vm2864_vm6, %v2863_v50, %v2862_v34 }
 0x2c7   :  { %v7705_v51 = vrot.slane %v6959_v49, 3  ;;  %v3596_v33 = vmax.f32 %v6917_v36, %v5078_v26  ;;  %v5077_v42 = vunpack.i.l.bf16 %v5076_v22  ;;  %v7151_v5 = vunpack.c.l.b16 %v3610_v12 }
 0x2c8   :  { %v7153_v58 = vunpack.c.l.b16 %v3609_v54  ;;  %4652 = vmatprep.mubr.msk.bf16.mxu1 %vm2945_vm8, %v2884_v10  ;;  %v2868_v55 = vsel %vm2867_vm7, %v2866_v57, %v2865_v29  ;;  %v3153_v22 = vrot.slane %v7039_v39, 2  ;;  %v7164_v47 = vunpack.c.l.b16 %v3608_v4 }
 0x2c9   :  { %v3016_v62 = vsel %vm2861_vm4, %v7705_v51, %v3014_v27  ;;  %v2883_v60 = vpack.c.b16 %v2868_v55, %v2868_v55  ;;  %v3612_v50 = vpack.c.bf16 %v3596_v33, %v3596_v33  ;;  %v3564_v36 = vsel %vm2718_vm15, %v5077_v42, %v5078_v26 }
 0x2ca   :  { %v3018_v59 = vsel %vm2864_vm6, %v3017_v8, %v3016_v62  ;;  %v3595_v37 = vmax.f32 %v6915_v9, %v3564_v36  ;;  %v3311_v31 = vrot.slane %v7039_v39, 4  ;;  %v3670_v38 = vrot.slane %v7076_v35, 5  ;;  %v5311_v9 = vld [vmem:[%s7613_s3 + $0x8] sm:$0xff]  }
 0x2cb   :  { %v3020_v14 = vsel %vm2867_vm7, %v3019_v45, %v3018_v59  ;;  %v3987_v57 = vrot.slane %v7076_v35, 1  ;;  %v7170_v8 = vunpack.c.l.b16 %v3607_v25  ;;  %2986 = vmatmul.mubr.bf16.vlgmr.msra.gmra.mrb[20].mxu1 %v2883_v60  ;;  %v3686_v12 = vrot.slane %v7072_v15, 4 }
 0x2cc   :  { %v3022_v23 = vpack.c.b16 %v3020_v14, %v3020_v14  ;;  %v3672_v54 = vrot.slane %v7144_v11, 4  ;;  %v3830_v45 = vrot.slane %v7144_v11, 6  ;;  %v3690_v30 = vrot.slane %v7151_v5, 2  ;;  %3090 = vmatpush1.bf16.msra.mxu1 %v5310_v6  ;;  %v5312_v6 = vld [vmem:[%s7613_s3 + $0x10] sm:$0xff]  }
 0x2cd   :  { %v3848_v20 = vrot.slane %v7151_v5, 4  ;;  %v3676_v28 = vrot.slane %v7153_v58, 2  ;;  %v7183_v27 = vunpack.c.l.b16 %v3612_v50  ;;  %v7706_v26 = vmov 0  }
 0x2ce   :  { %4663 = vmatprep.mubr.msk.bf16.mxu1 %vm2945_vm8, %v3022_v23  ;;  %3091 = vmatprep.subr.bf16.mxu1 %v7706_v26  ;;  %v3834_v4 = vrot.slane %v7153_v58, 4  ;;  %v3688_v25 = vrot.slane %v7164_v47, 3  ;;  %v3611_v10 = vpack.c.bf16 %v3595_v37, %v3595_v37  ;;  %v3154_v29 = vsel %vm2852_vm1, %v3153_v22, %v6975_v41 }
 0x2cf   :  { %v3846_v51 = vrot.slane %v7164_v47, 5  ;;  %v4004_v62 = vrot.slane %v7164_v47, 7  ;;  %v3674_v33 = vrot.slane %v7170_v8, 3  ;;  %v7707_v42 = vrot.slane %v6957_v24, 1 }
 0x2d0   :  { %3092 = vmatpush1.bf16.msra.mxu1 %v5311_v9  ;;  %v3160_v41 = vrot.slane %v7030_v32, 6  ;;  %v3162_v60 = vrot.slane %v7069_v21, 5  ;;  %v7708_v14 = vrot.slane %v6949_v7, 3  ;;  %v3692_v36 = vrot.slane %v7183_v27, 1 }
 0x2d1   :  { %v3156_v55 = vsel %vm2855_vm2, %v7707_v42, %v3154_v29  ;;  %3093 = vmatprep.subr.bf16.mxu1 %v7706_v26  ;;  %v7709_v22 = vrot.slane %v6972_v48, 7  ;;  %v7710_v23 = vrot.slane %v6997_v43, 2  ;;  %v3334_v9 = vrot.slane %v7058_v19, 7 }
 0x2d2   :  { %v3157_v59 = vsel %vm2858_vm3, %v7010_v56, %v3156_v55  ;;  %v3328_v50 = vsel %vm2855_vm2, %v7708_v14, %v7019_v53  ;;  %v3664_v29 = vunpack.c.l.b16 %v3611_v10  ;;  %v7711_v55 = vrot.slane %v6959_v49, 1 }
 0x2d3   :  { %v3159_v47 = vsel %vm2861_vm4, %v7709_v22, %v3157_v59  ;;  %v3330_v37 = vsel %vm2858_vm3, %v7710_v23, %v3328_v50  ;;  %v3312_v14 = vsel %vm2852_vm1, %v3311_v31, %v6978_v0  ;;  %v7712_v50 = vrot.slane %v6957_v24, 3 }
 0x2d4   :  { %v3161_v42 = vsel %vm2864_vm6, %v3160_v41, %v3159_v47  ;;  %v3332_v53 = vsel %vm2861_vm4, %v7711_v55, %v3330_v37  ;;  %v3320_v10 = vrot.slane %v7069_v21, 7  ;;  %v3832_v41 = vrot.slane %v7170_v8, 5  ;;  %3094 = vmatpush1.bf16.msra.mxu1 %v5312_v6  ;;  %v5313_v47 = vld [vmem:[%s7613_s3 + $0x18] sm:$0xff]  }
 0x2d5   :  { %v7223_v34 = vsel %vm2867_vm7, %v3162_v60, %v3161_v42  ;;  %v3333_v59 = vsel %vm2864_vm6, %v7027_v46, %v3332_v53  ;;  %v3314_v22 = vsel %vm2855_vm2, %v7712_v50, %v3312_v14  ;;  %v3687_v60 = vsel %vm2858_vm3, %v3686_v12, %v7101_v44  ;;  %3095 = vmatprep.subr.bf16.mxu1 %v7706_v26 }
 0x2d6   :  { %v7236_v0 = vsel %vm2867_vm7, %v3334_v9, %v3333_v59  ;;  %v3316_v31 = vsel %vm2858_vm3, %v3315_v16, %v3314_v22  ;;  %v3850_v23 = vrot.slane %v7183_v27, 3  ;;  %v7713_v6 = vrot.slane %v6972_v48, 1 }
 0x2d7   :  { %v3689_v42 = vsel %vm2861_vm4, %v3688_v25, %v3687_v60  ;;  %v3671_v9 = vsel %vm2855_vm2, %v3670_v38, %v7115_v13  ;;  %v3678_v12 = vrot.slane %v3664_v29, 1  ;;  %v3847_v25 = vsel %vm2861_vm4, %v3846_v51, %v7094_v1 }
 0x2d8   :  { %v3318_v37 = vsel %vm2861_vm4, %v7713_v6, %v3316_v31  ;;  %v3691_v16 = vsel %vm2864_vm6, %v3690_v30, %v3689_v42  ;;  %v3673_v44 = vsel %vm2858_vm3, %v3672_v54, %v3671_v9  ;;  %v3990_v13 = vrot.slane %v7170_v8, 7  ;;  %3096 = vmatpush1.bf16.msra.mxu1 %v5313_v47  ;;  %v5314_v54 = vld [vmem:[%s7613_s3 + $0x20] sm:$0xff]  }
 0x2d9   :  { %v3319_v55 = vsel %vm2864_vm6, %v7030_v32, %v3318_v37  ;;  %v7259_v14 = vsel %vm2867_vm7, %v3692_v36, %v3691_v16  ;;  %v3675_v59 = vsel %vm2861_vm4, %v3674_v33, %v3673_v44  ;;  %v4008_v38 = vrot.slane %v7183_v27, 5  ;;  %3097 = vmatprep.subr.bf16.mxu1 %v7706_v26  ;;  %v5319_v16 = vld [vmem:[%s7613_s3 + $0x48] sm:$0x3f]  }
 0x2da   :  { %v7256_v53 = vsel %vm2867_vm7, %v3320_v10, %v3319_v55  ;;  %v3677_v30 = vsel %vm2864_vm6, %v3676_v28, %v3675_v59  ;;  %v3849_v50 = vsel %vm2864_vm6, %v3848_v20, %v3847_v25  ;;  %v3831_v8 = vsel %vm2858_vm3, %v3830_v45, %v7108_v18 }
 0x2db   :  { %v7273_v33 = vsel %vm2867_vm7, %v3678_v12, %v3677_v30  ;;  %v7276_v1 = vsel %vm2867_vm7, %v3850_v23, %v3849_v50  ;;  %v3836_v27 = vrot.slane %v3664_v29, 3  ;;  %v2995_v51 = vrot.slane %v7039_v39, 6  ;;  %v5322_v30 = vld [vmem:[%s7613_s3 + $0xb0] sm:$0xff]   ;;  %v5323_v50 = vld [vmem:[%s7613_s3 + $0xb8] sm:$0xff]  }
 0x2dc   :  { %v3992_v28 = vrot.slane %v7153_v58, 6  ;;  %v3833_v20 = vsel %vm2861_vm4, %v3832_v41, %v3831_v8  ;;  %v4003_v36 = vsel %vm2858_vm3, %v7072_v15, %v7104_v2  ;;  %v3988_v18 = vsel %vm2855_vm2, %v3987_v57, %v7118_v63  ;;  %3098 = vmatpush1.bf16.msra.mxu1 %v5314_v54  ;;  %v5315_v58 = vld [vmem:[%s7613_s3 + $0x28] sm:$0xff]   ;;  %v5324_v8 = vld [vmem:[%s7613_s3 + $0xc0] sm:$0xff]  }
 0x2dd   :  { %v3835_v22 = vsel %vm2864_vm6, %v3834_v4, %v3833_v20  ;;  %v4005_v10 = vsel %vm2861_vm4, %v4004_v62, %v4003_v36  ;;  %v3994_v45 = vrot.slane %v3664_v29, 5  ;;  %v3167_v39 = vrot.slane %v7004_v3, 2  ;;  %3099 = vmatprep.subr.bf16.mxu1 %v7706_v26  ;;  %v5321_v54 = vld [vmem:[%s7613_s3 + $0xa8] sm:$0xff]   ;;  %v5328_v20 = vld [vmem:[%s7613_s3 + $0xe0] sm:$0xff]  }
 0x2de   :  { %v7299_v41 = vsel %vm2867_vm7, %v3836_v27, %v3835_v22  ;;  %v7714_v15 = vrot.slane %v7151_v5, 6  ;;  %v3989_v35 = vsel %vm2858_vm3, %v7144_v11, %v3988_v18  ;;  %v3164_v63 = vrot.slane %v6943_v17, 4  ;;  %v5325_v27 = vld [vmem:[%s7613_s3 + $0xc8] sm:$0xff]  }
 0x2df   :  { %v3991_v57 = vsel %vm2861_vm4, %v3990_v13, %v3989_v35  ;;  %v7715_v4 = vrot.slane %v6955_v61, 7  ;;  %v7716_v29 = vrot.slane %v6947_v40, 3  ;;  %v2997_v31 = vrot.slane %v6957_v24, 5  ;;  %v5317_v24 = vld [vmem:[%s7613_s3 + $0x38] sm:$0xff]   ;;  %v5329_v36 = vld [vmem:[%s7613_s3 + $0xe8] sm:$0x3f]  }
 0x2e0   :  { %v4007_v2 = vsel %vm2864_vm6, %v7714_v15, %v4005_v10  ;;  %v3993_v5 = vsel %vm2864_vm6, %v3992_v28, %v3991_v57  ;;  %3100 = vmatpush1.bf16.msra.mxu1 %v5315_v58  ;;  %v3169_v61 = vrot.slane %v6949_v7, 1  ;;  %v2999_v23 = vrot.slane %v7010_v56, 4  ;;  %v5318_v56 = vld [vmem:[%s7613_s3 + $0x40] sm:$0xff]   ;;  %v5327_v28 = vld [vmem:[%s7613_s3 + $0xd8] sm:$0xff]   ;;  %v5330_v10 = vld [vmem:[%s7613_s3 + $0xf0] sm:$0xff]  }
 0x2e1   :  { %v7309_v3 = vsel %vm2867_vm7, %v4008_v38, %v4007_v2  ;;  %v2994_v62 = vsel %vm2850_vm0, %v7715_v4, %v6951_v52  ;;  %v3166_v11 = vsel %vm2850_vm0, %v7716_v29, %v3164_v63  ;;  %v7322_v47 = vsel %vm2867_vm7, %v3994_v45, %v3993_v5  ;;  %v5316_v52 = vld [vmem:[%s7613_s3 + $0x30] sm:$0xff]   ;;  %3101 = vmatprep.subr.bf16.mxu1 %v7706_v26  ;;  %v5335_v15 = vld [vmem:[%s7613_s3 + $0x118] sm:$0xff]   ;;  %v5336_v2 = vld [vmem:[%s7613_s3 + $0x120] sm:$0xff]  }
 0x2e2   :  { %v2996_v17 = vsel %vm2852_vm1, %v2995_v51, %v2994_v62  ;;  %v3168_v60 = vsel %vm2852_vm1, %v3167_v39, %v3166_v11  ;;  %v3001_v42 = vrot.slane %v6972_v48, 3  ;;  %v3172_v9 = vrot.slane %v6959_v49, 7  ;;  %v5326_v51 = vld [vmem:[%s7613_s3 + $0xd0] sm:$0xff]   ;;  %v5331_v39 = vld [vmem:[%s7613_s3 + $0xf8] sm:$0xff]   ;;  %v5337_v35 = vld [vmem:[%s7613_s3 + $0x128] sm:$0xff]  }
 0x2e3   :  { %v2998_v40 = vsel %vm2855_vm2, %v2997_v31, %v2996_v17  ;;  %v3170_v6 = vsel %vm2855_vm2, %v3169_v61, %v3168_v60  ;;  %v3003_v48 = vrot.slane %v7030_v32, 2  ;;  %v3005_v49 = vrot.slane %v7069_v21, 1  ;;  %v5334_v58 = vld [vmem:[%s7613_s3 + $0x110] sm:$0xff]   ;;  %v5339_v57 = vld [vmem:[%s7613_s3 + $0x138] sm:$0x3f]   ;;  %v5340_v62 = vld [vmem:[%s7613_s3 + $0x140] sm:$0xff]  }
 0x2e4   :  { %3102 = vmatpush1.bf16.msra.mxu1 %v5316_v52  ;;  %v3000_v37 = vsel %vm2858_vm3, %v2999_v23, %v2998_v40  ;;  %v3171_v7 = vsel %vm2858_vm3, %v6997_v43, %v3170_v6  ;;  %v3174_v43 = vrot.slane %v7027_v46, 6  ;;  %v3176_v59 = vrot.slane %v7058_v19, 5  ;;  %v5320_v46 = vld [vmem:[%s7613_s3 + $0xa0] sm:$0xff]   ;;  %v5338_v63 = vld [vmem:[%s7613_s3 + $0x130] sm:$0xff]   ;;  %v5341_v11 = vld [vmem:[%s7613_s3 + $0x148] sm:$0xff]  }
 0x2e5   :  { %3103 = vmatprep.subr.bf16.mxu1 %v7706_v26  ;;  %v3002_v55 = vsel %vm2861_vm4, %v3001_v42, %v3000_v37  ;;  %v3173_v44 = vsel %vm2861_vm4, %v3172_v9, %v3171_v7  ;;  %v3087_v13 = vsel %vm2949_vm14, %v5319_v16, 0  ;;  %v3244_v22 = vsel %vm2949_vm14, %v5329_v36, 0  ;;  %v5344_v17 = vld [vmem:[%s7613_s3 + $0x160] sm:$0xff]   ;;  %v5345_v31 = vld [vmem:[%s7613_s3 + $0x168] sm:$0xff]   ;;  %v5346_v60 = vld [vmem:[%s7613_s3 + $0x170] sm:$0xff]  }
 0x2e6   :  { %v3004_v12 = vsel %vm2864_vm6, %v3003_v48, %v3002_v55  ;;  %v3175_v25 = vsel %vm2864_vm6, %v3174_v43, %v3173_v44  ;;  %v3178_v18 = vpack.c.b16 %v7223_v34, %v7223_v34  ;;  %v3337_v45 = vpack.c.b16 %v7236_v0, %v7236_v0  ;;  %v5332_v34 = vld [vmem:[%s7613_s3 + $0x100] sm:$0xff]   ;;  %v5333_v0 = vld [vmem:[%s7613_s3 + $0x108] sm:$0xff]   ;;  %v5347_v52 = vld [vmem:[%s7613_s3 + $0x178] sm:$0xff]  }
 0x2e7   :  { %v3006_v38 = vsel %vm2867_vm7, %v3005_v49, %v3004_v12  ;;  %v3177_v32 = vsel %vm2867_vm7, %v3176_v59, %v3175_v25  ;;  %v3402_v4 = vsel %vm2949_vm14, %v5339_v57, 0  ;;  %v3336_v5 = vpack.c.b16 %v7256_v53, %v7256_v53  ;;  %v5342_v53 = vld [vmem:[%s7613_s3 + $0x150] sm:$0xff]   ;;  %v5348_v61 = vld [vmem:[%s7613_s3 + $0x180] sm:$0xff]   ;;  %v5349_v40 = vld [vmem:[%s7613_s3 + $0x188] sm:$0x3f]  }
 0x2e8   :  { %3104 = vmatpush1.bf16.msra.mxu1 %v5317_v24  ;;  %v3021_v21 = vpack.c.b16 %v3006_v38, %v3006_v38  ;;  %v3179_v19 = vpack.c.b16 %v3177_v32, %v3177_v32  ;;  %v3695_v29 = vpack.c.b16 %v7259_v14, %v7259_v14  ;;  %v5343_v14 = vld [vmem:[%s7613_s3 + $0x158] sm:$0xff]   ;;  %v3760_v23 = vsel %vm2949_vm14, %v5349_v40, 0  ;;  %v5350_v6 = vld [vmem:[%s7613_s3 + $0x190] sm:$0xff]   ;;  %v5357_v55 = vld [vmem:[%s7613_s3 + $0x1c8] sm:$0xff]  }
 0x2e9   :  { %3105 = vmatprep.subr.bf16.mxu1 %v7706_v26  ;;  %v3694_v24 = vpack.c.b16 %v7273_v33, %v7273_v33  ;;  %v3853_v37 = vpack.c.b16 %v7276_v1, %v7276_v1  ;;  %v5351_v42 = vld [vmem:[%s7613_s3 + $0x198] sm:$0xff]   ;;  %v5352_v33 = vld [vmem:[%s7613_s3 + $0x1a0] sm:$0xff]   ;;  %v5353_v1 = vld [vmem:[%s7613_s3 + $0x1a8] sm:$0xff]   ;;  %v3852_v49 = vpack.c.b16 %v7299_v41, %v7299_v41  ;;  %v4011_v12 = vpack.c.b16 %v7309_v3, %v7309_v3 }
 0x2ea   :  { %v5354_v7 = vld [vmem:[%s7613_s3 + $0x1b0] sm:$0xff]   ;;  %v5355_v9 = vld [vmem:[%s7613_s3 + $0x1b8] sm:$0xff]   ;;  %v5360_v43 = vld [vmem:[%s7613_s3 + $0x1e0] sm:$0xff]  }
 0x2eb   :  { %v5358_v16 = vld [vmem:[%s7613_s3 + $0x1d0] sm:$0xff]   ;;  %v5359_v48 = vld [vmem:[%s7613_s3 + $0x1d8] sm:$0x3f]   ;;  %v5361_v59 = vld [vmem:[%s7613_s3 + $0x1e8] sm:$0xff]  }
 0x2ec   :  { %3106 = vmatpush1.bf16.msra.mxu1 %v5318_v56  ;;  %v5356_v56 = vld [vmem:[%s7613_s3 + $0x1c0] sm:$0xff]   ;;  %v3918_v44 = vsel %vm2949_vm14, %v5359_v48, 0  ;;  %v5362_v41 = vld [vmem:[%s7613_s3 + $0x1f0] sm:$0xff]   ;;  %v5363_v3 = vld [vmem:[%s7613_s3 + $0x1f8] sm:$0xff]  }
 0x2ed   :  { %3107 = vmatprep.subr.bf16.mxu1 %v7706_v26  ;;  %v5364_v32 = vld [vmem:[%s7613_s3 + $0x200] sm:$0xff]  }
 0x2ee   :  { %v4819_v40 = vld [vmem:[%s7615_s4] ss:$0 sm:$0xff] }
 0x2f0   :  { %3108 = vmatpush1.bf16.msra.mxu1 %v3087_v13 }
 0x2f1   :  { %3246 = vmatprep.subr.bf16.mxu1 %v7706_v26 }
 0x2f3   :  { %3122 = vmatmul.mubr.bf16.vlgmr.msra.gmra.mrb[24].mxu1 %v3021_v21  ;;  %v5365_v21 = vld [vmem:[%s7613_s3 + $0x208] sm:$0xff]  }
 0x2f4   :  { %3247 = vmatpush1.bf16.msra.mxu1 %v5320_v46  ;;  %4694 = vmatprep.mubr.msk.bf16.mxu1 %vm2945_vm8, %v3179_v19  ;;  %v5366_v19 = vld [vmem:[%s7613_s3 + $0x210] sm:$0xff]  }
 0x2f5   :  { %3248 = vmatprep.subr.bf16.mxu1 %v7706_v26 }
 0x2f8   :  { %3249 = vmatpush1.bf16.msra.mxu1 %v5321_v54  ;;  %v5367_v54 = vld [vmem:[%s7613_s3 + $0x218] sm:$0xff]  }
 0x2f9   :  { %3250 = vmatprep.subr.bf16.mxu1 %v7706_v26 }
 0x2fc   :  { %3251 = vmatpush1.bf16.msra.mxu1 %v5322_v30  ;;  %v5368_v30 = vld [vmem:[%s7613_s3 + $0x220] sm:$0xff]  }
 0x2fd   :  { %3252 = vmatprep.subr.bf16.mxu1 %v7706_v26 }
 0x300   :  { %3253 = vmatpush1.bf16.msra.mxu1 %v5323_v50  ;;  %v5369_v50 = vld [vmem:[%s7613_s3 + $0x228] sm:$0x3f]  }
 0x301   :  { %3254 = vmatprep.subr.bf16.mxu1 %v7706_v26 }
 0x304   :  { %3255 = vmatpush1.bf16.msra.mxu1 %v5324_v8  ;;  %v4076_v8 = vsel %vm2949_vm14, %v5369_v50, 0 }
 0x305   :  { %3256 = vmatprep.subr.bf16.mxu1 %v7706_v26 }
 0x308   :  { %3257 = vmatpush1.bf16.msra.mxu1 %v5325_v27  ;;  %v4010_v27 = vpack.c.b16 %v7322_v47, %v7322_v47 }
 0x309   :  { %3258 = vmatprep.subr.bf16.mxu1 %v7706_v26 }
 0x30c   :  { %3259 = vmatpush1.bf16.msra.mxu1 %v5326_v51 }
 0x30d   :  { %3260 = vmatprep.subr.bf16.mxu1 %v7706_v26 }
 0x310   :  { %3261 = vmatpush1.bf16.msra.mxu1 %v5327_v28 }
 0x311   :  { %3262 = vmatprep.subr.bf16.mxu1 %v7706_v26 }
 0x314   :  { %3263 = vmatpush1.bf16.msra.mxu1 %v5328_v20 }
 0x315   :  { %3264 = vmatprep.subr.bf16.mxu1 %v7706_v26 }
 0x318   :  { %3265 = vmatpush1.bf16.msra.mxu1 %v3244_v22 }
 0x319   :  { %3404 = vmatprep.subr.bf16.mxu1 %v7706_v26 }
 0x31b   :  { %3279 = vmatmul.mubr.bf16.vlgmr.msra.gmra.mrb[28].mxu1 %v3178_v18  ;;  %v4128_v18 = vld [vmem:[%s7614_s5] sm:$0xff] }
 0x31c   :  { %3405 = vmatpush1.bf16.msra.mxu1 %v5330_v10  ;;  %4725 = vmatprep.mubr.msk.bf16.mxu1 %vm2945_vm8, %v3337_v45  ;;  %v5383_v10 = vmov 0.0|0.0  }
 0x31d   :  { %3406 = vmatprep.subr.bf16.mxu1 %v7706_v26  ;;  %4833 = vmatprep.subr.bf16.mxu0 %v5383_v10 }
 0x320   :  { %3407 = vmatpush1.bf16.msra.mxu1 %v5331_v39 }
 0x321   :  { %3408 = vmatprep.subr.bf16.mxu1 %v7706_v26 }
 0x324   :  { %3409 = vmatpush1.bf16.msra.mxu1 %v5332_v34 }
 0x325   :  { %3410 = vmatprep.subr.bf16.mxu1 %v7706_v26 }
 0x328   :  { %3411 = vmatpush1.bf16.msra.mxu1 %v5333_v0 }
 0x329   :  { %3412 = vmatprep.subr.bf16.mxu1 %v7706_v26 }
 0x32c   :  { %3413 = vmatpush1.bf16.msra.mxu1 %v5334_v58 }
 0x32d   :  { %3414 = vmatprep.subr.bf16.mxu1 %v7706_v26 }
 0x330   :  { %3415 = vmatpush1.bf16.msra.mxu1 %v5335_v15  ;;  %v5386_v15 = vmov 0.0  }
 0x331   :  { %3416 = vmatprep.subr.bf16.mxu1 %v7706_v26  ;;  %4830 = vmatprep.mubr.msk.f32.mxu0 %vm5385_vm11, %v5386_v15 }
 0x334   :  { %3417 = vmatpush1.bf16.msra.mxu1 %v5336_v2 }
 0x335   :  { %3418 = vmatprep.subr.bf16.mxu1 %v7706_v26 }
 0x338   :  { %3419 = vmatpush1.bf16.msra.mxu1 %v5337_v35 }
 0x339   :  { %3420 = vmatprep.subr.bf16.mxu1 %v7706_v26 }
 0x33c   :  { %3421 = vmatpush1.bf16.msra.mxu1 %v5338_v63 }
 0x33d   :  { %3422 = vmatprep.subr.bf16.mxu1 %v7706_v26 }
 0x340   :  { %3423 = vmatpush1.bf16.msra.mxu1 %v3402_v4 }
 0x341   :  { %3762 = vmatprep.subr.bf16.mxu1 %v7706_v26 }
 0x343   :  { %3437 = vmatmul.mubr.bf16.vlgmr.msra.gmra.mrb[32].mxu1 %v3336_v5 }
 0x344   :  { %3763 = vmatpush1.bf16.msra.mxu1 %v5340_v62  ;;  %4756 = vmatprep.mubr.msk.bf16.mxu1 %vm2945_vm8, %v3695_v29 }
 0x345   :  { %3764 = vmatprep.subr.bf16.mxu1 %v7706_v26 }
 0x348   :  { %3765 = vmatpush1.bf16.msra.mxu1 %v5341_v11 }
 0x349   :  { %3766 = vmatprep.subr.bf16.mxu1 %v7706_v26 }
 0x34c   :  { %3767 = vmatpush1.bf16.msra.mxu1 %v5342_v53 }
 0x34d   :  { %3768 = vmatprep.subr.bf16.mxu1 %v7706_v26 }
 0x350   :  { %3769 = vmatpush1.bf16.msra.mxu1 %v5343_v14 }
 0x351   :  { %3770 = vmatprep.subr.bf16.mxu1 %v7706_v26 }
 0x354   :  { %3771 = vmatpush1.bf16.msra.mxu1 %v5344_v17 }
 0x355   :  { %3772 = vmatprep.subr.bf16.mxu1 %v7706_v26 }
 0x358   :  { %3773 = vmatpush1.bf16.msra.mxu1 %v5345_v31 }
 0x359   :  { %3774 = vmatprep.subr.bf16.mxu1 %v7706_v26 }
 0x35c   :  { %3775 = vmatpush1.bf16.msra.mxu1 %v5346_v60 }
 0x35d   :  { %3776 = vmatprep.subr.bf16.mxu1 %v7706_v26 }
 0x360   :  { %3777 = vmatpush1.bf16.msra.mxu1 %v5347_v52 }
 0x361   :  { %3778 = vmatprep.subr.bf16.mxu1 %v7706_v26 }
 0x364   :  { %3779 = vmatpush1.bf16.msra.mxu1 %v5348_v61 }
 0x365   :  { %3780 = vmatprep.subr.bf16.mxu1 %v7706_v26 }
 0x368   :  { %3781 = vmatpush1.bf16.msra.mxu1 %v3760_v23 }
 0x369   :  { %3920 = vmatprep.subr.bf16.mxu1 %v7706_v26 }
 0x36b   :  { %3795 = vmatmul.mubr.bf16.vlgmr.msra.gmra.mrb[36].mxu1 %v3694_v24 }
 0x36c   :  { %3921 = vmatpush1.bf16.msra.mxu1 %v5350_v6  ;;  %4787 = vmatprep.mubr.msk.bf16.mxu1 %vm2945_vm8, %v3853_v37 }
 0x36d   :  { %3922 = vmatprep.subr.bf16.mxu1 %v7706_v26 }
 0x370   :  { %3923 = vmatpush1.bf16.msra.mxu1 %v5351_v42 }
 0x371   :  { %3924 = vmatprep.subr.bf16.mxu1 %v7706_v26 }
 0x374   :  { %3925 = vmatpush1.bf16.msra.mxu1 %v5352_v33 }
 0x375   :  { %3926 = vmatprep.subr.bf16.mxu1 %v7706_v26 }
 0x378   :  { %3927 = vmatpush1.bf16.msra.mxu1 %v5353_v1  ;;  %v4820_v1 = vld [vmem:[%s7616_s6] ss:$0 sm:$0xff] }
 0x379   :  { %3928 = vmatprep.subr.bf16.mxu1 %v7706_v26 }
 0x37c   :  { %3929 = vmatpush1.bf16.msra.mxu1 %v5354_v7 }
 0x37d   :  { %3930 = vmatprep.subr.bf16.mxu1 %v7706_v26 }
 0x380   :  { %3931 = vmatpush1.bf16.msra.mxu1 %v5355_v9 }
 0x381   :  { %3932 = vmatprep.subr.bf16.mxu1 %v7706_v26 }
 0x384   :  { %3933 = vmatpush1.bf16.msra.mxu1 %v5356_v56 }
 0x385   :  { %3934 = vmatprep.subr.bf16.mxu1 %v7706_v26 }
 0x388   :  { %3935 = vmatpush1.bf16.msra.mxu1 %v5357_v55 }
 0x389   :  { %3936 = vmatprep.subr.bf16.mxu1 %v7706_v26 }
 0x38c   :  { %3937 = vmatpush1.bf16.msra.mxu1 %v5358_v16 }
 0x38d   :  { %3938 = vmatprep.subr.bf16.mxu1 %v7706_v26 }
 0x390   :  { %3939 = vmatpush1.bf16.msra.mxu1 %v3918_v44 }
 0x391   :  { %4078 = vmatprep.subr.bf16.mxu1 %v7706_v26 }
 0x393   :  { %3953 = vmatmul.mubr.bf16.vlgmr.msra.gmra.mrb[40].mxu1 %v3852_v49 }
 0x394   :  { %4079 = vmatpush1.bf16.msra.mxu1 %v5360_v43  ;;  %4818 = vmatprep.mubr.msk.bf16.mxu1 %vm2945_vm8, %v4011_v12 }
 0x395   :  { %4080 = vmatprep.subr.bf16.mxu1 %v7706_v26 }
 0x398   :  { %4081 = vmatpush1.bf16.msra.mxu1 %v5361_v59 }
 0x399   :  { %4082 = vmatprep.subr.bf16.mxu1 %v7706_v26 }
 0x39c   :  { %4083 = vmatpush1.bf16.msra.mxu1 %v5362_v41 }
 0x39d   :  { %4084 = vmatprep.subr.bf16.mxu1 %v7706_v26 }
 0x39e   :  { %v2987_v25 = vpop.f32.mrb[20].mxu1 }
 0x39f   :  { %v2989_v13 = vpop.f32.mrb[21].mxu1 }
 0x3a0   :  { %4085 = vmatpush1.bf16.msra.mxu1 %v5363_v3  ;;  %v2990_v38 = vpop.f32.mrb[22].mxu1 }
 0x3a1   :  { %v2991_v46 = vpop.f32.mrb[23].mxu1  ;;  %4086 = vmatprep.subr.bf16.mxu1 %v7706_v26 }
 0x3a4   :  { %4087 = vmatpush1.bf16.msra.mxu1 %v5364_v32 }
 0x3a5   :  { %4088 = vmatprep.subr.bf16.mxu1 %v7706_v26 }
 0x3a8   :  { %4089 = vmatpush1.bf16.msra.mxu1 %v5365_v21 }
 0x3a9   :  { %4090 = vmatprep.subr.bf16.mxu1 %v7706_v26 }
 0x3ac   :  { %4091 = vmatpush1.bf16.msra.mxu1 %v5366_v19 }
 0x3ad   :  { %4092 = vmatprep.subr.bf16.mxu1 %v7706_v26 }
 0x3b0   :  { %4093 = vmatpush1.bf16.msra.mxu1 %v5367_v54 }
 0x3b1   :  { %4094 = vmatprep.subr.bf16.mxu1 %v7706_v26 }
 0x3b4   :  { %4095 = vmatpush1.bf16.msra.mxu1 %v5368_v30 }
 0x3b5   :  { %4096 = vmatprep.subr.bf16.mxu1 %v7706_v26  ;;  %v4129_v26 = vld [vmem:[%s7614_s5 + $0x8] sm:$0x3] }
 0x3b6   :  { %v4834_v47 = vpack.c.bf16 %v4129_v26, %v4128_v18 }
 0x3b8   :  { %4097 = vmatpush1.bf16.msra.mxu1 %v4076_v8  ;;  %4836 = vmatpush3.bf16.msk.msra.mxu0 %vm4835_vm10, %v4834_v47 }
 0x3bb   :  { %4111 = vmatmul.mubr.bf16.vlgmr.msra.gmra.mrb[44].mxu1 %v4010_v27 }
 0x3c6   :  { %v3123_v51 = vpop.f32.mrb[24].mxu1 }
 0x3c7   :  { %v3124_v28 = vadd.f32 %v3123_v51, %v2987_v25  ;;  %v3125_v20 = vpop.f32.mrb[25].mxu1 }
 0x3c8   :  { %v3126_v36 = vpop.f32.mrb[26].mxu1 }
 0x3c9   :  { %v3127_v22 = vpop.f32.mrb[27].mxu1 }
 0x3ee   :  { %v3280_v45 = vpop.f32.mrb[28].mxu1 }
 0x3ef   :  { %v3286_v39 = vadd.f32 %v3280_v45, %v3124_v28  ;;  %v3282_v34 = vpop.f32.mrb[29].mxu1 }
 0x3f0   :  { %v3283_v0 = vpop.f32.mrb[30].mxu1 }
 0x3f1   :  { %v3284_v58 = vpop.f32.mrb[31].mxu1 }
 0x416   :  { %v3438_v2 = vpop.f32.mrb[32].mxu1 }
 0x417   :  { %v3444_v35 = vadd.f32 %v3438_v2, %v3286_v39  ;;  %v3440_v63 = vpop.f32.mrb[33].mxu1 }
 0x418   :  { %v3441_v57 = vpop.f32.mrb[34].mxu1 }
 0x419   :  { %v3442_v4 = vpop.f32.mrb[35].mxu1 }
 0x43e   :  { %v3796_v62 = vpop.f32.mrb[36].mxu1 }
 0x43f   :  { %v3802_v5 = vadd.f32 %v3796_v62, %v3444_v35  ;;  %v3798_v29 = vpop.f32.mrb[37].mxu1 }
 0x440   :  { %v3799_v11 = vpop.f32.mrb[38].mxu1 }
 0x441   :  { %v3800_v53 = vpop.f32.mrb[39].mxu1 }
 0x466   :  { %v3954_v14 = vpop.f32.mrb[40].mxu1 }
 0x467   :  { %v3960_v17 = vadd.f32 %v3954_v14, %v3802_v5  ;;  %v3956_v31 = vpop.f32.mrb[41].mxu1 }
 0x468   :  { %v3957_v60 = vpop.f32.mrb[42].mxu1 }
 0x469   :  { %v3958_v52 = vpop.f32.mrb[43].mxu1 }
 0x48e   :  { %v4112_v61 = vpop.f32.mrb[44].mxu1 }
 0x48f   :  { %v4118_v23 = vadd.f32 %v4112_v61, %v3960_v17  ;;  %v4114_v6 = vpop.f32.mrb[45].mxu1 }
 0x490   :  { %v4115_v24 = vpop.f32.mrb[46].mxu1 }
 0x491   :  { %v4126_v37 = vadd.f32 %v4819_v40, %v4118_v23  ;;  %v4116_v42 = vpop.f32.mrb[47].mxu1 }
 0x493   :  { %v4127_v33 = vmax.f32 %v4126_v37, 0.0 }
 0x495   :  { %4831 = vmatmul.mubr.msk.f32.vlgmr.msra.gmra.mrb[32].mxu0 %vm4137_vm5, %v4127_v33 }
 0x568   :  { %v4211_v7 = vpop.f32.mrb[32].mxu0 }
 0x569   :  { %v4212_v9 = vadd.f32 %v4820_v1, %v4211_v7  ;;  %v4832_v56 = vpop.f32.mrb[33].mxu0 }
 0x56b   :  { %v4215_v55 = vsel %vm4137_vm5, %v4212_v9, -inf }
 0x56c   :  { %4216 = vmax.xlane.f32.xlu0 %v4215_v55 }
 0x5f9   :  { %v4217_v16 = vpop.xlane.xlu0 %4216 }
 0x5fa   :  { %v4218_v48 = vsub.f32 %v4212_v9, %v4217_v16 }
 0x5fc   :  { %v4219_v44 = vmul.f32 1.442695, %v4218_v48 }
 0x5fe   :  { %5370 = vpow2.f32 %v4219_v44 }
 0x608   :  { %v5371_v43 = vpop.eup %5370 }
 0x609   :  { %v4221_v49 = vsel %vm4137_vm5, %v5371_v43, 0.0 }
 0x60a   :  { %4222 = vadd.xlane.f32.xlu1 %v4221_v49 }
 0x697   :  { %v4223_v12 = vpop.xlane.xlu1 %4222 }
 0x698   :  { %5372 = vlog2.f32 %v4223_v12 }
 0x6a2   :  { %v5373_v59 = vpop.eup %5372 }
 0x6a3   :  { %v4225_v41 = vmul.f32 0.6931472, %v5373_v59 }
 0x6a5   :  { %v4226_v3 = vadd.f32 %v4225_v41, %v4217_v16 }
 0x6a7   :  { %v4227_v25 = vsub.f32 %v4212_v9, %v4226_v3 }
 0x6a9   :  { %4228 = vst.msk [vmem:[%s7617_s7] sm:$0xff] %vm4137_vm5, %v4227_v25 }

</bundles_post_ra>
